<compile_context>
chip_gen: v7x
topology: tpu7x:2x2x1
jax: 0.10.0
libtpu: 0.0.40
codegen_flags: <defaults>
</compile_context>

<pallas_src>
import functools

import jax
import jax.numpy as jnp
from jax.experimental import pallas as pl
from jax.experimental.pallas import tpu as pltpu

_EPS = 1e-5


def _vmem_limit_bytes():
    # ~64 MiB scoped on v5e/v6e (128 MiB physical VMEM), 32 MiB on v7x (64 MiB).
    try:
        cap = int(pltpu.get_tpu_info().vmem_capacity_bytes)
    except Exception:
        cap = 64 * 1024 * 1024
    return int(min(64 * 1024 * 1024, max(32 * 1024 * 1024, cap // 2)))


_VMEM_LIMIT = _vmem_limit_bytes()


# ----------------------------------------------------------------------------
# Tile-size helpers
# ----------------------------------------------------------------------------
def _largest_divisor_leq(n, cap):
    cap = max(1, min(n, int(cap)))
    for d in range(cap, 0, -1):
        if n % d == 0:
            return d
    return 1


def _pick_batch_group(N, H, W):
    """Images per conv grid step: fold batch into the MXU M dim when H*W is small."""
    cap = max(1, 1024 // (H * W))
    for nb in range(min(N, cap), 0, -1):
        # nb*H*W output rows per step must be sublane aligned unless nb covers N.
        if N % nb == 0 and (nb == N or (nb * H * W) % 8 == 0):
            return nb
    return N


def _pick_bn_rows(R, WC, budget=8 << 20):
    cap = max(1, budget // max(1, WC * 4))
    if R <= cap:
        return R
    best = None
    d = 8
    while d <= min(R, cap):
        if R % d == 0:
            best = d
        d += 8
    return best if best is not None else R


# ----------------------------------------------------------------------------
# Conv 3x3 (padding=1) with fused producer-BN prologue and fused BN statistics.
# The halo is built in VMEM (no jnp.pad HBM pass); im2col feeds the MXU with a
# single K = 9*Cin bf16 matmul per grid step; the whole batch-group of images is
# folded into the matmul M dimension.
# ----------------------------------------------------------------------------
def _conv3x3_kernel(x_ref, w_ref, b_ref, ps_ref, ph_ref, y_ref, st_ref,
                    xwin, imcol, *, nb, H, W, cin, cout, prologue):
    # x_ref : (nb, H, W, cin)     bf16  producer's raw conv output (or stage input)
    # w_ref : (9*cin, cout)       bf16  weights
    # b_ref : (1, cout)           f32   bias
    # ps/ph : (1, cin)            f32   producer BN scale / shift (prologue)
    # y_ref : (nb*H*W, cout)      bf16  this layer's raw (pre-BN) conv output
    # st_ref: (1, 2, cout)        f32   per-step [sum, sum-of-squares] of f32 output
    # xwin  : (nb, H+2, W+2, cin) bf16  zero-padded window built in VMEM
    # imcol : (nb, H, W, 9*cin)   bf16  im2col slab -> one MXU matmul
    x = x_ref[...]
    if prologue:
        # Fused BN+ReLU of the producing layer (applied in f32, stored bf16).
        ps = ps_ref[...].reshape(1, 1, 1, cin)
        ph = ph_ref[...].reshape(1, 1, 1, cin)
        x = jnp.maximum(x.astype(jnp.float32) * ps + ph, 0.0).astype(jnp.bfloat16)

    # Zero halo (conv padding=1) + interior: replaces the per-layer XLA jnp.pad pass.
    zrow = jnp.zeros((nb, 1, W + 2, cin), jnp.bfloat16)
    zcol = jnp.zeros((nb, H + 2, 1, cin), jnp.bfloat16)
    xwin[:, 0:1, :, :] = zrow
    xwin[:, H + 1:H + 2, :, :] = zrow
    xwin[:, :, 0:1, :] = zcol
    xwin[:, :, W + 1:W + 2, :] = zcol
    xwin[:, 1:H + 1, 1:W + 1, :] = x

    # im2col: 9 shifted taps along the K axis of a bf16 VMEM slab.
    # TODO(synk): tap offsets are lane-misaligned for Cin in {3, 64} (masked stores);
    # acceptable since those are only the cheap first-stage layers.
    for kh in range(3):
        for kw in range(3):
            tap = kh * 3 + kw
            imcol[:, :, :, tap * cin:(tap + 1) * cin] = (
                xwin[:, kh:kh + H, kw:kw + W, :])

    lhs = imcol[...].reshape(nb * H * W, 9 * cin)
    acc = jnp.dot(lhs, w_ref[...], preferred_element_type=jnp.float32)
    acc = acc + b_ref[...]
    y_ref[...] = acc.astype(y_ref.dtype)              # lane-dense (M, Cout) store

    # Fused BatchNorm partial statistics (reduced by tiny glue outside).
    st_ref[0, 0:1, :] = jnp.sum(acc, axis=0, keepdims=True)
    st_ref[0, 1:2, :] = jnp.sum(acc * acc, axis=0, keepdims=True)


def conv3x3_stats(x, w, b, pscale, pshift, *, prologue):
    """3x3 same-padding conv on bf16 NHWC input (with optional fused producer BN+ReLU
    prologue).  Returns (y_bf16 NHWC, channel_sum, channel_sum_of_squares)."""
    N, H, W, Cin = x.shape
    Cout = w.shape[-1]
    nb = _pick_batch_group(N, H, W)
    ng = N // nb

    wf = w.reshape(9 * Cin, Cout).astype(jnp.bfloat16)   # (kh,kw,ci) -> K axis
    bf = b.reshape(1, Cout).astype(jnp.float32)
    ps = pscale.reshape(1, Cin).astype(jnp.float32)
    ph = pshift.reshape(1, Cin).astype(jnp.float32)

    kernel = functools.partial(_conv3x3_kernel, nb=nb, H=H, W=W,
                               cin=Cin, cout=Cout, prologue=prologue)
    y2, st = pl.pallas_call(
        kernel,
        out_shape=(jax.ShapeDtypeStruct((N * H * W, Cout), jnp.bfloat16),
                   jax.ShapeDtypeStruct((ng, 2, Cout), jnp.float32)),
        grid_spec=pltpu.PrefetchScalarGridSpec(
            num_scalar_prefetch=0,
            grid=(ng,),
            in_specs=[
                pl.BlockSpec((nb, H, W, Cin), lambda g: (g, 0, 0, 0)),   # input imgs
                pl.BlockSpec((9 * Cin, Cout), lambda g: (0, 0)),          # weights
                pl.BlockSpec((1, Cout), lambda g: (0, 0)),                # bias
                pl.BlockSpec((1, Cin), lambda g: (0, 0)),                 # prologue scale
                pl.BlockSpec((1, Cin), lambda g: (0, 0)),                 # prologue shift
            ],
            out_specs=(
                pl.BlockSpec((nb * H * W, Cout), lambda g: (g, 0)),
                pl.BlockSpec((1, 2, Cout), lambda g: (g, 0, 0)),
            ),
            scratch_shapes=[
                pltpu.VMEM((nb, H + 2, W + 2, Cin), jnp.bfloat16),        # padded window
                pltpu.VMEM((nb, H, W, 9 * Cin), jnp.bfloat16),            # im2col slab
            ]),
        compiler_params=pltpu.CompilerParams(
            dimension_semantics=("parallel",),
            vmem_limit_bytes=_VMEM_LIMIT),
    )(x, wf, bf, ps, ph)

    s = jnp.sum(st[:, 0, :], axis=0)
    ss = jnp.sum(st[:, 1, :], axis=0)
    return y2.reshape(N, H, W, Cout), s, ss


def conv_layer(x, prologue, params):
    """One Conv2dBNReLU.  The producing layer's BN+ReLU (if `prologue` is given) is
    fused into this conv; this layer's own BN+ReLU is deferred to its consumer.
    Returns (raw bf16 conv output, (scale, shift)) of this layer."""
    w, b, gamma, beta = params
    if prologue is None:
        cin = x.shape[-1]
        pscale = jnp.ones((cin,), jnp.float32)
        pshift = jnp.zeros((cin,), jnp.float32)
        y, s, ss = conv3x3_stats(x, w, b, pscale, pshift, prologue=False)
    else:
        y, s, ss = conv3x3_stats(x, w, b, prologue[0], prologue[1], prologue=True)
    cnt = float(y.shape[0] * y.shape[1] * y.shape[2])
    mean = s / cnt
    var = jnp.maximum(ss / cnt - mean * mean, 0.0)    # clamp f32 cancellation
    scale = gamma * jax.lax.rsqrt(var + _EPS)
    shift = beta - mean * scale
    return y, (scale, shift)


# ----------------------------------------------------------------------------
# Standalone BN + ReLU (lane-dense 2-D view).  Only needed where a concat must
# see a materialized activation (wavelet branches, level >= 1).
# ----------------------------------------------------------------------------
def _bn_relu_kernel(x_ref, s_ref, h_ref, o_ref):
    o_ref[...] = jnp.maximum(
        x_ref[...].astype(jnp.float32) * s_ref[...] + h_ref[...], 0.0
    ).astype(o_ref.dtype)


def bn_relu(y, scale, shift):
    N, H, W, C = y.shape
    WC = W * C
    R = N * H
    x2 = y.reshape(R, WC)                     # free view; stores are lane-dense
    s2 = jnp.tile(scale, W).reshape(1, WC).astype(jnp.float32)
    h2 = jnp.tile(shift, W).reshape(1, WC).astype(jnp.float32)
    tr = _pick_bn_rows(R, WC)

    out = pl.pallas_call(
        _bn_relu_kernel,
        out_shape=jax.ShapeDtypeStruct((R, WC), jnp.bfloat16),
        grid_spec=pltpu.PrefetchScalarGridSpec(
            num_scalar_prefetch=0,
            grid=(R // tr,),
            in_specs=[pl.BlockSpec((tr, WC), lambda i: (i, 0)),
                      pl.BlockSpec((1, WC), lambda i: (0, 0)),
                      pl.BlockSpec((1, WC), lambda i: (0, 0))],
            out_specs=pl.BlockSpec((tr, WC), lambda i: (i, 0))),
        compiler_params=pltpu.CompilerParams(
            dimension_semantics=("parallel",),
            vmem_limit_bytes=_VMEM_LIMIT),
    )(x2, s2, h2)
    return out.reshape(N, H, W, C)


# ----------------------------------------------------------------------------
# Fused BatchNorm + ReLU + MaxPool2d(2,2).  The column pairs are lane-packed by a
# free XLA metadata reshape (N,H,W,C)->(N,H,W/2,2C); inside the kernel the 2x2
# max reduces to one lane max and one row-pair max (no 6-D transpose).
# ----------------------------------------------------------------------------
def _bn_relu_pool_kernel(x_ref, s_ref, h_ref, o_ref, *, c, tho):
    x = jnp.maximum(x_ref[...].astype(jnp.float32) * s_ref[...] + h_ref[...], 0.0)
    m = jnp.maximum(x[..., :c], x[..., c:])                       # horizontal max
    m = m.reshape(tho, 2, m.shape[1], c)                          # split row pairs
    o_ref[...] = jnp.maximum(m[:, 0], m[:, 1]).astype(o_ref.dtype)  # vertical max


def bn_relu_pool(y, scale, shift):
    N, H, W, C = y.shape
    assert H % 2 == 0 and W % 2 == 0, "MaxPool2d(2,2) needs even spatial dims"
    Ho, Wo = H // 2, W // 2
    yv = y.reshape(N, H, Wo, 2 * C)                    # free metadata reshape
    s2 = jnp.concatenate([scale, scale]).reshape(1, 1, 2 * C).astype(jnp.float32)
    h2 = jnp.concatenate([shift, shift]).reshape(1, 1, 2 * C).astype(jnp.float32)
    tho = _largest_divisor_leq(Ho, max(1, (8 << 20) // max(1, 12 * W * C)))

    kernel = functools.partial(_bn_relu_pool_kernel, c=C, tho=tho)
    return pl.pallas_call(
        kernel,
        out_shape=jax.ShapeDtypeStruct((N, Ho, Wo, C), jnp.bfloat16),
        grid_spec=pltpu.PrefetchScalarGridSpec(
            num_scalar_prefetch=0,
            grid=(N, Ho // tho),
            in_specs=[
                pl.BlockSpec((None, 2 * tho, Wo, 2 * C), lambda n, t: (n, t, 0, 0)),
                pl.BlockSpec((1, 1, 2 * C), lambda n, t: (0, 0, 0)),
                pl.BlockSpec((1, 1, 2 * C), lambda n, t: (0, 0, 0)),
            ],
            out_specs=pl.BlockSpec((None, tho, Wo, C), lambda n, t: (n, t, 0, 0))),
        compiler_params=pltpu.CompilerParams(
            dimension_semantics=("parallel", "parallel"),
            vmem_limit_bytes=_VMEM_LIMIT),
    )(yv, s2, h2)


# ----------------------------------------------------------------------------
# Linear classifier
# ----------------------------------------------------------------------------
def _linear_kernel(x_ref, w_ref, b_ref, o_ref):
    o_ref[...] = jnp.dot(x_ref[...], w_ref[...],
                         preferred_element_type=jnp.float32) + b_ref[...]


def linear(x, w, b):
    N, F = x.shape
    O = w.shape[-1]
    return pl.pallas_call(
        _linear_kernel,
        out_shape=jax.ShapeDtypeStruct((N, O), jnp.float32),
        grid_spec=pltpu.PrefetchScalarGridSpec(
            num_scalar_prefetch=0,
            grid=(1,),
            in_specs=[pl.BlockSpec((N, F), lambda i: (0, 0)),
                      pl.BlockSpec((F, O), lambda i: (0, 0)),
                      pl.BlockSpec((1, O), lambda i: (0, 0))],
            out_specs=pl.BlockSpec((N, O), lambda i: (0, 0))),
        compiler_params=pltpu.CompilerParams(
            dimension_semantics=("arbitrary",),
            vmem_limit_bytes=_VMEM_LIMIT),
    )(x, w, b.reshape(1, O))


# ----------------------------------------------------------------------------
# Parameter init / layout helpers
# ----------------------------------------------------------------------------
def _nchw_to_nhwc_bf16(x):
    return jnp.transpose(x, (0, 2, 3, 1)).astype(jnp.bfloat16)


def _init_cbr(key, cin, cout):
    # Weight init differs from PyTorch's kaiming_uniform (parameter values only);
    # conv bias is a no-op through training-mode BatchNorm but is kept for parity.
    w = jax.random.normal(key, (3, 3, cin, cout), jnp.float32) * (2.0 / (9 * cin)) ** 0.5
    b = jnp.zeros((cout,), jnp.float32)
    gamma = jnp.ones((cout,), jnp.float32)
    beta = jnp.zeros((cout,), jnp.float32)
    return (w, b, gamma, beta)


# ----------------------------------------------------------------------------
# WaveletVGG
# ----------------------------------------------------------------------------
class WaveletVGGPallas:
    """Pallas-TPU forward pass of WaveletVGG."""

    def __init__(self, level=0, key=None):
        self.level = level
        self.kernel = [64, 128, 256, 512, 512]
        if key is None:
            key = jax.random.PRNGKey(0)
        keys = iter(jax.random.split(key, 64))
        nxt = lambda: next(keys)
        k = self.kernel

        self.conv1 = [_init_cbr(nxt(), 3, k[0]), _init_cbr(nxt(), k[0], k[0])]
        self.conv2 = [_init_cbr(nxt(), k[0], k[1]), _init_cbr(nxt(), k[1], k[1])]
        self.conv3 = [_init_cbr(nxt(), k[1], k[2]), _init_cbr(nxt(), k[2], k[2]),
                      _init_cbr(nxt(), k[2], k[2])]
        self.conv4 = [_init_cbr(nxt(), k[2], k[3]), _init_cbr(nxt(), k[3], k[3]),
                      _init_cbr(nxt(), k[3], k[3])]
        self.conv5 = [_init_cbr(nxt(), k[3], k[4]), _init_cbr(nxt(), k[4], k[4]),
                      _init_cbr(nxt(), k[4], k[4])]

        self.wavelets, self.reduces = {}, {}
        for lvl in range(1, 5):
            if level >= lvl:
                cw = k[lvl] // 4
                self.wavelets[lvl] = {
                    name: [_init_cbr(nxt(), 3, cw), _init_cbr(nxt(), cw, cw)]
                    for name in ("ll", "lh", "hl", "hh")}
                self.reduces[lvl] = _init_cbr(nxt(), k[lvl] * 2, k[lvl])

        self.fc_w = jax.random.normal(nxt(), (k[4], 10), jnp.float32) * k[4] ** -0.5
        self.fc_b = jnp.zeros((10,), jnp.float32)

    # WaveletConv2d: the reference calls wavelet(HH_i, HL_i, LH_i, LL_i) mapping onto
    # forward(ll, lh, hl, hh); concat order stays ll, lh, hl, hh.
    def _wavelet(self, lvl, ll, lh, hl, hh):
        params = self.wavelets[lvl]
        outs = []
        for name, z in (("ll", ll), ("lh", lh), ("hl", hl), ("hh", hh)):
            z = _nchw_to_nhwc_bf16(z)
            z, pend = conv_layer(z, None, params[name][0])
            z, pend = conv_layer(z, pend, params[name][1])
            outs.append(bn_relu(z, *pend))            # materialize for the concat
        return jnp.concatenate(outs, axis=-1)

    def _stage(self, out, convs, lvl, x):
        # The BN+ReLU of each conv is fused into the next conv's prologue; only the
        # stage-ending op (pool, or reduce-after-concat) materializes an activation.
        has_wavelet = (lvl >= 1) and (self.level >= lvl)
        pend = None
        for p in convs:
            out, pend = conv_layer(out, pend, p)
        if has_wavelet:
            out = bn_relu(out, *pend)                 # needed for the channel concat
            wav = self._wavelet(lvl, x['HH_%d' % lvl], x['HL_%d' % lvl],
                                x['LH_%d' % lvl], x['LL_%d' % lvl])
            out, pend = conv_layer(jnp.concatenate([out, wav], axis=-1), None,
                                   self.reduces[lvl])
        return bn_relu_pool(out, *pend)               # fused BN+ReLU+MaxPool(2,2)

    def __call__(self, x):
        out = _nchw_to_nhwc_bf16(x['Input'])
        out = self._stage(out, self.conv1, 0, x)
        out = self._stage(out, self.conv2, 1, x)
        out = self._stage(out, self.conv3, 2, x)
        out = self._stage(out, self.conv4, 3, x)
        out = self._stage(out, self.conv5, 4, x)
        # pool_avg is AvgPool2d(kernel_size=1, stride=1) == identity (no kernel).
        n = out.shape[0]
        feat = out.reshape(n, -1).astype(jnp.float32)   # 1x1 spatial -> (N, 512)
        return linear(feat, self.fc_w, self.fc_b)


if __name__ == "__main__":
    key = jax.random.PRNGKey(0)
    kx, kp = jax.random.split(key)

    # CIFAR-like input: 5 pooling stages bring 32x32 down to 1x1, matching the
    # 512-feature Linear classifier of the reference module (level=0 path).
    N, C, H, W = 2, 3, 32, 32
    x = {"Input": jax.random.normal(kx, (N, C, H, W), jnp.float32)}

    model = WaveletVGGPallas(level=0, key=kp)
    out = jax.block_until_ready(model(x))

    assert out.shape == (N, 10), out.shape
    assert bool(jnp.all(jnp.isfinite(out)))
    print("KERNEL_OK")
</pallas_src>

<mosaic_0001>
module attributes {stable_mosaic.version = 11 : i64} {
  func.func @_conv3x3_kernel(%arg0: i32, %arg1: memref<1x32x32x3xbf16, #tpu.memory_space<vmem>>, %arg2: memref<27x64xbf16, #tpu.memory_space<vmem>>, %arg3: memref<1x64xf32, #tpu.memory_space<vmem>>, %arg4: memref<1x3xf32, #tpu.memory_space<vmem>>, %arg5: memref<1x3xf32, #tpu.memory_space<vmem>>, %arg6: memref<1024x64xbf16, #tpu.memory_space<vmem>>, %arg7: memref<1x2x64xf32, #tpu.memory_space<vmem>>, %arg8: memref<1x34x34x3xbf16, #tpu.memory_space<vmem>>, %arg9: memref<1x32x32x27xbf16, #tpu.memory_space<vmem>>) attributes {dimension_semantics = [#tpu.dimension_semantics<parallel>], iteration_bounds = array<i64: 2>, scalar_prefetch = 0 : i64, scratch_operands = 2 : i64, tpu.core_type = #tpu.core_type<tc>, window_params = [{transform_indices = @transform_0, window_bounds = array<i64: 1, 32, 32, 3>}, {pipeline_mode = #tpu.pipeline_mode<synchronous>, transform_indices = @transform_1, window_bounds = array<i64: 27, 64>}, {pipeline_mode = #tpu.pipeline_mode<synchronous>, transform_indices = @transform_2, window_bounds = array<i64: 1, 64>}, {pipeline_mode = #tpu.pipeline_mode<synchronous>, transform_indices = @transform_3, window_bounds = array<i64: 1, 3>}, {pipeline_mode = #tpu.pipeline_mode<synchronous>, transform_indices = @transform_4, window_bounds = array<i64: 1, 3>}, {transform_indices = @transform_5, window_bounds = array<i64: 1024, 64>}, {transform_indices = @transform_6, window_bounds = array<i64: 1, 2, 64>}]} {
    %c0 = arith.constant 0 : index
    %c0_0 = arith.constant 0 : index
    %c0_1 = arith.constant 0 : index
    %c0_2 = arith.constant 0 : index
    %0 = vector.load %arg1[%c0, %c0_0, %c0_1, %c0_2] : memref<1x32x32x3xbf16, #tpu.memory_space<vmem>>, vector<1x32x32x3xbf16>
    %cst = arith.constant 0.000000e+00 : bf16
    %1 = vector.broadcast %cst : bf16 to vector<1x1x34x3xbf16>
    %cst_3 = arith.constant 0.000000e+00 : bf16
    %2 = vector.broadcast %cst_3 : bf16 to vector<1x34x1x3xbf16>
    %c0_4 = arith.constant 0 : index
    %c0_5 = arith.constant 0 : index
    %c0_6 = arith.constant 0 : index
    %c0_7 = arith.constant 0 : index
    %3 = vector.load %arg8[%c0_4, %c0_5, %c0_6, %c0_7] : memref<1x34x34x3xbf16, #tpu.memory_space<vmem>>, vector<1x1x34x3xbf16>
    tpu.vector_store %arg8[%c0_4, %c0_5, %c0_6, %c0_7], %1 {strides = array<i32>} : memref<1x34x34x3xbf16, #tpu.memory_space<vmem>>, vector<1x1x34x3xbf16>,
    %c0_8 = arith.constant 0 : index
    %c33 = arith.constant 33 : index
    %c0_9 = arith.constant 0 : index
    %c0_10 = arith.constant 0 : index
    %4 = vector.load %arg8[%c0_8, %c33, %c0_9, %c0_10] : memref<1x34x34x3xbf16, #tpu.memory_space<vmem>>, vector<1x1x34x3xbf16>
    tpu.vector_store %arg8[%c0_8, %c33, %c0_9, %c0_10], %1 {strides = array<i32>} : memref<1x34x34x3xbf16, #tpu.memory_space<vmem>>, vector<1x1x34x3xbf16>,
    %c0_11 = arith.constant 0 : index
    %c0_12 = arith.constant 0 : index
    %c0_13 = arith.constant 0 : index
    %c0_14 = arith.constant 0 : index
    %5 = vector.load %arg8[%c0_11, %c0_12, %c0_13, %c0_14] : memref<1x34x34x3xbf16, #tpu.memory_space<vmem>>, vector<1x34x1x3xbf16>
    tpu.vector_store %arg8[%c0_11, %c0_12, %c0_13, %c0_14], %2 {strides = array<i32>} : memref<1x34x34x3xbf16, #tpu.memory_space<vmem>>, vector<1x34x1x3xbf16>,
    %c0_15 = arith.constant 0 : index
    %c0_16 = arith.constant 0 : index
    %c33_17 = arith.constant 33 : index
    %c0_18 = arith.constant 0 : index
    %6 = vector.load %arg8[%c0_15, %c0_16, %c33_17, %c0_18] : memref<1x34x34x3xbf16, #tpu.memory_space<vmem>>, vector<1x34x1x3xbf16>
    tpu.vector_store %arg8[%c0_15, %c0_16, %c33_17, %c0_18], %2 {strides = array<i32>} : memref<1x34x34x3xbf16, #tpu.memory_space<vmem>>, vector<1x34x1x3xbf16>,
    %c0_19 = arith.constant 0 : index
    %c1 = arith.constant 1 : index
    %c1_20 = arith.constant 1 : index
    %c0_21 = arith.constant 0 : index
    %7 = vector.load %arg8[%c0_19, %c1, %c1_20, %c0_21] : memref<1x34x34x3xbf16, #tpu.memory_space<vmem>>, vector<1x32x32x3xbf16>
    tpu.vector_store %arg8[%c0_19, %c1, %c1_20, %c0_21], %0 {strides = array<i32>} : memref<1x34x34x3xbf16, #tpu.memory_space<vmem>>, vector<1x32x32x3xbf16>,
    %c0_22 = arith.constant 0 : index
    %c0_23 = arith.constant 0 : index
    %c0_24 = arith.constant 0 : index
    %c0_25 = arith.constant 0 : index
    %8 = vector.load %arg8[%c0_22, %c0_23, %c0_24, %c0_25] : memref<1x34x34x3xbf16, #tpu.memory_space<vmem>>, vector<1x32x32x3xbf16>
    %c0_26 = arith.constant 0 : index
    %c0_27 = arith.constant 0 : index
    %c0_28 = arith.constant 0 : index
    %c0_29 = arith.constant 0 : index
    %9 = vector.load %arg9[%c0_26, %c0_27, %c0_28, %c0_29] : memref<1x32x32x27xbf16, #tpu.memory_space<vmem>>, vector<1x32x32x3xbf16>
    tpu.vector_store %arg9[%c0_26, %c0_27, %c0_28, %c0_29], %8 {strides = array<i32>} : memref<1x32x32x27xbf16, #tpu.memory_space<vmem>>, vector<1x32x32x3xbf16>,
    %c0_30 = arith.constant 0 : index
    %c0_31 = arith.constant 0 : index
    %c1_32 = arith.constant 1 : index
    %c0_33 = arith.constant 0 : index
    %10 = vector.load %arg8[%c0_30, %c0_31, %c1_32, %c0_33] : memref<1x34x34x3xbf16, #tpu.memory_space<vmem>>, vector<1x32x32x3xbf16>
    %c0_34 = arith.constant 0 : index
    %c0_35 = arith.constant 0 : index
    %c0_36 = arith.constant 0 : index
    %c3 = arith.constant 3 : index
    %11 = vector.load %arg9[%c0_34, %c0_35, %c0_36, %c3] : memref<1x32x32x27xbf16, #tpu.memory_space<vmem>>, vector<1x32x32x3xbf16>
    tpu.vector_store %arg9[%c0_34, %c0_35, %c0_36, %c3], %10 {strides = array<i32>} : memref<1x32x32x27xbf16, #tpu.memory_space<vmem>>, vector<1x32x32x3xbf16>,
    %c0_37 = arith.constant 0 : index
    %c0_38 = arith.constant 0 : index
    %c2 = arith.constant 2 : index
    %c0_39 = arith.constant 0 : index
    %12 = vector.load %arg8[%c0_37, %c0_38, %c2, %c0_39] : memref<1x34x34x3xbf16, #tpu.memory_space<vmem>>, vector<1x32x32x3xbf16>
    %c0_40 = arith.constant 0 : index
    %c0_41 = arith.constant 0 : index
    %c0_42 = arith.constant 0 : index
    %c6 = arith.constant 6 : index
    %13 = vector.load %arg9[%c0_40, %c0_41, %c0_42, %c6] : memref<1x32x32x27xbf16, #tpu.memory_space<vmem>>, vector<1x32x32x3xbf16>
    tpu.vector_store %arg9[%c0_40, %c0_41, %c0_42, %c6], %12 {strides = array<i32>} : memref<1x32x32x27xbf16, #tpu.memory_space<vmem>>, vector<1x32x32x3xbf16>,
    %c0_43 = arith.constant 0 : index
    %c1_44 = arith.constant 1 : index
    %c0_45 = arith.constant 0 : index
    %c0_46 = arith.constant 0 : index
    %14 = vector.load %arg8[%c0_43, %c1_44, %c0_45, %c0_46] : memref<1x34x34x3xbf16, #tpu.memory_space<vmem>>, vector<1x32x32x3xbf16>
    %c0_47 = arith.constant 0 : index
    %c0_48 = arith.constant 0 : index
    %c0_49 = arith.constant 0 : index
    %c9 = arith.constant 9 : index
    %15 = vector.load %arg9[%c0_47, %c0_48, %c0_49, %c9] : memref<1x32x32x27xbf16, #tpu.memory_space<vmem>>, vector<1x32x32x3xbf16>
    tpu.vector_store %arg9[%c0_47, %c0_48, %c0_49, %c9], %14 {strides = array<i32>} : memref<1x32x32x27xbf16, #tpu.memory_space<vmem>>, vector<1x32x32x3xbf16>,
    %c0_50 = arith.constant 0 : index
    %c1_51 = arith.constant 1 : index
    %c1_52 = arith.constant 1 : index
    %c0_53 = arith.constant 0 : index
    %16 = vector.load %arg8[%c0_50, %c1_51, %c1_52, %c0_53] : memref<1x34x34x3xbf16, #tpu.memory_space<vmem>>, vector<1x32x32x3xbf16>
    %c0_54 = arith.constant 0 : index
    %c0_55 = arith.constant 0 : index
    %c0_56 = arith.constant 0 : index
    %c12 = arith.constant 12 : index
    %17 = vector.load %arg9[%c0_54, %c0_55, %c0_56, %c12] : memref<1x32x32x27xbf16, #tpu.memory_space<vmem>>, vector<1x32x32x3xbf16>
    tpu.vector_store %arg9[%c0_54, %c0_55, %c0_56, %c12], %16 {strides = array<i32>} : memref<1x32x32x27xbf16, #tpu.memory_space<vmem>>, vector<1x32x32x3xbf16>,
    %c0_57 = arith.constant 0 : index
    %c1_58 = arith.constant 1 : index
    %c2_59 = arith.constant 2 : index
    %c0_60 = arith.constant 0 : index
    %18 = vector.load %arg8[%c0_57, %c1_58, %c2_59, %c0_60] : memref<1x34x34x3xbf16, #tpu.memory_space<vmem>>, vector<1x32x32x3xbf16>
    %c0_61 = arith.constant 0 : index
    %c0_62 = arith.constant 0 : index
    %c0_63 = arith.constant 0 : index
    %c15 = arith.constant 15 : index
    %19 = vector.load %arg9[%c0_61, %c0_62, %c0_63, %c15] : memref<1x32x32x27xbf16, #tpu.memory_space<vmem>>, vector<1x32x32x3xbf16>
    tpu.vector_store %arg9[%c0_61, %c0_62, %c0_63, %c15], %18 {strides = array<i32>} : memref<1x32x32x27xbf16, #tpu.memory_space<vmem>>, vector<1x32x32x3xbf16>,
    %c0_64 = arith.constant 0 : index
    %c2_65 = arith.constant 2 : index
    %c0_66 = arith.constant 0 : index
    %c0_67 = arith.constant 0 : index
    %20 = vector.load %arg8[%c0_64, %c2_65, %c0_66, %c0_67] : memref<1x34x34x3xbf16, #tpu.memory_space<vmem>>, vector<1x32x32x3xbf16>
    %c0_68 = arith.constant 0 : index
    %c0_69 = arith.constant 0 : index
    %c0_70 = arith.constant 0 : index
    %c18 = arith.constant 18 : index
    %21 = vector.load %arg9[%c0_68, %c0_69, %c0_70, %c18] : memref<1x32x32x27xbf16, #tpu.memory_space<vmem>>, vector<1x32x32x3xbf16>
    tpu.vector_store %arg9[%c0_68, %c0_69, %c0_70, %c18], %20 {strides = array<i32>} : memref<1x32x32x27xbf16, #tpu.memory_space<vmem>>, vector<1x32x32x3xbf16>,
    %c0_71 = arith.constant 0 : index
    %c2_72 = arith.constant 2 : index
    %c1_73 = arith.constant 1 : index
    %c0_74 = arith.constant 0 : index
    %22 = vector.load %arg8[%c0_71, %c2_72, %c1_73, %c0_74] : memref<1x34x34x3xbf16, #tpu.memory_space<vmem>>, vector<1x32x32x3xbf16>
    %c0_75 = arith.constant 0 : index
    %c0_76 = arith.constant 0 : index
    %c0_77 = arith.constant 0 : index
    %c21 = arith.constant 21 : index
    %23 = vector.load %arg9[%c0_75, %c0_76, %c0_77, %c21] : memref<1x32x32x27xbf16, #tpu.memory_space<vmem>>, vector<1x32x32x3xbf16>
    tpu.vector_store %arg9[%c0_75, %c0_76, %c0_77, %c21], %22 {strides = array<i32>} : memref<1x32x32x27xbf16, #tpu.memory_space<vmem>>, vector<1x32x32x3xbf16>,
    %c0_78 = arith.constant 0 : index
    %c2_79 = arith.constant 2 : index
    %c2_80 = arith.constant 2 : index
    %c0_81 = arith.constant 0 : index
    %24 = vector.load %arg8[%c0_78, %c2_79, %c2_80, %c0_81] : memref<1x34x34x3xbf16, #tpu.memory_space<vmem>>, vector<1x32x32x3xbf16>
    %c0_82 = arith.constant 0 : index
    %c0_83 = arith.constant 0 : index
    %c0_84 = arith.constant 0 : index
    %c24 = arith.constant 24 : index
    %25 = vector.load %arg9[%c0_82, %c0_83, %c0_84, %c24] : memref<1x32x32x27xbf16, #tpu.memory_space<vmem>>, vector<1x32x32x3xbf16>
    tpu.vector_store %arg9[%c0_82, %c0_83, %c0_84, %c24], %24 {strides = array<i32>} : memref<1x32x32x27xbf16, #tpu.memory_space<vmem>>, vector<1x32x32x3xbf16>,
    %c0_85 = arith.constant 0 : index
    %c0_86 = arith.constant 0 : index
    %c0_87 = arith.constant 0 : index
    %c0_88 = arith.constant 0 : index
    %26 = vector.load %arg9[%c0_85, %c0_86, %c0_87, %c0_88] : memref<1x32x32x27xbf16, #tpu.memory_space<vmem>>, vector<1x32x32x27xbf16>
    %27 = vector.shape_cast %26 : vector<1x32x32x27xbf16> to vector<1024x27xbf16>
    %c0_89 = arith.constant 0 : index
    %c0_90 = arith.constant 0 : index
    %28 = vector.load %arg2[%c0_89, %c0_90] : memref<27x64xbf16, #tpu.memory_space<vmem>>, vector<27x64xbf16>
    %cst_91 = arith.constant dense<0.000000e+00> : vector<1024x64xf32>
    %29 = tpu.matmul %27, %28, %cst_91 {dimension_numbers = #tpu.dot_dimension_numbers<[1], [0], [0], [1], [0, 0, 1, 1], [], []>} : vector<1024x27xbf16>, vector<27x64xbf16>, vector<1024x64xf32> -> vector<1024x64xf32>
    %c0_92 = arith.constant 0 : index
    %c0_93 = arith.constant 0 : index
    %30 = vector.load %arg3[%c0_92, %c0_93] : memref<1x64xf32, #tpu.memory_space<vmem>>, vector<1x64xf32>
    %31 = vector.broadcast %30 : vector<1x64xf32> to vector<1024x64xf32>
    %32 = arith.addf %29, %31 : vector<1024x64xf32>
    %33 = arith.truncf %32 : vector<1024x64xf32> to vector<1024x64xbf16>
    %c0_94 = arith.constant 0 : index
    %c0_95 = arith.constant 0 : index
    %34 = vector.load %arg6[%c0_94, %c0_95] : memref<1024x64xbf16, #tpu.memory_space<vmem>>, vector<1024x64xbf16>
    tpu.vector_store %arg6[%c0_94, %c0_95], %33 {strides = array<i32>} : memref<1024x64xbf16, #tpu.memory_space<vmem>>, vector<1024x64xbf16>,
    %cst_96 = arith.constant dense<0.000000e+00> : vector<64xf32>
    %35 = vector.multi_reduction <add>, %32, %cst_96 [0] : vector<1024x64xf32> to vector<64xf32>
    %36 = vector.shape_cast %35 : vector<64xf32> to vector<1x64xf32>
    %c0_97 = arith.constant 0 : index
    %c0_98 = arith.constant 0 : index
    %c0_99 = arith.constant 0 : index
    %37 = vector.load %arg7[%c0_97, %c0_98, %c0_99] : memref<1x2x64xf32, #tpu.memory_space<vmem>>, vector<1x1x64xf32>
    %38 = vector.shape_cast %37 : vector<1x1x64xf32> to vector<1x64xf32>
    %39 = vector.shape_cast %36 : vector<1x64xf32> to vector<1x1x64xf32>
    tpu.vector_store %arg7[%c0_97, %c0_98, %c0_99], %39 {strides = array<i32>} : memref<1x2x64xf32, #tpu.memory_space<vmem>>, vector<1x1x64xf32>,
    %40 = arith.mulf %32, %32 : vector<1024x64xf32>
    %cst_100 = arith.constant dense<0.000000e+00> : vector<64xf32>
    %41 = vector.multi_reduction <add>, %40, %cst_100 [0] : vector<1024x64xf32> to vector<64xf32>
    %42 = vector.shape_cast %41 : vector<64xf32> to vector<1x64xf32>
    %c0_101 = arith.constant 0 : index
    %c1_102 = arith.constant 1 : index
    %c0_103 = arith.constant 0 : index
    %43 = vector.load %arg7[%c0_101, %c1_102, %c0_103] : memref<1x2x64xf32, #tpu.memory_space<vmem>>, vector<1x1x64xf32>
    %44 = vector.shape_cast %43 : vector<1x1x64xf32> to vector<1x64xf32>
    %45 = vector.shape_cast %42 : vector<1x64xf32> to vector<1x1x64xf32>
    tpu.vector_store %arg7[%c0_101, %c1_102, %c0_103], %45 {strides = array<i32>} : memref<1x2x64xf32, #tpu.memory_space<vmem>>, vector<1x1x64xf32>,
    return
  }
  func.func @transform_0(%arg0: i32) -> (i32, i32, i32, i32) {
    %c0_i32 = arith.constant 0 : i32
    %c0_i32_0 = arith.constant 0 : i32
    %c0_i32_1 = arith.constant 0 : i32
    %c0_i32_2 = arith.constant 0 : i32
    return %arg0, %c0_i32, %c0_i32_0, %c0_i32_1 : i32, i32, i32, i32
  }
  func.func @transform_1(%arg0: i32) -> (i32, i32) {
    %c0_i32 = arith.constant 0 : i32
    %c0_i32_0 = arith.constant 0 : i32
    %c0_i32_1 = arith.constant 0 : i32
    return %c0_i32, %c0_i32_0 : i32, i32
  }
  func.func @transform_2(%arg0: i32) -> (i32, i32) {
    %c0_i32 = arith.constant 0 : i32
    %c0_i32_0 = arith.constant 0 : i32
    %c0_i32_1 = arith.constant 0 : i32
    return %c0_i32, %c0_i32_0 : i32, i32
  }
  func.func @transform_3(%arg0: i32) -> (i32, i32) {
    %c0_i32 = arith.constant 0 : i32
    %c0_i32_0 = arith.constant 0 : i32
    %c0_i32_1 = arith.constant 0 : i32
    return %c0_i32, %c0_i32_0 : i32, i32
  }
  func.func @transform_4(%arg0: i32) -> (i32, i32) {
    %c0_i32 = arith.constant 0 : i32
    %c0_i32_0 = arith.constant 0 : i32
    %c0_i32_1 = arith.constant 0 : i32
    return %c0_i32, %c0_i32_0 : i32, i32
  }
  func.func @transform_5(%arg0: i32) -> (i32, i32) {
    %c0_i32 = arith.constant 0 : i32
    %c0_i32_0 = arith.constant 0 : i32
    return %arg0, %c0_i32 : i32, i32
  }
  func.func @transform_6(%arg0: i32) -> (i32, i32, i32) {
    %c0_i32 = arith.constant 0 : i32
    %c0_i32_0 = arith.constant 0 : i32
    %c0_i32_1 = arith.constant 0 : i32
    return %arg0, %c0_i32, %c0_i32_0 : i32, i32, i32
  }
}

</mosaic_0001>

<bundles_post_ra>
// kernel: tpu_custom_call.1
= control target key start
LH: loop header
LB: loop body
LE: loop exit
PB: predicated region body
PF: predicated region fallthrough
CT: control target
= control target key end

     0   :  { %12 = vsyncpa [#allocation5], 0  ;;  %s19836_s0 = inlined_call_operand.vmem [shape: bf16[2,32,32,3], index: 0, kind: input, shape index: {}]   ;;  %s19837_s1 = inlined_call_operand.vmem [shape: bf16[27,64], index: 1, kind: input, shape index: {}]   ;;  %s19838_s2 = inlined_call_operand.vmem [shape: f32[1,64], index: 2, kind: input, shape index: {}]   ;;  %s19839_s3 = inlined_call_operand.vmem [shape: f32[1,3], index: 3, kind: input, shape index: {}]   ;;  %s19840_s4 = inlined_call_operand.vmem [shape: f32[1,3], index: 4, kind: input, shape index: {}]   ;;  %s19841_s5 = inlined_call_operand.vmem [shape: bf16[2048,64], index: 5, kind: output, shape index: {0}]   ;;  %s19842_s6 = inlined_call_operand.hbm [shape: f32[2,2,64], index: 6, kind: output, shape index: {1}]  }
   0x1   :  { %14 = vsyncpa [#allocation5 + $0x1], 0  ;;  %s16049_s21 = smov 0   ;;  %s16051_s22 = smov 0  }
   0x2   :  { %s16053_s23 = smov 0   ;;  %s16055_s24 = smov 0  }
   0x3 LB: > { %s16070_s3 = sadd.s32 4294967295, %s16001_s24   ;;  %s13809_s4 = sadd.s32 4294967294, %s16001_s24   ;;  %s16001_s24 = sphi %s16055_s24, %s19899_s24   ;;  %s15997_s23 = sphi %s16053_s23, %s19898_s23   ;;  %s15993_s22 = sphi %s16051_s22, %s19897_s22   ;;  %s15989_s21 = sphi %s16049_s21, %s19896_s21  }
   0x4   : > { %s16074_s25 = sadd.s32 1, %s16001_s24   ;;  %s163_s26 = sadd.s32 1, %s15997_s23 }
   0x5   : > { %s160_s27 = ssub.s32 %s16001_s24, %s16074_s25  ;;  %p173_p0 = scmp.ne.s32.totalorder %s15997_s23, %s15993_s22 }
   0x6   : > { %p161_p1 = scmp.eq.s32.totalorder %s160_s27, 0  ;;  %p174_p2 = scmp.eq.s32.totalorder %s16070_s3, 1 }
   0x7   : > { %p179_p3 = scmp.ne.s32.totalorder %s15993_s22, %s15989_s21  ;;  %p180_p4 = scmp.eq.s32.totalorder %s13809_s4, 1 }
   0x8   : > { %s16085_s28 = scalar_select %p161_p1, %s15997_s23, %s163_s26  }
   0x9   : > { %p16087_p5 = por %p174_p2, %p173_p0  ;;  %p16091_p6 = por %p180_p4, %p179_p3 }
   0xa   : > { %p13812_p7 = scmp.ge.s32.totalorder %s16001_s24, 1  ;;  %p218_p8 = scmp.lt.s32.totalorder %s16001_s24, 3 }
   0xc   : > { %p219_p9 = pnand %p13812_p7, %p218_p8 }
   0xe   : > { %222 = sbr.rel (%p219_p9) target bundleno = 1675 (0x68b), region = 40 }
  0x15   : > { %vm393_vm0 = vcmask 19456   ;;  %vm398_vm1 = vcmask 16384   ;;  %vm407_vm2 = vsmask.f32 256  ;;  %v16003_v0 = vmov 0   ;;  %p253_p10 = scmp.lt.s32.totalorder %s16070_s3, 1 }
  0x16   : > { %396 = vst.msk [vmem:[#allocation2 + $0x8] sm:$0xf] %vm393_vm0, %v16003_v0  ;;  %397 = vst.msk [vmem:[#allocation2 + $0xc] sm:$0xf] %vm393_vm0, %v16003_v0  ;;  %vm511_vm4 = vsmask.f32 7938 }
  0x17   : > { %399 = vst.msk [vmem:[#allocation2 + $0x10] sm:$0x1] %vm398_vm1, %v16003_v0  ;;  %vm16102_vm3 = vmand %vm398_vm1, %vm407_vm2  ;;  %v412_v3 = vld [vmem:[#allocation2 + $0x14] sm:$0x1]  ;;  %v516_v4 = vld [vmem:[#allocation2 + $0x24] sm:$0x1] }
  0x18   : > { %394 = vst.msk [vmem:[#allocation2] sm:$0xf] %vm393_vm0, %v16003_v0  ;;  %395 = vst.msk [vmem:[#allocation2 + $0x4] sm:$0xf] %vm393_vm0, %v16003_v0  ;;  %s254_s7 = scalar_select %p253_p10, %s16070_s3, 1  ;;  %v413_v5 = vsel %vm16102_vm3, 0, %v412_v3 }
  0x19   : > { %401 = vst.msk [vmem:[#allocation2 + $0x294] sm:$0xf] %vm393_vm0, %v16003_v0  ;;  %402 = vst.msk [vmem:[#allocation2 + $0x298] sm:$0xf] %vm393_vm0, %v16003_v0  ;;  %v415_v7 = vld [vmem:[#allocation2 + $0x28] sm:$0x1] }
  0x1a   : > { %403 = vst.msk [vmem:[#allocation2 + $0x29c] sm:$0xf] %vm393_vm0, %v16003_v0  ;;  %404 = vst.msk [vmem:[#allocation2 + $0x2a0] sm:$0xf] %vm393_vm0, %v16003_v0  ;;  %v416_v8 = vsel %vm16102_vm3, 0, %v415_v7  ;;  %s14785_s8 = sshll.u32 %s254_s7, 9 }
  0x1b   : > { %405 = vst.msk [vmem:[#allocation2 + $0x2a4] sm:$0x1] %vm398_vm1, %v16003_v0  ;;  %vm16116_vm5 = vmand %vm398_vm1, %vm511_vm4  ;;  %v519_v9 = vld [vmem:[#allocation2 + $0x38] sm:$0x1]  ;;  %v418_v10 = vld [vmem:[#allocation2 + $0x3c] sm:$0x1]  ;;  %s16134_s11 = scalar_lea.vmem %s19836_s0, %s14785_s8 }
  0x1c   : > { %v517_v6 = vsel %vm16116_vm5, 0, %v516_v4  ;;  %414 = vst [vmem:[#allocation2 + $0x14] sm:$0x1] %v413_v5  ;;  %417 = vst [vmem:[#allocation2 + $0x28] sm:$0x1] %v416_v8  ;;  %v520_v11 = vsel %vm16116_vm5, 0, %v519_v9 }
  0x1d   : > { %518 = vst [vmem:[#allocation2 + $0x24] sm:$0x1] %v517_v6  ;;  %v419_v12 = vsel %vm16102_vm3, 0, %v418_v10  ;;  %v522_v13 = vld [vmem:[#allocation2 + $0x4c] sm:$0x1]  ;;  %vm16146_vm7 = vmand %vm393_vm0, %vm511_vm4  ;;  %s16004_s12 = smov 3  }
  0x1e   : > { %vm615_vm6 = vsmask.f32 4368  ;;  %521 = vst [vmem:[#allocation2 + $0x38] sm:$0x1] %v520_v11  ;;  %420 = vst [vmem:[#allocation2 + $0x3c] sm:$0x1] %v419_v12 }
  0x1f   : > { %v523_v14 = vsel %vm16116_vm5, 0, %v522_v13  ;;  %v265_v15 = vld [vmem:[%s16134_s11] sm:$0xf]  ;;  %v266_v16 = vld [vmem:[%s16134_s11 + $0x4] sm:$0xf]  ;;  %v15165_v20 = vld [vmem:[#allocation2 + $0x8] sm:$0xff]  }
  0x20   : > { %v267_v17 = vld [vmem:[%s16134_s11 + $0x8] sm:$0xf]  ;;  %524 = vst [vmem:[#allocation2 + $0x4c] sm:$0x1] %v523_v14  ;;  %v513_v18 = vld [vmem:[#allocation2 + $0x10] sm:$0x1]  ;;  %vm16156_vm8 = vmor %vm407_vm2, %vm615_vm6 }
  0x21   : > { %v514_v19 = vsel %vm16116_vm5, 0, %v513_v18  ;;  %v268_v21 = vld [vmem:[%s16134_s11 + $0xc] sm:$0xf]  ;;  %v618_v22 = vshrl.u32 %v265_v15, 16  ;;  %v621_v23 = vshll.u32 %v265_v15, 16  ;;  %v626_v24 = vshrl.u32 %v266_v16, 16 }
  0x22   : > { %515 = vst [vmem:[#allocation2 + $0x10] sm:$0x1] %v514_v19  ;;  %v629_v25 = vshll.u32 %v266_v16, 16  ;;  %v635_v26 = vshrl.u32 %v267_v17, 16  ;;  %v638_v27 = vshll.u32 %v267_v17, 16  ;;  %v3350_v29 = vshll.u32 %v15165_v20, 16 }
  0x23   : > { %v409_v28 = vld [vmem:[#allocation2] sm:$0x1]  ;;  %v3354_v30 = vshrl.u32 %v15165_v20, 16  ;;  %v620_v31 = vrot.slane %v618_v22, 7  ;;  %v644_v32 = vshrl.u32 %v268_v21, 16  ;;  %v628_v34 = vrot.slane %v626_v24, 7 }
  0x24   : > { %v1900_v33 = vld [vmem:[#allocation2 + $0x14] sm:$0xf]  ;;  %v637_v35 = vrot.slane %v635_v26, 7  ;;  %v647_v36 = vshll.u32 %v268_v21, 16  ;;  %v410_v38 = vsel %vm16102_vm3, 0, %v409_v28  ;;  %v16152_v39 = vrot.slane %v3350_v29, 1 }
  0x25   : > { %v623_v41 = vor.u32 %v621_v23, %v620_v31  ;;  %v624_v42 = vrot.slane %v620_v31, 4  ;;  %v646_v43 = vrot.slane %v644_v32, 7  ;;  %411 = vst [vmem:[#allocation2] sm:$0x1] %v410_v38  ;;  %v1906_v44 = vld [vmem:[#allocation2 + $0x24] sm:$0x1]  ;;  %v631_v45 = vor.u32 %v629_v25, %v628_v34 }
  0x26   : > { %v633_v46 = vrot.slane %v628_v34, 4  ;;  %v640_v47 = vor.u32 %v638_v27, %v637_v35  ;;  %v642_v48 = vrot.slane %v637_v35, 4  ;;  %v269_v49 = vld [vmem:[%s16134_s11 + $0x10] sm:$0xf]  ;;  %v270_v50 = vld [vmem:[%s16134_s11 + $0x14] sm:$0xf]  ;;  %v3356_v61 = vor.u32 %v3354_v30, %v16152_v39 }
  0x27   : > { %vm3341_vm9 = vsmask.f32 7424  ;;  %v649_v51 = vor.u32 %v647_v36, %v646_v43  ;;  %v1901_v52 = vsel %vm16146_vm7, %v623_v41, %v1900_v33  ;;  %v651_v53 = vrot.slane %v646_v43, 4  ;;  %v271_v54 = vld [vmem:[%s16134_s11 + $0x18] sm:$0xf]  ;;  %s16005_s13 = smov 6  }
  0x28   : > { %v632_v55 = vsel %vm16156_vm8, %v624_v42, %v631_v45  ;;  %v641_v56 = vsel %vm16156_vm8, %v633_v46, %v640_v47  ;;  %1902 = vst [vmem:[#allocation2 + $0x14] sm:$0xf] %v1901_v52  ;;  %v272_v57 = vld [vmem:[%s16134_s11 + $0x1c] sm:$0xf]  ;;  %v653_v58 = vshrl.u32 %v269_v49, 16  ;;  %v656_v59 = vshll.u32 %v269_v49, 16 }
  0x29   : > { %v15166_v60 = vld [vmem:[#allocation2 + $0x10] ss:$0 sps:$4 sm:$0x11]   ;;  %v650_v62 = vsel %vm16156_vm8, %v642_v48, %v649_v51  ;;  %1903 = vst.msk [vmem:[#allocation2 + $0x18] sm:$0xf] %vm393_vm0, %v632_v55  ;;  %v1907_v63 = vsel %vm16102_vm3, %v651_v53, %v1906_v44  ;;  %v661_v0 = vshrl.u32 %v270_v50, 16 }
  0x2a   : > { %1904 = vst.msk [vmem:[#allocation2 + $0x1c] sm:$0xf] %vm393_vm0, %v641_v56  ;;  %1905 = vst.msk [vmem:[#allocation2 + $0x20] sm:$0xf] %vm393_vm0, %v650_v62  ;;  %v655_v3 = vrot.slane %v653_v58, 7  ;;  %v664_v4 = vshll.u32 %v270_v50, 16 }
  0x2b   : > { %1908 = vst [vmem:[#allocation2 + $0x24] sm:$0x1] %v1907_v63  ;;  %v670_v5 = vshrl.u32 %v271_v54, 16  ;;  %v673_v6 = vshll.u32 %v271_v54, 16  ;;  %v273_v7 = vld [vmem:[%s16134_s11 + $0x20] sm:$0xf] }
  0x2c   : > { %v3358_v8 = vshll.u32 %v15166_v60, 16  ;;  %v663_v9 = vrot.slane %v661_v0, 7  ;;  %v679_v10 = vshrl.u32 %v272_v57, 16  ;;  %v682_v11 = vshll.u32 %v272_v57, 16  ;;  %v1909_v12 = vld [vmem:[#allocation2 + $0x28] sm:$0xf] }
  0x2d   : > { %v15169_v13 = vld [vmem:[#allocation2] sm:$0xff]   ;;  %v658_v14 = vor.u32 %v656_v59, %v655_v3  ;;  %v659_v15 = vrot.slane %v655_v3, 4  ;;  %v672_v16 = vrot.slane %v670_v5, 7  ;;  %v688_v17 = vshrl.u32 %v273_v7, 16  ;;  %v1915_v30 = vld [vmem:[#allocation2 + $0x38] sm:$0x1] }
  0x2e   : > { %v3360_v18 = vrot.slane %v3358_v8, 1  ;;  %v666_v19 = vor.u32 %v664_v4, %v663_v9  ;;  %v668_v20 = vrot.slane %v663_v9, 4  ;;  %v681_v21 = vrot.slane %v679_v10, 7  ;;  %v274_v34 = vld [vmem:[%s16134_s11 + $0x24] sm:$0xf]  ;;  %s16006_s14 = smov 9  }
  0x2f   : > { %v3343_v22 = vshrl.u32 %v15169_v13, 16  ;;  %v3345_v23 = vshll.u32 %v15169_v13, 16  ;;  %v675_v24 = vor.u32 %v673_v6, %v672_v16  ;;  %v677_v25 = vrot.slane %v672_v16, 4  ;;  %v275_v49 = vld [vmem:[%s16134_s11 + $0x28] sm:$0xf]  ;;  %s16007_s15 = smov 12  }
  0x30   : > { %v3361_v26 = vsel %vm3341_vm9, %v3356_v61, %v3360_v18  ;;  %v667_v27 = vsel %vm16156_vm8, %v659_v15, %v666_v19  ;;  %v684_v28 = vor.u32 %v682_v11, %v681_v21  ;;  %v1910_v29 = vsel %vm16146_vm7, %v658_v14, %v1909_v12  ;;  %v15167_v31 = vld [vmem:[#allocation2 + $0x14] sm:$0xff]   ;;  %v1918_v55 = vld [vmem:[#allocation2 + $0x3c] sm:$0xf]  ;;  %v276_v57 = vld [vmem:[%s16134_s11 + $0x2c] sm:$0xf]  ;;  %s16008_s16 = smov 15  }
  0x31   : > { %3984 = vrot.lane.b32.xlu0 %v3361_v26, %s16004_s12  ;;  %v3347_v32 = vrot.slane %v3345_v23, 1  ;;  %v676_v33 = vsel %vm16156_vm8, %v668_v20, %v675_v24  ;;  %1911 = vst [vmem:[#allocation2 + $0x28] sm:$0xf] %v1910_v29  ;;  %1912 = vst.msk [vmem:[#allocation2 + $0x2c] sm:$0xf] %vm393_vm0, %v667_v27  ;;  %v15168_v35 = vld [vmem:[#allocation2 + $0x1c] sm:$0xff]  }
  0x32   : > { %v685_v36 = vsel %vm16156_vm8, %v677_v25, %v684_v28  ;;  %1913 = vst.msk [vmem:[#allocation2 + $0x30] sm:$0xf] %vm393_vm0, %v676_v33  ;;  %v686_v38 = vrot.slane %v681_v21, 4  ;;  %v3363_v41 = vshrl.u32 %v15167_v31, 16  ;;  %v3365_v42 = vshll.u32 %v15167_v31, 16  ;;  %s16009_s17 = smov 18  }
  0x33   : > { %v3348_v43 = vor.u32 %v3347_v32, %v3343_v22  ;;  %v15170_v44 = vld [vmem:[#allocation2 + $0x24] ss:$0 sps:$4 sm:$0x11]   ;;  %1914 = vst.msk [vmem:[#allocation2 + $0x34] sm:$0xf] %vm393_vm0, %v685_v36  ;;  %v690_v45 = vrot.slane %v688_v17, 7 }
  0x34   : > { %v3370_v46 = vshll.u32 %v15168_v35, 16  ;;  %v3374_v47 = vshrl.u32 %v15168_v35, 16  ;;  %v1916_v48 = vsel %vm16102_vm3, %v686_v38, %v1915_v30  ;;  %v691_v50 = vshll.u32 %v273_v7, 16  ;;  %v421_v6 = vld [vmem:[#allocation2 + $0x50] sm:$0x1]  ;;  %s16010_s18 = smov 21  }
  0x35   : > { %v3367_v51 = vrot.slane %v3365_v42, 1  ;;  %v3353_v52 = vsel %vm3341_vm9, %v3348_v43, %v16152_v39  ;;  %v3378_v53 = vshll.u32 %v15170_v44, 16  ;;  %1917 = vst [vmem:[#allocation2 + $0x38] sm:$0x1] %v1916_v48  ;;  %v694_v54 = vrot.slane %v690_v45, 4  ;;  %s16011_s19 = smov 24  }
  0x36   : > { %v3372_v56 = vrot.slane %v3370_v46, 1  ;;  %3982 = vrot.lane.b32.xlu0 %v3353_v52, %s16004_s12  ;;  %v693_v58 = vor.u32 %v691_v50, %v690_v45  ;;  %v696_v59 = vshrl.u32 %v274_v34, 16  ;;  %v699_v60 = vshll.u32 %v274_v34, 16  ;;  %v277_v11 = vld [vmem:[%s16134_s11 + $0x30] sm:$0xf]  ;;  %s13816_s7 = sshll.u32 %s16070_s3, 7 }
  0x37   : > { %v3368_v61 = vor.u32 %v3367_v51, %v3363_v41  ;;  %v3380_v62 = vrot.slane %v3378_v53, 1  ;;  %v705_v63 = vshrl.u32 %v275_v49, 16  ;;  %v708_v0 = vshll.u32 %v275_v49, 16  ;;  %v1924_v17 = vld [vmem:[#allocation2 + $0x4c] sm:$0x1]  ;;  %p18426_p11 = scmp.lt.s32.totalorder %s13816_s7, 255 }
  0x38   : > { %v3376_v3 = vor.u32 %v3374_v47, %v3372_v56  ;;  %v15171_v4 = vld [vmem:[#allocation2 + $0x28] sm:$0xff]   ;;  %v698_v5 = vrot.slane %v696_v59, 7  ;;  %v1919_v39 = vsel %vm16146_vm7, %v693_v58, %v1918_v55  ;;  %v714_v9 = vshrl.u32 %v276_v57, 16  ;;  %v278_v22 = vld [vmem:[%s16134_s11 + $0x34] sm:$0xf]  ;;  %s14782_s8 = sshll.u32 %s16070_s3, 5 }
  0x39   : > { %v3373_v7 = vsel %vm3341_vm9, %v3368_v61, %v3372_v56  ;;  %v707_v8 = vrot.slane %v705_v63, 7  ;;  %v717_v10 = vshll.u32 %v276_v57, 16  ;;  %1920 = vst [vmem:[#allocation2 + $0x3c] sm:$0xf] %v1919_v39  ;;  %v3383_v14 = vshrl.u32 %v15171_v4, 16  ;;  %s19901_s7 = smov (!%p18426_p11, %s13816_s7), 255 }
  0x3a   : > { %3986 = vrot.lane.b32.xlu1 %v3373_v7, %s16004_s12  ;;  %v3381_v12 = vsel %vm3341_vm9, %v3376_v3, %v3380_v62  ;;  %v15172_v13 = vld [vmem:[#allocation2 + $0x30] sm:$0xff]   ;;  %v3385_v15 = vshll.u32 %v15171_v4, 16  ;;  %v701_v16 = vor.u32 %v699_v60, %v698_v5  ;;  %v703_v18 = vrot.slane %v698_v5, 4  ;;  %v279_v34 = vld [vmem:[%s16134_s11 + $0x38] sm:$0xf]  ;;  %s16013_s3 = smov [#allocation4]  }
  0x3b   : > { %v710_v19 = vor.u32 %v708_v0, %v707_v8  ;;  %v712_v20 = vrot.slane %v707_v8, 4  ;;  %v716_v21 = vrot.slane %v714_v9, 7  ;;  %v3390_v24 = vshll.u32 %v15172_v13, 16  ;;  %v280_v43 = vld [vmem:[%s16134_s11 + $0x3c] sm:$0xf]  ;;  %s15943_s4 = sshll.u32 %s16013_s3, 4  ;;  %s15944_s4 = int_to_ptr.vmem [resolvable:$false] %s15943_s4 }
  0x3c   : > { %v3387_v23 = vrot.slane %v3385_v15, 1  ;;  %v3394_v25 = vshrl.u32 %v15172_v13, 16  ;;  %v702_v26 = vsel %vm16156_vm8, %v694_v54, %v701_v16  ;;  %v15173_v27 = vld [vmem:[#allocation2 + $0x38] ss:$0 sps:$4 sm:$0x11]   ;;  %v422_v31 = vsel %vm16102_vm3, 0, %v421_v6 }
  0x3d   : > { %v711_v28 = vsel %vm16156_vm8, %v703_v18, %v710_v19  ;;  %v719_v29 = vor.u32 %v717_v10, %v716_v21  ;;  %1921 = vst.msk [vmem:[#allocation2 + $0x40] sm:$0xf] %vm393_vm0, %v702_v26  ;;  %v721_v30 = vrot.slane %v716_v21, 4  ;;  %v3392_v33 = vrot.slane %v3390_v24, 1  ;;  %423 = vst [vmem:[#allocation2 + $0x50] sm:$0x1] %v422_v31 }
  0x3e   : > { %3988 = vrot.lane.b32.xlu1 %v3381_v12, %s16004_s12  ;;  %v3388_v32 = vor.u32 %v3387_v23, %v3383_v14  ;;  %1922 = vst.msk [vmem:[#allocation2 + $0x44] sm:$0xf] %vm393_vm0, %v711_v28  ;;  %v723_v35 = vshrl.u32 %v277_v11, 16  ;;  %v726_v36 = vshll.u32 %v277_v11, 16  ;;  %v3398_v38 = vshll.u32 %v15173_v27, 16  ;;  %s15945_s26 = scalar_lea.vmem %s15944_s4, 64 }
  0x3f   : > { %v720_v41 = vsel %vm16156_vm8, %v712_v20, %v719_v29  ;;  %v1925_v42 = vsel %vm16102_vm3, %v721_v30, %v1924_v17  ;;  %v731_v44 = vshrl.u32 %v278_v22, 16  ;;  %v3396_v46 = vor.u32 %v3394_v25, %v3392_v33  ;;  %v525_v49 = vld [vmem:[#allocation2 + $0x60] sm:$0x1]  ;;  %v424_v54 = vld [vmem:[#allocation2 + $0x64] sm:$0x1] }
  0x40   : > { %v3393_v45 = vsel %vm3341_vm9, %v3388_v32, %v3392_v33  ;;  %1923 = vst.msk [vmem:[#allocation2 + $0x48] sm:$0xf] %vm393_vm0, %v720_v41  ;;  %1926 = vst [vmem:[#allocation2 + $0x4c] sm:$0x1] %v1925_v42  ;;  %v725_v47 = vrot.slane %v723_v35, 7  ;;  %v734_v48 = vshll.u32 %v278_v22, 16 }
  0x41   : > { %3990 = vrot.lane.b32.xlu0 %v3393_v45, %s16004_s12  ;;  %v3400_v50 = vrot.slane %v3398_v38, 1  ;;  %v733_v51 = vrot.slane %v731_v44, 7  ;;  %v740_v52 = vshrl.u32 %v279_v34, 16  ;;  %v743_v53 = vshll.u32 %v279_v34, 16  ;;  %v281_v59 = vld [vmem:[%s16134_s11 + $0x40] sm:$0xf] }
  0x42   : > { %v728_v55 = vor.u32 %v726_v36, %v725_v47  ;;  %v729_v56 = vrot.slane %v725_v47, 4  ;;  %v749_v57 = vshrl.u32 %v280_v43, 16  ;;  %v752_v58 = vshll.u32 %v280_v43, 16  ;;  %v282_v14 = vld [vmem:[%s16134_s11 + $0x44] sm:$0xf] }
  0x43   : > { %v3401_v60 = vsel %vm3341_vm9, %v3396_v46, %v3400_v50  ;;  %v736_v61 = vor.u32 %v734_v48, %v733_v51  ;;  %v738_v62 = vrot.slane %v733_v51, 4  ;;  %v742_v63 = vrot.slane %v740_v52, 7  ;;  %v283_v15 = vld [vmem:[%s16134_s11 + $0x48] sm:$0xf]  ;;  %v284_v19 = vld [vmem:[%s16134_s11 + $0x4c] sm:$0xf] }
  0x44   : > { %3992 = vrot.lane.b32.xlu1 %v3401_v60, %s16004_s12  ;;  %v15174_v0 = vld [vmem:[#allocation2 + $0x3c] sm:$0xff]   ;;  %v751_v3 = vrot.slane %v749_v57, 7  ;;  %v526_v4 = vsel %vm16116_vm5, 0, %v525_v49  ;;  %v425_v5 = vsel %vm16102_vm3, 0, %v424_v54  ;;  %v1927_v8 = vld [vmem:[#allocation2 + $0x50] sm:$0xf] }
  0x45   : > { %v737_v39 = vsel %vm16156_vm8, %v729_v56, %v736_v61  ;;  %v745_v6 = vor.u32 %v743_v53, %v742_v63  ;;  %v747_v7 = vrot.slane %v742_v63, 4  ;;  %527 = vst [vmem:[#allocation2 + $0x60] sm:$0x1] %v526_v4  ;;  %426 = vst [vmem:[#allocation2 + $0x64] sm:$0x1] %v425_v5  ;;  %v758_v9 = vshrl.u32 %v281_v59, 16 }
  0x46   : > { %v3403_v10 = vshrl.u32 %v15174_v0, 16  ;;  %v3405_v11 = vshll.u32 %v15174_v0, 16  ;;  %v754_v12 = vor.u32 %v752_v58, %v751_v3  ;;  %v1928_v13 = vsel %vm16146_vm7, %v728_v55, %v1927_v8  ;;  %1930 = vst.msk [vmem:[#allocation2 + $0x54] sm:$0xf] %vm393_vm0, %v737_v39  ;;  %v528_v29 = vld [vmem:[#allocation2 + $0x74] sm:$0x1] }
  0x47   : > { %v15175_v16 = vld [vmem:[#allocation2 + $0x44] sm:$0xff]   ;;  %v746_v17 = vsel %vm16156_vm8, %v738_v62, %v745_v6  ;;  %1929 = vst [vmem:[#allocation2 + $0x50] sm:$0xf] %v1928_v13  ;;  %v756_v18 = vrot.slane %v751_v3, 4  ;;  %v760_v23 = vrot.slane %v758_v9, 7  ;;  %v761_v24 = vshll.u32 %v281_v59, 16 }
  0x48   : > { %v3407_v20 = vrot.slane %v3405_v11, 1  ;;  %v15176_v21 = vld [vmem:[#allocation2 + $0x4c] ss:$0 sps:$4 sm:$0x11]   ;;  %v755_v22 = vsel %vm16156_vm8, %v747_v7, %v754_v12  ;;  %1931 = vst.msk [vmem:[#allocation2 + $0x58] sm:$0xf] %vm393_vm0, %v746_v17 }
  0x49   : > { %v3410_v25 = vshll.u32 %v15175_v16, 16  ;;  %v3414_v26 = vshrl.u32 %v15175_v16, 16  ;;  %1932 = vst.msk [vmem:[#allocation2 + $0x5c] sm:$0xf] %vm393_vm0, %v755_v22  ;;  %v766_v27 = vshrl.u32 %v282_v14, 16  ;;  %v769_v28 = vshll.u32 %v282_v14, 16 }
  0x4a   : > { %v3408_v30 = vor.u32 %v3407_v20, %v3403_v10  ;;  %v3418_v31 = vshll.u32 %v15176_v21, 16  ;;  %v763_v32 = vor.u32 %v761_v24, %v760_v23  ;;  %v764_v33 = vrot.slane %v760_v23, 4  ;;  %v285_v34 = vld [vmem:[%s16134_s11 + $0x50] sm:$0xf]  ;;  %v427_v42 = vld [vmem:[#allocation2 + $0x78] sm:$0x1] }
  0x4b   : > { %v3412_v35 = vrot.slane %v3410_v25, 1  ;;  %v768_v36 = vrot.slane %v766_v27, 7  ;;  %v775_v38 = vshrl.u32 %v283_v15, 16  ;;  %v778_v41 = vshll.u32 %v283_v15, 16  ;;  %v286_v60 = vld [vmem:[%s16134_s11 + $0x54] sm:$0xf] }
  0x4c   : > { %v3420_v43 = vrot.slane %v3418_v31, 1  ;;  %v1933_v44 = vld [vmem:[#allocation2 + $0x60] sm:$0x1]  ;;  %v784_v45 = vshrl.u32 %v284_v19, 16  ;;  %v787_v46 = vshll.u32 %v284_v19, 16  ;;  %v529_v47 = vsel %vm16116_vm5, 0, %v528_v29 }
  0x4d   : > { %v3413_v48 = vsel %vm3341_vm9, %v3408_v30, %v3412_v35  ;;  %v3416_v49 = vor.u32 %v3414_v26, %v3412_v35  ;;  %v1934_v50 = vsel %vm16102_vm3, %v756_v18, %v1933_v44  ;;  %v771_v51 = vor.u32 %v769_v28, %v768_v36  ;;  %v1936_v52 = vld [vmem:[#allocation2 + $0x64] sm:$0xf]  ;;  %530 = vst [vmem:[#allocation2 + $0x74] sm:$0x1] %v529_v47  ;;  %v287_v7 = vld [vmem:[%s16134_s11 + $0x58] sm:$0xf] }
  0x4e   : > { %3994 = vrot.lane.b32.xlu0 %v3413_v48, %s16004_s12  ;;  %v15177_v53 = vld [vmem:[#allocation2 + $0x50] sm:$0xff]   ;;  %1935 = vst [vmem:[#allocation2 + $0x60] sm:$0x1] %v1934_v50  ;;  %v773_v54 = vrot.slane %v768_v36, 4  ;;  %v777_v55 = vrot.slane %v775_v38, 7  ;;  %v786_v56 = vrot.slane %v784_v45, 7  ;;  %v1937_v57 = vsel %vm16146_vm7, %v763_v32, %v1936_v52 }
  0x4f   : > { %v3421_v58 = vsel %vm3341_vm9, %v3416_v49, %v3420_v43  ;;  %v772_v59 = vsel %vm16156_vm8, %v764_v33, %v771_v51  ;;  %1938 = vst [vmem:[#allocation2 + $0x64] sm:$0xf] %v1937_v57  ;;  %v428_v61 = vsel %vm16102_vm3, 0, %v427_v42  ;;  %v793_v62 = vshrl.u32 %v285_v34, 16  ;;  %v288_v15 = vld [vmem:[%s16134_s11 + $0x5c] sm:$0xf] }
  0x50   : > { %3996 = vrot.lane.b32.xlu1 %v3421_v58, %s16004_s12  ;;  %v15178_v63 = vld [vmem:[#allocation2 + $0x58] sm:$0xff]   ;;  %v3423_v0 = vshrl.u32 %v15177_v53, 16  ;;  %v3425_v3 = vshll.u32 %v15177_v53, 16  ;;  %v780_v4 = vor.u32 %v778_v41, %v777_v55  ;;  %v782_v5 = vrot.slane %v777_v55, 4  ;;  %1939 = vst.msk [vmem:[#allocation2 + $0x68] sm:$0xf] %vm393_vm0, %v772_v59 }
  0x51   : > { %429 = vst [vmem:[#allocation2 + $0x78] sm:$0x1] %v428_v61  ;;  %v789_v39 = vor.u32 %v787_v46, %v786_v56  ;;  %v791_v6 = vrot.slane %v786_v56, 4  ;;  %v795_v8 = vrot.slane %v793_v62, 7  ;;  %v796_v9 = vshll.u32 %v285_v34, 16 }
  0x52   : > { %v3427_v10 = vrot.slane %v3425_v3, 1  ;;  %v3430_v11 = vshll.u32 %v15178_v63, 16  ;;  %v3434_v12 = vshrl.u32 %v15178_v63, 16  ;;  %v781_v13 = vsel %vm16156_vm8, %v773_v54, %v780_v4  ;;  %v531_v18 = vld [vmem:[#allocation2 + $0x88] sm:$0x1] }
  0x53   : > { %v790_v14 = vsel %vm16156_vm8, %v782_v5, %v789_v39  ;;  %1940 = vst.msk [vmem:[#allocation2 + $0x6c] sm:$0xf] %vm393_vm0, %v781_v13  ;;  %v799_v16 = vrot.slane %v795_v8, 4  ;;  %v801_v17 = vshrl.u32 %v286_v60, 16  ;;  %v804_v22 = vshll.u32 %v286_v60, 16 }
  0x54   : > { %v3428_v19 = vor.u32 %v3427_v10, %v3423_v0  ;;  %v3432_v20 = vrot.slane %v3430_v11, 1  ;;  %1941 = vst.msk [vmem:[#allocation2 + $0x70] sm:$0xf] %vm393_vm0, %v790_v14  ;;  %v1942_v21 = vld [vmem:[#allocation2 + $0x74] sm:$0x1]  ;;  %v810_v23 = vshrl.u32 %v287_v7, 16  ;;  %v798_v26 = vor.u32 %v796_v9, %v795_v8 }
  0x55   : > { %v15179_v24 = vld [vmem:[#allocation2 + $0x60] ss:$0 sps:$4 sm:$0x11]   ;;  %v1943_v25 = vsel %vm16102_vm3, %v791_v6, %v1942_v21  ;;  %v803_v27 = vrot.slane %v801_v17, 7  ;;  %v813_v31 = vshll.u32 %v287_v7, 16  ;;  %v819_v41 = vshrl.u32 %v288_v15, 16 }
  0x56   : > { %v3433_v28 = vsel %vm3341_vm9, %v3428_v19, %v3432_v20  ;;  %v3436_v29 = vor.u32 %v3434_v12, %v3432_v20  ;;  %1944 = vst [vmem:[#allocation2 + $0x74] sm:$0x1] %v1943_v25  ;;  %v812_v30 = vrot.slane %v810_v23, 7  ;;  %v289_v32 = vld [vmem:[%s16134_s11 + $0x60] sm:$0xf]  ;;  %v3438_v34 = vshll.u32 %v15179_v24, 16 }
  0x57   : > { %v430_v33 = vld [vmem:[#allocation2 + $0x8c] sm:$0x1]  ;;  %3998 = vrot.lane.b32.xlu0 %v3433_v28, %s16004_s12  ;;  %v15180_v35 = vld [vmem:[#allocation2 + $0x64] sm:$0xff]   ;;  %v806_v36 = vor.u32 %v804_v22, %v803_v27  ;;  %v808_v38 = vrot.slane %v803_v27, 4  ;;  %v822_v44 = vshll.u32 %v288_v15, 16  ;;  %v532_v46 = vsel %vm16116_vm5, 0, %v531_v18 }
  0x58   : > { %v815_v42 = vor.u32 %v813_v31, %v812_v30  ;;  %v817_v43 = vrot.slane %v812_v30, 4  ;;  %v1945_v45 = vld [vmem:[#allocation2 + $0x78] sm:$0xf]  ;;  %v3440_v47 = vrot.slane %v3438_v34, 1  ;;  %v3443_v48 = vshrl.u32 %v15180_v35, 16 }
  0x59   : > { %v3445_v49 = vshll.u32 %v15180_v35, 16  ;;  %v807_v50 = vsel %vm16156_vm8, %v799_v16, %v806_v36  ;;  %533 = vst [vmem:[#allocation2 + $0x88] sm:$0x1] %v532_v46  ;;  %v290_v51 = vld [vmem:[%s16134_s11 + $0x64] sm:$0xf]  ;;  %v821_v53 = vrot.slane %v819_v41, 7  ;;  %v1946_v54 = vsel %vm16146_vm7, %v798_v26, %v1945_v45 }
  0x5a   : > { %v816_v52 = vsel %vm16156_vm8, %v808_v38, %v815_v42  ;;  %1948 = vst.msk [vmem:[#allocation2 + $0x7c] sm:$0xf] %vm393_vm0, %v807_v50  ;;  %v431_v55 = vsel %vm16102_vm3, 0, %v430_v33  ;;  %v3441_v56 = vsel %vm3341_vm9, %v3436_v29, %v3440_v47  ;;  %1947 = vst [vmem:[#allocation2 + $0x78] sm:$0xf] %v1946_v54  ;;  %v828_v59 = vshrl.u32 %v289_v32, 16 }
  0x5b   : > { %v15181_v57 = vld [vmem:[#allocation2 + $0x6c] sm:$0xff]   ;;  %v3447_v58 = vrot.slane %v3445_v49, 1  ;;  %1949 = vst.msk [vmem:[#allocation2 + $0x80] sm:$0xf] %vm393_vm0, %v816_v52  ;;  %432 = vst [vmem:[#allocation2 + $0x8c] sm:$0x1] %v431_v55  ;;  %4000 = vrot.lane.b32.xlu1 %v3441_v56, %s16004_s12  ;;  %v824_v61 = vor.u32 %v822_v44, %v821_v53 }
  0x5c   : > { %v831_v60 = vshll.u32 %v289_v32, 16  ;;  %v826_v62 = vrot.slane %v821_v53, 4  ;;  %v291_v63 = vld [vmem:[%s16134_s11 + $0x68] sm:$0xf]  ;;  %v836_v0 = vshrl.u32 %v290_v51, 16  ;;  %v839_v3 = vshll.u32 %v290_v51, 16 }
  0x5d   : > { %v3448_v4 = vor.u32 %v3447_v58, %v3443_v48  ;;  %v3450_v5 = vshll.u32 %v15181_v57, 16  ;;  %v15182_v39 = vld [vmem:[#allocation2 + $0x74] ss:$0 sps:$4 sm:$0x11]   ;;  %v3454_v6 = vshrl.u32 %v15181_v57, 16  ;;  %v825_v7 = vsel %vm16156_vm8, %v817_v43, %v824_v61 }
  0x5e   : > { %v292_v8 = vld [vmem:[%s16134_s11 + $0x6c] sm:$0xf]  ;;  %v830_v9 = vrot.slane %v828_v59, 7  ;;  %v838_v10 = vrot.slane %v836_v0, 7  ;;  %v3458_v12 = vshll.u32 %v15182_v39, 16  ;;  %v845_v13 = vshrl.u32 %v291_v63, 16 }
  0x5f   : > { %v3452_v11 = vrot.slane %v3450_v5, 1  ;;  %1950 = vst.msk [vmem:[#allocation2 + $0x84] sm:$0xf] %vm393_vm0, %v825_v7  ;;  %v848_v14 = vshll.u32 %v291_v63, 16  ;;  %v534_v15 = vld [vmem:[#allocation2 + $0x9c] sm:$0x1] }
  0x60   : > { %v1951_v16 = vld [vmem:[#allocation2 + $0x88] sm:$0x1]  ;;  %v833_v17 = vor.u32 %v831_v60, %v830_v9  ;;  %v834_v18 = vrot.slane %v830_v9, 4  ;;  %v841_v19 = vor.u32 %v839_v3, %v838_v10  ;;  %v843_v20 = vrot.slane %v838_v10, 4  ;;  %v293_v21 = vld [vmem:[%s16134_s11 + $0x70] sm:$0xf] }
  0x61   : > { %v3453_v22 = vsel %vm3341_vm9, %v3448_v4, %v3452_v11  ;;  %v3456_v23 = vor.u32 %v3454_v6, %v3452_v11  ;;  %v3460_v24 = vrot.slane %v3458_v12, 1  ;;  %v1952_v25 = vsel %vm16102_vm3, %v826_v62, %v1951_v16  ;;  %v294_v26 = vld [vmem:[%s16134_s11 + $0x74] sm:$0xf]  ;;  %v433_v27 = vld [vmem:[#allocation2 + $0xa0] sm:$0x1]  ;;  %v15183_v28 = vld [vmem:[#allocation2 + $0x78] sm:$0xff]  }
  0x62   : > { %4002 = vrot.lane.b32.xlu0 %v3453_v22, %s16004_s12  ;;  %1953 = vst [vmem:[#allocation2 + $0x88] sm:$0x1] %v1952_v25  ;;  %v842_v29 = vsel %vm16156_vm8, %v834_v18, %v841_v19  ;;  %v847_v30 = vrot.slane %v845_v13, 7  ;;  %v854_v32 = vshrl.u32 %v292_v8, 16  ;;  %v857_v33 = vshll.u32 %v292_v8, 16 }
  0x63   : > { %v3461_v31 = vsel %vm3341_vm9, %v3456_v23, %v3460_v24  ;;  %v1954_v34 = vld [vmem:[#allocation2 + $0x8c] sm:$0xf]  ;;  %1957 = vst.msk [vmem:[#allocation2 + $0x90] sm:$0xf] %vm393_vm0, %v842_v29  ;;  %v535_v35 = vsel %vm16116_vm5, 0, %v534_v15  ;;  %v3463_v36 = vshrl.u32 %v15183_v28, 16 }
  0x64   : > { %4004 = vrot.lane.b32.xlu1 %v3461_v31, %s16004_s12  ;;  %v3465_v38 = vshll.u32 %v15183_v28, 16  ;;  %v850_v41 = vor.u32 %v848_v14, %v847_v30  ;;  %v852_v42 = vrot.slane %v847_v30, 4  ;;  %536 = vst [vmem:[#allocation2 + $0x9c] sm:$0x1] %v535_v35  ;;  %v856_v43 = vrot.slane %v854_v32, 7 }
  0x65   : > { %v1955_v44 = vsel %vm16146_vm7, %v833_v17, %v1954_v34  ;;  %v434_v45 = vsel %vm16102_vm3, 0, %v433_v27  ;;  %v863_v46 = vshrl.u32 %v293_v21, 16  ;;  %v866_v50 = vshll.u32 %v293_v21, 16  ;;  %v295_v54 = vld [vmem:[%s16134_s11 + $0x78] sm:$0xf] }
  0x66   : > { %v15184_v47 = vld [vmem:[#allocation2 + $0x80] sm:$0xff]   ;;  %v3467_v48 = vrot.slane %v3465_v38, 1  ;;  %v851_v49 = vsel %vm16156_vm8, %v843_v20, %v850_v41  ;;  %1956 = vst [vmem:[#allocation2 + $0x8c] sm:$0xf] %v1955_v44  ;;  %435 = vst [vmem:[#allocation2 + $0xa0] sm:$0x1] %v434_v45  ;;  %v859_v52 = vor.u32 %v857_v33, %v856_v43 }
  0x67   : > { %v871_v51 = vshrl.u32 %v294_v26, 16  ;;  %1958 = vst.msk [vmem:[#allocation2 + $0x94] sm:$0xf] %vm393_vm0, %v851_v49  ;;  %v861_v53 = vrot.slane %v856_v43, 4  ;;  %v865_v55 = vrot.slane %v863_v46, 7  ;;  %v874_v56 = vshll.u32 %v294_v26, 16 }
  0x68   : > { %v3468_v57 = vor.u32 %v3467_v48, %v3463_v36  ;;  %v3470_v58 = vshll.u32 %v15184_v47, 16  ;;  %v3474_v59 = vshrl.u32 %v15184_v47, 16  ;;  %v296_v60 = vld [vmem:[%s16134_s11 + $0x7c] sm:$0xf]  ;;  %v860_v63 = vsel %vm16156_vm8, %v852_v42, %v859_v52  ;;  %v537_v4 = vld [vmem:[#allocation2 + $0xb0] sm:$0x1] }
  0x69   : > { %v873_v61 = vrot.slane %v871_v51, 7  ;;  %v15185_v62 = vld [vmem:[#allocation2 + $0x88] ss:$0 sps:$4 sm:$0x11]   ;;  %v868_v0 = vor.u32 %v866_v50, %v865_v55  ;;  %v869_v3 = vrot.slane %v865_v55, 4  ;;  %v880_v8 = vshrl.u32 %v295_v54, 16 }
  0x6a   : > { %v436_v5 = vld [vmem:[#allocation2 + $0xb4] sm:$0x1]  ;;  %v3472_v39 = vrot.slane %v3470_v58, 1  ;;  %1959 = vst.msk [vmem:[#allocation2 + $0x98] sm:$0xf] %vm393_vm0, %v860_v63  ;;  %v3478_v9 = vshll.u32 %v15185_v62, 16 }
  0x6b   : > { %v876_v6 = vor.u32 %v874_v56, %v873_v61  ;;  %v878_v7 = vrot.slane %v873_v61, 4  ;;  %v1960_v10 = vld [vmem:[#allocation2 + $0x9c] sm:$0x1]  ;;  %v883_v11 = vshll.u32 %v295_v54, 16  ;;  %v889_v12 = vshrl.u32 %v296_v60, 16 }
  0x6c   : > { %v892_v13 = vshll.u32 %v296_v60, 16  ;;  %v3473_v14 = vsel %vm3341_vm9, %v3468_v57, %v3472_v39  ;;  %v3476_v15 = vor.u32 %v3474_v59, %v3472_v39  ;;  %v1961_v16 = vsel %vm16102_vm3, %v861_v53, %v1960_v10  ;;  %v297_v18 = vld [vmem:[%s16134_s11 + $0x80] sm:$0xf]  ;;  %v298_v30 = vld [vmem:[%s16134_s11 + $0x84] sm:$0xf] }
  0x6d   : > { %v877_v17 = vsel %vm16156_vm8, %v869_v3, %v876_v6  ;;  %4006 = vrot.lane.b32.xlu0 %v3473_v14, %s16004_s12  ;;  %v3480_v19 = vrot.slane %v3478_v9, 1  ;;  %v15186_v20 = vld [vmem:[#allocation2 + $0x8c] sm:$0xff]   ;;  %1962 = vst [vmem:[#allocation2 + $0x9c] sm:$0x1] %v1961_v16  ;;  %v882_v21 = vrot.slane %v880_v8, 7  ;;  %v891_v22 = vrot.slane %v889_v12, 7 }
  0x6e   : > { %1966 = vst.msk [vmem:[#allocation2 + $0xa4] sm:$0xf] %vm393_vm0, %v877_v17  ;;  %v1963_v23 = vld [vmem:[#allocation2 + $0xa0] sm:$0xf]  ;;  %v538_v24 = vsel %vm16116_vm5, 0, %v537_v4  ;;  %v437_v25 = vsel %vm16102_vm3, 0, %v436_v5 }
  0x6f   : > { %v3481_v26 = vsel %vm3341_vm9, %v3476_v15, %v3480_v19  ;;  %v3483_v27 = vshrl.u32 %v15186_v20, 16  ;;  %v3485_v28 = vshll.u32 %v15186_v20, 16  ;;  %v885_v29 = vor.u32 %v883_v11, %v882_v21  ;;  %539 = vst [vmem:[#allocation2 + $0xb0] sm:$0x1] %v538_v24  ;;  %v299_v31 = vld [vmem:[%s16134_s11 + $0x88] sm:$0xf] }
  0x70   : > { %438 = vst [vmem:[#allocation2 + $0xb4] sm:$0x1] %v437_v25  ;;  %4008 = vrot.lane.b32.xlu1 %v3481_v26, %s16004_s12  ;;  %v887_v32 = vrot.slane %v882_v21, 4  ;;  %v894_v33 = vor.u32 %v892_v13, %v891_v22  ;;  %v1964_v34 = vsel %vm16146_vm7, %v868_v0, %v1963_v23  ;;  %v896_v35 = vrot.slane %v891_v22, 4  ;;  %v300_v51 = vld [vmem:[%s16134_s11 + $0x8c] sm:$0xf] }
  0x71   : > { %v15187_v36 = vld [vmem:[#allocation2 + $0x94] sm:$0xff]   ;;  %v3487_v38 = vrot.slane %v3485_v28, 1  ;;  %v886_v41 = vsel %vm16156_vm8, %v878_v7, %v885_v29  ;;  %1965 = vst [vmem:[#allocation2 + $0xa0] sm:$0xf] %v1964_v34  ;;  %v898_v42 = vshrl.u32 %v297_v18, 16  ;;  %v901_v43 = vshll.u32 %v297_v18, 16 }
  0x72   : > { %v895_v44 = vsel %vm16156_vm8, %v887_v32, %v894_v33  ;;  %1967 = vst.msk [vmem:[#allocation2 + $0xa8] sm:$0xf] %vm393_vm0, %v886_v41  ;;  %v906_v45 = vshrl.u32 %v298_v30, 16  ;;  %v909_v46 = vshll.u32 %v298_v30, 16  ;;  %v915_v47 = vshrl.u32 %v299_v31, 16 }
  0x73   : > { %v3488_v48 = vor.u32 %v3487_v38, %v3483_v27  ;;  %v3490_v49 = vshll.u32 %v15187_v36, 16  ;;  %v3494_v50 = vshrl.u32 %v15187_v36, 16  ;;  %1968 = vst.msk [vmem:[#allocation2 + $0xac] sm:$0xf] %vm393_vm0, %v895_v44  ;;  %v900_v52 = vrot.slane %v898_v42, 7 }
  0x74   : > { %v15188_v53 = vld [vmem:[#allocation2 + $0x9c] ss:$0 sps:$4 sm:$0x11]   ;;  %v908_v54 = vrot.slane %v906_v45, 7  ;;  %v540_v55 = vld [vmem:[#allocation2 + $0xc4] sm:$0x1] }
  0x75   : > { %v439_v56 = vld [vmem:[#allocation2 + $0xc8] sm:$0x1]  ;;  %v3492_v57 = vrot.slane %v3490_v49, 1  ;;  %v903_v58 = vor.u32 %v901_v43, %v900_v52  ;;  %v904_v59 = vrot.slane %v900_v52, 4  ;;  %v917_v60 = vrot.slane %v915_v47, 7 }
  0x76   : > { %v3498_v61 = vshll.u32 %v15188_v53, 16  ;;  %v1969_v62 = vld [vmem:[#allocation2 + $0xb0] sm:$0x1]  ;;  %v911_v63 = vor.u32 %v909_v46, %v908_v54  ;;  %v913_v0 = vrot.slane %v908_v54, 4  ;;  %v918_v3 = vshll.u32 %v299_v31, 16 }
  0x77   : > { %v301_v4 = vld [vmem:[%s16134_s11 + $0x90] sm:$0xf]  ;;  %v3493_v5 = vsel %vm3341_vm9, %v3488_v48, %v3492_v57  ;;  %v3496_v39 = vor.u32 %v3494_v50, %v3492_v57  ;;  %v1970_v6 = vsel %vm16102_vm3, %v896_v35, %v1969_v62  ;;  %v922_v7 = vrot.slane %v917_v60, 4  ;;  %v1972_v8 = vld [vmem:[#allocation2 + $0xb4] sm:$0xf] }
  0x78   : > { %v302_v9 = vld [vmem:[%s16134_s11 + $0x94] sm:$0xf]  ;;  %4010 = vrot.lane.b32.xlu0 %v3493_v5, %s16004_s12  ;;  %v3500_v10 = vrot.slane %v3498_v61, 1  ;;  %v15189_v11 = vld [vmem:[#allocation2 + $0xa0] sm:$0xff]   ;;  %1971 = vst [vmem:[#allocation2 + $0xb0] sm:$0x1] %v1970_v6  ;;  %v912_v12 = vsel %vm16156_vm8, %v904_v59, %v911_v63  ;;  %v920_v13 = vor.u32 %v918_v3, %v917_v60  ;;  %v1973_v16 = vsel %vm16146_vm7, %v903_v58, %v1972_v8 }
  0x79   : > { %v924_v14 = vshrl.u32 %v300_v51, 16  ;;  %v927_v15 = vshll.u32 %v300_v51, 16  ;;  %1975 = vst.msk [vmem:[#allocation2 + $0xb8] sm:$0xf] %vm393_vm0, %v912_v12  ;;  %v541_v17 = vsel %vm16116_vm5, 0, %v540_v55  ;;  %v440_v18 = vsel %vm16102_vm3, 0, %v439_v56 }
  0x7a   : > { %v3501_v19 = vsel %vm3341_vm9, %v3496_v39, %v3500_v10  ;;  %v15190_v20 = vld [vmem:[#allocation2 + $0xa8] sm:$0xff]   ;;  %v3503_v21 = vshrl.u32 %v15189_v11, 16  ;;  %v3505_v22 = vshll.u32 %v15189_v11, 16  ;;  %v921_v23 = vsel %vm16156_vm8, %v913_v0, %v920_v13  ;;  %1974 = vst [vmem:[#allocation2 + $0xb4] sm:$0xf] %v1973_v16 }
  0x7b   : > { %542 = vst [vmem:[#allocation2 + $0xc4] sm:$0x1] %v541_v17  ;;  %441 = vst [vmem:[#allocation2 + $0xc8] sm:$0x1] %v440_v18  ;;  %4012 = vrot.lane.b32.xlu1 %v3501_v19, %s16004_s12  ;;  %v926_v24 = vrot.slane %v924_v14, 7  ;;  %v933_v26 = vshrl.u32 %v301_v4, 16 }
  0x7c   : > { %1976 = vst.msk [vmem:[#allocation2 + $0xbc] sm:$0xf] %vm393_vm0, %v921_v23  ;;  %v303_v25 = vld [vmem:[%s16134_s11 + $0x98] sm:$0xf]  ;;  %v936_v27 = vshll.u32 %v301_v4, 16  ;;  %v941_v28 = vshrl.u32 %v302_v9, 16 }
  0x7d   : > { %v3507_v29 = vrot.slane %v3505_v22, 1  ;;  %v3510_v30 = vshll.u32 %v15190_v20, 16  ;;  %v3514_v31 = vshrl.u32 %v15190_v20, 16  ;;  %v944_v32 = vshll.u32 %v302_v9, 16  ;;  %v304_v42 = vld [vmem:[%s16134_s11 + $0x9c] sm:$0xf] }
  0x7e   : > { %v929_v33 = vor.u32 %v927_v15, %v926_v24  ;;  %v931_v34 = vrot.slane %v926_v24, 4  ;;  %v935_v35 = vrot.slane %v933_v26, 7  ;;  %v943_v36 = vrot.slane %v941_v28, 7  ;;  %v543_v49 = vld [vmem:[#allocation2 + $0xd8] sm:$0x1] }
  0x7f   : > { %v3508_v38 = vor.u32 %v3507_v29, %v3503_v21  ;;  %v3512_v41 = vrot.slane %v3510_v30, 1  ;;  %v950_v43 = vshrl.u32 %v303_v25, 16  ;;  %v953_v44 = vshll.u32 %v303_v25, 16  ;;  %v15191_v45 = vld [vmem:[#allocation2 + $0xb0] ss:$0 sps:$4 sm:$0x11]  }
  0x80   : > { %v930_v46 = vsel %vm16156_vm8, %v922_v7, %v929_v33  ;;  %v939_v47 = vrot.slane %v935_v35, 4  ;;  %v946_v48 = vor.u32 %v944_v32, %v943_v36  ;;  %v938_v51 = vor.u32 %v936_v27, %v935_v35  ;;  %v305_v54 = vld [vmem:[%s16134_s11 + $0xa0] sm:$0xf]  ;;  %v442_v55 = vld [vmem:[#allocation2 + $0xdc] sm:$0x1] }
  0x81   : > { %v3513_v50 = vsel %vm3341_vm9, %v3508_v38, %v3512_v41  ;;  %1977 = vst.msk [vmem:[#allocation2 + $0xc0] sm:$0xf] %vm393_vm0, %v930_v46  ;;  %v948_v52 = vrot.slane %v943_v36, 4  ;;  %v952_v53 = vrot.slane %v950_v43, 7  ;;  %v3516_v56 = vor.u32 %v3514_v31, %v3512_v41  ;;  %v15192_v58 = vld [vmem:[#allocation2 + $0xb4] sm:$0xff]  }
  0x82   : > { %4014 = vrot.lane.b32.xlu0 %v3513_v50, %s16004_s12  ;;  %v3518_v57 = vshll.u32 %v15191_v45, 16  ;;  %v1978_v59 = vld [vmem:[#allocation2 + $0xc4] sm:$0x1]  ;;  %v947_v60 = vsel %vm16156_vm8, %v939_v47, %v946_v48  ;;  %v959_v0 = vshrl.u32 %v304_v42, 16  ;;  %v1981_v3 = vld [vmem:[#allocation2 + $0xc8] sm:$0xf] }
  0x83   : > { %v1979_v61 = vsel %vm16102_vm3, %v931_v34, %v1978_v59  ;;  %v955_v62 = vor.u32 %v953_v44, %v952_v53  ;;  %v957_v63 = vrot.slane %v952_v53, 4  ;;  %1984 = vst.msk [vmem:[#allocation2 + $0xcc] sm:$0xf] %vm393_vm0, %v947_v60  ;;  %v3523_v5 = vshrl.u32 %v15192_v58, 16  ;;  %v306_v7 = vld [vmem:[%s16134_s11 + $0xa4] sm:$0xf] }
  0x84   : > { %v3520_v4 = vrot.slane %v3518_v57, 1  ;;  %v3525_v39 = vshll.u32 %v15192_v58, 16  ;;  %1980 = vst [vmem:[#allocation2 + $0xc4] sm:$0x1] %v1979_v61  ;;  %v962_v6 = vshll.u32 %v304_v42, 16  ;;  %v961_v9 = vrot.slane %v959_v0, 7 }
  0x85   : > { %v956_v8 = vsel %vm16156_vm8, %v948_v52, %v955_v62  ;;  %v1982_v10 = vsel %vm16146_vm7, %v938_v51, %v1981_v3  ;;  %v544_v11 = vsel %vm16116_vm5, 0, %v543_v49  ;;  %v307_v12 = vld [vmem:[%s16134_s11 + $0xa8] sm:$0xf]  ;;  %v308_v15 = vld [vmem:[%s16134_s11 + $0xac] sm:$0xf]  ;;  %v443_v16 = vsel %vm16102_vm3, 0, %v442_v55 }
  0x86   : > { %v3521_v13 = vsel %vm3341_vm9, %v3516_v56, %v3520_v4  ;;  %v3527_v14 = vrot.slane %v3525_v39, 1  ;;  %1983 = vst [vmem:[#allocation2 + $0xc8] sm:$0xf] %v1982_v10  ;;  %1985 = vst.msk [vmem:[#allocation2 + $0xd0] sm:$0xf] %vm393_vm0, %v956_v8  ;;  %v968_v17 = vshrl.u32 %v305_v54, 16  ;;  %v964_v18 = vor.u32 %v962_v6, %v961_v9 }
  0x87   : > { %545 = vst [vmem:[#allocation2 + $0xd8] sm:$0x1] %v544_v11  ;;  %4016 = vrot.lane.b32.xlu1 %v3521_v13, %s16004_s12  ;;  %v966_v19 = vrot.slane %v961_v9, 4  ;;  %444 = vst [vmem:[#allocation2 + $0xdc] sm:$0x1] %v443_v16  ;;  %v971_v20 = vshll.u32 %v305_v54, 16 }
  0x88   : > { %v976_v21 = vshrl.u32 %v306_v7, 16  ;;  %v15193_v22 = vld [vmem:[#allocation2 + $0xbc] sm:$0xff]   ;;  %v970_v23 = vrot.slane %v968_v17, 7  ;;  %v979_v24 = vshll.u32 %v306_v7, 16  ;;  %v985_v25 = vshrl.u32 %v307_v12, 16 }
  0x89   : > { %v3528_v26 = vor.u32 %v3527_v14, %v3523_v5  ;;  %v965_v27 = vsel %vm16156_vm8, %v957_v63, %v964_v18  ;;  %v994_v29 = vshrl.u32 %v308_v15, 16  ;;  %v3530_v30 = vshll.u32 %v15193_v22, 16  ;;  %v546_v41 = vld [vmem:[#allocation2 + $0xec] sm:$0x1]  ;;  %v445_v46 = vld [vmem:[#allocation2 + $0xf0] sm:$0x1] }
  0x8a   : > { %v978_v28 = vrot.slane %v976_v21, 7  ;;  %v3534_v31 = vshrl.u32 %v15193_v22, 16  ;;  %1986 = vst.msk [vmem:[#allocation2 + $0xd4] sm:$0xf] %vm393_vm0, %v965_v27  ;;  %v974_v32 = vrot.slane %v970_v23, 4  ;;  %v988_v33 = vshll.u32 %v307_v12, 16 }
  0x8b   : > { %v15194_v34 = vld [vmem:[#allocation2 + $0xc4] ss:$0 sps:$4 sm:$0x11]   ;;  %v973_v35 = vor.u32 %v971_v20, %v970_v23  ;;  %v3532_v42 = vrot.slane %v3530_v30, 1  ;;  %v987_v43 = vrot.slane %v985_v25, 7  ;;  %v16396_v44 = vrot.slane %v994_v29, 7 }
  0x8c   : > { %v981_v36 = vor.u32 %v979_v24, %v978_v28  ;;  %v983_v38 = vrot.slane %v978_v28, 4  ;;  %v997_v45 = vshll.u32 %v308_v15, 16  ;;  %v3538_v47 = vshll.u32 %v15194_v34, 16  ;;  %v309_v50 = vld [vmem:[%s16134_s11 + $0xb0] sm:$0xf] }
  0x8d   : > { %v15195_v48 = vld [vmem:[#allocation2 + $0xc8] sm:$0xff]   ;;  %v3533_v51 = vsel %vm3341_vm9, %v3528_v26, %v3532_v42  ;;  %v3536_v52 = vor.u32 %v3534_v31, %v3532_v42  ;;  %v990_v54 = vor.u32 %v988_v33, %v987_v43  ;;  %v992_v55 = vrot.slane %v987_v43, 4  ;;  %v310_v61 = vld [vmem:[%s16134_s11 + $0xb4] sm:$0xf]  ;;  %v311_v4 = vld [vmem:[%s16134_s11 + $0xb8] sm:$0xf] }
  0x8e   : > { %v982_v49 = vsel %vm16156_vm8, %v974_v32, %v981_v36  ;;  %v1987_v53 = vld [vmem:[#allocation2 + $0xd8] sm:$0x1]  ;;  %v1990_v56 = vld [vmem:[#allocation2 + $0xdc] sm:$0xf]  ;;  %4018 = vrot.lane.b32.xlu0 %v3533_v51, %s16004_s12  ;;  %v3540_v57 = vrot.slane %v3538_v47, 1  ;;  %v3543_v58 = vshrl.u32 %v15195_v48, 16  ;;  %v999_v63 = vor.u32 %v997_v45, %v16396_v44 }
  0x8f   : > { %1993 = vst.msk [vmem:[#allocation2 + $0xe0] sm:$0xf] %vm393_vm0, %v982_v49  ;;  %v3545_v59 = vshll.u32 %v15195_v48, 16  ;;  %v1988_v60 = vsel %vm16102_vm3, %v966_v19, %v1987_v53  ;;  %v991_v62 = vsel %vm16156_vm8, %v983_v38, %v990_v54  ;;  %v1991_v0 = vsel %vm16146_vm7, %v973_v35, %v1990_v56  ;;  %v312_v5 = vld [vmem:[%s16134_s11 + $0xbc] sm:$0xf] }
  0x90   : > { %1989 = vst [vmem:[#allocation2 + $0xd8] sm:$0x1] %v1988_v60  ;;  %v547_v3 = vsel %vm16116_vm5, 0, %v546_v41  ;;  %v3541_v39 = vsel %vm3341_vm9, %v3536_v52, %v3540_v57  ;;  %1992 = vst [vmem:[#allocation2 + $0xdc] sm:$0xf] %v1991_v0  ;;  %v446_v8 = vsel %vm16102_vm3, 0, %v445_v46  ;;  %v1000_v9 = vsel %vm16156_vm8, %v992_v55, %v999_v63 }
  0x91   : > { %v15196_v6 = vld [vmem:[#allocation2 + $0xd0] sm:$0xff]   ;;  %v3547_v7 = vrot.slane %v3545_v59, 1  ;;  %1994 = vst.msk [vmem:[#allocation2 + $0xe4] sm:$0xf] %vm393_vm0, %v991_v62  ;;  %548 = vst [vmem:[#allocation2 + $0xec] sm:$0x1] %v547_v3  ;;  %4020 = vrot.lane.b32.xlu1 %v3541_v39, %s16004_s12 }
  0x92   : > { %v1001_v10 = vrot.slane %v16396_v44, 4  ;;  %447 = vst [vmem:[#allocation2 + $0xf0] sm:$0x1] %v446_v8  ;;  %v1003_v11 = vshrl.u32 %v309_v50, 16  ;;  %v1011_v12 = vshrl.u32 %v310_v61, 16  ;;  %v3550_v15 = vshll.u32 %v15196_v6, 16 }
  0x93   : > { %v549_v13 = vld [vmem:[#allocation2 + $0x100] sm:$0x1]  ;;  %v3548_v14 = vor.u32 %v3547_v7, %v3543_v58  ;;  %1995 = vst.msk [vmem:[#allocation2 + $0xe8] sm:$0xf] %vm393_vm0, %v1000_v9  ;;  %v1006_v16 = vshll.u32 %v309_v50, 16  ;;  %v1014_v17 = vshll.u32 %v310_v61, 16 }
  0x94   : > { %v3554_v18 = vshrl.u32 %v15196_v6, 16  ;;  %v1005_v19 = vrot.slane %v1003_v11, 7  ;;  %v1013_v20 = vrot.slane %v1011_v12, 7  ;;  %v1020_v21 = vshrl.u32 %v311_v4, 16  ;;  %v313_v38 = vld [vmem:[%s16134_s11 + $0xc0] sm:$0xf] }
  0x95   : > { %v3552_v22 = vrot.slane %v3550_v15, 1  ;;  %v1023_v23 = vshll.u32 %v311_v4, 16  ;;  %v1029_v24 = vshrl.u32 %v312_v5, 16  ;;  %v550_v25 = vsel %vm16116_vm5, 0, %v549_v13  ;;  %v448_v41 = vld [vmem:[#allocation2 + $0x104] sm:$0x1] }
  0x96   : > { %v1009_v26 = vrot.slane %v1005_v19, 4  ;;  %v1016_v27 = vor.u32 %v1014_v17, %v1013_v20  ;;  %v1018_v28 = vrot.slane %v1013_v20, 4  ;;  %v1032_v29 = vshll.u32 %v312_v5, 16  ;;  %551 = vst [vmem:[#allocation2 + $0x100] sm:$0x1] %v550_v25 }
  0x97   : > { %v3553_v30 = vsel %vm3341_vm9, %v3548_v14, %v3552_v22  ;;  %v15197_v31 = vld [vmem:[#allocation2 + $0xd8] ss:$0 sps:$4 sm:$0x11]   ;;  %v1008_v32 = vor.u32 %v1006_v16, %v1005_v19  ;;  %v1022_v33 = vrot.slane %v1020_v21, 7  ;;  %v15198_v34 = vld [vmem:[#allocation2 + $0xdc] sm:$0xff]   ;;  %v1031_v36 = vrot.slane %v1029_v24, 7 }
  0x98   : > { %4022 = vrot.lane.b32.xlu0 %v3553_v30, %s16004_s12  ;;  %v1017_v35 = vsel %vm16156_vm8, %v1009_v26, %v1016_v27  ;;  %v3556_v42 = vor.u32 %v3554_v18, %v3552_v22  ;;  %v3558_v43 = vshll.u32 %v15197_v31, 16  ;;  %v1996_v44 = vld [vmem:[#allocation2 + $0xec] sm:$0x1]  ;;  %v3563_v49 = vshrl.u32 %v15198_v34, 16  ;;  %v314_v57 = vld [vmem:[%s16134_s11 + $0xc4] sm:$0xf] }
  0x99   : > { %v1025_v45 = vor.u32 %v1023_v23, %v1022_v33  ;;  %v1027_v46 = vrot.slane %v1022_v33, 4  ;;  %v1999_v47 = vld [vmem:[#allocation2 + $0xf0] sm:$0xf]  ;;  %2002 = vst.msk [vmem:[#allocation2 + $0xf4] sm:$0xf] %vm393_vm0, %v1017_v35  ;;  %v3565_v50 = vshll.u32 %v15198_v34, 16  ;;  %v1997_v51 = vsel %vm16102_vm3, %v1001_v10, %v1996_v44 }
  0x9a   : > { %v15199_v48 = vld [vmem:[#allocation2 + $0xe4] sm:$0xff]   ;;  %v1034_v52 = vor.u32 %v1032_v29, %v1031_v36  ;;  %v3560_v53 = vrot.slane %v3558_v43, 1  ;;  %1998 = vst [vmem:[#allocation2 + $0xec] sm:$0x1] %v1997_v51  ;;  %v2000_v55 = vsel %vm16146_vm7, %v1008_v32, %v1999_v47  ;;  %v1036_v56 = vrot.slane %v1031_v36, 4 }
  0x9b   : > { %v1026_v54 = vsel %vm16156_vm8, %v1018_v28, %v1025_v45  ;;  %v315_v58 = vld [vmem:[%s16134_s11 + $0xc8] sm:$0xf]  ;;  %v3567_v59 = vrot.slane %v3565_v50, 1  ;;  %v3570_v60 = vshll.u32 %v15199_v48, 16  ;;  %v3574_v61 = vshrl.u32 %v15199_v48, 16 }
  0x9c   : > { %v1035_v62 = vsel %vm16156_vm8, %v1027_v46, %v1034_v52  ;;  %2001 = vst [vmem:[#allocation2 + $0xf0] sm:$0xf] %v2000_v55  ;;  %2003 = vst.msk [vmem:[#allocation2 + $0xf8] sm:$0xf] %vm393_vm0, %v1026_v54  ;;  %v316_v63 = vld [vmem:[%s16134_s11 + $0xcc] sm:$0xf]  ;;  %v3561_v0 = vsel %vm3341_vm9, %v3556_v42, %v3560_v53 }
  0x9d   : > { %2004 = vst.msk [vmem:[#allocation2 + $0xfc] sm:$0xf] %vm393_vm0, %v1035_v62  ;;  %v2005_v3 = vld [vmem:[#allocation2 + $0x100] sm:$0x1]  ;;  %v449_v4 = vsel %vm16102_vm3, 0, %v448_v41  ;;  %v1038_v5 = vshrl.u32 %v313_v38, 16  ;;  %4024 = vrot.lane.b32.xlu1 %v3561_v0, %s16004_s12  ;;  %v3568_v6 = vor.u32 %v3567_v59, %v3563_v49 }
  0x9e   : > { %v1041_v39 = vshll.u32 %v313_v38, 16  ;;  %v3572_v7 = vrot.slane %v3570_v60, 1  ;;  %v2006_v8 = vsel %vm16102_vm3, %v1036_v56, %v2005_v3  ;;  %450 = vst [vmem:[#allocation2 + $0x104] sm:$0x1] %v449_v4  ;;  %v1046_v9 = vshrl.u32 %v314_v57, 16 }
  0x9f   : > { %2007 = vst [vmem:[#allocation2 + $0x100] sm:$0x1] %v2006_v8  ;;  %v1040_v10 = vrot.slane %v1038_v5, 7  ;;  %v1049_v11 = vshll.u32 %v314_v57, 16  ;;  %v1055_v12 = vshrl.u32 %v315_v58, 16  ;;  %v1058_v13 = vshll.u32 %v315_v58, 16 }
  0xa0   : > { %v3573_v14 = vsel %vm3341_vm9, %v3568_v6, %v3572_v7  ;;  %v1048_v15 = vrot.slane %v1046_v9, 7  ;;  %v1064_v16 = vshrl.u32 %v316_v63, 16  ;;  %v552_v17 = vld [vmem:[#allocation2 + $0x114] sm:$0x1]  ;;  %v1067_v20 = vshll.u32 %v316_v63, 16 }
  0xa1   : > { %4026 = vrot.lane.b32.xlu0 %v3573_v14, %s16004_s12  ;;  %v1044_v18 = vrot.slane %v1040_v10, 4  ;;  %v1057_v19 = vrot.slane %v1055_v12, 7  ;;  %v451_v21 = vld [vmem:[#allocation2 + $0x118] sm:$0x1]  ;;  %v317_v25 = vld [vmem:[%s16134_s11 + $0xd0] sm:$0xf]  ;;  %v3576_v26 = vor.u32 %v3574_v61, %v3572_v7  ;;  %v1043_v28 = vor.u32 %v1041_v39, %v1040_v10 }
  0xa2   : > { %v15200_v22 = vld [vmem:[#allocation2 + $0xec] ss:$0 sps:$4 sm:$0x11]   ;;  %v1051_v23 = vor.u32 %v1049_v11, %v1048_v15  ;;  %v1053_v24 = vrot.slane %v1048_v15, 4  ;;  %v1066_v34 = vrot.slane %v1064_v16, 7  ;;  %v553_v35 = vsel %vm16116_vm5, 0, %v552_v17 }
  0xa3   : > { %v15201_v27 = vld [vmem:[#allocation2 + $0xf0] sm:$0xff]   ;;  %v1060_v29 = vor.u32 %v1058_v13, %v1057_v19  ;;  %v1062_v30 = vrot.slane %v1057_v19, 4  ;;  %v3578_v31 = vshll.u32 %v15200_v22, 16  ;;  %554 = vst [vmem:[#allocation2 + $0x114] sm:$0x1] %v553_v35  ;;  %v452_v45 = vsel %vm16102_vm3, 0, %v451_v21 }
  0xa4   : > { %v15202_v32 = vld [vmem:[#allocation2 + $0xf8] sm:$0xff]   ;;  %v1052_v33 = vsel %vm16156_vm8, %v1044_v18, %v1051_v23  ;;  %v318_v36 = vld [vmem:[%s16134_s11 + $0xd4] sm:$0xf]  ;;  %v3583_v38 = vshrl.u32 %v15201_v27, 16  ;;  %v3585_v41 = vshll.u32 %v15201_v27, 16  ;;  %v1069_v49 = vor.u32 %v1067_v20, %v1066_v34 }
  0xa5   : > { %v1061_v42 = vsel %vm16156_vm8, %v1053_v24, %v1060_v29  ;;  %v2008_v43 = vld [vmem:[#allocation2 + $0x104] sm:$0xf]  ;;  %2011 = vst.msk [vmem:[#allocation2 + $0x108] sm:$0xf] %vm393_vm0, %v1052_v33  ;;  %v319_v44 = vld [vmem:[%s16134_s11 + $0xd8] sm:$0xf] }
  0xa6   : > { %v3580_v46 = vrot.slane %v3578_v31, 1  ;;  %v3590_v47 = vshll.u32 %v15202_v32, 16  ;;  %v3594_v48 = vshrl.u32 %v15202_v32, 16  ;;  %2012 = vst.msk [vmem:[#allocation2 + $0x10c] sm:$0xf] %vm393_vm0, %v1061_v42  ;;  %v3587_v50 = vrot.slane %v3585_v41, 1 }
  0xa7   : > { %453 = vst [vmem:[#allocation2 + $0x118] sm:$0x1] %v452_v45  ;;  %v15203_v51 = vld [vmem:[#allocation2 + $0x100] ss:$0 sps:$4 sm:$0x11]   ;;  %v2009_v52 = vsel %vm16146_vm7, %v1043_v28, %v2008_v43  ;;  %v1071_v53 = vrot.slane %v1066_v34, 4  ;;  %v1070_v57 = vsel %vm16156_vm8, %v1062_v30, %v1069_v49 }
  0xa8   : > { %v1073_v54 = vshrl.u32 %v317_v25, 16  ;;  %v3581_v55 = vsel %vm3341_vm9, %v3576_v26, %v3580_v46  ;;  %v3592_v56 = vrot.slane %v3590_v47, 1  ;;  %2010 = vst [vmem:[#allocation2 + $0x104] sm:$0xf] %v2009_v52  ;;  %v1076_v58 = vshll.u32 %v317_v25, 16 }
  0xa9   : > { %4028 = vrot.lane.b32.xlu1 %v3581_v55, %s16004_s12  ;;  %v3588_v59 = vor.u32 %v3587_v50, %v3583_v38  ;;  %v3598_v60 = vshll.u32 %v15203_v51, 16  ;;  %2013 = vst.msk [vmem:[#allocation2 + $0x110] sm:$0xf] %vm393_vm0, %v1070_v57  ;;  %v320_v61 = vld [vmem:[%s16134_s11 + $0xdc] sm:$0xf]  ;;  %v1081_v63 = vshrl.u32 %v318_v36, 16 }
  0xaa   : > { %v1075_v62 = vrot.slane %v1073_v54, 7  ;;  %v3596_v0 = vor.u32 %v3594_v48, %v3592_v56  ;;  %v1084_v3 = vshll.u32 %v318_v36, 16  ;;  %v1090_v4 = vshrl.u32 %v319_v44, 16  ;;  %v555_v39 = vld [vmem:[#allocation2 + $0x128] sm:$0x1] }
  0xab   : > { %v1093_v5 = vshll.u32 %v319_v44, 16  ;;  %v3593_v6 = vsel %vm3341_vm9, %v3588_v59, %v3592_v56  ;;  %v3600_v7 = vrot.slane %v3598_v60, 1  ;;  %v321_v10 = vld [vmem:[%s16134_s11 + $0xe0] sm:$0xf]  ;;  %v454_v11 = vld [vmem:[#allocation2 + $0x12c] sm:$0x1] }
  0xac   : > { %v1078_v8 = vor.u32 %v1076_v58, %v1075_v62  ;;  %v1079_v9 = vrot.slane %v1075_v62, 4  ;;  %4030 = vrot.lane.b32.xlu0 %v3593_v6, %s16004_s12  ;;  %v2014_v12 = vld [vmem:[#allocation2 + $0x114] sm:$0x1]  ;;  %v1083_v13 = vrot.slane %v1081_v63, 7  ;;  %v1092_v14 = vrot.slane %v1090_v4, 7 }
  0xad   : > { %v3601_v15 = vsel %vm3341_vm9, %v3596_v0, %v3600_v7  ;;  %v2015_v16 = vsel %vm16102_vm3, %v1071_v53, %v2014_v12  ;;  %v1099_v17 = vshrl.u32 %v320_v61, 16  ;;  %v1102_v18 = vshll.u32 %v320_v61, 16  ;;  %v322_v24 = vld [vmem:[%s16134_s11 + $0xe4] sm:$0xf]  ;;  %v323_v33 = vld [vmem:[%s16134_s11 + $0xe8] sm:$0xf] }
  0xae   : > { %v2017_v19 = vld [vmem:[#allocation2 + $0x118] sm:$0xf]  ;;  %4032 = vrot.lane.b32.xlu1 %v3601_v15, %s16004_s12  ;;  %2016 = vst [vmem:[#allocation2 + $0x114] sm:$0x1] %v2015_v16  ;;  %v1086_v20 = vor.u32 %v1084_v3, %v1083_v13  ;;  %v1088_v21 = vrot.slane %v1083_v13, 4  ;;  %v1095_v22 = vor.u32 %v1093_v5, %v1092_v14  ;;  %v1097_v23 = vrot.slane %v1092_v14, 4 }
  0xaf   : > { %v15204_v25 = vld [vmem:[#allocation2 + $0x104] sm:$0xff]   ;;  %v1101_v26 = vrot.slane %v1099_v17, 7  ;;  %v2018_v27 = vsel %vm16146_vm7, %v1078_v8, %v2017_v19  ;;  %v556_v28 = vsel %vm16116_vm5, 0, %v555_v39  ;;  %v455_v29 = vsel %vm16102_vm3, 0, %v454_v11  ;;  %v324_v48 = vld [vmem:[%s16134_s11 + $0xec] sm:$0xf] }
  0xb0   : > { %v15205_v30 = vld [vmem:[#allocation2 + $0x10c] sm:$0xff]   ;;  %v1087_v31 = vsel %vm16156_vm8, %v1079_v9, %v1086_v20  ;;  %v1096_v32 = vsel %vm16156_vm8, %v1088_v21, %v1095_v22  ;;  %2019 = vst [vmem:[#allocation2 + $0x118] sm:$0xf] %v2018_v27  ;;  %557 = vst [vmem:[#allocation2 + $0x128] sm:$0x1] %v556_v28  ;;  %v1108_v34 = vshrl.u32 %v321_v10, 16 }
  0xb1   : > { %456 = vst [vmem:[#allocation2 + $0x12c] sm:$0x1] %v455_v29  ;;  %v3603_v35 = vshrl.u32 %v15204_v25, 16  ;;  %v3605_v36 = vshll.u32 %v15204_v25, 16  ;;  %v1104_v38 = vor.u32 %v1102_v18, %v1101_v26  ;;  %2020 = vst.msk [vmem:[#allocation2 + $0x11c] sm:$0xf] %vm393_vm0, %v1087_v31 }
  0xb2   : > { %2021 = vst.msk [vmem:[#allocation2 + $0x120] sm:$0xf] %vm393_vm0, %v1096_v32  ;;  %v1111_v41 = vshll.u32 %v321_v10, 16  ;;  %v3610_v42 = vshll.u32 %v15205_v30, 16  ;;  %v3614_v43 = vshrl.u32 %v15205_v30, 16  ;;  %v1110_v44 = vrot.slane %v1108_v34, 7 }
  0xb3   : > { %v1116_v45 = vshrl.u32 %v322_v24, 16  ;;  %v3607_v46 = vrot.slane %v3605_v36, 1  ;;  %v1105_v47 = vsel %vm16156_vm8, %v1097_v23, %v1104_v38  ;;  %v1119_v49 = vshll.u32 %v322_v24, 16  ;;  %v558_v55 = vld [vmem:[#allocation2 + $0x13c] sm:$0x1] }
  0xb4   : > { %v1125_v50 = vshrl.u32 %v323_v33, 16  ;;  %v3612_v51 = vrot.slane %v3610_v42, 1  ;;  %2022 = vst.msk [vmem:[#allocation2 + $0x124] sm:$0xf] %vm393_vm0, %v1105_v47  ;;  %v1106_v52 = vrot.slane %v1101_v26, 4  ;;  %v1114_v53 = vrot.slane %v1110_v44, 4 }
  0xb5   : > { %v1118_v54 = vrot.slane %v1116_v45, 7  ;;  %v3608_v56 = vor.u32 %v3607_v46, %v3603_v35  ;;  %v15206_v57 = vld [vmem:[#allocation2 + $0x114] ss:$0 sps:$4 sm:$0x11]   ;;  %v1113_v59 = vor.u32 %v1111_v41, %v1110_v44  ;;  %v1128_v62 = vshll.u32 %v323_v33, 16 }
  0xb6   : > { %v1127_v58 = vrot.slane %v1125_v50, 7  ;;  %v325_v63 = vld [vmem:[%s16134_s11 + $0xf0] sm:$0xf]  ;;  %v457_v0 = vld [vmem:[#allocation2 + $0x140] sm:$0x1]  ;;  %v3616_v4 = vor.u32 %v3614_v43, %v3612_v51  ;;  %v3618_v5 = vshll.u32 %v15206_v57, 16 }
  0xb7   : > { %v1121_v60 = vor.u32 %v1119_v49, %v1118_v54  ;;  %v1123_v61 = vrot.slane %v1118_v54, 4  ;;  %v3613_v3 = vsel %vm3341_vm9, %v3608_v56, %v3612_v51  ;;  %v2023_v39 = vld [vmem:[#allocation2 + $0x128] sm:$0x1]  ;;  %v326_v7 = vld [vmem:[%s16134_s11 + $0xf4] sm:$0xf]  ;;  %v1134_v12 = vshrl.u32 %v324_v48, 16 }
  0xb8   : > { %v1132_v6 = vrot.slane %v1127_v58, 4  ;;  %4034 = vrot.lane.b32.xlu0 %v3613_v3, %s16004_s12  ;;  %v15207_v8 = vld [vmem:[#allocation2 + $0x118] sm:$0xff]   ;;  %v2024_v9 = vsel %vm16102_vm3, %v1106_v52, %v2023_v39  ;;  %v1130_v11 = vor.u32 %v1128_v62, %v1127_v58  ;;  %v3620_v13 = vrot.slane %v3618_v5, 1  ;;  %v2026_v15 = vld [vmem:[#allocation2 + $0x12c] sm:$0xf] }
  0xb9   : > { %v1122_v10 = vsel %vm16156_vm8, %v1114_v53, %v1121_v60  ;;  %2025 = vst [vmem:[#allocation2 + $0x128] sm:$0x1] %v2024_v9  ;;  %v1137_v14 = vshll.u32 %v324_v48, 16  ;;  %v559_v16 = vsel %vm16116_vm5, 0, %v558_v55  ;;  %v458_v17 = vsel %vm16102_vm3, 0, %v457_v0 }
  0xba   : > { %2029 = vst.msk [vmem:[#allocation2 + $0x130] sm:$0xf] %vm393_vm0, %v1122_v10  ;;  %v3623_v18 = vshrl.u32 %v15207_v8, 16  ;;  %v3625_v19 = vshll.u32 %v15207_v8, 16  ;;  %v1131_v20 = vsel %vm16156_vm8, %v1123_v61, %v1130_v11  ;;  %v1136_v21 = vrot.slane %v1134_v12, 7 }
  0xbb   : > { %560 = vst [vmem:[#allocation2 + $0x13c] sm:$0x1] %v559_v16  ;;  %v327_v22 = vld [vmem:[%s16134_s11 + $0xf8] sm:$0xf]  ;;  %459 = vst [vmem:[#allocation2 + $0x140] sm:$0x1] %v458_v17  ;;  %v3621_v23 = vsel %vm3341_vm9, %v3616_v4, %v3620_v13  ;;  %v2027_v25 = vsel %vm16146_vm7, %v1113_v59, %v2026_v15 }
  0xbc   : > { %v15208_v24 = vld [vmem:[#allocation2 + $0x120] sm:$0xff]   ;;  %2030 = vst.msk [vmem:[#allocation2 + $0x134] sm:$0xf] %vm393_vm0, %v1131_v20  ;;  %v1143_v26 = vshrl.u32 %v325_v63, 16  ;;  %v1146_v27 = vshll.u32 %v325_v63, 16  ;;  %4036 = vrot.lane.b32.xlu1 %v3621_v23, %s16004_s12  ;;  %v3627_v28 = vrot.slane %v3625_v19, 1  ;;  %v1139_v29 = vor.u32 %v1137_v14, %v1136_v21 }
  0xbd   : > { %2028 = vst [vmem:[#allocation2 + $0x12c] sm:$0xf] %v2027_v25  ;;  %v1141_v30 = vrot.slane %v1136_v21, 4  ;;  %v1151_v31 = vshrl.u32 %v326_v7, 16  ;;  %v3630_v32 = vshll.u32 %v15208_v24, 16  ;;  %v3634_v33 = vshrl.u32 %v15208_v24, 16 }
  0xbe   : > { %v1145_v34 = vrot.slane %v1143_v26, 7  ;;  %v1154_v35 = vshll.u32 %v326_v7, 16  ;;  %v3628_v36 = vor.u32 %v3627_v28, %v3623_v18  ;;  %v1140_v38 = vsel %vm16156_vm8, %v1132_v6, %v1139_v29  ;;  %v328_v41 = vld [vmem:[%s16134_s11 + $0xfc] sm:$0xf]  ;;  %v561_v48 = vld [vmem:[#allocation2 + $0x150] sm:$0x1] }
  0xbf   : > { %v1153_v42 = vrot.slane %v1151_v31, 7  ;;  %v1160_v43 = vshrl.u32 %v327_v22, 16  ;;  %v3632_v44 = vrot.slane %v3630_v32, 1  ;;  %2031 = vst.msk [vmem:[#allocation2 + $0x138] sm:$0xf] %vm393_vm0, %v1140_v38  ;;  %v1163_v47 = vshll.u32 %v327_v22, 16 }
  0xc0   : > { %v1148_v45 = vor.u32 %v1146_v27, %v1145_v34  ;;  %v1149_v46 = vrot.slane %v1145_v34, 4  ;;  %v329_v49 = vld [vmem:[%s16134_s11 + $0x100] sm:$0xf]  ;;  %v460_v50 = vld [vmem:[#allocation2 + $0x154] sm:$0x1]  ;;  %v1169_v58 = vshrl.u32 %v328_v41, 16 }
  0xc1   : > { %v15209_v51 = vld [vmem:[#allocation2 + $0x128] ss:$0 sps:$4 sm:$0x11]   ;;  %v1156_v52 = vor.u32 %v1154_v35, %v1153_v42  ;;  %v1158_v53 = vrot.slane %v1153_v42, 4  ;;  %v3633_v54 = vsel %vm3341_vm9, %v3628_v36, %v3632_v44  ;;  %v3636_v55 = vor.u32 %v3634_v33, %v3632_v44  ;;  %v330_v8 = vld [vmem:[%s16134_s11 + $0x104] sm:$0xf] }
  0xc2   : > { %v2032_v56 = vld [vmem:[#allocation2 + $0x13c] sm:$0x1]  ;;  %v1162_v57 = vrot.slane %v1160_v43, 7  ;;  %4038 = vrot.lane.b32.xlu0 %v3633_v54, %s16004_s12  ;;  %v3638_v59 = vshll.u32 %v15209_v51, 16  ;;  %v1172_v62 = vshll.u32 %v328_v41, 16  ;;  %v1171_v5 = vrot.slane %v1169_v58, 7 }
  0xc3   : > { %v2033_v60 = vsel %vm16102_vm3, %v1141_v30, %v2032_v56  ;;  %v1157_v61 = vsel %vm16156_vm8, %v1149_v46, %v1156_v52  ;;  %v2035_v63 = vld [vmem:[#allocation2 + $0x140] sm:$0xf]  ;;  %v562_v7 = vsel %vm16116_vm5, 0, %v561_v48  ;;  %v461_v9 = vsel %vm16102_vm3, 0, %v460_v50  ;;  %v331_v15 = vld [vmem:[%s16134_s11 + $0x108] sm:$0xf] }
  0xc4   : > { %v15210_v0 = vld [vmem:[#allocation2 + $0x12c] sm:$0xff]   ;;  %2034 = vst [vmem:[#allocation2 + $0x13c] sm:$0x1] %v2033_v60  ;;  %v1165_v3 = vor.u32 %v1163_v47, %v1162_v57  ;;  %v1167_v4 = vrot.slane %v1162_v57, 4  ;;  %v2036_v39 = vsel %vm16146_vm7, %v1148_v45, %v2035_v63  ;;  %2038 = vst.msk [vmem:[#allocation2 + $0x144] sm:$0xf] %vm393_vm0, %v1157_v61  ;;  %v1174_v14 = vor.u32 %v1172_v62, %v1171_v5 }
  0xc5   : > { %v3640_v6 = vrot.slane %v3638_v59, 1  ;;  %2037 = vst [vmem:[#allocation2 + $0x140] sm:$0xf] %v2036_v39  ;;  %v1178_v10 = vshrl.u32 %v329_v49, 16  ;;  %v3643_v11 = vshrl.u32 %v15210_v0, 16  ;;  %v3645_v12 = vshll.u32 %v15210_v0, 16 }
  0xc6   : > { %v1166_v13 = vsel %vm16156_vm8, %v1158_v53, %v1165_v3  ;;  %563 = vst [vmem:[#allocation2 + $0x150] sm:$0x1] %v562_v7  ;;  %462 = vst [vmem:[#allocation2 + $0x154] sm:$0x1] %v461_v9  ;;  %v15211_v17 = vld [vmem:[#allocation2 + $0x134] sm:$0xff]   ;;  %v1181_v19 = vshll.u32 %v329_v49, 16  ;;  %v1175_v21 = vsel %vm16156_vm8, %v1167_v4, %v1174_v14 }
  0xc7   : > { %v3641_v16 = vsel %vm3341_vm9, %v3636_v55, %v3640_v6  ;;  %2039 = vst.msk [vmem:[#allocation2 + $0x148] sm:$0xf] %vm393_vm0, %v1166_v13  ;;  %v1180_v18 = vrot.slane %v1178_v10, 7  ;;  %v3647_v20 = vrot.slane %v3645_v12, 1  ;;  %v1186_v22 = vshrl.u32 %v330_v8, 16 }
  0xc8   : > { %4040 = vrot.lane.b32.xlu1 %v3641_v16, %s16004_s12  ;;  %v1189_v23 = vshll.u32 %v330_v8, 16  ;;  %v3650_v24 = vshll.u32 %v15211_v17, 16  ;;  %v3654_v25 = vshrl.u32 %v15211_v17, 16  ;;  %2040 = vst.msk [vmem:[#allocation2 + $0x14c] sm:$0xf] %vm393_vm0, %v1175_v21  ;;  %v1176_v26 = vrot.slane %v1171_v5, 4 }
  0xc9   : > { %v1184_v27 = vrot.slane %v1180_v18, 4  ;;  %v3648_v28 = vor.u32 %v3647_v20, %v3643_v11  ;;  %v332_v29 = vld [vmem:[%s16134_s11 + $0x10c] sm:$0xf]  ;;  %v1188_v30 = vrot.slane %v1186_v22, 7  ;;  %v1195_v31 = vshrl.u32 %v331_v15, 16 }
  0xca   : > { %v1198_v32 = vshll.u32 %v331_v15, 16  ;;  %v3652_v33 = vrot.slane %v3650_v24, 1  ;;  %v564_v35 = vld [vmem:[#allocation2 + $0x164] sm:$0x1]  ;;  %v1183_v38 = vor.u32 %v1181_v19, %v1180_v18  ;;  %v333_v49 = vld [vmem:[%s16134_s11 + $0x110] sm:$0xf] }
  0xcb   : > { %v15212_v34 = vld [vmem:[#allocation2 + $0x13c] ss:$0 sps:$4 sm:$0x11]   ;;  %v1191_v41 = vor.u32 %v1189_v23, %v1188_v30  ;;  %v1193_v42 = vrot.slane %v1188_v30, 4  ;;  %v1197_v47 = vrot.slane %v1195_v31, 7  ;;  %v1204_v58 = vshrl.u32 %v332_v29, 16 }
  0xcc   : > { %v15213_v36 = vld [vmem:[#allocation2 + $0x140] sm:$0xff]   ;;  %v3653_v43 = vsel %vm3341_vm9, %v3648_v28, %v3652_v33  ;;  %v3656_v44 = vor.u32 %v3654_v25, %v3652_v33  ;;  %v3658_v45 = vshll.u32 %v15212_v34, 16  ;;  %v463_v54 = vld [vmem:[#allocation2 + $0x168] sm:$0x1]  ;;  %v334_v59 = vld [vmem:[%s16134_s11 + $0x114] sm:$0xf] }
  0xcd   : > { %v2041_v46 = vld [vmem:[#allocation2 + $0x150] sm:$0x1]  ;;  %v2044_v48 = vld [vmem:[#allocation2 + $0x154] sm:$0xf]  ;;  %4042 = vrot.lane.b32.xlu0 %v3653_v43, %s16004_s12  ;;  %v3663_v50 = vshrl.u32 %v15213_v36, 16  ;;  %v3665_v51 = vshll.u32 %v15213_v36, 16  ;;  %v1192_v53 = vsel %vm16156_vm8, %v1184_v27, %v1191_v41  ;;  %v1200_v56 = vor.u32 %v1198_v32, %v1197_v47 }
  0xce   : > { %v2042_v52 = vsel %vm16102_vm3, %v1176_v26, %v2041_v46  ;;  %v3660_v55 = vrot.slane %v3658_v45, 1  ;;  %v1202_v57 = vrot.slane %v1197_v47, 4  ;;  %2047 = vst.msk [vmem:[#allocation2 + $0x158] sm:$0xf] %vm393_vm0, %v1192_v53  ;;  %v1207_v62 = vshll.u32 %v332_v29, 16 }
  0xcf   : > { %2043 = vst [vmem:[#allocation2 + $0x150] sm:$0x1] %v2042_v52  ;;  %v15214_v60 = vld [vmem:[#allocation2 + $0x148] sm:$0xff]   ;;  %v3667_v61 = vrot.slane %v3665_v51, 1  ;;  %v2045_v63 = vsel %vm16146_vm7, %v1183_v38, %v2044_v48  ;;  %v565_v0 = vsel %vm16116_vm5, 0, %v564_v35  ;;  %v1201_v4 = vsel %vm16156_vm8, %v1193_v42, %v1200_v56 }
  0xd0   : > { %v3661_v3 = vsel %vm3341_vm9, %v3656_v44, %v3660_v55  ;;  %v1206_v5 = vrot.slane %v1204_v58, 7  ;;  %2046 = vst [vmem:[#allocation2 + $0x154] sm:$0xf] %v2045_v63  ;;  %566 = vst [vmem:[#allocation2 + $0x164] sm:$0x1] %v565_v0  ;;  %v464_v6 = vsel %vm16102_vm3, 0, %v463_v54 }
  0xd1   : > { %v335_v39 = vld [vmem:[%s16134_s11 + $0x118] sm:$0xf]  ;;  %4044 = vrot.lane.b32.xlu1 %v3661_v3, %s16004_s12  ;;  %v3668_v7 = vor.u32 %v3667_v61, %v3663_v50  ;;  %v3670_v8 = vshll.u32 %v15214_v60, 16  ;;  %v3674_v9 = vshrl.u32 %v15214_v60, 16  ;;  %2048 = vst.msk [vmem:[#allocation2 + $0x15c] sm:$0xf] %vm393_vm0, %v1201_v4 }
  0xd2   : > { %v336_v10 = vld [vmem:[%s16134_s11 + $0x11c] sm:$0xf]  ;;  %465 = vst [vmem:[#allocation2 + $0x168] sm:$0x1] %v464_v6  ;;  %v1213_v11 = vshrl.u32 %v333_v49, 16  ;;  %v1209_v12 = vor.u32 %v1207_v62, %v1206_v5  ;;  %v1211_v13 = vrot.slane %v1206_v5, 4 }
  0xd3   : > { %v1216_v14 = vshll.u32 %v333_v49, 16  ;;  %v1221_v15 = vshrl.u32 %v334_v59, 16  ;;  %v3672_v16 = vrot.slane %v3670_v8, 1  ;;  %v1224_v18 = vshll.u32 %v334_v59, 16  ;;  %v567_v28 = vld [vmem:[#allocation2 + $0x178] sm:$0x1] }
  0xd4   : > { %v1215_v17 = vrot.slane %v1213_v11, 7  ;;  %v1230_v19 = vshrl.u32 %v335_v39, 16  ;;  %v1210_v20 = vsel %vm16156_vm8, %v1202_v57, %v1209_v12  ;;  %v1233_v22 = vshll.u32 %v335_v39, 16  ;;  %v466_v33 = vld [vmem:[#allocation2 + $0x17c] sm:$0x1] }
  0xd5   : > { %v1223_v21 = vrot.slane %v1221_v15, 7  ;;  %v1239_v23 = vshrl.u32 %v336_v10, 16  ;;  %v3673_v24 = vsel %vm3341_vm9, %v3668_v7, %v3672_v16  ;;  %2049 = vst.msk [vmem:[#allocation2 + $0x160] sm:$0xf] %vm393_vm0, %v1210_v20  ;;  %v3676_v34 = vor.u32 %v3674_v9, %v3672_v16  ;;  %v337_v41 = vld [vmem:[%s16134_s11 + $0x120] sm:$0xf] }
  0xd6   : > { %v15215_v25 = vld [vmem:[#allocation2 + $0x150] ss:$0 sps:$4 sm:$0x11]   ;;  %v1218_v26 = vor.u32 %v1216_v14, %v1215_v17  ;;  %v1219_v27 = vrot.slane %v1215_v17, 4  ;;  %4046 = vrot.lane.b32.xlu0 %v3673_v24, %s16004_s12  ;;  %v1232_v31 = vrot.slane %v1230_v19, 7  ;;  %v1242_v50 = vshll.u32 %v336_v10, 16 }
  0xd7   : > { %v1226_v29 = vor.u32 %v1224_v18, %v1223_v21  ;;  %v1228_v30 = vrot.slane %v1223_v21, 4  ;;  %v16577_v32 = vrot.slane %v1239_v23, 7  ;;  %v3678_v35 = vshll.u32 %v15215_v25, 16  ;;  %v15216_v36 = vld [vmem:[#allocation2 + $0x154] sm:$0xff]   ;;  %v2050_v38 = vld [vmem:[#allocation2 + $0x164] sm:$0x1] }
  0xd8   : > { %v2051_v42 = vsel %vm16102_vm3, %v1211_v13, %v2050_v38  ;;  %v1235_v44 = vor.u32 %v1233_v22, %v1232_v31  ;;  %v1237_v45 = vrot.slane %v1232_v31, 4  ;;  %v3683_v48 = vshrl.u32 %v15216_v36, 16  ;;  %v338_v51 = vld [vmem:[%s16134_s11 + $0x124] sm:$0xf]  ;;  %v339_v56 = vld [vmem:[%s16134_s11 + $0x128] sm:$0xf] }
  0xd9   : > { %v1227_v43 = vsel %vm16156_vm8, %v1219_v27, %v1226_v29  ;;  %v2053_v46 = vld [vmem:[#allocation2 + $0x168] sm:$0xf]  ;;  %v3680_v47 = vrot.slane %v3678_v35, 1  ;;  %v3685_v49 = vshll.u32 %v15216_v36, 16  ;;  %2052 = vst [vmem:[#allocation2 + $0x164] sm:$0x1] %v2051_v42  ;;  %v1244_v59 = vor.u32 %v1242_v50, %v16577_v32 }
  0xda   : > { %2056 = vst.msk [vmem:[#allocation2 + $0x16c] sm:$0xf] %vm393_vm0, %v1227_v43  ;;  %v1236_v52 = vsel %vm16156_vm8, %v1228_v30, %v1235_v44  ;;  %v2054_v53 = vsel %vm16146_vm7, %v1218_v26, %v2053_v46  ;;  %v568_v54 = vsel %vm16116_vm5, 0, %v567_v28  ;;  %v1246_v55 = vrot.slane %v16577_v32, 4  ;;  %v340_v60 = vld [vmem:[%s16134_s11 + $0x12c] sm:$0xf] }
  0xdb   : > { %v3681_v57 = vsel %vm3341_vm9, %v3676_v34, %v3680_v47  ;;  %v3687_v58 = vrot.slane %v3685_v49, 1  ;;  %2055 = vst [vmem:[#allocation2 + $0x168] sm:$0xf] %v2054_v53  ;;  %2057 = vst.msk [vmem:[#allocation2 + $0x170] sm:$0xf] %vm393_vm0, %v1236_v52  ;;  %v467_v61 = vsel %vm16102_vm3, 0, %v466_v33  ;;  %v1245_v5 = vsel %vm16156_vm8, %v1237_v45, %v1244_v59 }
  0xdc   : > { %569 = vst [vmem:[#allocation2 + $0x178] sm:$0x1] %v568_v54  ;;  %4048 = vrot.lane.b32.xlu1 %v3681_v57, %s16004_s12  ;;  %v15217_v62 = vld [vmem:[#allocation2 + $0x15c] sm:$0xff]   ;;  %468 = vst [vmem:[#allocation2 + $0x17c] sm:$0x1] %v467_v61  ;;  %v1248_v63 = vshrl.u32 %v337_v41, 16 }
  0xdd   : > { %v1251_v0 = vshll.u32 %v337_v41, 16  ;;  %v1256_v3 = vshrl.u32 %v338_v51, 16  ;;  %v3688_v4 = vor.u32 %v3687_v58, %v3683_v48  ;;  %v1259_v39 = vshll.u32 %v338_v51, 16  ;;  %2058 = vst.msk [vmem:[#allocation2 + $0x174] sm:$0xf] %vm393_vm0, %v1245_v5  ;;  %v15454_v37 = vld [vmem:[#allocation2 + $0x15c] sm:$0xff]  }
  0xde   : > { %v1265_v6 = vshrl.u32 %v339_v56, 16  ;;  %v3690_v7 = vshll.u32 %v15217_v62, 16  ;;  %v3694_v8 = vshrl.u32 %v15217_v62, 16  ;;  %v1250_v9 = vrot.slane %v1248_v63, 7  ;;  %v570_v15 = vld [vmem:[#allocation2 + $0x18c] sm:$0x1] }
  0xdf   : > { %v1258_v10 = vrot.slane %v1256_v3, 7  ;;  %v1268_v12 = vshll.u32 %v339_v56, 16  ;;  %v1274_v13 = vshrl.u32 %v340_v60, 16  ;;  %v1277_v14 = vshll.u32 %v340_v60, 16  ;;  %v469_v20 = vld [vmem:[#allocation2 + $0x190] sm:$0x1] }
  0xe0   : > { %v1267_v11 = vrot.slane %v1265_v6, 7  ;;  %v3692_v16 = vrot.slane %v3690_v7, 1  ;;  %v15218_v17 = vld [vmem:[#allocation2 + $0x164] ss:$0 sps:$4 sm:$0x11]   ;;  %v1253_v18 = vor.u32 %v1251_v0, %v1250_v9  ;;  %v1254_v21 = vrot.slane %v1250_v9, 4 }
  0xe1   : > { %v1261_v19 = vor.u32 %v1259_v39, %v1258_v10  ;;  %v1263_v22 = vrot.slane %v1258_v10, 4  ;;  %v341_v25 = vld [vmem:[%s16134_s11 + $0x130] sm:$0xf]  ;;  %v3698_v28 = vshll.u32 %v15218_v17, 16  ;;  %v342_v30 = vld [vmem:[%s16134_s11 + $0x134] sm:$0xf] }
  0xe2   : > { %v1270_v23 = vor.u32 %v1268_v12, %v1267_v11  ;;  %v1272_v24 = vrot.slane %v1267_v11, 4  ;;  %v3693_v26 = vsel %vm3341_vm9, %v3688_v4, %v3692_v16  ;;  %v3696_v27 = vor.u32 %v3694_v8, %v3692_v16  ;;  %v15219_v29 = vld [vmem:[#allocation2 + $0x168] sm:$0xff]   ;;  %v343_v44 = vld [vmem:[%s16134_s11 + $0x138] sm:$0xf]  ;;  %v344_v52 = vld [vmem:[%s16134_s11 + $0x13c] sm:$0xf] }
  0xe3   : > { %4050 = vrot.lane.b32.xlu0 %v3693_v26, %s16004_s12  ;;  %v2059_v31 = vld [vmem:[#allocation2 + $0x178] sm:$0x1]  ;;  %v1262_v32 = vsel %vm16156_vm8, %v1254_v21, %v1261_v19  ;;  %v1276_v34 = vrot.slane %v1274_v13, 7  ;;  %v2062_v35 = vld [vmem:[#allocation2 + $0x17c] sm:$0xf]  ;;  %v571_v36 = vsel %vm16116_vm5, 0, %v570_v15 }
  0xe4   : > { %v1271_v33 = vsel %vm16156_vm8, %v1263_v22, %v1270_v23  ;;  %v3700_v38 = vrot.slane %v3698_v28, 1  ;;  %v3703_v41 = vshrl.u32 %v15219_v29, 16  ;;  %v3705_v42 = vshll.u32 %v15219_v29, 16  ;;  %2065 = vst.msk [vmem:[#allocation2 + $0x180] sm:$0xf] %vm393_vm0, %v1262_v32  ;;  %v15220_v45 = vld [vmem:[#allocation2 + $0x170] sm:$0xff]  }
  0xe5   : > { %v2060_v43 = vsel %vm16102_vm3, %v1246_v55, %v2059_v31  ;;  %2066 = vst.msk [vmem:[#allocation2 + $0x184] sm:$0xf] %vm393_vm0, %v1271_v33  ;;  %572 = vst [vmem:[#allocation2 + $0x18c] sm:$0x1] %v571_v36  ;;  %v1279_v46 = vor.u32 %v1277_v14, %v1276_v34  ;;  %v2063_v47 = vsel %vm16146_vm7, %v1253_v18, %v2062_v35  ;;  %v1281_v48 = vrot.slane %v1276_v34, 4  ;;  %v15455_v40 = vld [vmem:[#allocation2 + $0x168] sm:$0xff]  }
  0xe6   : > { %2061 = vst [vmem:[#allocation2 + $0x178] sm:$0x1] %v2060_v43  ;;  %v470_v49 = vsel %vm16102_vm3, 0, %v469_v20  ;;  %v3701_v50 = vsel %vm3341_vm9, %v3696_v27, %v3700_v38  ;;  %v3707_v51 = vrot.slane %v3705_v42, 1  ;;  %2064 = vst [vmem:[#allocation2 + $0x17c] sm:$0xf] %v2063_v47 }
  0xe7   : > { %471 = vst [vmem:[#allocation2 + $0x190] sm:$0x1] %v470_v49  ;;  %v1283_v53 = vshrl.u32 %v341_v25, 16  ;;  %v1286_v54 = vshll.u32 %v341_v25, 16  ;;  %4052 = vrot.lane.b32.xlu1 %v3701_v50, %s16004_s12  ;;  %v3710_v55 = vshll.u32 %v15220_v45, 16  ;;  %v3714_v56 = vshrl.u32 %v15220_v45, 16 }
  0xe8   : > { %v1280_v57 = vsel %vm16156_vm8, %v1272_v24, %v1279_v46  ;;  %v1291_v58 = vshrl.u32 %v342_v30, 16  ;;  %v3708_v59 = vor.u32 %v3707_v51, %v3703_v41  ;;  %v1294_v61 = vshll.u32 %v342_v30, 16  ;;  %v573_v63 = vld [vmem:[#allocation2 + $0x1a0] sm:$0x1]  ;;  %v472_v9 = vld [vmem:[#allocation2 + $0x1a4] sm:$0x1]  ;;  %v16650_v46 = vpop.permute.xlu0 %3984 }
  0xe9   : > { %2067 = vst.msk [vmem:[#allocation2 + $0x188] sm:$0xf] %vm393_vm0, %v1280_v57  ;;  %v1285_v60 = vrot.slane %v1283_v53, 7  ;;  %v1300_v62 = vshrl.u32 %v343_v44, 16  ;;  %v3712_v0 = vrot.slane %v3710_v55, 1  ;;  %v1303_v4 = vshll.u32 %v343_v44, 16 }
  0xea   : > { %v1293_v3 = vrot.slane %v1291_v58, 7  ;;  %v1309_v5 = vshrl.u32 %v344_v52, 16  ;;  %v345_v39 = vld [vmem:[%s16134_s11 + $0x140] sm:$0xf]  ;;  %v1312_v8 = vshll.u32 %v344_v52, 16  ;;  %v574_v23 = vsel %vm16116_vm5, 0, %v573_v63  ;;  %v16655_v52 = vpop.permute.xlu1 %3986 }
  0xeb   : > { %v1289_v6 = vrot.slane %v1285_v60, 4  ;;  %v1302_v7 = vrot.slane %v1300_v62, 7  ;;  %v3713_v10 = vsel %vm3341_vm9, %v3708_v59, %v3712_v0  ;;  %v1288_v12 = vor.u32 %v1286_v54, %v1285_v60  ;;  %v346_v24 = vld [vmem:[%s16134_s11 + $0x144] sm:$0xf]  ;;  %575 = vst [vmem:[#allocation2 + $0x1a0] sm:$0x1] %v574_v23 }
  0xec   : > { %v2068_v11 = vld [vmem:[#allocation2 + $0x18c] sm:$0x1]  ;;  %v1296_v13 = vor.u32 %v1294_v61, %v1293_v3  ;;  %4054 = vrot.lane.b32.xlu0 %v3713_v10, %s16004_s12  ;;  %v3716_v15 = vor.u32 %v3714_v56, %v3712_v0  ;;  %v1298_v17 = vrot.slane %v1293_v3, 4  ;;  %v1311_v22 = vrot.slane %v1309_v5, 7  ;;  %v347_v36 = vld [vmem:[%s16134_s11 + $0x148] sm:$0xf] }
  0xed   : > { %v15221_v14 = vld [vmem:[#allocation2 + $0x178] ss:$0 sps:$4 sm:$0x11]   ;;  %v2069_v16 = vsel %vm16102_vm3, %v1281_v48, %v2068_v11  ;;  %v1305_v18 = vor.u32 %v1303_v4, %v1302_v7  ;;  %v15222_v19 = vld [vmem:[#allocation2 + $0x17c] sm:$0xff]   ;;  %v1307_v21 = vrot.slane %v1302_v7, 4  ;;  %v473_v28 = vsel %vm16102_vm3, 0, %v472_v9 }
  0xee   : > { %2070 = vst [vmem:[#allocation2 + $0x18c] sm:$0x1] %v2069_v16  ;;  %v1297_v20 = vsel %vm16156_vm8, %v1289_v6, %v1296_v13  ;;  %v3718_v25 = vshll.u32 %v15221_v14, 16  ;;  %v2071_v27 = vld [vmem:[#allocation2 + $0x190] sm:$0xf]  ;;  %v1318_v29 = vshrl.u32 %v345_v39, 16  ;;  %v1314_v33 = vor.u32 %v1312_v8, %v1311_v22 }
  0xef   : > { %v1306_v26 = vsel %vm16156_vm8, %v1298_v17, %v1305_v18  ;;  %2074 = vst.msk [vmem:[#allocation2 + $0x194] sm:$0xf] %vm393_vm0, %v1297_v20  ;;  %v3723_v31 = vshrl.u32 %v15222_v19, 16  ;;  %v3725_v32 = vshll.u32 %v15222_v19, 16  ;;  %v2072_v34 = vsel %vm16146_vm7, %v1288_v12, %v2071_v27  ;;  %474 = vst [vmem:[#allocation2 + $0x1a4] sm:$0x1] %v473_v28 }
  0xf0   : > { %v15223_v30 = vld [vmem:[#allocation2 + $0x184] sm:$0xff]   ;;  %2075 = vst.msk [vmem:[#allocation2 + $0x198] sm:$0xf] %vm393_vm0, %v1306_v26  ;;  %v3720_v35 = vrot.slane %v3718_v25, 1  ;;  %2073 = vst [vmem:[#allocation2 + $0x190] sm:$0xf] %v2072_v34  ;;  %v1315_v45 = vsel %vm16156_vm8, %v1307_v21, %v1314_v33  ;;  %v16674_v21 = vpop.permute.xlu1 %3988 }
  0xf1   : > { %v1320_v38 = vrot.slane %v1318_v29, 7  ;;  %v1321_v41 = vshll.u32 %v345_v39, 16  ;;  %v3727_v42 = vrot.slane %v3725_v32, 1  ;;  %v3730_v43 = vshll.u32 %v15223_v30, 16  ;;  %2076 = vst.msk [vmem:[#allocation2 + $0x19c] sm:$0xf] %vm393_vm0, %v1315_v45 }
  0xf2   : > { %v3734_v44 = vshrl.u32 %v15223_v30, 16  ;;  %v3721_v47 = vsel %vm3341_vm9, %v3716_v15, %v3720_v35  ;;  %v1316_v48 = vrot.slane %v1311_v22, 4  ;;  %v348_v49 = vld [vmem:[%s16134_s11 + $0x14c] sm:$0xf]  ;;  %v1326_v51 = vshrl.u32 %v346_v24, 16  ;;  %v16665_v15 = vpop.permute.xlu0 %3982 }
  0xf3   : > { %v1324_v50 = vrot.slane %v1320_v38, 4  ;;  %4056 = vrot.lane.b32.xlu1 %v3721_v47, %s16004_s12  ;;  %v3728_v53 = vor.u32 %v3727_v42, %v3723_v31  ;;  %v3732_v54 = vrot.slane %v3730_v43, 1  ;;  %v1329_v55 = vshll.u32 %v346_v24, 16  ;;  %v576_v57 = vld [vmem:[#allocation2 + $0x1b4] sm:$0x1] }
  0xf4   : > { %v1335_v56 = vshrl.u32 %v347_v36, 16  ;;  %v1323_v59 = vor.u32 %v1321_v41, %v1320_v38  ;;  %v1328_v60 = vrot.slane %v1326_v51, 7  ;;  %v2077_v63 = vld [vmem:[#allocation2 + $0x1a0] sm:$0x1]  ;;  %v1338_v3 = vshll.u32 %v347_v36, 16 }
  0xf5   : > { %v15224_v58 = vld [vmem:[#allocation2 + $0x18c] ss:$0 sps:$4 sm:$0x11]   ;;  %v3733_v61 = vsel %vm3341_vm9, %v3728_v53, %v3732_v54  ;;  %v3736_v62 = vor.u32 %v3734_v44, %v3732_v54  ;;  %v16660_v4 = vld [vmem:[%s16134_s11 + $0x150] sm:$0xf]  ;;  %v2078_v6 = vsel %vm16102_vm3, %v1316_v48, %v2077_v63  ;;  %v1344_v13 = vshrl.u32 %v348_v49, 16 }
  0xf6   : > { %v1337_v0 = vrot.slane %v1335_v56, 7  ;;  %v475_v5 = vld [vmem:[#allocation2 + $0x1b8] sm:$0x1]  ;;  %4058 = vrot.lane.b32.xlu0 %v3733_v61, %s16004_s12  ;;  %v3738_v39 = vshll.u32 %v15224_v58, 16  ;;  %v1331_v7 = vor.u32 %v1329_v55, %v1328_v60  ;;  %v1333_v8 = vrot.slane %v1328_v60, 4  ;;  %v16689_v47 = vpop.permute.xlu0 %3990 }
  0xf7   : > { %v2080_v9 = vld [vmem:[#allocation2 + $0x1a4] sm:$0xf]  ;;  %v15225_v10 = vld [vmem:[#allocation2 + $0x190] sm:$0xff]   ;;  %2079 = vst [vmem:[#allocation2 + $0x1a0] sm:$0x1] %v2078_v6  ;;  %v1347_v14 = vshll.u32 %v348_v49, 16 }
  0xf8   : > { %v1340_v11 = vor.u32 %v1338_v3, %v1337_v0  ;;  %v1342_v12 = vrot.slane %v1337_v0, 4  ;;  %v3740_v16 = vrot.slane %v3738_v39, 1  ;;  %v1332_v17 = vsel %vm16156_vm8, %v1324_v50, %v1331_v7  ;;  %v350_v20 = vld [vmem:[%s16134_s11 + $0x154] sm:$0xf]  ;;  %v15226_v22 = vld [vmem:[#allocation2 + $0x198] sm:$0xff]   ;;  %v16692_v50 = vpop.permute.xlu1 %3992 }
  0xf9   : > { %v2081_v18 = vsel %vm16146_vm7, %v1323_v59, %v2080_v9  ;;  %v577_v19 = vsel %vm16116_vm5, 0, %v576_v57  ;;  %v3743_v23 = vshrl.u32 %v15225_v10, 16  ;;  %v3745_v24 = vshll.u32 %v15225_v10, 16  ;;  %2083 = vst.msk [vmem:[#allocation2 + $0x1a8] sm:$0xf] %vm393_vm0, %v1332_v17 }
  0xfa   : > { %v1341_v25 = vsel %vm16156_vm8, %v1333_v8, %v1340_v11  ;;  %v1346_v26 = vrot.slane %v1344_v13, 7  ;;  %2082 = vst [vmem:[#allocation2 + $0x1a4] sm:$0xf] %v2081_v18  ;;  %578 = vst [vmem:[#allocation2 + $0x1b4] sm:$0x1] %v577_v19  ;;  %v3741_v27 = vsel %vm3341_vm9, %v3736_v62, %v3740_v16  ;;  %v476_v29 = vsel %vm16102_vm3, 0, %v475_v5  ;;  %v16703_v16 = vpop.permute.xlu0 %3994 }
  0xfb   : > { %2084 = vst.msk [vmem:[#allocation2 + $0x1ac] sm:$0xf] %vm393_vm0, %v1341_v25  ;;  %v351_v28 = vld [vmem:[%s16134_s11 + $0x158] sm:$0xf]  ;;  %v1353_v30 = vshrl.u32 %v16660_v4, 16  ;;  %4060 = vrot.lane.b32.xlu1 %v3741_v27, %s16004_s12  ;;  %v3747_v31 = vrot.slane %v3745_v24, 1 }
  0xfc   : > { %v3750_v32 = vshll.u32 %v15226_v22, 16  ;;  %v1349_v33 = vor.u32 %v1347_v14, %v1346_v26  ;;  %477 = vst [vmem:[#allocation2 + $0x1b8] sm:$0x1] %v476_v29  ;;  %v1356_v34 = vshll.u32 %v16660_v4, 16  ;;  %v3754_v35 = vshrl.u32 %v15226_v22, 16 }
  0xfd   : > { %v1355_v36 = vrot.slane %v1353_v30, 7  ;;  %v1361_v38 = vshrl.u32 %v350_v20, 16  ;;  %v1364_v41 = vshll.u32 %v350_v20, 16  ;;  %v3748_v42 = vor.u32 %v3747_v31, %v3743_v23  ;;  %v352_v53 = vld [vmem:[%s16134_s11 + $0x15c] sm:$0xf]  ;;  %v16710_v23 = vpop.permute.xlu1 %3996 }
  0xfe   : > { %v3752_v43 = vrot.slane %v3750_v32, 1  ;;  %v1350_v44 = vsel %vm16156_vm8, %v1342_v12, %v1349_v33  ;;  %v1370_v45 = vshrl.u32 %v351_v28, 16  ;;  %v15227_v48 = vld [vmem:[#allocation2 + $0x1a0] ss:$0 sps:$4 sm:$0x11]   ;;  %v1351_v49 = vrot.slane %v1346_v26, 4 }
  0xff   : > { %2085 = vst.msk [vmem:[#allocation2 + $0x1b0] sm:$0xf] %vm393_vm0, %v1350_v44  ;;  %v1359_v54 = vrot.slane %v1355_v36, 4  ;;  %v1363_v55 = vrot.slane %v1361_v38, 7  ;;  %v3758_v58 = vshll.u32 %v15227_v48, 16  ;;  %v1358_v60 = vor.u32 %v1356_v34, %v1355_v36 }
 0x100   : > { %v3753_v51 = vsel %vm3341_vm9, %v3748_v42, %v3752_v43  ;;  %v1372_v56 = vrot.slane %v1370_v45, 7  ;;  %v3756_v57 = vor.u32 %v3754_v35, %v3752_v43  ;;  %v579_v61 = vld [vmem:[#allocation2 + $0x1c8] sm:$0x1]  ;;  %v478_v62 = vld [vmem:[#allocation2 + $0x1cc] sm:$0x1]  ;;  %v1373_v4 = vshll.u32 %v351_v28, 16 }
 0x101   : > { %4062 = vrot.lane.b32.xlu0 %v3753_v51, %s16004_s12  ;;  %v15228_v59 = vld [vmem:[#allocation2 + $0x1a4] sm:$0xff]   ;;  %v2086_v63 = vld [vmem:[#allocation2 + $0x1b4] sm:$0x1]  ;;  %v1366_v0 = vor.u32 %v1364_v41, %v1363_v55  ;;  %v1368_v3 = vrot.slane %v1363_v55, 4  ;;  %v3760_v5 = vrot.slane %v3758_v58, 1  ;;  %v1379_v12 = vshrl.u32 %v352_v53, 16 }
 0x102   : > { %v3763_v39 = vshrl.u32 %v15228_v59, 16  ;;  %v3765_v6 = vshll.u32 %v15228_v59, 16  ;;  %v2087_v7 = vsel %vm16102_vm3, %v1351_v49, %v2086_v63  ;;  %v1375_v10 = vor.u32 %v1373_v4, %v1372_v56  ;;  %v353_v13 = vld [vmem:[%s16134_s11 + $0x160] sm:$0xf]  ;;  %v354_v14 = vld [vmem:[%s16134_s11 + $0x164] sm:$0xf]  ;;  %v16726_v59 = vpop.permute.xlu1 %4000 }
 0x103   : > { %v2089_v8 = vld [vmem:[#allocation2 + $0x1b8] sm:$0xf]  ;;  %2088 = vst [vmem:[#allocation2 + $0x1b4] sm:$0x1] %v2087_v7  ;;  %v1367_v9 = vsel %vm16156_vm8, %v1359_v54, %v1366_v0  ;;  %v1377_v11 = vrot.slane %v1372_v56, 4  ;;  %v3761_v17 = vsel %vm3341_vm9, %v3756_v57, %v3760_v5  ;;  %v1382_v19 = vshll.u32 %v352_v53, 16  ;;  %v16723_v54 = vpop.permute.xlu0 %3998 }
 0x104   : > { %v3767_v18 = vrot.slane %v3765_v6, 1  ;;  %v2090_v20 = vsel %vm16146_vm7, %v1358_v60, %v2089_v8  ;;  %2092 = vst.msk [vmem:[#allocation2 + $0x1bc] sm:$0xf] %vm393_vm0, %v1367_v9  ;;  %v355_v22 = vld [vmem:[%s16134_s11 + $0x168] sm:$0xf]  ;;  %4064 = vrot.lane.b32.xlu1 %v3761_v17, %s16004_s12  ;;  %v1376_v25 = vsel %vm16156_vm8, %v1368_v3, %v1375_v10  ;;  %v1381_v26 = vrot.slane %v1379_v12, 7 }
 0x105   : > { %2091 = vst [vmem:[#allocation2 + $0x1b8] sm:$0xf] %v2090_v20  ;;  %v580_v27 = vsel %vm16116_vm5, 0, %v579_v61  ;;  %v479_v28 = vsel %vm16102_vm3, 0, %v478_v62  ;;  %2093 = vst.msk [vmem:[#allocation2 + $0x1c0] sm:$0xf] %vm393_vm0, %v1376_v25 }
 0x106   : > { %v15229_v24 = vld [vmem:[#allocation2 + $0x1ac] sm:$0xff]   ;;  %v3768_v29 = vor.u32 %v3767_v18, %v3763_v39  ;;  %581 = vst [vmem:[#allocation2 + $0x1c8] sm:$0x1] %v580_v27  ;;  %480 = vst [vmem:[#allocation2 + $0x1cc] sm:$0x1] %v479_v28  ;;  %v1388_v31 = vshrl.u32 %v353_v13, 16  ;;  %v1384_v36 = vor.u32 %v1382_v19, %v1381_v26 }
 0x107   : > { %v356_v30 = vld [vmem:[%s16134_s11 + $0x16c] sm:$0xf]  ;;  %v1391_v32 = vshll.u32 %v353_v13, 16  ;;  %v1396_v33 = vshrl.u32 %v354_v14, 16  ;;  %v3770_v34 = vshll.u32 %v15229_v24, 16  ;;  %v3774_v35 = vshrl.u32 %v15229_v24, 16  ;;  %v16745_v28 = vpop.permute.xlu0 %4002 }
 0x108   : > { %v1386_v38 = vrot.slane %v1381_v26, 4  ;;  %v1390_v41 = vrot.slane %v1388_v31, 7  ;;  %v1399_v43 = vshll.u32 %v354_v14, 16  ;;  %v1405_v44 = vshrl.u32 %v355_v22, 16  ;;  %v582_v53 = vld [vmem:[#allocation2 + $0x1dc] sm:$0x1] }
 0x109   : > { %v1398_v42 = vrot.slane %v1396_v33, 7  ;;  %v3772_v45 = vrot.slane %v3770_v34, 1  ;;  %v1385_v48 = vsel %vm16156_vm8, %v1377_v11, %v1384_v36  ;;  %v1408_v49 = vshll.u32 %v355_v22, 16  ;;  %19853 = vst [vmem:[#allocation7_spill] sm:$0xff] %v16723_v54  ;;  %19854 = vst [vmem:[#allocation8_spill] sm:$0xff] %v16726_v59  ;;  %v16751_v33 = vpop.permute.xlu1 %4004 }
 0x10a   : > { %v1414_v51 = vshrl.u32 %v356_v30, 16  ;;  %v15230_v55 = vld [vmem:[#allocation2 + $0x1b4] ss:$0 sps:$4 sm:$0x11]   ;;  %2094 = vst.msk [vmem:[#allocation2 + $0x1c4] sm:$0xf] %vm393_vm0, %v1385_v48  ;;  %v1393_v56 = vor.u32 %v1391_v32, %v1390_v41 }
 0x10b   : > { %v1394_v57 = vrot.slane %v1390_v41, 4  ;;  %v1401_v58 = vor.u32 %v1399_v43, %v1398_v42  ;;  %v3773_v60 = vsel %vm3341_vm9, %v3768_v29, %v3772_v45  ;;  %v3776_v61 = vor.u32 %v3774_v35, %v3772_v45  ;;  %v357_v0 = vld [vmem:[%s16134_s11 + $0x170] sm:$0xf]  ;;  %v481_v3 = vld [vmem:[#allocation2 + $0x1e0] sm:$0x1]  ;;  %19855 = vst [vmem:[#allocation9_spill] sm:$0xff] %v16745_v28 }
 0x10c   : > { %v1403_v62 = vrot.slane %v1398_v42, 4  ;;  %v1407_v63 = vrot.slane %v1405_v44, 7  ;;  %4066 = vrot.lane.b32.xlu0 %v3773_v60, %s16004_s12  ;;  %v3778_v4 = vshll.u32 %v15230_v55, 16  ;;  %v15231_v5 = vld [vmem:[#allocation2 + $0x1b8] sm:$0xff]   ;;  %v1416_v6 = vrot.slane %v1414_v51, 7  ;;  %19856 = vst [vmem:[#allocation10_spill] sm:$0xff] %v16751_v33 }
 0x10d   : > { %v1402_v39 = vsel %vm16156_vm8, %v1394_v57, %v1401_v58  ;;  %v1417_v7 = vshll.u32 %v356_v30, 16  ;;  %v358_v8 = vld [vmem:[%s16134_s11 + $0x174] sm:$0xf]  ;;  %v2095_v9 = vld [vmem:[#allocation2 + $0x1c8] sm:$0x1]  ;;  %v583_v12 = vsel %vm16116_vm5, 0, %v582_v53 }
 0x10e   : > { %v1410_v10 = vor.u32 %v1408_v49, %v1407_v63  ;;  %v1412_v11 = vrot.slane %v1407_v63, 4  ;;  %2101 = vst.msk [vmem:[#allocation2 + $0x1d0] sm:$0xf] %vm393_vm0, %v1402_v39  ;;  %v359_v13 = vld [vmem:[%s16134_s11 + $0x178] sm:$0xf]  ;;  %v3780_v14 = vrot.slane %v3778_v4, 1  ;;  %v2096_v19 = vsel %vm16102_vm3, %v1386_v38, %v2095_v9  ;;  %v16760_v39 = vpop.permute.xlu0 %4006 }
 0x10f   : > { %v3783_v17 = vshrl.u32 %v15231_v5, 16  ;;  %v3785_v18 = vshll.u32 %v15231_v5, 16  ;;  %v2098_v20 = vld [vmem:[#allocation2 + $0x1cc] sm:$0xf]  ;;  %584 = vst [vmem:[#allocation2 + $0x1dc] sm:$0x1] %v583_v12  ;;  %v1419_v24 = vor.u32 %v1417_v7, %v1416_v6 }
 0x110   : > { %2097 = vst [vmem:[#allocation2 + $0x1c8] sm:$0x1] %v2096_v19  ;;  %v1411_v22 = vsel %vm16156_vm8, %v1403_v62, %v1410_v10  ;;  %v2099_v25 = vsel %vm16146_vm7, %v1393_v56, %v2098_v20  ;;  %v1421_v26 = vrot.slane %v1416_v6, 4  ;;  %v360_v27 = vld [vmem:[%s16134_s11 + $0x17c] sm:$0xf]  ;;  %v3781_v29 = vsel %vm3341_vm9, %v3776_v61, %v3780_v14  ;;  %19857 = vst [vmem:[#allocation11_spill] sm:$0xff] %v16760_v39 }
 0x111   : > { %v3787_v30 = vrot.slane %v3785_v18, 1  ;;  %2100 = vst [vmem:[#allocation2 + $0x1cc] sm:$0xf] %v2099_v25  ;;  %2102 = vst.msk [vmem:[#allocation2 + $0x1d4] sm:$0xf] %vm393_vm0, %v1411_v22  ;;  %v482_v31 = vsel %vm16102_vm3, 0, %v481_v3  ;;  %4068 = vrot.lane.b32.xlu1 %v3781_v29, %s16004_s12  ;;  %v1420_v35 = vsel %vm16156_vm8, %v1412_v11, %v1419_v24  ;;  %v16765_v11 = vpop.permute.xlu1 %4008 }
 0x112   : > { %v1423_v32 = vshrl.u32 %v357_v0, 16  ;;  %v15232_v34 = vld [vmem:[#allocation2 + $0x1c0] sm:$0xff]   ;;  %483 = vst [vmem:[#allocation2 + $0x1e0] sm:$0x1] %v482_v31  ;;  %v1426_v36 = vshll.u32 %v357_v0, 16  ;;  %v1431_v38 = vshrl.u32 %v358_v8, 16 }
 0x113   : > { %v1434_v41 = vshll.u32 %v358_v8, 16  ;;  %v3788_v42 = vor.u32 %v3787_v30, %v3783_v17  ;;  %2103 = vst.msk [vmem:[#allocation2 + $0x1d8] sm:$0xf] %vm393_vm0, %v1420_v35  ;;  %v1440_v44 = vshrl.u32 %v359_v13, 16  ;;  %v1443_v45 = vshll.u32 %v359_v13, 16  ;;  %19858 = vst [vmem:[#allocation12_spill] sm:$0xff] %v16765_v11 }
 0x114   : > { %v1425_v43 = vrot.slane %v1423_v32, 7  ;;  %v3790_v48 = vshll.u32 %v15232_v34, 16  ;;  %v3794_v49 = vshrl.u32 %v15232_v34, 16  ;;  %v1433_v51 = vrot.slane %v1431_v38, 7  ;;  %v585_v55 = vld [vmem:[#allocation2 + $0x1f0] sm:$0x1] }
 0x115   : > { %v1449_v53 = vshrl.u32 %v360_v27, 16  ;;  %v1442_v58 = vrot.slane %v1440_v44, 7  ;;  %v1452_v60 = vshll.u32 %v360_v27, 16  ;;  %v361_v4 = vld [vmem:[%s16134_s11 + $0x180] sm:$0xf]  ;;  %v586_v25 = vsel %vm16116_vm5, 0, %v585_v55  ;;  %v16790_v55 = vpop.permute.xlu1 %4012 }
 0x116   : > { %v1428_v56 = vor.u32 %v1426_v36, %v1425_v43  ;;  %v1429_v57 = vrot.slane %v1425_v43, 4  ;;  %v3792_v61 = vrot.slane %v3790_v48, 1  ;;  %v2104_v62 = vld [vmem:[#allocation2 + $0x1dc] sm:$0x1]  ;;  %v1436_v63 = vor.u32 %v1434_v41, %v1433_v51  ;;  %v484_v5 = vld [vmem:[#allocation2 + $0x1f4] sm:$0x1] }
 0x117   : > { %v1438_v0 = vrot.slane %v1433_v51, 4  ;;  %v16757_v3 = vrot.slane %v1449_v53, 7  ;;  %v15233_v6 = vld [vmem:[#allocation2 + $0x1c8] ss:$0 sps:$4 sm:$0x11]   ;;  %v2105_v7 = vsel %vm16102_vm3, %v1421_v26, %v2104_v62  ;;  %v1445_v8 = vor.u32 %v1443_v45, %v1442_v58  ;;  %v16787_v45 = vpop.permute.xlu0 %4010  ;;  %19860 = vst [vmem:[#allocation14_spill] sm:$0xff] %v16790_v55 }
 0x118   : > { %v1447_v9 = vrot.slane %v1442_v58, 4  ;;  %v362_v10 = vld [vmem:[%s16134_s11 + $0x184] sm:$0xf]  ;;  %v3793_v12 = vsel %vm3341_vm9, %v3788_v42, %v3792_v61  ;;  %v3796_v13 = vor.u32 %v3794_v49, %v3792_v61  ;;  %v15234_v14 = vld [vmem:[#allocation2 + $0x1cc] sm:$0xff]   ;;  %2106 = vst [vmem:[#allocation2 + $0x1dc] sm:$0x1] %v2105_v7  ;;  %v1437_v17 = vsel %vm16156_vm8, %v1429_v57, %v1436_v63 }
 0x119   : > { %v1454_v18 = vor.u32 %v1452_v60, %v16757_v3  ;;  %v363_v19 = vld [vmem:[%s16134_s11 + $0x188] sm:$0xf]  ;;  %4070 = vrot.lane.b32.xlu0 %v3793_v12, %s16004_s12  ;;  %v3798_v20 = vshll.u32 %v15233_v6, 16  ;;  %v1446_v22 = vsel %vm16156_vm8, %v1438_v0, %v1445_v8  ;;  %v2107_v24 = vld [vmem:[#allocation2 + $0x1e0] sm:$0xf]  ;;  %v1456_v26 = vrot.slane %v16757_v3, 4 }
 0x11a   : > { %2110 = vst.msk [vmem:[#allocation2 + $0x1e4] sm:$0xf] %vm393_vm0, %v1437_v17  ;;  %v15235_v27 = vld [vmem:[#allocation2 + $0x1d4] sm:$0xff]   ;;  %v3803_v29 = vshrl.u32 %v15234_v14, 16  ;;  %v3805_v30 = vshll.u32 %v15234_v14, 16  ;;  %v2108_v32 = vsel %vm16146_vm7, %v1428_v56, %v2107_v24  ;;  %v485_v35 = vsel %vm16102_vm3, 0, %v484_v5 }
 0x11b   : > { %v1455_v31 = vsel %vm16156_vm8, %v1447_v9, %v1454_v18  ;;  %2111 = vst.msk [vmem:[#allocation2 + $0x1e8] sm:$0xf] %vm393_vm0, %v1446_v22  ;;  %587 = vst [vmem:[#allocation2 + $0x1f0] sm:$0x1] %v586_v25  ;;  %v3800_v34 = vrot.slane %v3798_v20, 1  ;;  %v1458_v36 = vshrl.u32 %v361_v4, 16 }
 0x11c   : > { %2109 = vst [vmem:[#allocation2 + $0x1e0] sm:$0xf] %v2108_v32  ;;  %2112 = vst.msk [vmem:[#allocation2 + $0x1ec] sm:$0xf] %vm393_vm0, %v1455_v31  ;;  %v1461_v38 = vshll.u32 %v361_v4, 16  ;;  %v3807_v41 = vrot.slane %v3805_v30, 1  ;;  %v16805_v31 = vpop.permute.xlu1 %4016 }
 0x11d   : > { %v3810_v42 = vshll.u32 %v15235_v27, 16  ;;  %v3814_v43 = vshrl.u32 %v15235_v27, 16  ;;  %486 = vst [vmem:[#allocation2 + $0x1f4] sm:$0x1] %v485_v35  ;;  %v1466_v44 = vshrl.u32 %v362_v10, 16  ;;  %19859 = vst [vmem:[#allocation13_spill] sm:$0xff] %v16787_v45  ;;  %v3801_v48 = vsel %vm3341_vm9, %v3796_v13, %v3800_v34 }
 0x11e   : > { %v1460_v49 = vrot.slane %v1458_v36, 7  ;;  %v1469_v51 = vshll.u32 %v362_v10, 16  ;;  %v1475_v53 = vshrl.u32 %v363_v19, 16  ;;  %4072 = vrot.lane.b32.xlu1 %v3801_v48, %s16004_s12  ;;  %v3808_v56 = vor.u32 %v3807_v41, %v3803_v29  ;;  %v364_v58 = vld [vmem:[%s16134_s11 + $0x18c] sm:$0xf]  ;;  %19862 = vst [vmem:[#allocation16_spill] sm:$0xff] %v16805_v31 }
 0x11f   : > { %v3812_v57 = vrot.slane %v3810_v42, 1  ;;  %v1468_v60 = vrot.slane %v1466_v44, 7  ;;  %v1478_v61 = vshll.u32 %v363_v19, 16  ;;  %v15236_v62 = vld [vmem:[#allocation2 + $0x1dc] ss:$0 sps:$4 sm:$0x11]   ;;  %v16801_v19 = vpop.permute.xlu0 %4014 }
 0x120   : > { %v1464_v63 = vrot.slane %v1460_v49, 4  ;;  %v1463_v3 = vor.u32 %v1461_v38, %v1460_v49  ;;  %v3818_v7 = vshll.u32 %v15236_v62, 16  ;;  %v1477_v9 = vrot.slane %v1475_v53, 7  ;;  %v588_v10 = vld [vmem:[#allocation2 + $0x204] sm:$0x1]  ;;  %19861 = vst [vmem:[#allocation15_spill] sm:$0xff] %v16801_v19 }
 0x121   : > { %v3813_v0 = vsel %vm3341_vm9, %v3808_v56, %v3812_v57  ;;  %v1471_v4 = vor.u32 %v1469_v51, %v1468_v60  ;;  %v1473_v5 = vrot.slane %v1468_v60, 4  ;;  %v3816_v6 = vor.u32 %v3814_v43, %v3812_v57  ;;  %v365_v18 = vld [vmem:[%s16134_s11 + $0x190] sm:$0xf]  ;;  %v366_v30 = vld [vmem:[%s16134_s11 + $0x194] sm:$0xf]  ;;  %v15317_v45 = vld [vmem:[#allocation2 + $0x104] sm:$0xff]  }
 0x122   : > { %4074 = vrot.lane.b32.xlu0 %v3813_v0, %s16004_s12  ;;  %v2113_v8 = vld [vmem:[#allocation2 + $0x1f0] sm:$0x1]  ;;  %v1484_v17 = vshrl.u32 %v364_v58, 16  ;;  %v3820_v20 = vrot.slane %v3818_v7, 1  ;;  %v1480_v24 = vor.u32 %v1478_v61, %v1477_v9  ;;  %v1482_v25 = vrot.slane %v1477_v9, 4  ;;  %v16829_v9 = vpop.permute.xlu1 %4020 }
 0x123   : > { %v15237_v12 = vld [vmem:[#allocation2 + $0x1e0] sm:$0xff]   ;;  %v2114_v13 = vsel %vm16102_vm3, %v1456_v26, %v2113_v8  ;;  %v1472_v14 = vsel %vm16156_vm8, %v1464_v63, %v1471_v4  ;;  %v15238_v22 = vld [vmem:[#allocation2 + $0x1e8] sm:$0xff]   ;;  %v1487_v27 = vshll.u32 %v364_v58, 16  ;;  %v367_v36 = vld [vmem:[%s16134_s11 + $0x198] sm:$0xf]  ;;  %v589_v51 = vsel %vm16116_vm5, 0, %v588_v10 }
 0x124   : > { %2115 = vst [vmem:[#allocation2 + $0x1f0] sm:$0x1] %v2114_v13  ;;  %v2116_v29 = vld [vmem:[#allocation2 + $0x1f4] sm:$0xf]  ;;  %2119 = vst.msk [vmem:[#allocation2 + $0x1f8] sm:$0xf] %vm393_vm0, %v1472_v14  ;;  %v3821_v41 = vsel %vm3341_vm9, %v3816_v6, %v3820_v20  ;;  %v1481_v43 = vsel %vm16156_vm8, %v1473_v5, %v1480_v24 }
 0x125   : > { %v3823_v26 = vshrl.u32 %v15237_v12, 16  ;;  %v3825_v32 = vshll.u32 %v15237_v12, 16  ;;  %v16807_v34 = vrot.slane %v1484_v17, 7  ;;  %v2117_v35 = vsel %vm16146_vm7, %v1463_v3, %v2116_v29  ;;  %v487_v38 = vld [vmem:[#allocation2 + $0x208] sm:$0x1]  ;;  %4076 = vrot.lane.b32.xlu1 %v3821_v41, %s16004_s12  ;;  %v16825_v3 = vpop.permute.xlu0 %4018  ;;  %19864 = vst [vmem:[#allocation18_spill] sm:$0xff] %v16829_v9 }
 0x126   : > { %v3830_v42 = vshll.u32 %v15238_v22, 16  ;;  %2118 = vst [vmem:[#allocation2 + $0x1f4] sm:$0xf] %v2117_v35  ;;  %v3834_v48 = vshrl.u32 %v15238_v22, 16  ;;  %2120 = vst.msk [vmem:[#allocation2 + $0x1fc] sm:$0xf] %vm393_vm0, %v1481_v43 }
 0x127   : > { %v3827_v44 = vrot.slane %v3825_v32, 1  ;;  %v1489_v49 = vor.u32 %v1487_v27, %v16807_v34  ;;  %590 = vst [vmem:[#allocation2 + $0x204] sm:$0x1] %v589_v51  ;;  %v488_v56 = vsel %vm16102_vm3, 0, %v487_v38  ;;  %v1493_v57 = vshrl.u32 %v365_v18, 16  ;;  %19863 = vst [vmem:[#allocation17_spill] sm:$0xff] %v16825_v3 }
 0x128   : > { %v3832_v53 = vrot.slane %v3830_v42, 1  ;;  %v1496_v58 = vshll.u32 %v365_v18, 16  ;;  %v368_v62 = vld [vmem:[%s16134_s11 + $0x19c] sm:$0xf]  ;;  %489 = vst [vmem:[#allocation2 + $0x208] sm:$0x1] %v488_v56 }
 0x129   : > { %v3828_v60 = vor.u32 %v3827_v44, %v3823_v26  ;;  %v1490_v61 = vsel %vm16156_vm8, %v1482_v25, %v1489_v49  ;;  %v1501_v63 = vshrl.u32 %v366_v30, 16  ;;  %v1504_v0 = vshll.u32 %v366_v30, 16  ;;  %v591_v8 = vld [vmem:[#allocation2 + $0x218] sm:$0x1]  ;;  %v490_v24 = vld [vmem:[#allocation2 + $0x21c] sm:$0x1]  ;;  %v16839_v51 = vpop.permute.xlu0 %4022 }
 0x12a   : > { %2121 = vst.msk [vmem:[#allocation2 + $0x200] sm:$0xf] %vm393_vm0, %v1490_v61  ;;  %v1491_v4 = vrot.slane %v16807_v34, 4  ;;  %v1495_v5 = vrot.slane %v1493_v57, 7  ;;  %v1510_v6 = vshrl.u32 %v367_v36, 16  ;;  %v1513_v7 = vshll.u32 %v367_v36, 16 }
 0x12b   : > { %v3833_v10 = vsel %vm3341_vm9, %v3828_v60, %v3832_v53  ;;  %v15239_v12 = vld [vmem:[#allocation2 + $0x1f0] ss:$0 sps:$4 sm:$0x11]   ;;  %v3836_v13 = vor.u32 %v3834_v48, %v3832_v53  ;;  %v1503_v14 = vrot.slane %v1501_v63, 7  ;;  %v1519_v22 = vshrl.u32 %v368_v62, 16  ;;  %19865 = vst [vmem:[#allocation19_spill] sm:$0xff] %v16839_v51 }
 0x12c   : > { %4078 = vrot.lane.b32.xlu0 %v3833_v10, %s16004_s12  ;;  %v1498_v17 = vor.u32 %v1496_v58, %v1495_v5  ;;  %v1499_v18 = vrot.slane %v1495_v5, 4  ;;  %v1512_v20 = vrot.slane %v1510_v6, 7  ;;  %v3838_v25 = vshll.u32 %v15239_v12, 16  ;;  %v369_v32 = vld [vmem:[%s16134_s11 + $0x1a0] sm:$0xf] }
 0x12d   : > { %v15240_v27 = vld [vmem:[#allocation2 + $0x1f4] sm:$0xff]   ;;  %v1506_v29 = vor.u32 %v1504_v0, %v1503_v14  ;;  %v1508_v30 = vrot.slane %v1503_v14, 4  ;;  %v1522_v26 = vshll.u32 %v368_v62, 16  ;;  %v370_v34 = vld [vmem:[%s16134_s11 + $0x1a4] sm:$0xf]  ;;  %v1521_v38 = vrot.slane %v1519_v22, 7  ;;  %v16848_v62 = vpop.permute.xlu1 %4024 }
 0x12e   : > { %v1515_v35 = vor.u32 %v1513_v7, %v1512_v20  ;;  %v1517_v36 = vrot.slane %v1512_v20, 4  ;;  %v592_v41 = vsel %vm16116_vm5, 0, %v591_v8  ;;  %v3840_v42 = vrot.slane %v3838_v25, 1  ;;  %v2122_v48 = vld [vmem:[#allocation2 + $0x204] sm:$0x1]  ;;  %19866 = vst [vmem:[#allocation20_spill] sm:$0xff] %v16848_v62 }
 0x12f   : > { %v3843_v43 = vshrl.u32 %v15240_v27, 16  ;;  %v3845_v44 = vshll.u32 %v15240_v27, 16  ;;  %v1507_v49 = vsel %vm16156_vm8, %v1499_v18, %v1506_v29  ;;  %593 = vst [vmem:[#allocation2 + $0x218] sm:$0x1] %v592_v41  ;;  %v2123_v53 = vsel %vm16102_vm3, %v1491_v4, %v2122_v48  ;;  %v2125_v58 = vld [vmem:[#allocation2 + $0x208] sm:$0xf] }
 0x130   : > { %v1516_v56 = vsel %vm16156_vm8, %v1508_v30, %v1515_v35  ;;  %v1524_v57 = vor.u32 %v1522_v26, %v1521_v38  ;;  %2128 = vst.msk [vmem:[#allocation2 + $0x20c] sm:$0xf] %vm393_vm0, %v1507_v49  ;;  %v371_v60 = vld [vmem:[%s16134_s11 + $0x1a8] sm:$0xf]  ;;  %v372_v61 = vld [vmem:[%s16134_s11 + $0x1ac] sm:$0xf]  ;;  %v3841_v63 = vsel %vm3341_vm9, %v3836_v13, %v3840_v42  ;;  %v2126_v6 = vsel %vm16146_vm7, %v1498_v17, %v2125_v58 }
 0x131   : > { %v15241_v0 = vld [vmem:[#allocation2 + $0x1fc] sm:$0xff]   ;;  %v3847_v5 = vrot.slane %v3845_v44, 1  ;;  %2124 = vst [vmem:[#allocation2 + $0x204] sm:$0x1] %v2123_v53  ;;  %2129 = vst.msk [vmem:[#allocation2 + $0x210] sm:$0xf] %vm393_vm0, %v1516_v56  ;;  %4080 = vrot.lane.b32.xlu1 %v3841_v63, %s16004_s12 }
 0x132   : > { %v491_v4 = vsel %vm16102_vm3, 0, %v490_v24  ;;  %v1525_v7 = vsel %vm16156_vm8, %v1517_v36, %v1524_v57  ;;  %2127 = vst [vmem:[#allocation2 + $0x208] sm:$0xf] %v2126_v6  ;;  %v1528_v8 = vshrl.u32 %v369_v32, 16  ;;  %v1531_v10 = vshll.u32 %v369_v32, 16  ;;  %v16862_v36 = vpop.permute.xlu0 %4026 }
 0x133   : > { %492 = vst [vmem:[#allocation2 + $0x21c] sm:$0x1] %v491_v4  ;;  %v1536_v12 = vshrl.u32 %v370_v34, 16  ;;  %v594_v13 = vld [vmem:[#allocation2 + $0x22c] sm:$0x1]  ;;  %v3848_v14 = vor.u32 %v3847_v5, %v3843_v43  ;;  %v3850_v18 = vshll.u32 %v15241_v0, 16 }
 0x134   : > { %2130 = vst.msk [vmem:[#allocation2 + $0x214] sm:$0xf] %vm393_vm0, %v1525_v7  ;;  %v1526_v17 = vrot.slane %v1521_v38, 4  ;;  %v1539_v20 = vshll.u32 %v370_v34, 16  ;;  %v3854_v22 = vshrl.u32 %v15241_v0, 16  ;;  %v1530_v25 = vrot.slane %v1528_v8, 7  ;;  %v16864_v34 = vpop.permute.xlu1 %4028 }
 0x135   : > { %v1538_v24 = vrot.slane %v1536_v12, 7  ;;  %v1545_v27 = vshrl.u32 %v371_v60, 16  ;;  %v3852_v29 = vrot.slane %v3850_v18, 1  ;;  %v1548_v30 = vshll.u32 %v371_v60, 16  ;;  %19867 = vst [vmem:[#allocation21_spill] sm:$0xff] %v16862_v36  ;;  %19868 = vst [vmem:[#allocation22_spill] sm:$0xff] %v16864_v34 }
 0x136   : > { %v1554_v26 = vshrl.u32 %v372_v61, 16  ;;  %v595_v35 = vsel %vm16116_vm5, 0, %v594_v13  ;;  %v2131_v32 = vld [vmem:[#allocation2 + $0x218] sm:$0x1]  ;;  %v1533_v41 = vor.u32 %v1531_v10, %v1530_v25  ;;  %v1534_v42 = vrot.slane %v1530_v25, 4  ;;  %v16968_v34 = vld [vmem:[#allocation2 + $0xf0] sm:$0xff]  }
 0x137   : > { %v1541_v43 = vor.u32 %v1539_v20, %v1538_v24  ;;  %v1557_v44 = vshll.u32 %v372_v61, 16  ;;  %596 = vst [vmem:[#allocation2 + $0x22c] sm:$0x1] %v595_v35  ;;  %v3853_v38 = vsel %vm3341_vm9, %v3848_v14, %v3852_v29  ;;  %v2132_v48 = vsel %vm16102_vm3, %v1526_v17, %v2131_v32  ;;  %v373_v60 = vld [vmem:[%s16134_s11 + $0x1b0] sm:$0xf]  ;;  %v16879_v20 = vpop.permute.xlu0 %4030  ;;  %v16970_v36 = vld [vmem:[#allocation2 + $0xf8] sm:$0xff]  }
 0x138   : > { %v1543_v49 = vrot.slane %v1538_v24, 4  ;;  %v1547_v53 = vrot.slane %v1545_v27, 7  ;;  %4082 = vrot.lane.b32.xlu0 %v3853_v38, %s16004_s12  ;;  %v15242_v56 = vld [vmem:[#allocation2 + $0x204] ss:$0 sps:$4 sm:$0x11]   ;;  %v1556_v58 = vrot.slane %v1554_v26, 7  ;;  %v3856_v6 = vor.u32 %v3854_v22, %v3852_v29 }
 0x139   : > { %2133 = vst [vmem:[#allocation2 + $0x218] sm:$0x1] %v2132_v48  ;;  %v1542_v57 = vsel %vm16156_vm8, %v1534_v42, %v1541_v43  ;;  %v493_v61 = vld [vmem:[#allocation2 + $0x230] sm:$0x1]  ;;  %v15243_v63 = vld [vmem:[#allocation2 + $0x208] sm:$0xff]   ;;  %v3858_v4 = vshll.u32 %v15242_v56, 16 }
 0x13a   : > { %v1550_v0 = vor.u32 %v1548_v30, %v1547_v53  ;;  %v1552_v5 = vrot.slane %v1547_v53, 4  ;;  %2137 = vst.msk [vmem:[#allocation2 + $0x220] sm:$0xf] %vm393_vm0, %v1542_v57  ;;  %v1559_v8 = vor.u32 %v1557_v44, %v1556_v58  ;;  %v2134_v10 = vld [vmem:[#allocation2 + $0x21c] sm:$0xf]  ;;  %v3863_v12 = vshrl.u32 %v15243_v63, 16  ;;  %v16885_v30 = vpop.permute.xlu1 %4032 }
 0x13b   : > { %v15244_v7 = vld [vmem:[#allocation2 + $0x210] sm:$0xff]   ;;  %v3865_v13 = vshll.u32 %v15243_v63, 16  ;;  %v2135_v18 = vsel %vm16146_vm7, %v1533_v41, %v2134_v10  ;;  %19869 = vst [vmem:[#allocation23_spill] sm:$0xff] %v16879_v20  ;;  %v3860_v25 = vrot.slane %v3858_v4, 1  ;;  %v375_v29 = vld [vmem:[%s16134_s11 + $0x1b8] sm:$0xf] }
 0x13c   : > { %v1551_v14 = vsel %vm16156_vm8, %v1543_v49, %v1550_v0  ;;  %v374_v17 = vld [vmem:[%s16134_s11 + $0x1b4] sm:$0xf]  ;;  %v3870_v24 = vshll.u32 %v15244_v7, 16  ;;  %v3874_v27 = vshrl.u32 %v15244_v7, 16  ;;  %v1560_v22 = vsel %vm16156_vm8, %v1552_v5, %v1559_v8  ;;  %2136 = vst [vmem:[#allocation2 + $0x21c] sm:$0xf] %v2135_v18  ;;  %v16900_v7 = vpop.permute.xlu0 %4034 }
 0x13d   : > { %2138 = vst.msk [vmem:[#allocation2 + $0x224] sm:$0xf] %vm393_vm0, %v1551_v14  ;;  %19870 = vst [vmem:[#allocation24_spill] sm:$0xff] %v16885_v30  ;;  %v3867_v26 = vrot.slane %v3865_v13, 1  ;;  %v1561_v35 = vrot.slane %v1556_v58, 4  ;;  %v494_v41 = vsel %vm16102_vm3, 0, %v493_v61  ;;  %v3861_v43 = vsel %vm3341_vm9, %v3856_v6, %v3860_v25 }
 0x13e   : > { %2139 = vst.msk [vmem:[#allocation2 + $0x228] sm:$0xf] %vm393_vm0, %v1560_v22  ;;  %v2140_v32 = vld [vmem:[#allocation2 + $0x22c] sm:$0x1]  ;;  %v1563_v42 = vshrl.u32 %v373_v60, 16  ;;  %v3872_v44 = vrot.slane %v3870_v24, 1  ;;  %4084 = vrot.lane.b32.xlu1 %v3861_v43, %s16004_s12  ;;  %v16907_v14 = vpop.permute.xlu1 %4036 }
 0x13f   : > { %495 = vst [vmem:[#allocation2 + $0x230] sm:$0x1] %v494_v41  ;;  %v1566_v38 = vshll.u32 %v373_v60, 16  ;;  %v1571_v48 = vshrl.u32 %v374_v17, 16  ;;  %v3868_v49 = vor.u32 %v3867_v26, %v3863_v12  ;;  %v2141_v56 = vsel %vm16102_vm3, %v1561_v35, %v2140_v32  ;;  %v16898_v4 = vld [vmem:[%s16134_s11 + $0x1bc] sm:$0xf] }
 0x140   : > { %v15245_v53 = vld [vmem:[#allocation2 + $0x218] ss:$0 sps:$4 sm:$0x11]   ;;  %v1565_v57 = vrot.slane %v1563_v42, 7  ;;  %2142 = vst [vmem:[#allocation2 + $0x22c] sm:$0x1] %v2141_v56  ;;  %v3876_v5 = vor.u32 %v3874_v27, %v3872_v44  ;;  %v16998_v59 = vpop.permute.xlu0 %4038 }
 0x141   : > { %v16894_v58 = vrot.slane %v1571_v48, 7  ;;  %v1574_v61 = vshll.u32 %v374_v17, 16  ;;  %v1580_v63 = vshrl.u32 %v375_v29, 16  ;;  %v3873_v0 = vsel %vm3341_vm9, %v3868_v49, %v3872_v44  ;;  %19871 = vst [vmem:[#allocation25_spill] sm:$0xff] %v16900_v7  ;;  %19872 = vst [vmem:[#allocation26_spill] sm:$0xff] %v16907_v14  ;;  %v16922_v41 = vld [vmem:[#allocation2 + $0x14] sm:$0xff]  }
 0x142   : > { %v3878_v6 = vshll.u32 %v15245_v53, 16  ;;  %v1569_v60 = vrot.slane %v1565_v57, 4  ;;  %4086 = vrot.lane.b32.xlu0 %v3873_v0, %s16004_s12  ;;  %v1583_v13 = vshll.u32 %v375_v29, 16  ;;  %v1568_v25 = vor.u32 %v1566_v38, %v1565_v57  ;;  %v16911_v24 = vld [vmem:[#allocation2 + $0x240] sm:$0x1]  ;;  %v16920_v29 = vld [vmem:[#allocation2 + $0x8] sm:$0xff]  }
 0x143   : > { %v1576_v8 = vor.u32 %v1574_v61, %v16894_v58  ;;  %v1578_v10 = vrot.slane %v16894_v58, 4  ;;  %v16905_v12 = vrot.slane %v1580_v63, 7  ;;  %v16909_v17 = vld [vmem:[#allocation2 + $0x21c] sm:$0xff]   ;;  %v1589_v32 = vshrl.u32 %v16898_v4, 16  ;;  %v16928_v44 = vld [vmem:[#allocation2 + $0x28] sm:$0xff]   ;;  %v16930_v38 = vld [vmem:[#allocation2 + $0x30] sm:$0xff]  }
 0x144   : > { %v3880_v18 = vrot.slane %v3878_v6, 1  ;;  %v16924_v42 = vld [vmem:[#allocation2] sm:$0xff]   ;;  %v16936_v53 = vld [vmem:[#allocation2 + $0x50] sm:$0xff]   ;;  %v16938_v56 = vld [vmem:[#allocation2 + $0x58] sm:$0xff]   ;;  %v3883_v51 = vshrl.u32 %v16909_v17, 16  ;;  %v3885_v9 = vshll.u32 %v16909_v17, 16 }
 0x145   : > { %v16913_v27 = vld [vmem:[#allocation2 + $0x224] sm:$0xff]   ;;  %v1577_v22 = vsel %vm16156_vm8, %v1569_v60, %v1576_v8  ;;  %v1585_v26 = vor.u32 %v1583_v13, %v16905_v12  ;;  %v16926_v43 = vld [vmem:[#allocation2 + $0x1c] sm:$0xff]   ;;  %v16942_v58 = vld [vmem:[#allocation2 + $0x6c] sm:$0xff]   ;;  %v1592_v3 = vshll.u32 %v16898_v4, 16  ;;  %v16987_v4 = vrot.slane %v1589_v32, 7 }
 0x146   : > { %v16932_v48 = vld [vmem:[#allocation2 + $0x3c] sm:$0xff]   ;;  %v16934_v49 = vld [vmem:[#allocation2 + $0x44] sm:$0xff]   ;;  %v16948_v0 = vld [vmem:[#allocation2 + $0x8c] sm:$0xff]   ;;  %v3881_v62 = vsel %vm3341_vm9, %v3876_v5, %v3880_v18  ;;  %2146 = vst.msk [vmem:[#allocation2 + $0x234] sm:$0xf] %vm393_vm0, %v1577_v22  ;;  %v3890_v11 = vshll.u32 %v16913_v27, 16 }
 0x147   : > { %v16940_v57 = vld [vmem:[#allocation2 + $0x64] sm:$0xff]   ;;  %v16944_v61 = vld [vmem:[#allocation2 + $0x78] sm:$0xff]   ;;  %v16962_v7 = vld [vmem:[#allocation2 + $0xd0] sm:$0xff]   ;;  %4088 = vrot.lane.b32.xlu1 %v3881_v62, %s16004_s12  ;;  %v3894_v5 = vshrl.u32 %v16913_v27, 16  ;;  %v1586_v18 = vsel %vm16156_vm8, %v1578_v10, %v1585_v26  ;;  %v3887_v39 = vrot.slane %v3885_v9, 1  ;;  %v1594_v54 = vor.u32 %v1592_v3, %v16987_v4 }
 0x148   : > { %v16946_v63 = vld [vmem:[#allocation2 + $0x80] sm:$0xff]   ;;  %v16950_v6 = vld [vmem:[#allocation2 + $0x94] sm:$0xff]   ;;  %v16954_v8 = vld [vmem:[#allocation2 + $0xa8] sm:$0xff]   ;;  %2147 = vst.msk [vmem:[#allocation2 + $0x238] sm:$0xf] %vm393_vm0, %v1586_v18  ;;  %v3892_v27 = vrot.slane %v3890_v11, 1 }
 0x149   : > { %v16952_v60 = vld [vmem:[#allocation2 + $0xa0] sm:$0xff]   ;;  %v16956_v13 = vld [vmem:[#allocation2 + $0xb4] sm:$0xff]   ;;  %v16960_v14 = vld [vmem:[#allocation2 + $0xc8] sm:$0xff]   ;;  %v598_v10 = vsel %vm16116_vm5, 0, %v16911_v24  ;;  %vm2700_vm10 = vcmask 23552   ;;  %vm4174_vm11 = vcmask 48152  }
 0x14a   : > { %v16958_v35 = vld [vmem:[#allocation2 + $0xbc] sm:$0xff]   ;;  %v16966_v20 = vld [vmem:[#allocation2 + $0xe4] sm:$0xff]   ;;  %v2143_v31 = vld [vmem:[#allocation2 + $0x230] sm:$0xf]  ;;  %599 = vst [vmem:[#allocation2 + $0x240] sm:$0x1] %v598_v10 }
 0x14b   : > { %v16964_v30 = vld [vmem:[#allocation2 + $0xdc] sm:$0xff]   ;;  %v16980_v55 = vld [vmem:[#allocation2 + $0x244] sm:$0x1]  ;;  %v15318_v22 = vld [vmem:[#allocation2 + $0x10c] sm:$0xff]   ;;  %v2144_v28 = vsel %vm16146_vm7, %v1568_v25, %v2143_v31  ;;  %v17008_v31 = vpop.permute.xlu1 %4040  ;;  %v3888_v25 = vor.u32 %v3887_v39, %v3883_v51  ;;  %v19873_v24 = vrot.slane %v16905_v12, 4  ;;  %2702 = vst.msk [vmem:[#allocation3 + $0x8] sm:$0xff] %vm2700_vm10, %v16920_v29 }
 0x14c   : > { %v16978_v19 = vld [vmem:[%s16134_s11 + $0x1c0] sm:$0xf]  ;;  %v16990_v17 = vld [vmem:[%s16134_s11 + $0x1c4] sm:$0xf]  ;;  %v16996_v62 = vld [vmem:[%s16134_s11 + $0x1c8] sm:$0xf] }
 0x14d   : > { %v15248_v33 = vld [vmem:[#allocation2 + $0x22c] ss:$0 sps:$4 sm:$0x11]   ;;  %2145 = vst [vmem:[#allocation2 + $0x230] sm:$0xf] %v2144_v28  ;;  %v15322_v32 = vld [vmem:[#allocation2 + $0x118] sm:$0xff]   ;;  %v17014_v28 = vor.u32 %v3894_v5, %v3892_v27  ;;  %v1595_v9 = vsel %vm16156_vm8, %v19873_v24, %v1594_v54  ;;  %v3893_v54 = vsel %vm3341_vm9, %v3888_v25, %v3892_v27 }
 0x14e   : > { %v17006_v26 = vld [vmem:[%s16134_s11 + $0x1cc] sm:$0xf]  ;;  %v3898_v18 = vshll.u32 %v15248_v33, 16  ;;  %v17010_v11 = vld [vmem:[#allocation2 + $0x254] sm:$0x1]  ;;  %v17012_v3 = vld [vmem:[#allocation2 + $0x120] sm:$0xff]   ;;  %4090 = vrot.lane.b32.xlu0 %v3893_v54, %s16004_s12 }
 0x14f   : > { %2703 = vst.msk [vmem:[#allocation3 + $0x10] sm:$0xff] %vm2700_vm10, %v16922_v41  ;;  %v497_v33 = vsel %vm16102_vm3, 0, %v16980_v55  ;;  %v1598_v39 = vshrl.u32 %v16978_v19, 16  ;;  %2701 = vst.msk [vmem:[#allocation3] sm:$0xff] %vm2700_vm10, %v16924_v42  ;;  %v17032_v51 = vld [vmem:[#allocation2 + $0x258] sm:$0x1] }
 0x150   : > { %2704 = vst.msk [vmem:[#allocation3 + $0x18] sm:$0xff] %vm2700_vm10, %v16926_v43  ;;  %2705 = vst.msk [vmem:[#allocation3 + $0x20] sm:$0xff] %vm2700_vm10, %v16928_v44  ;;  %v3900_v55 = vrot.slane %v3898_v18, 1  ;;  %v19885_v12 = vld [vmem:[#allocation18_spill] sm:$0xff]  ;;  %v19888_v29 = vld [vmem:[#allocation21_spill] sm:$0xff]  ;;  %vm4815_vm12 = vcmask 1046528  }
 0x151   : > { %2706 = vst.msk [vmem:[#allocation3 + $0x28] sm:$0xff] %vm2700_vm10, %v16930_v38  ;;  %2707 = vst.msk [vmem:[#allocation3 + $0x30] sm:$0xff] %vm2700_vm10, %v16932_v48  ;;  %v19889_v41 = vld [vmem:[#allocation22_spill] sm:$0xff]  ;;  %v19890_v42 = vld [vmem:[#allocation23_spill] sm:$0xff]  ;;  %v1600_v48 = vrot.slane %v1598_v39, 7  ;;  %vm5168_vm13 = vcmask 72752  }
 0x152   : > { %2708 = vst.msk [vmem:[#allocation3 + $0x38] sm:$0xff] %vm2700_vm10, %v16934_v49  ;;  %2709 = vst.msk [vmem:[#allocation3 + $0x40] sm:$0xff] %vm2700_vm10, %v16936_v53  ;;  %v19891_v43 = vld [vmem:[#allocation24_spill] sm:$0xff]  ;;  %v19892_v44 = vld [vmem:[#allocation25_spill] sm:$0xff]  ;;  %v1609_v49 = vshll.u32 %v16990_v17, 16  ;;  %v1615_v53 = vshrl.u32 %v16996_v62, 16 }
 0x153   : > { %2710 = vst.msk [vmem:[#allocation3 + $0x48] sm:$0xff] %vm2700_vm10, %v16938_v56  ;;  %2711 = vst.msk [vmem:[#allocation3 + $0x50] sm:$0xff] %vm2700_vm10, %v16940_v57  ;;  %v19893_v38 = vld [vmem:[#allocation26_spill] sm:$0xff]  ;;  %v1618_v56 = vshll.u32 %v16996_v62, 16  ;;  %v15328_v5 = vld [vmem:[#allocation2 + $0x134] sm:$0xff]   ;;  %vm5873_vm14 = vcmask 97352  }
 0x154   : > { %2712 = vst.msk [vmem:[#allocation3 + $0x58] sm:$0xff] %vm2700_vm10, %v16942_v58  ;;  %2713 = vst.msk [vmem:[#allocation3 + $0x60] sm:$0xff] %vm2700_vm10, %v16944_v61  ;;  %v1624_v58 = vshrl.u32 %v17006_v26, 16  ;;  %v1627_v61 = vshll.u32 %v17006_v26, 16  ;;  %v2149_v26 = vld [vmem:[#allocation2 + $0x240] sm:$0x1] }
 0x155   : > { %2714 = vst.msk [vmem:[#allocation3 + $0x68] sm:$0xff] %vm2700_vm10, %v16946_v63  ;;  %2715 = vst.msk [vmem:[#allocation3 + $0x70] sm:$0xff] %vm2700_vm10, %v16948_v0  ;;  %v4043_v63 = vpop.permute.xlu0 %4042  ;;  %v383_v39 = vld [vmem:[%s16134_s11 + $0x1d8] sm:$0xf]  ;;  %vm11855_vm15 = vcmask 1044480   ;;  %vm7346_vm1 = vcmask 121952  }
 0x156   : > { %2716 = vst.msk [vmem:[#allocation3 + $0x78] sm:$0xff] %vm2700_vm10, %v16950_v6  ;;  %2717 = vst.msk [vmem:[#allocation3 + $0x80] sm:$0xff] %vm2700_vm10, %v16952_v60  ;;  %v1604_v6 = vrot.slane %v1600_v48, 4  ;;  %v1617_v60 = vrot.slane %v1615_v53, 7  ;;  %v1626_v10 = vrot.slane %v1624_v58, 7  ;;  %vm8339_vm2 = vcmask 146552  }
 0x157   : > { %2718 = vst.msk [vmem:[#allocation3 + $0x88] sm:$0xff] %vm2700_vm10, %v16954_v8  ;;  %2719 = vst.msk [vmem:[#allocation3 + $0x90] sm:$0xff] %vm2700_vm10, %v16956_v13  ;;  %v601_v8 = vsel %vm16116_vm5, 0, %v17010_v11  ;;  %v382_v13 = vld [vmem:[%s16134_s11 + $0x1d4] sm:$0xf]  ;;  %vm9045_vm4 = vcmask 171152  }
 0x158   : > { %2720 = vst.msk [vmem:[#allocation3 + $0x98] sm:$0xff] %vm2700_vm10, %v16958_v35  ;;  %2721 = vst.msk [vmem:[#allocation3 + $0xa0] sm:$0xff] %vm2700_vm10, %v16960_v14  ;;  %v19886_v14 = vld [vmem:[#allocation19_spill] sm:$0xff]  ;;  %v19887_v35 = vld [vmem:[#allocation20_spill] sm:$0xff]  ;;  %vm10518_vm6 = vcmask 195752  }
 0x159   : > { %2722 = vst.msk [vmem:[#allocation3 + $0xa8] sm:$0xff] %vm2700_vm10, %v16962_v7  ;;  %2723 = vst.msk [vmem:[#allocation3 + $0xb0] sm:$0xff] %vm2700_vm10, %v16964_v30  ;;  %v19883_v30 = vld [vmem:[#allocation16_spill] sm:$0xff]  ;;  %v19884_v7 = vld [vmem:[#allocation17_spill] sm:$0xff] }
 0x15a   : > { %2724 = vst.msk [vmem:[#allocation3 + $0xb8] sm:$0xff] %vm2700_vm10, %v16966_v20  ;;  %2725 = vst.msk [vmem:[#allocation3 + $0xc0] sm:$0xff] %vm2700_vm10, %v16968_v34  ;;  %v17094_v34 = vld [vmem:[%s16134_s11 + $0x1d0] sm:$0xf]  ;;  %v386_v58 = vld [vmem:[%s16134_s11 + $0x1e4] sm:$0xf] }
 0x15b   : > { %2726 = vst.msk [vmem:[#allocation3 + $0xc8] sm:$0xff] %vm2700_vm10, %v16970_v36  ;;  %2727 = vst.msk [vmem:[#allocation3 + $0xd0] sm:$0xff] %vm2700_vm10, %v15317_v45  ;;  %v1601_v36 = vshll.u32 %v16978_v19, 16  ;;  %v1606_v45 = vshrl.u32 %v16990_v17, 16  ;;  %v19882_v20 = vld [vmem:[#allocation15_spill] sm:$0xff]  ;;  %v4045_v17 = vpop.permute.xlu1 %4044  ;;  %v1633_v25 = vshrl.u32 %v17094_v34, 16 }
 0x15c   : > { %2728 = vst.msk [vmem:[#allocation3 + $0xd8] sm:$0xff] %vm2700_vm10, %v15318_v22  ;;  %2729 = vst.msk [vmem:[#allocation3 + $0xe0] sm:$0xff] %vm2700_vm10, %v15322_v32  ;;  %v15327_v19 = vld [vmem:[#allocation2 + $0x12c] sm:$0xff]   ;;  %v1620_v32 = vor.u32 %v1618_v56, %v1617_v60  ;;  %v1636_v18 = vshll.u32 %v17094_v34, 16 }
 0x15d   : > { %2148 = vst.msk [vmem:[#allocation2 + $0x23c] sm:$0xf] %vm393_vm0, %v1595_v9  ;;  %498 = vst [vmem:[#allocation2 + $0x244] sm:$0x1] %v497_v33  ;;  %v1608_v57 = vrot.slane %v1606_v45, 7  ;;  %v1603_v0 = vor.u32 %v1601_v36, %v1600_v48  ;;  %v15249_v22 = vld [vmem:[#allocation2 + $0x230] sm:$0xff]  }
 0x15e   : > { %4176 = vst.msk [vmem:[#allocation3 + $0x8] sm:$0xff] %vm4174_vm11, %v16650_v46  ;;  %4177 = vst.msk [vmem:[#allocation3 + $0x10] sm:$0xff] %vm4174_vm11, %v16655_v52  ;;  %v19874_v46 = vld [vmem:[#allocation7_spill] sm:$0xff]  ;;  %v19875_v52 = vld [vmem:[#allocation8_spill] sm:$0xff]  ;;  %v500_v9 = vsel %vm16102_vm3, 0, %v17032_v51  ;;  %v3903_v11 = vshrl.u32 %v15249_v22, 16 }
 0x15f   : > { %4175 = vst.msk [vmem:[#allocation3] sm:$0xff] %vm4174_vm11, %v16665_v15  ;;  %4178 = vst.msk [vmem:[#allocation3 + $0x18] sm:$0xff] %vm4174_vm11, %v16674_v21  ;;  %v19876_v15 = vld [vmem:[#allocation9_spill] sm:$0xff]  ;;  %v19877_v21 = vld [vmem:[#allocation10_spill] sm:$0xff]  ;;  %v1611_v62 = vor.u32 %v1609_v49, %v1608_v57  ;;  %v1613_v27 = vrot.slane %v1608_v57, 4  ;;  %v1631_v45 = vrot.slane %v1626_v10, 4 }
 0x160   : > { %4179 = vst.msk [vmem:[#allocation3 + $0x20] sm:$0xff] %vm4174_vm11, %v16689_v47  ;;  %4180 = vst.msk [vmem:[#allocation3 + $0x28] sm:$0xff] %vm4174_vm11, %v16692_v50  ;;  %v19878_v47 = vld [vmem:[#allocation11_spill] sm:$0xff]  ;;  %v19879_v50 = vld [vmem:[#allocation12_spill] sm:$0xff] }
 0x161   : > { %4181 = vst.msk [vmem:[#allocation3 + $0x30] sm:$0xff] %vm4174_vm11, %v16703_v16  ;;  %4182 = vst.msk [vmem:[#allocation3 + $0x38] sm:$0xff] %vm4174_vm11, %v16710_v23  ;;  %v19880_v16 = vld [vmem:[#allocation13_spill] sm:$0xff]  ;;  %v19881_v23 = vld [vmem:[#allocation14_spill] sm:$0xff]  ;;  %v1612_v33 = vsel %vm16156_vm8, %v1604_v6, %v1611_v62  ;;  %v1621_v54 = vsel %vm16156_vm8, %v1613_v27, %v1620_v32 }
 0x162   : > { %4183 = vst.msk [vmem:[#allocation3 + $0x40] sm:$0xff] %vm4174_vm11, %v19874_v46  ;;  %4184 = vst.msk [vmem:[#allocation3 + $0x48] sm:$0xff] %vm4174_vm11, %v19875_v52  ;;  %v384_v46 = vld [vmem:[%s16134_s11 + $0x1dc] sm:$0xf]  ;;  %v1635_v52 = vrot.slane %v1633_v25, 7 }
 0x163   : > { %4185 = vst.msk [vmem:[#allocation3 + $0x50] sm:$0xff] %vm4174_vm11, %v19876_v15  ;;  %4186 = vst.msk [vmem:[#allocation3 + $0x58] sm:$0xff] %vm4174_vm11, %v19877_v21  ;;  %v1641_v15 = vshrl.u32 %v382_v13, 16  ;;  %v502_v48 = vld [vmem:[#allocation2 + $0x26c] sm:$0x1] }
 0x164   : > { %4187 = vst.msk [vmem:[#allocation3 + $0x60] sm:$0xff] %vm4174_vm11, %v19878_v47  ;;  %4188 = vst.msk [vmem:[#allocation3 + $0x68] sm:$0xff] %vm4174_vm11, %v19879_v50  ;;  %v15250_v51 = vld [vmem:[#allocation2 + $0x238] sm:$0xff]   ;;  %v2152_v36 = vld [vmem:[#allocation2 + $0x244] sm:$0xf] }
 0x165   : > { %4189 = vst.msk [vmem:[#allocation3 + $0x70] sm:$0xff] %vm4174_vm11, %v19880_v16  ;;  %4190 = vst.msk [vmem:[#allocation3 + $0x78] sm:$0xff] %vm4174_vm11, %v19881_v23  ;;  %v2153_v34 = vsel %vm16146_vm7, %v1603_v0, %v2152_v36  ;;  %v3910_v21 = vshll.u32 %v15250_v51, 16  ;;  %v3914_v47 = vshrl.u32 %v15250_v51, 16  ;;  %v1644_v16 = vshll.u32 %v382_v13, 16 }
 0x166   : > { %4191 = vst.msk [vmem:[#allocation3 + $0x80] sm:$0xff] %vm4174_vm11, %v19882_v20  ;;  %4192 = vst.msk [vmem:[#allocation3 + $0x88] sm:$0xff] %vm4174_vm11, %v19883_v30  ;;  %v603_v23 = vld [vmem:[#allocation2 + $0x268] sm:$0x1]  ;;  %v15332_v20 = vld [vmem:[#allocation2 + $0x140] sm:$0xff]   ;;  %v4047_v30 = vpop.permute.xlu0 %4046 }
 0x167   : > { %4193 = vst.msk [vmem:[#allocation3 + $0x90] sm:$0xff] %vm4174_vm11, %v19884_v7  ;;  %4194 = vst.msk [vmem:[#allocation3 + $0x98] sm:$0xff] %vm4174_vm11, %v19885_v12  ;;  %v1638_v12 = vor.u32 %v1636_v18, %v1635_v52  ;;  %v387_v51 = vld [vmem:[%s16134_s11 + $0x1e8] sm:$0xf] }
 0x168   : > { %4195 = vst.msk [vmem:[#allocation3 + $0xa0] sm:$0xff] %vm4174_vm11, %v19886_v14  ;;  %4196 = vst.msk [vmem:[#allocation3 + $0xa8] sm:$0xff] %vm4174_vm11, %v19887_v35  ;;  %v1639_v14 = vrot.slane %v1635_v52, 4  ;;  %v1643_v35 = vrot.slane %v1641_v15, 7 }
 0x169   : > { %4197 = vst.msk [vmem:[#allocation3 + $0xb0] sm:$0xff] %vm4174_vm11, %v19888_v29  ;;  %4198 = vst.msk [vmem:[#allocation3 + $0xb8] sm:$0xff] %vm4174_vm11, %v19889_v41  ;;  %v3912_v29 = vrot.slane %v3910_v21, 1 }
 0x16a   : > { %4199 = vst.msk [vmem:[#allocation3 + $0xc0] sm:$0xff] %vm4174_vm11, %v19890_v42  ;;  %4200 = vst.msk [vmem:[#allocation3 + $0xc8] sm:$0xff] %vm4174_vm11, %v19891_v43  ;;  %v1650_v42 = vshrl.u32 %v383_v39, 16  ;;  %v1653_v43 = vshll.u32 %v383_v39, 16  ;;  %v1646_v53 = vor.u32 %v1644_v16, %v1643_v35  ;;  %v1648_v56 = vrot.slane %v1643_v35, 4 }
 0x16b   : > { %4201 = vst.msk [vmem:[#allocation3 + $0xd0] sm:$0xff] %vm4174_vm11, %v19892_v44  ;;  %4202 = vst.msk [vmem:[#allocation3 + $0xd8] sm:$0xff] %vm4174_vm11, %v19893_v38  ;;  %v1659_v44 = vshrl.u32 %v384_v46, 16  ;;  %v385_v38 = vld [vmem:[%s16134_s11 + $0x1e0] sm:$0xf]  ;;  %v3916_v62 = vor.u32 %v3914_v47, %v3912_v29 }
 0x16c   : > { %4203 = vst.msk [vmem:[#allocation3 + $0xe0] sm:$0xff] %vm4174_vm11, %v16998_v59  ;;  %v3901_v59 = vsel %vm3341_vm9, %v17014_v28, %v3900_v55  ;;  %602 = vst [vmem:[#allocation2 + $0x254] sm:$0x1] %v601_v8  ;;  %v19894_v28 = vrot.slane %v16987_v4, 4  ;;  %v1629_v55 = vor.u32 %v1627_v61, %v1626_v10  ;;  %v1647_v6 = vsel %vm16156_vm8, %v1639_v14, %v1646_v53  ;;  %v388_v47 = vld [vmem:[%s16134_s11 + $0x1ec] sm:$0xf] }
 0x16d   : > { %2730 = vst.msk [vmem:[#allocation3 + $0xe8] sm:$0xff] %vm2700_vm10, %v17012_v3  ;;  %4092 = vrot.lane.b32.xlu1 %v3901_v59, %s16004_s12  ;;  %2731 = vst.msk [vmem:[#allocation3 + $0xf0] sm:$0xff] %vm2700_vm10, %v15327_v19  ;;  %v3905_v3 = vshll.u32 %v15249_v22, 16  ;;  %v1662_v59 = vshll.u32 %v384_v46, 16  ;;  %v1652_v19 = vrot.slane %v1650_v42, 7  ;;  %v604_v8 = vsel %vm16116_vm5, 0, %v603_v23 }
 0x16e   : > { %4204 = vst.msk [vmem:[#allocation3 + $0xe8] sm:$0xff] %vm4174_vm11, %v17008_v31  ;;  %v1622_v31 = vrot.slane %v1617_v60, 4  ;;  %501 = vst [vmem:[#allocation2 + $0x258] sm:$0x1] %v500_v9  ;;  %v2150_v24 = vsel %vm16102_vm3, %v19894_v28, %v2149_v26  ;;  %v503_v9 = vsel %vm16102_vm3, 0, %v502_v48  ;;  %v1668_v26 = vshrl.u32 %v385_v38, 16  ;;  %v4049_v28 = vpop.permute.xlu1 %4048 }
 0x16f   : > { %4205 = vst.msk [vmem:[#allocation3 + $0xf0] sm:$0xff] %vm4174_vm11, %v4043_v63  ;;  %2151 = vst [vmem:[#allocation2 + $0x240] sm:$0x1] %v2150_v24  ;;  %v3907_v4 = vrot.slane %v3905_v3, 1  ;;  %v17198_v63 = vrot.slane %v1659_v44, 7  ;;  %v1655_v13 = vor.u32 %v1653_v43, %v1652_v19  ;;  %v1671_v18 = vshll.u32 %v385_v38, 16  ;;  %v4051_v43 = vpop.permute.xlu0 %4050 }
 0x170   : > { %2732 = vst.msk [vmem:[#allocation3 + $0xf8] sm:$0xff] %vm2700_vm10, %v15328_v5  ;;  %v1630_v50 = vsel %vm16156_vm8, %v1622_v31, %v1629_v55  ;;  %2154 = vst [vmem:[#allocation2 + $0x244] sm:$0xf] %v2153_v34  ;;  %v1657_v5 = vrot.slane %v1652_v19, 4  ;;  %v15333_v3 = vld [vmem:[#allocation2 + $0x148] sm:$0xff]  }
 0x171   : > { %4206 = vst.msk [vmem:[#allocation3 + $0xf8] sm:$0xff] %vm4174_vm11, %v4045_v17  ;;  %v3908_v7 = vor.u32 %v3907_v4, %v3903_v11  ;;  %v1664_v17 = vor.u32 %v1662_v59, %v17198_v63  ;;  %605 = vst [vmem:[#allocation2 + $0x268] sm:$0x1] %v604_v8  ;;  %v1666_v22 = vrot.slane %v17198_v63, 4  ;;  %v1656_v31 = vsel %vm16156_vm8, %v1648_v56, %v1655_v13  ;;  %v606_v42 = vld [vmem:[#allocation2 + $0x27c] sm:$0x1] }
 0x172   : > { %2155 = vst.msk [vmem:[#allocation2 + $0x248] sm:$0xf] %vm393_vm0, %v1612_v33  ;;  %2156 = vst.msk [vmem:[#allocation2 + $0x24c] sm:$0xf] %vm393_vm0, %v1621_v54  ;;  %v1676_v11 = vshrl.u32 %v386_v58, 16  ;;  %v1670_v54 = vrot.slane %v1668_v26, 7  ;;  %v4053_v59 = vpop.permute.xlu1 %4052 }
 0x173   : > { %2157 = vst.msk [vmem:[#allocation2 + $0x250] sm:$0xf] %vm393_vm0, %v1630_v50  ;;  %v2158_v41 = vld [vmem:[#allocation2 + $0x254] sm:$0x1]  ;;  %v3913_v61 = vsel %vm3341_vm9, %v3908_v7, %v3912_v29  ;;  %2164 = vst.msk [vmem:[#allocation2 + $0x25c] sm:$0xf] %vm393_vm0, %v1647_v6  ;;  %v1665_v25 = vsel %vm16156_vm8, %v1657_v5, %v1664_v17 }
 0x174   : > { %2733 = vst.msk [vmem:[#allocation3 + $0x100] sm:$0xff] %vm2700_vm10, %v15332_v20  ;;  %v2159_v49 = vsel %vm16102_vm3, %v1631_v45, %v2158_v41  ;;  %4094 = vrot.lane.b32.xlu0 %v3913_v61, %s16004_s12  ;;  %504 = vst [vmem:[#allocation2 + $0x26c] sm:$0x1] %v503_v9  ;;  %v1678_v45 = vrot.slane %v1676_v11, 7  ;;  %v1679_v4 = vshll.u32 %v386_v58, 16  ;;  %v1673_v15 = vor.u32 %v1671_v18, %v1670_v54  ;;  %v15337_v56 = vld [vmem:[#allocation2 + $0x154] sm:$0xff]  }
 0x175   : > { %v2161_v57 = vld [vmem:[#allocation2 + $0x258] sm:$0xf]  ;;  %4207 = vst.msk [vmem:[#allocation3 + $0x100] sm:$0xff] %vm4174_vm11, %v4047_v30  ;;  %2160 = vst [vmem:[#allocation2 + $0x254] sm:$0x1] %v2159_v49  ;;  %v1674_v50 = vrot.slane %v1670_v54, 4 }
 0x176   : > { %v15251_v0 = vld [vmem:[#allocation2 + $0x240] ss:$0 sps:$4 sm:$0x11]   ;;  %v2162_v60 = vsel %vm16146_vm7, %v1638_v12, %v2161_v57  ;;  %2165 = vst.msk [vmem:[#allocation2 + $0x260] sm:$0xf] %vm393_vm0, %v1656_v31  ;;  %v1681_v16 = vor.u32 %v1679_v4, %v1678_v45  ;;  %v1683_v23 = vrot.slane %v1678_v45, 4  ;;  %v4057_v18 = vpop.permute.xlu1 %4056 }
 0x177   : > { %2163 = vst [vmem:[#allocation2 + $0x258] sm:$0xf] %v2162_v60  ;;  %v3918_v27 = vshll.u32 %v15251_v0, 16  ;;  %2166 = vst.msk [vmem:[#allocation2 + $0x264] sm:$0xf] %vm393_vm0, %v1665_v25  ;;  %v1685_v29 = vshrl.u32 %v387_v51, 16 }
 0x178   : > { %2734 = vst.msk [vmem:[#allocation3 + $0x108] sm:$0xff] %vm2700_vm10, %v15333_v3  ;;  %v2167_v14 = vld [vmem:[#allocation2 + $0x268] sm:$0x1]  ;;  %v1682_v35 = vsel %vm16156_vm8, %v1674_v50, %v1681_v16  ;;  %v1688_v41 = vshll.u32 %v387_v51, 16  ;;  %v1694_v6 = vshrl.u32 %v388_v47, 16  ;;  %v1697_v60 = vshll.u32 %v388_v47, 16 }
 0x179   : > { %v15254_v10 = vld [vmem:[#allocation2 + $0x244] sm:$0xff]   ;;  %v3920_v24 = vrot.slane %v3918_v27, 1  ;;  %4208 = vst.msk [vmem:[#allocation3 + $0x108] sm:$0xff] %vm4174_vm11, %v4049_v28  ;;  %v2168_v58 = vsel %vm16102_vm3, %v1666_v22, %v2167_v14  ;;  %v1687_v61 = vrot.slane %v1685_v29, 7  ;;  %v15338_v5 = vld [vmem:[#allocation2 + $0x15c] sm:$0xff]   ;;  %v607_v27 = vsel %vm16116_vm5, 0, %v606_v42 }
 0x17a   : > { %v15255_v32 = vld [vmem:[#allocation2 + $0x24c] sm:$0xff]   ;;  %v3923_v33 = vshrl.u32 %v15254_v10, 16  ;;  %v3925_v39 = vshll.u32 %v15254_v10, 16  ;;  %2173 = vst.msk [vmem:[#allocation2 + $0x270] sm:$0xf] %vm393_vm0, %v1682_v35 }
 0x17b   : > { %v3930_v55 = vshll.u32 %v15255_v32, 16  ;;  %v3934_v36 = vshrl.u32 %v15255_v32, 16  ;;  %v3921_v34 = vsel %vm3341_vm9, %v3916_v62, %v3920_v24  ;;  %v2170_v53 = vld [vmem:[#allocation2 + $0x26c] sm:$0xf]  ;;  %2169 = vst [vmem:[#allocation2 + $0x268] sm:$0x1] %v2168_v58  ;;  %v1690_v13 = vor.u32 %v1688_v41, %v1687_v61  ;;  %v4055_v32 = vpop.permute.xlu0 %4054 }
 0x17c   : > { %v3927_v46 = vrot.slane %v3925_v39, 1  ;;  %v15256_v52 = vld [vmem:[#allocation2 + $0x254] ss:$0 sps:$4 sm:$0x11]   ;;  %4096 = vrot.lane.b32.xlu1 %v3921_v34, %s16004_s12  ;;  %v2171_v19 = vsel %vm16146_vm7, %v1673_v15, %v2170_v53  ;;  %2735 = vst.msk [vmem:[#allocation3 + $0x110] sm:$0xff] %vm2700_vm10, %v15337_v56  ;;  %v1692_v22 = vrot.slane %v1687_v61, 4 }
 0x17d   : > { %v3932_v21 = vrot.slane %v3930_v55, 1  ;;  %v3938_v30 = vshll.u32 %v15256_v52, 16  ;;  %2172 = vst [vmem:[#allocation2 + $0x26c] sm:$0xf] %v2171_v19  ;;  %4209 = vst.msk [vmem:[#allocation3 + $0x110] sm:$0xff] %vm4174_vm11, %v4051_v43  ;;  %v1696_v62 = vrot.slane %v1694_v6, 7  ;;  %v1691_v9 = vsel %vm16156_vm8, %v1683_v23, %v1690_v13 }
 0x17e   : > { %v3928_v20 = vor.u32 %v3927_v46, %v3923_v33  ;;  %v15259_v7 = vld [vmem:[#allocation2 + $0x258] sm:$0xff]   ;;  %v15260_v57 = vld [vmem:[#allocation2 + $0x260] sm:$0xff]   ;;  %608 = vst [vmem:[#allocation2 + $0x27c] sm:$0x1] %v607_v27  ;;  %2736 = vst.msk [vmem:[#allocation3 + $0x118] sm:$0xff] %vm2700_vm10, %v15338_v5 }
 0x17f   : > { %v3936_v12 = vor.u32 %v3934_v36, %v3932_v21  ;;  %v3940_v38 = vrot.slane %v3938_v30, 1  ;;  %v3943_v48 = vshrl.u32 %v15259_v7, 16  ;;  %v3945_v49 = vshll.u32 %v15259_v7, 16  ;;  %v15342_v26 = vld [vmem:[#allocation2 + $0x168] sm:$0xff]   ;;  %2174 = vst.msk [vmem:[#allocation2 + $0x274] sm:$0xf] %vm393_vm0, %v1691_v9 }
 0x180   : > { %v3933_v44 = vsel %vm3341_vm9, %v3928_v20, %v3932_v21  ;;  %v3950_v8 = vshll.u32 %v15260_v57, 16  ;;  %v1699_v31 = vor.u32 %v1697_v60, %v1696_v62  ;;  %4210 = vst.msk [vmem:[#allocation3 + $0x118] sm:$0xff] %vm4174_vm11, %v4053_v59  ;;  %v15343_v25 = vld [vmem:[#allocation2 + $0x170] sm:$0xff]   ;;  %v3954_v3 = vshrl.u32 %v15260_v57, 16  ;;  %v15269_v34 = vld [vmem:[#allocation2] sm:$0xfe]  }
 0x181   : > { %4098 = vrot.lane.b32.xlu0 %v3933_v44, %s16004_s12  ;;  %v3941_v63 = vsel %vm3341_vm9, %v3936_v12, %v3940_v38  ;;  %v3947_v0 = vrot.slane %v3945_v49, 1  ;;  %2737 = vst.msk [vmem:[#allocation3 + $0x120] sm:$0xff] %vm2700_vm10, %v15342_v26  ;;  %v1701_v24 = vrot.slane %v1696_v62, 4  ;;  %2738 = vst.msk [vmem:[#allocation3 + $0x128] sm:$0xff] %vm2700_vm10, %v15343_v25  ;;  %v15270_v15 = vld [vmem:[#allocation2 + $0x8] sm:$0xff]   ;;  %v15275_v20 = vld [vmem:[#allocation2 + $0x1c] sm:$0xff]  }
 0x182   : > { %4100 = vrot.lane.b32.xlu1 %v3941_v63, %s16004_s12  ;;  %v3952_v10 = vrot.slane %v3950_v8, 1  ;;  %v1700_v28 = vsel %vm16156_vm8, %v1692_v22, %v1699_v31  ;;  %4211 = vst.msk [vmem:[#allocation3 + $0x120] sm:$0xff] %vm4174_vm11, %v4055_v32  ;;  %v15261_v33 = vld [vmem:[#allocation2 + $0x268] ss:$0 sps:$4 sm:$0x11]   ;;  %4212 = vst.msk [vmem:[#allocation3 + $0x128] sm:$0xff] %vm4174_vm11, %v4057_v18  ;;  %v4059_v32 = vpop.permute.xlu0 %4058 }
 0x183   : > { %v3948_v17 = vor.u32 %v3947_v0, %v3943_v48  ;;  %2175 = vst.msk [vmem:[#allocation2 + $0x278] sm:$0xf] %vm393_vm0, %v1700_v28  ;;  %v3958_v54 = vshll.u32 %v15261_v33, 16  ;;  %v15274_v23 = vld [vmem:[#allocation2 + $0x14] sm:$0xfe]   ;;  %v4816_v7 = vrot.slane %v15269_v34, 1 }
 0x184   : > { %v15264_v39 = vld [vmem:[#allocation2 + $0x26c] sm:$0xff]   ;;  %v3956_v51 = vor.u32 %v3954_v3, %v3952_v10  ;;  %v4817_v35 = vrot.slane %v15270_v15, 1  ;;  %v15276_v38 = vld [vmem:[#allocation2 + $0x24] ss:$0 sps:$4 sm:$0x11]   ;;  %v4821_v49 = vrot.slane %v15274_v23, 1 }
 0x185   : > { %v3953_v11 = vsel %vm3341_vm9, %v3948_v17, %v3952_v10  ;;  %v3965_v55 = vshll.u32 %v15264_v39, 16  ;;  %v2176_v36 = vld [vmem:[#allocation2 + $0x27c] sm:$0x1]  ;;  %v3960_v45 = vrot.slane %v3958_v54, 1  ;;  %v3963_v46 = vshrl.u32 %v15264_v39, 16  ;;  %v15280_v42 = vld [vmem:[#allocation2 + $0x30] sm:$0xff]   ;;  %v4061_v39 = vpop.permute.xlu1 %4060 }
 0x186   : > { %4102 = vrot.lane.b32.xlu0 %v3953_v11, %s16004_s12  ;;  %v2177_v4 = vsel %vm16102_vm3, %v1701_v24, %v2176_v36  ;;  %v15271_v12 = vld [vmem:[#allocation2 + $0x10] ss:$0 sps:$4 sm:$0x11]   ;;  %v4818_v48 = vsel %vm4815_vm12, %v4816_v7, %v4817_v35  ;;  %v4822_v53 = vrot.slane %v15275_v20, 1  ;;  %v15279_v56 = vld [vmem:[#allocation2 + $0x28] sm:$0xfe]  }
 0x187   : > { %v3967_v52 = vrot.slane %v3965_v55, 1  ;;  %2178 = vst [vmem:[#allocation2 + $0x27c] sm:$0x1] %v2177_v4  ;;  %v3961_v21 = vsel %vm3341_vm9, %v3956_v51, %v3960_v45  ;;  %v15285_v59 = vld [vmem:[#allocation2 + $0x44] sm:$0xff]   ;;  %v4819_v58 = vrot.slane %v15271_v12, 1  ;;  %v4826_v0 = vrot.slane %v15279_v56, 1 }
 0x188   : > { %4104 = vrot.lane.b32.xlu1 %v3961_v21, %s16004_s12  ;;  %v15284_v61 = vld [vmem:[#allocation2 + $0x3c] sm:$0xfe]   ;;  %v4823_v63 = vsel %vm4815_vm12, %v4821_v49, %v4822_v53  ;;  %v4827_v6 = vrot.slane %v15280_v42, 1  ;;  %v4824_v8 = vrot.slane %v15276_v38, 1  ;;  %v4832_v22 = vrot.slane %v15285_v59, 1  ;;  %v15295_v18 = vld [vmem:[#allocation2 + $0x6c] sm:$0xff]  }
 0x189   : > { %v3968_v50 = vor.u32 %v3967_v52, %v3963_v46  ;;  %v4820_v60 = vsel %vm4815_vm12, %v4817_v35, %v4819_v58  ;;  %v15281_v13 = vld [vmem:[#allocation2 + $0x38] ss:$0 sps:$4 sm:$0x11]   ;;  %v4831_v17 = vrot.slane %v15284_v61, 1  ;;  %v15289_v27 = vld [vmem:[#allocation2 + $0x50] sm:$0xfe]   ;;  %v4063_v52 = vpop.permute.xlu0 %4062 }
 0x18a   : > { %v15265_v47 = vld [vmem:[#allocation2 + $0x274] sm:$0xff]   ;;  %v15286_v62 = vld [vmem:[#allocation2 + $0x4c] ss:$0 sps:$4 sm:$0x11]   ;;  %v4828_v10 = vsel %vm4815_vm12, %v4826_v0, %v4827_v6  ;;  %v4825_v9 = vsel %vm4815_vm12, %v4822_v53, %v4824_v8  ;;  %v4829_v26 = vrot.slane %v15281_v13, 1  ;;  %v15347_v3 = vld [vmem:[#allocation2 + $0x17c] sm:$0xff]  }
 0x18b   : > { %v3970_v16 = vshll.u32 %v15265_v47, 16  ;;  %v3974_v30 = vshrl.u32 %v15265_v47, 16  ;;  %v15290_v5 = vld [vmem:[#allocation2 + $0x58] sm:$0xff]   ;;  %v15291_v31 = vld [vmem:[#allocation2 + $0x60] ss:$0 sps:$4 sm:$0x11]   ;;  %v4833_v28 = vsel %vm4815_vm12, %v4831_v17, %v4832_v22 }
 0x18c   : > { %v15294_v25 = vld [vmem:[#allocation2 + $0x64] sm:$0xfe]   ;;  %v4837_v11 = vrot.slane %v15290_v5, 1  ;;  %v4836_v24 = vrot.slane %v15289_v27, 1  ;;  %v4830_v51 = vsel %vm4815_vm12, %v4827_v6, %v4829_v26  ;;  %v4834_v54 = vrot.slane %v15286_v62, 1  ;;  %2739 = vst.msk [vmem:[#allocation3 + $0x130] sm:$0xff] %vm2700_vm10, %v15347_v3 }
 0x18d   : > { %v3972_v14 = vrot.slane %v3970_v16, 1  ;;  %v15348_v33 = vld [vmem:[#allocation2 + $0x184] sm:$0xff]   ;;  %v15299_v36 = vld [vmem:[#allocation2 + $0x78] sm:$0xfe]   ;;  %4213 = vst.msk [vmem:[#allocation3 + $0x130] sm:$0xff] %vm4174_vm11, %v4059_v32  ;;  %v4842_v4 = vrot.slane %v15295_v18, 1  ;;  %v4065_v16 = vpop.permute.xlu1 %4064 }
 0x18e   : > { %v15266_v29 = vld [vmem:[#allocation2 + $0x27c] ss:$0 sps:$4 sm:$0x11]   ;;  %v17273_v55 = vld [vmem:[#allocation2 + $0x80] sm:$0xff]   ;;  %v17276_v45 = vld [vmem:[#allocation2 + $0x94] sm:$0xff]   ;;  %2740 = vst.msk [vmem:[#allocation3 + $0x138] sm:$0xff] %vm2700_vm10, %v15348_v33  ;;  %v4838_v15 = vsel %vm4815_vm12, %v4836_v24, %v4837_v11 }
 0x18f   : > { %v3973_v41 = vsel %vm3341_vm9, %v3968_v50, %v3972_v14  ;;  %v3976_v43 = vor.u32 %v3974_v30, %v3972_v14  ;;  %v3978_v44 = vshll.u32 %v15266_v29, 16  ;;  %v15296_v34 = vld [vmem:[#allocation2 + $0x74] ss:$0 sps:$4 sm:$0x11]   ;;  %4214 = vst.msk [vmem:[#allocation3 + $0x138] sm:$0xff] %vm4174_vm11, %v4061_v39  ;;  %v4839_v21 = vrot.slane %v15291_v31, 1 }
 0x190   : > { %4106 = vrot.lane.b32.xlu0 %v3973_v41, %s16004_s12  ;;  %v15352_v46 = vld [vmem:[#allocation2 + $0x190] sm:$0xff]   ;;  %v4841_v47 = vrot.slane %v15294_v25, 1  ;;  %v4835_v50 = vsel %vm4815_vm12, %v4832_v22, %v4834_v54  ;;  %v4846_v23 = vrot.slane %v15299_v36, 1  ;;  %v4847_v20 = vrot.slane %v17273_v55, 1  ;;  %v15353_v12 = vld [vmem:[#allocation2 + $0x198] sm:$0xff]   ;;  %v15310_v42 = vld [vmem:[#allocation2 + $0xa8] sm:$0xff]  }
 0x191   : > { %v3980_v57 = vrot.slane %v3978_v44, 1  ;;  %2741 = vst.msk [vmem:[#allocation3 + $0x140] sm:$0xff] %vm2700_vm10, %v15352_v46  ;;  %v15301_v30 = vld [vmem:[#allocation2 + $0x88] ss:$0 sps:$4 sm:$0x11]   ;;  %v4852_v7 = vrot.slane %v17276_v45, 1  ;;  %v4840_v29 = vsel %vm4815_vm12, %v4837_v11, %v4839_v21  ;;  %v4067_v44 = vpop.permute.xlu0 %4066  ;;  %v4069_v59 = vpop.permute.xlu1 %4068 }
 0x192   : > { %4215 = vst.msk [vmem:[#allocation3 + $0x140] sm:$0xff] %vm4174_vm11, %v4063_v52  ;;  %v4843_v14 = vsel %vm4815_vm12, %v4841_v47, %v4842_v4  ;;  %v15304_v35 = vld [vmem:[#allocation2 + $0x8c] sm:$0xfe]   ;;  %v4844_v41 = vrot.slane %v15296_v34, 1  ;;  %v15309_v38 = vld [vmem:[#allocation2 + $0xa0] sm:$0xfe]  }
 0x193   : > { %v3981_v19 = vsel %vm3341_vm9, %v3976_v43, %v3980_v57  ;;  %2742 = vst.msk [vmem:[#allocation3 + $0x148] sm:$0xff] %vm2700_vm10, %v15353_v12  ;;  %v15357_v43 = vld [vmem:[#allocation2 + $0x1a4] sm:$0xff]   ;;  %v4851_v49 = vrot.slane %v15304_v35, 1  ;;  %v15306_v53 = vld [vmem:[#allocation2 + $0x9c] ss:$0 sps:$4 sm:$0x11]  }
 0x194   : > { %4976 = vrot.lane.b32.xlu0 %v4818_v48, %s16005_s13  ;;  %4108 = vrot.lane.b32.xlu1 %v3981_v19, %s16004_s12  ;;  %4216 = vst.msk [vmem:[#allocation3 + $0x148] sm:$0xff] %vm4174_vm11, %v4065_v16  ;;  %v4848_v48 = vsel %vm4815_vm12, %v4846_v23, %v4847_v20  ;;  %v17299_v56 = vld [vmem:[#allocation2 + $0xbc] sm:$0xff]   ;;  %v4845_v57 = vsel %vm4815_vm12, %v4842_v4, %v4844_v41  ;;  %v4849_v58 = vrot.slane %v15301_v30, 1  ;;  %v15358_v61 = vld [vmem:[#allocation2 + $0x1ac] sm:$0xff]   ;;  %v4857_v0 = vrot.slane %v15310_v42, 1  ;;  %v17313_v26 = vld [vmem:[#allocation2 + $0xe4] sm:$0xff]  }
 0x195   : > { %2743 = vst.msk [vmem:[#allocation3 + $0x150] sm:$0xff] %vm2700_vm10, %v15357_v43  ;;  %v17303_v19 = vld [vmem:[#allocation2 + $0xd0] sm:$0xff]   ;;  %2744 = vst.msk [vmem:[#allocation3 + $0x158] sm:$0xff] %vm2700_vm10, %v15358_v61  ;;  %v15319_v13 = vld [vmem:[#allocation2 + $0xc8] sm:$0xfe]   ;;  %v4071_v5 = vpop.permute.xlu0 %4070  ;;  %v4854_v22 = vrot.slane %v15306_v53, 1 }
 0x196   : > { %4217 = vst.msk [vmem:[#allocation3 + $0x150] sm:$0xff] %vm4174_vm11, %v4067_v44  ;;  %v15311_v6 = vld [vmem:[#allocation2 + $0xb0] ss:$0 sps:$4 sm:$0x11]   ;;  %v15314_v8 = vld [vmem:[#allocation2 + $0xb4] sm:$0xfe]   ;;  %v4850_v17 = vsel %vm4815_vm12, %v4847_v20, %v4849_v58 }
 0x197   : > { %4218 = vst.msk [vmem:[#allocation3 + $0x158] sm:$0xff] %vm4174_vm11, %v4069_v59  ;;  %v15362_v62 = vld [vmem:[#allocation2 + $0x1b8] sm:$0xff]   ;;  %v4862_v27 = vrot.slane %v17299_v56, 1  ;;  %v4861_v31 = vrot.slane %v15314_v8, 1  ;;  %v4867_v25 = vrot.slane %v17303_v19, 1  ;;  %v4855_v18 = vsel %vm4815_vm12, %v4852_v7, %v4854_v22  ;;  %v15367_v24 = vld [vmem:[#allocation2 + $0x1cc] sm:$0xff]  }
 0x198   : > { %4980 = vrot.lane.b32.xlu0 %v4823_v63, %s16005_s13  ;;  %4978 = vrot.lane.b32.xlu1 %v4820_v60, %s16005_s13  ;;  %v4856_v63 = vrot.slane %v15309_v38, 1  ;;  %v4853_v60 = vsel %vm4815_vm12, %v4851_v49, %v4852_v7  ;;  %2745 = vst.msk [vmem:[#allocation3 + $0x160] sm:$0xff] %vm2700_vm10, %v15362_v62  ;;  %v4859_v11 = vrot.slane %v15311_v6, 1  ;;  %v15316_v3 = vld [vmem:[#allocation2 + $0xc4] ss:$0 sps:$4 sm:$0x11]  }
 0x199   : > { %4219 = vst.msk [vmem:[#allocation3 + $0x160] sm:$0xff] %vm4174_vm11, %v4071_v5  ;;  %v4075_v33 = vpop.permute.xlu0 %4074  ;;  %v15321_v39 = vld [vmem:[#allocation2 + $0xd8] ss:$0 sps:$4 sm:$0x11]   ;;  %v4863_v54 = vsel %vm4815_vm12, %v4861_v31, %v4862_v27  ;;  %v4864_v45 = vrot.slane %v15316_v3, 1  ;;  %v4872_v4 = vrot.slane %v17313_v26, 1 }
 0x19a   : > { %v4858_v32 = vsel %vm4815_vm12, %v4856_v63, %v4857_v0  ;;  %v17326_v55 = vld [vmem:[#allocation2 + $0xf8] sm:$0xff]   ;;  %2747 = vst.msk [vmem:[#allocation3 + $0x170] sm:$0xff] %vm2700_vm10, %v15367_v24  ;;  %v4860_v36 = vsel %vm4815_vm12, %v4857_v0, %v4859_v11  ;;  %v15326_v46 = vld [vmem:[#allocation2 + $0xec] ss:$0 sps:$4 sm:$0x11]   ;;  %v4869_v20 = vrot.slane %v15321_v39, 1 }
 0x19b   : > { %4221 = vst.msk [vmem:[#allocation3 + $0x170] sm:$0xff] %vm4174_vm11, %v4075_v33  ;;  %v15368_v52 = vld [vmem:[#allocation2 + $0x1d4] sm:$0xff]   ;;  %v4865_v23 = vsel %vm4815_vm12, %v4862_v27, %v4864_v45  ;;  %v4874_v30 = vrot.slane %v15326_v46, 1  ;;  %v4877_v7 = vrot.slane %v17326_v55, 1  ;;  %v15335_v12 = vld [vmem:[#allocation2 + $0x10c] sm:$0xff]   ;;  %v15340_v53 = vld [vmem:[#allocation2 + $0x120] sm:$0xff]  }
 0x19c   : > { %4984 = vrot.lane.b32.xlu0 %v4828_v10, %s16005_s13  ;;  %4982 = vrot.lane.b32.xlu1 %v4825_v9, %s16005_s13  ;;  %v15363_v10 = vld [vmem:[#allocation2 + $0x1c0] sm:$0xff]   ;;  %v4073_v9 = vpop.permute.xlu1 %4072  ;;  %2748 = vst.msk [vmem:[#allocation3 + $0x178] sm:$0xff] %vm2700_vm10, %v15368_v52  ;;  %v4870_v44 = vsel %vm4815_vm12, %v4867_v25, %v4869_v20  ;;  %v4882_v38 = vrot.slane %v15335_v12, 1  ;;  %v15339_v49 = vld [vmem:[#allocation2 + $0x118] sm:$0xfe]   ;;  %v4887_v6 = vrot.slane %v15340_v53, 1 }
 0x19d   : > { %2746 = vst.msk [vmem:[#allocation3 + $0x168] sm:$0xff] %vm2700_vm10, %v15363_v10  ;;  %v15331_v35 = vld [vmem:[#allocation2 + $0x100] ss:$0 sps:$4 sm:$0x11]   ;;  %v15334_v43 = vld [vmem:[#allocation2 + $0x104] sm:$0xfe]   ;;  %v4875_v19 = vsel %vm4815_vm12, %v4872_v4, %v4874_v30 }
 0x19e   : > { %4220 = vst.msk [vmem:[#allocation3 + $0x168] sm:$0xff] %vm4174_vm11, %v4073_v9  ;;  %v4079_v16 = vpop.permute.xlu0 %4078  ;;  %v4881_v59 = vrot.slane %v15334_v43, 1  ;;  %v15377_v58 = vld [vmem:[#allocation2 + $0x1f4] sm:$0xff]   ;;  %v4879_v63 = vrot.slane %v15331_v35, 1  ;;  %v15378_v0 = vld [vmem:[#allocation2 + $0x1fc] sm:$0xff]   ;;  %v17355_v8 = vld [vmem:[#allocation2 + $0x148] sm:$0xff]  }
 0x19f   : > { %2751 = vst.msk [vmem:[#allocation3 + $0x190] sm:$0xff] %vm2700_vm10, %v15377_v58  ;;  %2752 = vst.msk [vmem:[#allocation3 + $0x198] sm:$0xff] %vm2700_vm10, %v15378_v0  ;;  %v4886_v5 = vrot.slane %v15339_v49, 1  ;;  %v17361_v22 = vld [vmem:[#allocation2 + $0x15c] sm:$0xff]   ;;  %v15382_v10 = vld [vmem:[#allocation2 + $0x208] sm:$0xff]   ;;  %v4897_v11 = vrot.slane %v17355_v8, 1 }
 0x1a0   : > { %4988 = vrot.lane.b32.xlu0 %v4833_v28, %s16005_s13  ;;  %4986 = vrot.lane.b32.xlu1 %v4830_v51, %s16005_s13  ;;  %v4866_v28 = vrot.slane %v15319_v13, 1  ;;  %v15324_v51 = vld [vmem:[#allocation2 + $0xdc] sm:$0xfe]   ;;  %v4077_v34 = vpop.permute.xlu1 %4076  ;;  %v4883_v13 = vsel %vm4815_vm12, %v4881_v59, %v4882_v38  ;;  %v4880_v62 = vsel %vm4815_vm12, %v4877_v7, %v4879_v63  ;;  %2753 = vst.msk [vmem:[#allocation3 + $0x1a0] sm:$0xff] %vm2700_vm10, %v15382_v10  ;;  %v4902_v3 = vrot.slane %v17361_v22, 1  ;;  %v15365_v20 = vld [vmem:[#allocation2 + $0x184] sm:$0xff]  }
 0x1a1   : > { %v4871_v47 = vrot.slane %v15324_v51, 1  ;;  %4222 = vst.msk [vmem:[#allocation3 + $0x178] sm:$0xff] %vm4174_vm11, %v4077_v34  ;;  %v15349_v31 = vld [vmem:[#allocation2 + $0x140] sm:$0xfe]   ;;  %v17373_v51 = vld [vmem:[#allocation2 + $0x170] sm:$0xff]   ;;  %v17387_v30 = vld [vmem:[#allocation2 + $0x198] sm:$0xff]  }
 0x1a2   : > { %v4868_v21 = vsel %vm4815_vm12, %v4866_v28, %v4867_v25  ;;  %v4888_v25 = vsel %vm4815_vm12, %v4886_v5, %v4887_v6  ;;  %v15383_v28 = vld [vmem:[#allocation2 + $0x210] sm:$0xff]   ;;  %v4896_v55 = vrot.slane %v15349_v31, 1  ;;  %v15356_v52 = vld [vmem:[#allocation2 + $0x164] ss:$0 sps:$4 sm:$0x11]   ;;  %v4917_v59 = vrot.slane %v17387_v30, 1 }
 0x1a3   : > { %v4873_v42 = vsel %vm4815_vm12, %v4871_v47, %v4872_v4  ;;  %v15351_v39 = vld [vmem:[#allocation2 + $0x150] ss:$0 sps:$4 sm:$0x11]   ;;  %2754 = vst.msk [vmem:[#allocation3 + $0x1a8] sm:$0xff] %vm2700_vm10, %v15383_v28  ;;  %v15354_v4 = vld [vmem:[#allocation2 + $0x154] sm:$0xfe]  }
 0x1a4   : > { %4992 = vrot.lane.b32.xlu0 %v4838_v15, %s16005_s13  ;;  %4990 = vrot.lane.b32.xlu1 %v4835_v50, %s16005_s13  ;;  %v15329_v15 = vld [vmem:[#allocation2 + $0xf0] sm:$0xfe]   ;;  %v15372_v50 = vld [vmem:[#allocation2 + $0x1e0] sm:$0xff]   ;;  %v4081_v41 = vpop.permute.xlu1 %4080  ;;  %v15359_v12 = vld [vmem:[#allocation2 + $0x168] sm:$0xfe]  }
 0x1a5   : > { %2749 = vst.msk [vmem:[#allocation3 + $0x180] sm:$0xff] %vm2700_vm10, %v15372_v50  ;;  %v15388_v47 = vld [vmem:[#allocation2 + $0x224] sm:$0xff]   ;;  %v4899_v50 = vrot.slane %v15351_v39, 1  ;;  %v17391_v35 = vld [vmem:[#allocation2 + $0x1ac] sm:$0xff]   ;;  %v15364_v49 = vld [vmem:[#allocation2 + $0x17c] sm:$0xfe]  }
 0x1a6   : > { %4223 = vst.msk [vmem:[#allocation3 + $0x180] sm:$0xff] %vm4174_vm11, %v4079_v16  ;;  %v4901_v16 = vrot.slane %v15354_v4, 1  ;;  %v4922_v58 = vrot.slane %v17391_v35, 1  ;;  %v4911_v0 = vrot.slane %v15364_v49, 1  ;;  %v15380_v22 = vld [vmem:[#allocation2 + $0x1c0] sm:$0xff]   ;;  %v15402_v10 = vld [vmem:[#allocation2 + $0x258] sm:$0xff]  }
 0x1a7   : > { %2756 = vst.msk [vmem:[#allocation3 + $0x1b8] sm:$0xff] %vm2700_vm10, %v15388_v47  ;;  %v15371_v8 = vld [vmem:[#allocation2 + $0x1a0] ss:$0 sps:$4 sm:$0x11]   ;;  %2761 = vst.msk [vmem:[#allocation3 + $0x1e0] sm:$0xff] %vm2700_vm10, %v15402_v10  ;;  %v4927_v28 = vrot.slane %v15380_v22, 1 }
 0x1a8   : > { %4996 = vrot.lane.b32.xlu0 %v4843_v14, %s16005_s13  ;;  %4994 = vrot.lane.b32.xlu1 %v4840_v29, %s16005_s13  ;;  %v4876_v14 = vrot.slane %v15329_v15, 1  ;;  %v15373_v29 = vld [vmem:[#allocation2 + $0x1e8] sm:$0xff]   ;;  %v4903_v43 = vsel %vm4815_vm12, %v4901_v16, %v4902_v3  ;;  %v15376_v31 = vld [vmem:[#allocation2 + $0x1b4] ss:$0 sps:$4 sm:$0x11]  }
 0x1a9   : > { %2750 = vst.msk [vmem:[#allocation3 + $0x188] sm:$0xff] %vm2700_vm10, %v15373_v29  ;;  %v4904_v29 = vrot.slane %v15356_v52, 1  ;;  %v15407_v4 = vld [vmem:[#allocation2 + $0x26c] sm:$0xff]   ;;  %v15386_v16 = vld [vmem:[#allocation2 + $0x1dc] ss:$0 sps:$4 sm:$0x11]  }
 0x1aa   : > { %4224 = vst.msk [vmem:[#allocation3 + $0x188] sm:$0xff] %vm4174_vm11, %v4081_v41  ;;  %v4878_v56 = vsel %vm4815_vm12, %v4876_v14, %v4877_v7  ;;  %v4083_v61 = vpop.permute.xlu0 %4082  ;;  %v15361_v14 = vld [vmem:[#allocation2 + $0x178] ss:$0 sps:$4 sm:$0x11]   ;;  %v4934_v30 = vrot.slane %v15386_v16, 1 }
 0x1ab   : > { %4225 = vst.msk [vmem:[#allocation3 + $0x190] sm:$0xff] %vm4174_vm11, %v4083_v61  ;;  %v15397_v61 = vld [vmem:[#allocation2 + $0x244] sm:$0xff]   ;;  %v4909_v63 = vrot.slane %v15361_v14, 1  ;;  %v15415_v16 = vld [vmem:[#allocation2 + $0x258] sm:$0xfe]  }
 0x1ac   : > { %5000 = vrot.lane.b32.xlu0 %v4848_v48, %s16005_s13  ;;  %4998 = vrot.lane.b32.xlu1 %v4845_v57, %s16005_s13  ;;  %v15336_v48 = vld [vmem:[#allocation2 + $0x114] ss:$0 sps:$4 sm:$0x11]   ;;  %2759 = vst.msk [vmem:[#allocation3 + $0x1d0] sm:$0xff] %vm2700_vm10, %v15397_v61  ;;  %2763 = vst.msk [vmem:[#allocation3 + $0x1f0] sm:$0xff] %vm2700_vm10, %v15407_v4 }
 0x1ad   : > { %v17350_v57 = vld [vmem:[#allocation2 + $0x134] sm:$0xff]   ;;  %v4884_v27 = vrot.slane %v15336_v48, 1  ;;  %v4900_v48 = vsel %vm4815_vm12, %v4897_v11, %v4899_v50  ;;  %v15412_v4 = vld [vmem:[#allocation2 + $0x244] sm:$0xfe]  }
 0x1ae   : > { %v4892_v9 = vrot.slane %v17350_v57, 1  ;;  %v15366_v57 = vld [vmem:[#allocation2 + $0x18c] ss:$0 sps:$4 sm:$0x11]  }
 0x1af   : > { %v4885_v24 = vsel %vm4815_vm12, %v4882_v38, %v4884_v27  ;;  %v15393_v38 = vld [vmem:[#allocation2 + $0x238] sm:$0xff]   ;;  %v4914_v27 = vrot.slane %v15366_v57, 1 }
 0x1b0   : > { %5004 = vrot.lane.b32.xlu0 %v4853_v60, %s16005_s13  ;;  %5002 = vrot.lane.b32.xlu1 %v4850_v17, %s16005_s13  ;;  %v15341_v60 = vld [vmem:[#allocation2 + $0x128] ss:$0 sps:$4 sm:$0x11]   ;;  %v15344_v17 = vld [vmem:[#allocation2 + $0x12c] sm:$0xfe]   ;;  %v4085_v26 = vpop.permute.xlu1 %4084  ;;  %2758 = vst.msk [vmem:[#allocation3 + $0x1c8] sm:$0xff] %vm2700_vm10, %v15393_v38 }
 0x1b1   : > { %4226 = vst.msk [vmem:[#allocation3 + $0x198] sm:$0xff] %vm4174_vm11, %v4085_v26  ;;  %v4889_v33 = vrot.slane %v15341_v60, 1  ;;  %v15369_v60 = vld [vmem:[#allocation2 + $0x190] sm:$0xfe]  }
 0x1b3   : > { %v4890_v34 = vsel %vm4815_vm12, %v4887_v6, %v4889_v33  ;;  %v4905_v6 = vsel %vm4815_vm12, %v4902_v3, %v4904_v29  ;;  %v15403_v3 = vld [vmem:[#allocation2 + $0x260] sm:$0xff]   ;;  %v15379_v33 = vld [vmem:[#allocation2 + $0x1b8] sm:$0xfe]  }
 0x1b4   : > { %5008 = vrot.lane.b32.xlu0 %v4858_v32, %s16005_s13  ;;  %5006 = vrot.lane.b32.xlu1 %v4855_v18, %s16005_s13  ;;  %v15346_v32 = vld [vmem:[#allocation2 + $0x13c] ss:$0 sps:$4 sm:$0x11]   ;;  %v4891_v18 = vrot.slane %v15344_v17, 1  ;;  %v4916_v17 = vrot.slane %v15369_v60, 1  ;;  %2762 = vst.msk [vmem:[#allocation3 + $0x1e8] sm:$0xff] %vm2700_vm10, %v15403_v3 }
 0x1b5   : > { %v4894_v46 = vrot.slane %v15346_v32, 1  ;;  %v4919_v32 = vrot.slane %v15371_v8, 1  ;;  %v15389_v29 = vld [vmem:[#allocation2 + $0x1e0] sm:$0xfe]   ;;  %v15399_v60 = vld [vmem:[#allocation2 + $0x208] sm:$0xfe]  }
 0x1b6   : > { %v4893_v45 = vsel %vm4815_vm12, %v4891_v18, %v4892_v9  ;;  %v4918_v26 = vsel %vm4815_vm12, %v4916_v17, %v4917_v59  ;;  %v15401_v8 = vld [vmem:[#allocation2 + $0x218] ss:$0 sps:$4 sm:$0x11]  }
 0x1b7   : > { %v4895_v7 = vsel %vm4815_vm12, %v4892_v9, %v4894_v46  ;;  %v15374_v9 = vld [vmem:[#allocation2 + $0x1a4] sm:$0xfe]   ;;  %v15408_v46 = vld [vmem:[#allocation2 + $0x274] sm:$0xff]   ;;  %v4949_v22 = vrot.slane %v15401_v8, 1 }
 0x1b8   : > { %5012 = vrot.lane.b32.xlu0 %v4863_v54, %s16005_s13  ;;  %5010 = vrot.lane.b32.xlu1 %v4860_v36, %s16005_s13  ;;  %v4087_v54 = vpop.permute.xlu0 %4086  ;;  %v15387_v36 = vld [vmem:[#allocation2 + $0x21c] sm:$0xff]   ;;  %2764 = vst.msk [vmem:[#allocation3 + $0x1f8] sm:$0xff] %vm2700_vm10, %v15408_v46  ;;  %v15424_v8 = vld [vmem:[#allocation2 + $0x30] sm:$0xff]  }
 0x1b9   : > { %4227 = vst.msk [vmem:[#allocation3 + $0x1a0] sm:$0xff] %vm4174_vm11, %v4087_v54  ;;  %v4089_v15 = vpop.permute.xlu1 %4088  ;;  %v15381_v54 = vld [vmem:[#allocation2 + $0x1c8] ss:$0 sps:$4 sm:$0x11]  }
 0x1ba   : > { %2755 = vst.msk [vmem:[#allocation3 + $0x1b0] sm:$0xff] %vm2700_vm10, %v15387_v36  ;;  %v4920_v36 = vsel %vm4815_vm12, %v4917_v59, %v4919_v32  ;;  %v4929_v50 = vrot.slane %v15381_v54, 1  ;;  %v15396_v59 = vld [vmem:[#allocation2 + $0x204] ss:$0 sps:$4 sm:$0x11]  }
 0x1bb   : > { %4228 = vst.msk [vmem:[#allocation3 + $0x1a8] sm:$0xff] %vm4174_vm11, %v4089_v15  ;;  %v15416_v54 = vld [vmem:[#allocation2 + $0x260] sm:$0xff]  }
 0x1bc   : > { %5016 = vrot.lane.b32.xlu0 %v4868_v21, %s16005_s13  ;;  %5014 = vrot.lane.b32.xlu1 %v4865_v23, %s16005_s13  ;;  %v4907_v21 = vrot.slane %v17373_v51, 1  ;;  %v4898_v23 = vsel %vm4815_vm12, %v4896_v55, %v4897_v11  ;;  %v4921_v11 = vrot.slane %v15374_v9, 1  ;;  %v4924_v51 = vrot.slane %v15376_v31, 1  ;;  %v15390_v55 = vld [vmem:[#allocation2 + $0x1e8] sm:$0xff]   ;;  %v15404_v9 = vld [vmem:[#allocation2 + $0x21c] sm:$0xfe]  }
 0x1bd   : > { %v4930_v35 = vsel %vm4815_vm12, %v4927_v28, %v4929_v50  ;;  %v4951_v31 = vrot.slane %v15404_v9, 1  ;;  %v15428_v9 = vld [vmem:[#allocation2 + $0x58] sm:$0xff]  }
 0x1be   : > { %v4923_v39 = vsel %vm4815_vm12, %v4921_v11, %v4922_v58  ;;  %v4925_v47 = vsel %vm4815_vm12, %v4922_v58, %v4924_v51  ;;  %v15413_v11 = vld [vmem:[#allocation2 + $0x24c] sm:$0xff]  }
 0x1c0   : > { %5020 = vrot.lane.b32.xlu0 %v4873_v42, %s16005_s13  ;;  %5018 = vrot.lane.b32.xlu1 %v4870_v44, %s16005_s13  ;;  %v4091_v41 = vpop.permute.xlu0 %4090  ;;  %v15392_v42 = vld [vmem:[#allocation2 + $0x230] sm:$0xff]   ;;  %v4906_v44 = vrot.slane %v15359_v12, 1 }
 0x1c1   : > { %4229 = vst.msk [vmem:[#allocation3 + $0x1b0] sm:$0xff] %vm4174_vm11, %v4091_v41 }
 0x1c2   : > { %2757 = vst.msk [vmem:[#allocation3 + $0x1c0] sm:$0xff] %vm2700_vm10, %v15392_v42  ;;  %v15391_v42 = vld [vmem:[#allocation2 + $0x1f0] ss:$0 sps:$4 sm:$0x11]  }
 0x1c3   : > { %v4939_v38 = vrot.slane %v15391_v42, 1 }
 0x1c4   : > { %5024 = vrot.lane.b32.xlu0 %v4878_v56, %s16005_s13  ;;  %5022 = vrot.lane.b32.xlu1 %v4875_v19, %s16005_s13  ;;  %v4912_v56 = vrot.slane %v15365_v20, 1  ;;  %v4908_v19 = vsel %vm4815_vm12, %v4906_v44, %v4907_v21  ;;  %v4937_v20 = vrot.slane %v15390_v55, 1  ;;  %v15400_v44 = vld [vmem:[#allocation2 + $0x210] sm:$0xff]  }
 0x1c5   : > { %v4947_v61 = vrot.slane %v15400_v44, 1  ;;  %v15420_v44 = vld [vmem:[#allocation2 + $0x27c] ss:$0 sps:$4 sm:$0x11]  }
 0x1c6   : > { %v4913_v5 = vsel %vm4815_vm12, %v4911_v0, %v4912_v56  ;;  %v4915_v18 = vsel %vm4815_vm12, %v4912_v56, %v4914_v27  ;;  %v15394_v56 = vld [vmem:[#allocation2 + $0x1f4] sm:$0xfe]   ;;  %v4940_v0 = vsel %vm4815_vm12, %v4937_v20, %v4939_v38 }
 0x1c7   : > { %v4941_v58 = vrot.slane %v15394_v56, 1  ;;  %v4950_v32 = vsel %vm4815_vm12, %v4947_v61, %v4949_v22  ;;  %v15426_v22 = vld [vmem:[#allocation2 + $0x44] sm:$0xff]  }
 0x1c8   : > { %5028 = vrot.lane.b32.xlu0 %v4883_v13, %s16005_s13  ;;  %5026 = vrot.lane.b32.xlu1 %v4880_v62, %s16005_s13  ;;  %v15398_v13 = vld [vmem:[#allocation2 + $0x24c] sm:$0xff]   ;;  %v4910_v62 = vsel %vm4815_vm12, %v4907_v21, %v4909_v63  ;;  %v15405_v63 = vld [vmem:[#allocation2 + $0x224] sm:$0xff]  }
 0x1c9   : > { %2760 = vst.msk [vmem:[#allocation3 + $0x1d8] sm:$0xff] %vm2700_vm10, %v15398_v13  ;;  %v15384_v21 = vld [vmem:[#allocation2 + $0x1cc] sm:$0xfe]   ;;  %v4946_v13 = vrot.slane %v15399_v60, 1  ;;  %vm13048_vm10 = vcmask 523264  }
 0x1cb   : > { %v4948_v27 = vsel %vm4815_vm12, %v4946_v13, %v4947_v61  ;;  %v15425_v13 = vld [vmem:[#allocation2 + $0x3c] sm:$0xff]  }
 0x1cc   : > { %5032 = vrot.lane.b32.xlu0 %v4888_v25, %s16005_s13  ;;  %5030 = vrot.lane.b32.xlu1 %v4885_v24, %s16005_s13  ;;  %v15385_v24 = vld [vmem:[#allocation2 + $0x1d4] sm:$0xff]  }
 0x1d0   : > { %5036 = vrot.lane.b32.xlu0 %v4893_v45, %s16005_s13  ;;  %5034 = vrot.lane.b32.xlu1 %v4890_v34, %s16005_s13  ;;  %v4926_v45 = vrot.slane %v15379_v33, 1  ;;  %v4932_v34 = vrot.slane %v15385_v24, 1  ;;  %v15411_v24 = vld [vmem:[#allocation2 + $0x240] ss:$0 sps:$4 sm:$0x11]  }
 0x1d1   : > { %v4959_v55 = vrot.slane %v15411_v24, 1  ;;  %v15433_v24 = vld [vmem:[#allocation2 + $0x8c] sm:$0xff]  }
 0x1d2   : > { %v4928_v15 = vsel %vm4815_vm12, %v4926_v45, %v4927_v28  ;;  %v4935_v49 = vsel %vm4815_vm12, %v4932_v34, %v4934_v30  ;;  %v15409_v28 = vld [vmem:[#allocation2 + $0x230] sm:$0xfe]   ;;  %v15417_v30 = vld [vmem:[#allocation2 + $0x268] ss:$0 sps:$4 sm:$0x11]  }
 0x1d3   : > { %v4956_v51 = vrot.slane %v15409_v28, 1  ;;  %v15432_v28 = vld [vmem:[#allocation2 + $0x80] sm:$0xff]  }
 0x1d4   : > { %5040 = vrot.lane.b32.xlu0 %v4898_v23, %s16005_s13  ;;  %5038 = vrot.lane.b32.xlu1 %v4895_v7, %s16005_s13  ;;  %v4931_v23 = vrot.slane %v15384_v21, 1  ;;  %v15395_v7 = vld [vmem:[#allocation2 + $0x1fc] sm:$0xff]   ;;  %v15419_v21 = vld [vmem:[#allocation2 + $0x274] sm:$0xff]  }
 0x1d6   : > { %v4933_v14 = vsel %vm4815_vm12, %v4931_v23, %v4932_v34  ;;  %v15414_v34 = vld [vmem:[#allocation2 + $0x254] ss:$0 sps:$4 sm:$0x11]   ;;  %v4967_v23 = vrot.slane %v15416_v54, 1  ;;  %v15435_v54 = vld [vmem:[#allocation2 + $0xa0] sm:$0xff]  }
 0x1d7   : > { %v4964_v50 = vrot.slane %v15414_v34, 1 }
 0x1d8   : > { %5044 = vrot.lane.b32.xlu0 %v4903_v43, %s16005_s13  ;;  %5042 = vrot.lane.b32.xlu1 %v4900_v48, %s16005_s13  ;;  %v4936_v43 = vrot.slane %v15389_v29, 1  ;;  %v4942_v48 = vrot.slane %v15395_v7, 1  ;;  %v4966_v7 = vrot.slane %v15415_v16, 1  ;;  %v15418_v29 = vld [vmem:[#allocation2 + $0x26c] sm:$0xfe]   ;;  %v15441_v16 = vld [vmem:[#allocation2 + $0xdc] sm:$0xff]  }
 0x1d9   : > { %v4971_v38 = vrot.slane %v15418_v29, 1  ;;  %v15445_v29 = vld [vmem:[#allocation2 + $0x104] sm:$0xff]  }
 0x1dc   : > { %5048 = vrot.lane.b32.xlu0 %v4908_v19, %s16005_s13  ;;  %5046 = vrot.lane.b32.xlu1 %v4905_v6, %s16005_s13  ;;  %v4944_v19 = vrot.slane %v15396_v59, 1  ;;  %v4943_v6 = vsel %vm4815_vm12, %v4941_v58, %v4942_v48 }
 0x1de   : > { %v4945_v17 = vsel %vm4815_vm12, %v4942_v48, %v4944_v19  ;;  %v4974_v48 = vrot.slane %v15420_v44, 1  ;;  %v15447_v44 = vld [vmem:[#allocation2 + $0x118] sm:$0xff]  }
 0x1df   : > { %v4093_v53 = vpop.permute.xlu1 %4092 }
 0x1e0   : > { %4230 = vst.msk [vmem:[#allocation3 + $0x1b8] sm:$0xff] %vm4174_vm11, %v4093_v53  ;;  %5052 = vrot.lane.b32.xlu0 %v4913_v5, %s16005_s13  ;;  %5050 = vrot.lane.b32.xlu1 %v4910_v62, %s16005_s13  ;;  %v4938_v53 = vsel %vm4815_vm12, %v4936_v43, %v4937_v20  ;;  %v4952_v5 = vrot.slane %v15405_v63, 1  ;;  %v15410_v62 = vld [vmem:[#allocation2 + $0x238] sm:$0xff]   ;;  %v4968_v43 = vsel %vm4815_vm12, %v4966_v7, %v4967_v23  ;;  %v15443_v7 = vld [vmem:[#allocation2 + $0xf0] sm:$0xff]  }
 0x1e1   : > { %v15422_v63 = vld [vmem:[#allocation2 + $0x1c] sm:$0xff]  }
 0x1e2   : > { %v4953_v3 = vsel %vm4815_vm12, %v4951_v31, %v4952_v5 }
 0x1e4   : > { %5056 = vrot.lane.b32.xlu0 %v4918_v26, %s16005_s13  ;;  %5054 = vrot.lane.b32.xlu1 %v4915_v18, %s16005_s13  ;;  %v15406_v26 = vld [vmem:[#allocation2 + $0x22c] ss:$0 sps:$4 sm:$0x11]  }
 0x1e5   : > { %v4954_v18 = vrot.slane %v15406_v26, 1  ;;  %v15429_v26 = vld [vmem:[#allocation2 + $0x64] sm:$0xff]  }
 0x1e6   : > { %v4095_v25 = vpop.permute.xlu0 %4094 }
 0x1e7   : > { %4231 = vst.msk [vmem:[#allocation3 + $0x1c0] sm:$0xff] %vm4174_vm11, %v4095_v25  ;;  %v4957_v25 = vrot.slane %v15410_v62, 1  ;;  %v4955_v33 = vsel %vm4815_vm12, %v4952_v5, %v4954_v18  ;;  %v15427_v62 = vld [vmem:[#allocation2 + $0x50] sm:$0xff]   ;;  %v15431_v18 = vld [vmem:[#allocation2 + $0x78] sm:$0xff]  }
 0x1e8   : > { %5060 = vrot.lane.b32.xlu0 %v4923_v39, %s16005_s13  ;;  %5058 = vrot.lane.b32.xlu1 %v4920_v36, %s16005_s13  ;;  %v4962_v36 = vrot.slane %v15413_v11, 1 }
 0x1e9   : > { %v4958_v45 = vsel %vm4815_vm12, %v4956_v51, %v4957_v25  ;;  %v4960_v46 = vsel %vm4815_vm12, %v4957_v25, %v4959_v55  ;;  %v15430_v25 = vld [vmem:[#allocation2 + $0x6c] sm:$0xff]   ;;  %v15434_v51 = vld [vmem:[#allocation2 + $0x94] sm:$0xff]  }
 0x1ec   : > { %5064 = vrot.lane.b32.xlu0 %v4928_v15, %s16005_s13  ;;  %5062 = vrot.lane.b32.xlu1 %v4925_v47, %s16005_s13  ;;  %v4961_v15 = vrot.slane %v15412_v4, 1  ;;  %v15437_v4 = vld [vmem:[#allocation2 + $0xb4] sm:$0xff]  }
 0x1ee   : > { %v4097_v52 = vpop.permute.xlu1 %4096  ;;  %v4963_v20 = vsel %vm4815_vm12, %v4961_v15, %v4962_v36  ;;  %v15439_v15 = vld [vmem:[#allocation2 + $0xc8] sm:$0xff]  }
 0x1ef   : > { %4232 = vst.msk [vmem:[#allocation3 + $0x1c8] sm:$0xff] %vm4174_vm11, %v4097_v52 }
 0x1f0   : > { %5068 = vrot.lane.b32.xlu0 %v4933_v14, %s16005_s13  ;;  %5066 = vrot.lane.b32.xlu1 %v4930_v35, %s16005_s13  ;;  %v4969_v35 = vrot.slane %v15417_v30, 1  ;;  %v15442_v30 = vld [vmem:[#allocation2 + $0xe4] sm:$0xff]  }
 0x1f3   : > { %v4099_v12 = vpop.permute.xlu0 %4098 }
 0x1f4   : > { %4233 = vst.msk [vmem:[#allocation3 + $0x1d0] sm:$0xff] %vm4174_vm11, %v4099_v12  ;;  %v4101_v41 = vpop.permute.xlu1 %4100  ;;  %5072 = vrot.lane.b32.xlu0 %v4938_v53, %s16005_s13  ;;  %5070 = vrot.lane.b32.xlu1 %v4935_v49, %s16005_s13  ;;  %v4965_v12 = vsel %vm4815_vm12, %v4962_v36, %v4964_v50  ;;  %v4970_v49 = vsel %vm4815_vm12, %v4967_v23, %v4969_v35  ;;  %v15440_v50 = vld [vmem:[#allocation2 + $0xd0] sm:$0xff]   ;;  %v15444_v35 = vld [vmem:[#allocation2 + $0xf8] sm:$0xff]  }
 0x1f5   : > { %4234 = vst.msk [vmem:[#allocation3 + $0x1d8] sm:$0xff] %vm4174_vm11, %v4101_v41  ;;  %v4972_v41 = vrot.slane %v15419_v21, 1 }
 0x1f7   : > { %v4973_v56 = vsel %vm4815_vm12, %v4971_v38, %v4972_v41  ;;  %v4975_v58 = vsel %vm4815_vm12, %v4972_v41, %v4974_v48  ;;  %v389_v38 = vld [vmem:[%s16134_s11 + $0x1f0] sm:$0xf]  ;;  %v390_v48 = vld [vmem:[%s16134_s11 + $0x1f4] sm:$0xf] }
 0x1f8   : > { %v4103_v57 = vpop.permute.xlu0 %4102  ;;  %5076 = vrot.lane.b32.xlu0 %v4943_v6, %s16005_s13  ;;  %5074 = vrot.lane.b32.xlu1 %v4940_v0, %s16005_s13  ;;  %v15423_v0 = vld [vmem:[#allocation2 + $0x28] sm:$0xff]  }
 0x1f9   : > { %4235 = vst.msk [vmem:[#allocation3 + $0x1e0] sm:$0xff] %vm4174_vm11, %v4103_v57  ;;  %v15421_v57 = vld [vmem:[#allocation2 + $0x14] sm:$0xff]  }
 0x1fa   : > { %v4105_v10 = vpop.permute.xlu1 %4104 }
 0x1fb   : > { %4236 = vst.msk [vmem:[#allocation3 + $0x1e8] sm:$0xff] %vm4174_vm11, %v4105_v10 }
 0x1fc   : > { %5080 = vrot.lane.b32.xlu0 %v4948_v27, %s16005_s13  ;;  %5078 = vrot.lane.b32.xlu1 %v4945_v17, %s16005_s13 }
 0x200   : > { %5082 = vrot.lane.b32.xlu1 %v4950_v32, %s16005_s13  ;;  %5084 = vrot.lane.b32.xlu0 %v4953_v3, %s16005_s13 }
 0x202   : > { %v4107_v39 = vpop.permute.xlu0 %4106 }
 0x203   : > { %4237 = vst.msk [vmem:[#allocation3 + $0x1f0] sm:$0xff] %vm4174_vm11, %v4107_v39 }
 0x204   : > { %5086 = vrot.lane.b32.xlu1 %v4955_v33, %s16005_s13  ;;  %5088 = vrot.lane.b32.xlu0 %v4958_v45, %s16005_s13  ;;  %v15436_v45 = vld [vmem:[#allocation2 + $0xa8] sm:$0xff]  }
 0x206   : > { %v4977_v52 = vpop.permute.xlu0 %4976  ;;  %v4109_v47 = vpop.permute.xlu1 %4108 }
 0x207   : > { %5169 = vst.msk [vmem:[#allocation3] sm:$0xff] %vm5168_vm13, %v4977_v52  ;;  %v15438_v52 = vld [vmem:[#allocation2 + $0xbc] sm:$0xff]  }
 0x208   : > { %4238 = vst.msk [vmem:[#allocation3 + $0x1f8] sm:$0xff] %vm4174_vm11, %v4109_v47  ;;  %5090 = vrot.lane.b32.xlu1 %v4960_v46, %s16005_s13  ;;  %5092 = vrot.lane.b32.xlu0 %v4963_v20, %s16005_s13  ;;  %vm12919_vm11 = vcmask 519168  }
 0x20a   : > { %v4981_v14 = vpop.permute.xlu0 %4980  ;;  %v4979_v42 = vpop.permute.xlu1 %4978 }
 0x20b   : > { %5171 = vst.msk [vmem:[#allocation3 + $0x10] sm:$0xff] %vm5168_vm13, %v4981_v14  ;;  %5170 = vst.msk [vmem:[#allocation3 + $0x8] sm:$0xff] %vm5168_vm13, %v4979_v42 }
 0x20c   : > { %5094 = vrot.lane.b32.xlu1 %v4965_v12, %s16005_s13  ;;  %5096 = vrot.lane.b32.xlu0 %v4968_v43, %s16005_s13  ;;  %v15446_v43 = vld [vmem:[#allocation2 + $0x10c] sm:$0xff]  }
 0x20e   : > { %v4985_v53 = vpop.permute.xlu0 %4984  ;;  %v4983_v59 = vpop.permute.xlu1 %4982 }
 0x20f   : > { %5173 = vst.msk [vmem:[#allocation3 + $0x20] sm:$0xff] %vm5168_vm13, %v4985_v53  ;;  %5172 = vst.msk [vmem:[#allocation3 + $0x18] sm:$0xff] %vm5168_vm13, %v4983_v59  ;;  %v1703_v59 = vshrl.u32 %v389_v38, 16 }
 0x210   : > { %5098 = vrot.lane.b32.xlu1 %v4970_v49, %s16005_s13  ;;  %5100 = vrot.lane.b32.xlu0 %v4973_v56, %s16005_s13  ;;  %v505_v49 = vld [vmem:[#allocation2 + $0x280] sm:$0x1] }
 0x211   : > { %v506_v56 = vsel %vm16102_vm3, 0, %v505_v49  ;;  %v15464_v49 = vld [vmem:[#allocation2 + $0x1c0] sm:$0xff]  }
 0x212   : > { %v4989_v61 = vpop.permute.xlu0 %4988  ;;  %v4987_v19 = vpop.permute.xlu1 %4986  ;;  %507 = vst [vmem:[#allocation2 + $0x280] sm:$0x1] %v506_v56 }
 0x213   : > { %5175 = vst.msk [vmem:[#allocation3 + $0x30] sm:$0xff] %vm5168_vm13, %v4989_v61  ;;  %5174 = vst.msk [vmem:[#allocation3 + $0x28] sm:$0xff] %vm5168_vm13, %v4987_v19  ;;  %v15448_v19 = vld [vmem:[#allocation2 + $0x120] sm:$0xff]  }
 0x214   : > { %5102 = vrot.lane.b32.xlu1 %v4975_v58, %s16005_s13  ;;  %5681 = vrot.lane.b32.xlu0 %v15421_v57, %s16006_s14  ;;  %v1711_v57 = vshrl.u32 %v390_v48, 16  ;;  %v391_v58 = vld [vmem:[%s16134_s11 + $0x1f8] sm:$0xf]  ;;  %s19794_s13 = scalar_lea.hbm %s19842_s6, %s14782_s8 }
 0x216   : > { %v4993_v6 = vpop.permute.xlu0 %4992  ;;  %v4991_v60 = vpop.permute.xlu1 %4990 }
 0x217   : > { %5177 = vst.msk [vmem:[#allocation3 + $0x40] sm:$0xff] %vm5168_vm13, %v4993_v6  ;;  %5176 = vst.msk [vmem:[#allocation3 + $0x38] sm:$0xff] %vm5168_vm13, %v4991_v60  ;;  %v392_v6 = vld [vmem:[%s16134_s11 + $0x1fc] sm:$0xf]  ;;  %v1720_v60 = vshrl.u32 %v391_v58, 16  ;;  %s13817_s11 = sshll.u32 %s19901_s7, 2 }
 0x218   : > { %5683 = vrot.lane.b32.xlu1 %v15422_v63, %s16006_s14  ;;  %5685 = vrot.lane.b32.xlu0 %v15423_v0, %s16006_s14  ;;  %v1706_v63 = vshll.u32 %v389_v38, 16  ;;  %v1714_v0 = vshll.u32 %v390_v48, 16 }
 0x21a   : > { %v4997_v5 = vpop.permute.xlu0 %4996  ;;  %v4995_v17 = vpop.permute.xlu1 %4994 }
 0x21b   : > { %5179 = vst.msk [vmem:[#allocation3 + $0x50] sm:$0xff] %vm5168_vm13, %v4997_v5  ;;  %5178 = vst.msk [vmem:[#allocation3 + $0x48] sm:$0xff] %vm5168_vm13, %v4995_v17  ;;  %v1705_v5 = vrot.slane %v1703_v59, 7  ;;  %v1713_v17 = vrot.slane %v1711_v57, 7  ;;  %v15466_v57 = vld [vmem:[#allocation2 + $0x1d4] sm:$0xff]  }
 0x21c   : > { %5687 = vrot.lane.b32.xlu1 %v15424_v8, %s16006_s14  ;;  %5689 = vrot.lane.b32.xlu0 %v15425_v13, %s16006_s14  ;;  %v1723_v8 = vshll.u32 %v391_v58, 16  ;;  %v15449_v13 = vld [vmem:[#allocation2 + $0x12c] sm:$0xff]   ;;  %v15467_v58 = vld [vmem:[#allocation2 + $0x1e0] sm:$0xff]  }
 0x21e   : > { %v5001_v27 = vpop.permute.xlu0 %5000  ;;  %v4999_v10 = vpop.permute.xlu1 %4998 }
 0x21f   : > { %5181 = vst.msk [vmem:[#allocation3 + $0x60] sm:$0xff] %vm5168_vm13, %v5001_v27  ;;  %5180 = vst.msk [vmem:[#allocation3 + $0x58] sm:$0xff] %vm5168_vm13, %v4999_v10  ;;  %v1732_v27 = vshll.u32 %v392_v6, 16 }
 0x220   : > { %5691 = vrot.lane.b32.xlu1 %v15426_v22, %s16006_s14  ;;  %5693 = vrot.lane.b32.xlu0 %v15427_v62, %s16006_s14  ;;  %v1729_v22 = vshrl.u32 %v392_v6, 16  ;;  %v1722_v62 = vrot.slane %v1720_v60, 7 }
 0x222   : > { %v5005_v32 = vpop.permute.xlu0 %5004  ;;  %v5003_v31 = vpop.permute.xlu1 %5002 }
 0x223   : > { %5183 = vst.msk [vmem:[#allocation3 + $0x70] sm:$0xff] %vm5168_vm13, %v5005_v32  ;;  %5182 = vst.msk [vmem:[#allocation3 + $0x68] sm:$0xff] %vm5168_vm13, %v5003_v31  ;;  %v1718_v32 = vrot.slane %v1713_v17, 4 }
 0x224   : > { %5695 = vrot.lane.b32.xlu1 %v15428_v9, %s16006_s14  ;;  %5697 = vrot.lane.b32.xlu0 %v15429_v26, %s16006_s14  ;;  %v1709_v9 = vrot.slane %v1705_v5, 4  ;;  %v1716_v26 = vor.u32 %v1714_v0, %v1713_v17  ;;  %v15469_v0 = vld [vmem:[#allocation2 + $0x1f4] sm:$0xff]  }
 0x226   : > { %v5009_v11 = vpop.permute.xlu0 %5008  ;;  %v5007_v3 = vpop.permute.xlu1 %5006 }
 0x227   : > { %5185 = vst.msk [vmem:[#allocation3 + $0x80] sm:$0xff] %vm5168_vm13, %v5009_v11  ;;  %5184 = vst.msk [vmem:[#allocation3 + $0x78] sm:$0xff] %vm5168_vm13, %v5007_v3  ;;  %v1727_v11 = vrot.slane %v1722_v62, 4  ;;  %v17544_v3 = vrot.slane %v1729_v22, 7  ;;  %v15472_v22 = vld [vmem:[#allocation2 + $0x210] sm:$0xff]  }
 0x228   : > { %5699 = vrot.lane.b32.xlu1 %v15430_v25, %s16006_s14  ;;  %5701 = vrot.lane.b32.xlu0 %v15431_v18, %s16006_s14  ;;  %v1708_v25 = vor.u32 %v1706_v63, %v1705_v5  ;;  %v1725_v18 = vor.u32 %v1723_v8, %v1722_v62  ;;  %v15468_v63 = vld [vmem:[#allocation2 + $0x1e8] sm:$0xff]   ;;  %v15470_v8 = vld [vmem:[#allocation2 + $0x1fc] sm:$0xff]  }
 0x229   : > { %v15473_v62 = vld [vmem:[#allocation2 + $0x21c] sm:$0xff]  }
 0x22a   : > { %v5013_v33 = vpop.permute.xlu0 %5012  ;;  %v5011_v39 = vpop.permute.xlu1 %5010 }
 0x22b   : > { %5187 = vst.msk [vmem:[#allocation3 + $0x90] sm:$0xff] %vm5168_vm13, %v5013_v33  ;;  %5186 = vst.msk [vmem:[#allocation3 + $0x88] sm:$0xff] %vm5168_vm13, %v5011_v39  ;;  %v15451_v33 = vld [vmem:[#allocation2 + $0x140] sm:$0xff]   ;;  %v1726_v39 = vsel %vm16156_vm8, %v1718_v32, %v1725_v18 }
 0x22c   : > { %5703 = vrot.lane.b32.xlu1 %v15432_v28, %s16006_s14  ;;  %5705 = vrot.lane.b32.xlu0 %v15433_v24, %s16006_s14  ;;  %v15450_v28 = vld [vmem:[#allocation2 + $0x134] sm:$0xff]   ;;  %v1717_v24 = vsel %vm16156_vm8, %v1709_v9, %v1716_v26  ;;  %2183 = vst.msk [vmem:[#allocation2 + $0x288] sm:$0xf] %vm393_vm0, %v1726_v39  ;;  %v15474_v9 = vld [vmem:[#allocation2 + $0x224] sm:$0xff]  }
 0x22d   : > { %2182 = vst.msk [vmem:[#allocation2 + $0x284] sm:$0xf] %vm393_vm0, %v1717_v24  ;;  %v15475_v26 = vld [vmem:[#allocation2 + $0x230] sm:$0xff]   ;;  %v15487_v32 = vld [vmem:[#allocation2 + $0x24] ss:$0 sps:$4 sm:$0x11]  }
 0x22e   : > { %v5017_v55 = vpop.permute.xlu0 %5016  ;;  %v5015_v36 = vpop.permute.xlu1 %5014  ;;  %v15477_v24 = vld [vmem:[#allocation2 + $0x244] sm:$0xff]  }
 0x22f   : > { %5189 = vst.msk [vmem:[#allocation3 + $0xa0] sm:$0xff] %vm5168_vm13, %v5017_v55  ;;  %5188 = vst.msk [vmem:[#allocation3 + $0x98] sm:$0xff] %vm5168_vm13, %v5015_v36  ;;  %v2179_v55 = vld [vmem:[#allocation2 + $0x280] sm:$0xf] }
 0x230   : > { %5707 = vrot.lane.b32.xlu1 %v15434_v51, %s16006_s14  ;;  %5709 = vrot.lane.b32.xlu0 %v15435_v54, %s16006_s14  ;;  %v1734_v51 = vor.u32 %v1732_v27, %v17544_v3 }
 0x232   : > { %v5021_v34 = vpop.permute.xlu0 %5020  ;;  %v5019_v46 = vpop.permute.xlu1 %5018 }
 0x233   : > { %5191 = vst.msk [vmem:[#allocation3 + $0xb0] sm:$0xff] %vm5168_vm13, %v5021_v34  ;;  %5190 = vst.msk [vmem:[#allocation3 + $0xa8] sm:$0xff] %vm5168_vm13, %v5019_v46  ;;  %v15452_v34 = vld [vmem:[#allocation2 + $0x148] sm:$0xff]   ;;  %v15453_v46 = vld [vmem:[#allocation2 + $0x154] sm:$0xff]  }
 0x234   : > { %5711 = vrot.lane.b32.xlu1 %v15436_v45, %s16006_s14  ;;  %5713 = vrot.lane.b32.xlu0 %v15437_v4, %s16006_s14  ;;  %v2180_v45 = vsel %vm16146_vm7, %v1708_v25, %v2179_v55  ;;  %v1735_v4 = vsel %vm16156_vm8, %v1727_v11, %v1734_v51  ;;  %v17611_v11 = vld [vmem:[#allocation2 + $0x1c] sm:$0xff]   ;;  %v15478_v51 = vld [vmem:[#allocation2 + $0x24c] sm:$0xff]   ;;  %vm11511_vm7 = vcmask 220352   ;;  %vm11662_vm8 = vcmask 220160  }
 0x235   : > { %2181 = vst [vmem:[#allocation2 + $0x280] sm:$0xf] %v2180_v45  ;;  %2184 = vst.msk [vmem:[#allocation2 + $0x28c] sm:$0xf] %vm393_vm0, %v1735_v4  ;;  %v6522_v55 = vshll.u32 %v17611_v11, 16  ;;  %v17619_v45 = vld [vmem:[#allocation2 + $0x28] sm:$0xff]  }
 0x236   : > { %v5025_v21 = vpop.permute.xlu0 %5024  ;;  %v5023_v47 = vpop.permute.xlu1 %5022  ;;  %v17623_v4 = vld [vmem:[#allocation2 + $0x30] sm:$0xff]   ;;  %vm11856_vm0 = vcmask 1045504  }
 0x237   : > { %5193 = vst.msk [vmem:[#allocation3 + $0xc0] sm:$0xff] %vm5168_vm13, %v5025_v21  ;;  %5192 = vst.msk [vmem:[#allocation3 + $0xb8] sm:$0xff] %vm5168_vm13, %v5023_v47 }
 0x238   : > { %5715 = vrot.lane.b32.xlu1 %v15438_v52, %s16006_s14  ;;  %5717 = vrot.lane.b32.xlu0 %v15439_v15, %s16006_s14 }
 0x23a   : > { %v5029_v23 = vpop.permute.xlu0 %5028  ;;  %v5027_v20 = vpop.permute.xlu1 %5026 }
 0x23b   : > { %5195 = vst.msk [vmem:[#allocation3 + $0xd0] sm:$0xff] %vm5168_vm13, %v5029_v23  ;;  %5194 = vst.msk [vmem:[#allocation3 + $0xc8] sm:$0xff] %vm5168_vm13, %v5027_v20 }
 0x23c   : > { %5719 = vrot.lane.b32.xlu1 %v15440_v50, %s16006_s14  ;;  %5721 = vrot.lane.b32.xlu0 %v15441_v16, %s16006_s14  ;;  %v15456_v50 = vld [vmem:[#allocation2 + $0x170] sm:$0xff]   ;;  %v15457_v16 = vld [vmem:[#allocation2 + $0x17c] sm:$0xff]  }
 0x23e   : > { %v5033_v12 = vpop.permute.xlu0 %5032  ;;  %v5031_v14 = vpop.permute.xlu1 %5030 }
 0x23f   : > { %5197 = vst.msk [vmem:[#allocation3 + $0xe0] sm:$0xff] %vm5168_vm13, %v5033_v12  ;;  %5196 = vst.msk [vmem:[#allocation3 + $0xd8] sm:$0xff] %vm5168_vm13, %v5031_v14 }
 0x240   : > { %5723 = vrot.lane.b32.xlu1 %v15442_v30, %s16006_s14  ;;  %5725 = vrot.lane.b32.xlu0 %v15443_v7, %s16006_s14  ;;  %v15458_v30 = vld [vmem:[#allocation2 + $0x184] sm:$0xff]   ;;  %v15459_v7 = vld [vmem:[#allocation2 + $0x190] sm:$0xff]  }
 0x242   : > { %v5037_v41 = vpop.permute.xlu0 %5036  ;;  %v5035_v42 = vpop.permute.xlu1 %5034 }
 0x243   : > { %5199 = vst.msk [vmem:[#allocation3 + $0xf0] sm:$0xff] %vm5168_vm13, %v5037_v41  ;;  %5198 = vst.msk [vmem:[#allocation3 + $0xe8] sm:$0xff] %vm5168_vm13, %v5035_v42 }
 0x244   : > { %5727 = vrot.lane.b32.xlu1 %v15444_v35, %s16006_s14  ;;  %5729 = vrot.lane.b32.xlu0 %v15445_v29, %s16006_s14  ;;  %v15460_v35 = vld [vmem:[#allocation2 + $0x198] sm:$0xff]   ;;  %v15461_v29 = vld [vmem:[#allocation2 + $0x1a4] sm:$0xff]  }
 0x246   : > { %v5041_v53 = vpop.permute.xlu0 %5040  ;;  %v5039_v61 = vpop.permute.xlu1 %5038 }
 0x247   : > { %5201 = vst.msk [vmem:[#allocation3 + $0x100] sm:$0xff] %vm5168_vm13, %v5041_v53  ;;  %5200 = vst.msk [vmem:[#allocation3 + $0xf8] sm:$0xff] %vm5168_vm13, %v5039_v61  ;;  %v15465_v53 = vld [vmem:[#allocation2 + $0x1cc] sm:$0xff]  }
 0x248   : > { %5731 = vrot.lane.b32.xlu1 %v15446_v43, %s16006_s14  ;;  %5733 = vrot.lane.b32.xlu0 %v15447_v44, %s16006_s14  ;;  %v15462_v43 = vld [vmem:[#allocation2 + $0x1ac] sm:$0xff]   ;;  %v15463_v44 = vld [vmem:[#allocation2 + $0x1b8] sm:$0xff]  }
 0x24a   : > { %v5045_v10 = vpop.permute.xlu0 %5044  ;;  %v5043_v31 = vpop.permute.xlu1 %5042 }
 0x24b   : > { %5203 = vst.msk [vmem:[#allocation3 + $0x110] sm:$0xff] %vm5168_vm13, %v5045_v10  ;;  %5202 = vst.msk [vmem:[#allocation3 + $0x108] sm:$0xff] %vm5168_vm13, %v5043_v31  ;;  %v17609_v31 = vld [vmem:[#allocation2 + $0x14] sm:$0xff]  }
 0x24c   : > { %5735 = vrot.lane.b32.xlu1 %v15448_v19, %s16006_s14  ;;  %5737 = vrot.lane.b32.xlu0 %v15449_v13, %s16006_s14  ;;  %v15471_v13 = vld [vmem:[#allocation2 + $0x208] sm:$0xff]  }
 0x24e   : > { %v5049_v54 = vpop.permute.xlu0 %5048  ;;  %v5047_v36 = vpop.permute.xlu1 %5046 }
 0x24f   : > { %5205 = vst.msk [vmem:[#allocation3 + $0x120] sm:$0xff] %vm5168_vm13, %v5049_v54  ;;  %5204 = vst.msk [vmem:[#allocation3 + $0x118] sm:$0xff] %vm5168_vm13, %v5047_v36  ;;  %v6517_v54 = vshll.u32 %v17609_v31, 16  ;;  %v6530_v36 = vshll.u32 %v15487_v32, 16 }
 0x250   : > { %5739 = vrot.lane.b32.xlu1 %v15450_v28, %s16006_s14  ;;  %5741 = vrot.lane.b32.xlu0 %v15451_v33, %s16006_s14  ;;  %v15476_v28 = vld [vmem:[#allocation2 + $0x238] sm:$0xff]   ;;  %v15499_v32 = vld [vmem:[#allocation2 + $0x74] ss:$0 sps:$4 sm:$0x11]  }
 0x252   : > { %v5053_v52 = vpop.permute.xlu0 %5052  ;;  %v5051_v15 = vpop.permute.xlu1 %5050 }
 0x253   : > { %5207 = vst.msk [vmem:[#allocation3 + $0x130] sm:$0xff] %vm5168_vm13, %v5053_v52  ;;  %5206 = vst.msk [vmem:[#allocation3 + $0x128] sm:$0xff] %vm5168_vm13, %v5051_v15  ;;  %v6515_v52 = vshrl.u32 %v17609_v31, 16  ;;  %v17628_v15 = vld [vmem:[#allocation2 + $0x3c] sm:$0xff]  }
 0x254   : > { %5743 = vrot.lane.b32.xlu1 %v15452_v34, %s16006_s14  ;;  %5745 = vrot.lane.b32.xlu0 %v15453_v46, %s16006_s14  ;;  %v15490_v34 = vld [vmem:[#allocation2 + $0x38] ss:$0 sps:$4 sm:$0x11]  }
 0x255   : > { %v15479_v46 = vld [vmem:[#allocation2 + $0x258] sm:$0xff]  }
 0x256   : > { %v5057_v21 = vpop.permute.xlu0 %5056  ;;  %v5055_v47 = vpop.permute.xlu1 %5054 }
 0x257   : > { %5209 = vst.msk [vmem:[#allocation3 + $0x140] sm:$0xff] %vm5168_vm13, %v5057_v21  ;;  %5208 = vst.msk [vmem:[#allocation3 + $0x138] sm:$0xff] %vm5168_vm13, %v5055_v47 }
 0x258   : > { %5747 = vrot.lane.b32.xlu1 %v15454_v37, %s16006_s14  ;;  %5749 = vrot.lane.b32.xlu0 %v15455_v40, %s16006_s14  ;;  %v6526_v37 = vshrl.u32 %v17611_v11, 16  ;;  %v17631_v40 = vld [vmem:[#allocation2 + $0x44] sm:$0xff]  }
 0x25a   : > { %v5061_v23 = vpop.permute.xlu0 %5060  ;;  %v5059_v20 = vpop.permute.xlu1 %5058 }
 0x25b   : > { %5211 = vst.msk [vmem:[#allocation3 + $0x150] sm:$0xff] %vm5168_vm13, %v5061_v23  ;;  %5210 = vst.msk [vmem:[#allocation3 + $0x148] sm:$0xff] %vm5168_vm13, %v5059_v20  ;;  %v6519_v23 = vrot.slane %v6517_v54, 1  ;;  %v6524_v20 = vrot.slane %v6522_v55, 1 }
 0x25c   : > { %5751 = vrot.lane.b32.xlu1 %v15456_v50, %s16006_s14  ;;  %5753 = vrot.lane.b32.xlu0 %v15457_v16, %s16006_s14  ;;  %v15480_v50 = vld [vmem:[#allocation2 + $0x260] sm:$0xff]   ;;  %v15481_v16 = vld [vmem:[#allocation2 + $0x26c] sm:$0xff]  }
 0x25d   : > { %v6528_v11 = vor.u32 %v6526_v37, %v6524_v20  ;;  %v6610_v37 = vshll.u32 %v15499_v32, 16 }
 0x25e   : > { %v5065_v12 = vpop.permute.xlu0 %5064  ;;  %v5063_v14 = vpop.permute.xlu1 %5062 }
 0x25f   : > { %5213 = vst.msk [vmem:[#allocation3 + $0x160] sm:$0xff] %vm5168_vm13, %v5065_v12  ;;  %5212 = vst.msk [vmem:[#allocation3 + $0x158] sm:$0xff] %vm5168_vm13, %v5063_v14  ;;  %v6535_v12 = vshrl.u32 %v17619_v45, 16  ;;  %v6542_v14 = vshll.u32 %v17623_v4, 16 }
 0x260   : > { %5755 = vrot.lane.b32.xlu1 %v15458_v30, %s16006_s14  ;;  %5757 = vrot.lane.b32.xlu0 %v15459_v7, %s16006_s14  ;;  %v17633_v30 = vrot.slane %v6530_v36, 1  ;;  %v6537_v7 = vshll.u32 %v17619_v45, 16  ;;  %v17675_v36 = vld [vmem:[#allocation2 + $0x80] sm:$0xff]   ;;  %v15502_v45 = vld [vmem:[#allocation2 + $0x88] ss:$0 sps:$4 sm:$0x11]  }
 0x262   : > { %v5069_v41 = vpop.permute.xlu0 %5068  ;;  %v5067_v42 = vpop.permute.xlu1 %5066 }
 0x263   : > { %5215 = vst.msk [vmem:[#allocation3 + $0x170] sm:$0xff] %vm5168_vm13, %v5069_v41  ;;  %5214 = vst.msk [vmem:[#allocation3 + $0x168] sm:$0xff] %vm5168_vm13, %v5067_v42  ;;  %v6546_v41 = vshrl.u32 %v17623_v4, 16  ;;  %v6557_v42 = vshll.u32 %v17628_v15, 16 }
 0x264   : > { %5759 = vrot.lane.b32.xlu1 %v15460_v35, %s16006_s14  ;;  %5761 = vrot.lane.b32.xlu0 %v15461_v29, %s16006_s14  ;;  %v6550_v35 = vshll.u32 %v15490_v34, 16  ;;  %v15493_v29 = vld [vmem:[#allocation2 + $0x4c] ss:$0 sps:$4 sm:$0x11]  }
 0x266   : > { %v5073_v38 = vpop.permute.xlu0 %5072  ;;  %v5071_v48 = vpop.permute.xlu1 %5070 }
 0x267   : > { %5217 = vst.msk [vmem:[#allocation3 + $0x180] sm:$0xff] %vm5168_vm13, %v5073_v38  ;;  %5216 = vst.msk [vmem:[#allocation3 + $0x178] sm:$0xff] %vm5168_vm13, %v5071_v48  ;;  %v17645_v38 = vld [vmem:[#allocation2 + $0x50] sm:$0xff]  }
 0x268   : > { %5763 = vrot.lane.b32.xlu1 %v15462_v43, %s16006_s14  ;;  %5765 = vrot.lane.b32.xlu0 %v15463_v44, %s16006_s14  ;;  %v15496_v43 = vld [vmem:[#allocation2 + $0x60] ss:$0 sps:$4 sm:$0x11]   ;;  %v6562_v44 = vshll.u32 %v17631_v40, 16 }
 0x26a   : > { %v5077_v56 = vpop.permute.xlu0 %5076  ;;  %v5075_v59 = vpop.permute.xlu1 %5074 }
 0x26b   : > { %5219 = vst.msk [vmem:[#allocation3 + $0x190] sm:$0xff] %vm5168_vm13, %v5077_v56  ;;  %5218 = vst.msk [vmem:[#allocation3 + $0x188] sm:$0xff] %vm5168_vm13, %v5075_v59  ;;  %v17647_v56 = vld [vmem:[#allocation2 + $0x58] sm:$0xff]  }
 0x26c   : > { %5767 = vrot.lane.b32.xlu1 %v15464_v49, %s16006_s14  ;;  %5769 = vrot.lane.b32.xlu0 %v15465_v53, %s16006_s14  ;;  %v6539_v53 = vrot.slane %v6537_v7, 1  ;;  %v15482_v59 = vld [vmem:[#allocation2 + $0x274] sm:$0xff]  }
 0x26e   : > { %v5081_v61 = vpop.permute.xlu0 %5080  ;;  %v5079_v19 = vpop.permute.xlu1 %5078 }
 0x26f   : > { %5221 = vst.msk [vmem:[#allocation3 + $0x1a0] sm:$0xff] %vm5168_vm13, %v5081_v61  ;;  %5220 = vst.msk [vmem:[#allocation3 + $0x198] sm:$0xff] %vm5168_vm13, %v5079_v19  ;;  %v6555_v61 = vshrl.u32 %v17628_v15, 16  ;;  %v6566_v19 = vshrl.u32 %v17631_v40, 16  ;;  %v17686_v40 = vld [vmem:[#allocation2 + $0x8c] sm:$0xff]  }
 0x270   : > { %5771 = vrot.lane.b32.xlu1 %v15466_v57, %s16006_s14  ;;  %5773 = vrot.lane.b32.xlu0 %v15467_v58, %s16006_s14  ;;  %v6544_v57 = vrot.slane %v6542_v14, 1  ;;  %v17651_v58 = vrot.slane %v6550_v35, 1  ;;  %v6622_v14 = vshll.u32 %v17675_v36, 16  ;;  %v6630_v35 = vshll.u32 %v15502_v45, 16 }
 0x272   : > { %v5083_v6 = vpop.permute.xlu1 %5082  ;;  %v5085_v60 = vpop.permute.xlu0 %5084 }
 0x273   : > { %5222 = vst.msk [vmem:[#allocation3 + $0x1a8] sm:$0xff] %vm5168_vm13, %v5083_v6  ;;  %5223 = vst.msk [vmem:[#allocation3 + $0x1b0] sm:$0xff] %vm5168_vm13, %v5085_v60  ;;  %v6570_v6 = vshll.u32 %v15493_v29, 16  ;;  %v6559_v60 = vrot.slane %v6557_v42, 1 }
 0x274   : > { %5775 = vrot.lane.b32.xlu1 %v15468_v63, %s16006_s14  ;;  %5777 = vrot.lane.b32.xlu0 %v15469_v0, %s16006_s14  ;;  %v15483_v63 = vld [vmem:[#allocation2 + $0x280] sm:$0xff]   ;;  %v6520_v0 = vor.u32 %v6519_v23, %v6515_v52  ;;  %v17692_v23 = vld [vmem:[#allocation2 + $0x94] sm:$0xff]   ;;  %v15505_v29 = vld [vmem:[#allocation2 + $0x9c] ss:$0 sps:$4 sm:$0x11]  }
 0x275   : > { %v6572_v31 = vrot.slane %v6570_v6, 1  ;;  %v17712_v6 = vrot.slane %v6630_v35, 1  ;;  %v17754_v35 = vld [vmem:[#allocation2 + $0xd0] sm:$0xff]  }
 0x276   : > { %v5087_v5 = vpop.permute.xlu1 %5086  ;;  %v5089_v17 = vpop.permute.xlu0 %5088 }
 0x277   : > { %5224 = vst.msk [vmem:[#allocation3 + $0x1b8] sm:$0xff] %vm5168_vm13, %v5087_v5  ;;  %5225 = vst.msk [vmem:[#allocation3 + $0x1c0] sm:$0xff] %vm5168_vm13, %v5089_v17  ;;  %v6577_v5 = vshll.u32 %v17645_v38, 16 }
 0x278   : > { %5779 = vrot.lane.b32.xlu1 %v15470_v8, %s16006_s14  ;;  %5781 = vrot.lane.b32.xlu0 %v15471_v13, %s16006_s14  ;;  %v17657_v8 = vrot.slane %v6562_v44, 1  ;;  %v6575_v13 = vshrl.u32 %v17645_v38, 16  ;;  %v17703_v38 = vrot.slane %v6610_v37, 1 }
 0x27a   : > { %v5091_v27 = vpop.permute.xlu1 %5090  ;;  %v5093_v10 = vpop.permute.xlu0 %5092 }
 0x27b   : > { %5226 = vst.msk [vmem:[#allocation3 + $0x1c8] sm:$0xff] %vm5168_vm13, %v5091_v27  ;;  %5227 = vst.msk [vmem:[#allocation3 + $0x1d0] sm:$0xff] %vm5168_vm13, %v5093_v10  ;;  %v6582_v27 = vshll.u32 %v17647_v56, 16  ;;  %v6590_v10 = vshll.u32 %v15496_v43, 16 }
 0x27c   : > { %5783 = vrot.lane.b32.xlu1 %v15472_v22, %s16006_s14  ;;  %5785 = vrot.lane.b32.xlu0 %v15473_v62, %s16006_s14  ;;  %v15484_v62 = vld [vmem:[#allocation2 + $0x288] sm:$0xff]  }
 0x27d   : > { %v6584_v54 = vrot.slane %v6582_v27, 1  ;;  %v17679_v4 = vrot.slane %v6590_v10, 1  ;;  %v6650_v27 = vshll.u32 %v15505_v29, 16  ;;  %v17726_v10 = vld [vmem:[#allocation2 + $0xb4] sm:$0xff]  }
 0x27e   : > { %v5095_v25 = vpop.permute.xlu1 %5094  ;;  %v5097_v18 = vpop.permute.xlu0 %5096  ;;  %v15514_v29 = vld [vmem:[#allocation2 + $0xd8] ss:$0 sps:$4 sm:$0x11]  }
 0x27f   : > { %5228 = vst.msk [vmem:[#allocation3 + $0x1d8] sm:$0xff] %vm5168_vm13, %v5095_v25  ;;  %5229 = vst.msk [vmem:[#allocation3 + $0x1e0] sm:$0xff] %vm5168_vm13, %v5097_v18  ;;  %v6586_v25 = vshrl.u32 %v17647_v56, 16  ;;  %v6525_v18 = vsel %vm3341_vm9, %v6520_v0, %v6524_v20  ;;  %v6624_v0 = vrot.slane %v6622_v14, 1 }
 0x280   : > { %5787 = vrot.lane.b32.xlu1 %v15474_v9, %s16006_s14  ;;  %5789 = vrot.lane.b32.xlu0 %v15475_v26, %s16006_s14  ;;  %v17662_v9 = vld [vmem:[#allocation2 + $0x64] sm:$0xff]   ;;  %v17666_v26 = vld [vmem:[#allocation2 + $0x6c] sm:$0xff]  }
 0x281   : > { %v6597_v55 = vshll.u32 %v17662_v9, 16  ;;  %v6602_v34 = vshll.u32 %v17666_v26, 16  ;;  %v6595_v52 = vshrl.u32 %v17662_v9, 16  ;;  %v6606_v15 = vshrl.u32 %v17666_v26, 16  ;;  %v15512_v26 = vld [vmem:[#allocation2 + $0xc8] sm:$0xff]  }
 0x282   : > { %v5099_v33 = vpop.permute.xlu1 %5098  ;;  %v5101_v39 = vpop.permute.xlu0 %5100 }
 0x283   : > { %5230 = vst.msk [vmem:[#allocation3 + $0x1e8] sm:$0xff] %vm5168_vm13, %v5099_v33  ;;  %5231 = vst.msk [vmem:[#allocation3 + $0x1f0] sm:$0xff] %vm5168_vm13, %v5101_v39  ;;  %v17672_v33 = vld [vmem:[#allocation2 + $0x78] sm:$0xff]  }
 0x284   : > { %5791 = vrot.lane.b32.xlu1 %v15476_v28, %s16006_s14  ;;  %5793 = vrot.lane.b32.xlu0 %v15477_v24, %s16006_s14  ;;  %v6540_v28 = vor.u32 %v6539_v53, %v6535_v12  ;;  %v6579_v24 = vrot.slane %v6577_v5, 1  ;;  %v6599_v12 = vrot.slane %v6597_v55, 1  ;;  %v6615_v42 = vshrl.u32 %v17672_v33, 16  ;;  %v15508_v5 = vld [vmem:[#allocation2 + $0xb0] ss:$0 sps:$4 sm:$0x11]  }
 0x285   : > { %v6670_v56 = vshll.u32 %v15508_v5, 16  ;;  %v6706_v5 = vshrl.u32 %v17754_v35, 16 }
 0x286   : > { %v5103_v21 = vpop.permute.xlu1 %5102  ;;  %v5682_v47 = vpop.permute.xlu0 %5681  ;;  %v6580_v44 = vor.u32 %v6579_v24, %v6575_v13  ;;  %v6646_v13 = vshrl.u32 %v17692_v23, 16 }
 0x287   : > { %5232 = vst.msk [vmem:[#allocation3 + $0x1f8] sm:$0xff] %vm5168_vm13, %v5103_v21  ;;  %v6533_v21 = vsel %vm3341_vm9, %v6528_v11, %v17633_v30  ;;  %v6568_v30 = vor.u32 %v6566_v19, %v17657_v8 }
 0x288   : > { %5874 = vst.msk [vmem:[#allocation3] sm:$0xff] %vm5873_vm14, %v5682_v47  ;;  %5795 = vrot.lane.b32.xlu1 %v15478_v51, %s16006_s14  ;;  %5797 = vrot.lane.b32.xlu0 %v15479_v46, %s16006_s14  ;;  %v6548_v46 = vor.u32 %v6546_v41, %v6544_v57  ;;  %v6545_v47 = vsel %vm3341_vm9, %v6540_v28, %v6544_v57  ;;  %v6604_v41 = vrot.slane %v6602_v34, 1  ;;  %v6642_v57 = vshll.u32 %v17692_v23, 16 }
 0x28a   : > { %v5684_v48 = vpop.permute.xlu1 %5683  ;;  %v5686_v49 = vpop.permute.xlu0 %5685  ;;  %v6553_v43 = vsel %vm3341_vm9, %v6548_v46, %v17651_v58  ;;  %v6635_v58 = vshrl.u32 %v17686_v40, 16  ;;  %v6644_v32 = vrot.slane %v6642_v57, 1 }
 0x28b   : > { %5875 = vst.msk [vmem:[#allocation3 + $0x8] sm:$0xff] %vm5873_vm14, %v5684_v48  ;;  %5876 = vst.msk [vmem:[#allocation3 + $0x10] sm:$0xff] %vm5873_vm14, %v5686_v49  ;;  %v6626_v48 = vshrl.u32 %v17675_v36, 16  ;;  %v6608_v36 = vor.u32 %v6606_v15, %v6604_v41 }
 0x28c   : > { %5799 = vrot.lane.b32.xlu1 %v15480_v50, %s16006_s14  ;;  %5801 = vrot.lane.b32.xlu0 %v15481_v16, %s16006_s14  ;;  %v6560_v50 = vor.u32 %v6559_v60, %v6555_v61  ;;  %v6617_v16 = vshll.u32 %v17672_v33, 16  ;;  %v17710_v61 = vld [vmem:[#allocation2 + $0xa0] sm:$0xff]   ;;  %v17715_v60 = vld [vmem:[#allocation2 + $0xa8] sm:$0xff]  }
 0x28d   : > { %v6662_v24 = vshll.u32 %v17715_v60, 16  ;;  %v15511_v33 = vld [vmem:[#allocation2 + $0xc4] ss:$0 sps:$4 sm:$0x11]   ;;  %v6628_v15 = vor.u32 %v6626_v48, %v6624_v0 }
 0x28e   : > { %v5688_v17 = vpop.permute.xlu1 %5687  ;;  %v5690_v22 = vpop.permute.xlu0 %5689  ;;  %v6565_v49 = vsel %vm3341_vm9, %v6560_v50, %v17657_v8  ;;  %v6619_v53 = vrot.slane %v6617_v16, 1  ;;  %v6573_v8 = vsel %vm3341_vm9, %v6568_v30, %v6572_v31  ;;  %v6655_v31 = vshrl.u32 %v17710_v61, 16  ;;  %v17760_v48 = vld [vmem:[#allocation2 + $0xe4] sm:$0xff]  }
 0x28f   : > { %5877 = vst.msk [vmem:[#allocation3 + $0x18] sm:$0xff] %vm5873_vm14, %v5688_v17  ;;  %5878 = vst.msk [vmem:[#allocation3 + $0x20] sm:$0xff] %vm5873_vm14, %v5690_v22  ;;  %v6585_v17 = vsel %vm3341_vm9, %v6580_v44, %v6584_v54  ;;  %v6588_v22 = vor.u32 %v6586_v25, %v6584_v54  ;;  %v17733_v25 = vld [vmem:[#allocation2 + $0xbc] sm:$0xff]   ;;  %v6664_v37 = vrot.slane %v6662_v24, 1  ;;  %v6697_v44 = vshll.u32 %v15512_v26, 16 }
 0x290   : > { %5803 = vrot.lane.b32.xlu1 %v15482_v59, %s16006_s14  ;;  %5805 = vrot.lane.b32.xlu0 %v15483_v63, %s16006_s14  ;;  %v6637_v59 = vshll.u32 %v17686_v40, 16  ;;  %v6620_v45 = vor.u32 %v6619_v53, %v6615_v42  ;;  %v6666_v40 = vshrl.u32 %v17715_v60, 16  ;;  %v6686_v50 = vshrl.u32 %v17733_v25, 16  ;;  %v17756_v42 = vld [vmem:[#allocation2 + $0xdc] sm:$0xff]  }
 0x291   : > { %v6593_v54 = vsel %vm3341_vm9, %v6588_v22, %v17679_v4  ;;  %v6682_v4 = vshll.u32 %v17733_v25, 16  ;;  %v6699_v23 = vrot.slane %v6697_v44, 1  ;;  %v15520_v22 = vld [vmem:[#allocation2 + $0x100] ss:$0 sps:$4 sm:$0x11]   ;;  %v6715_v25 = vshrl.u32 %v17756_v42, 16 }
 0x292   : > { %v5692_v39 = vpop.permute.xlu1 %5691  ;;  %v5694_v51 = vpop.permute.xlu0 %5693  ;;  %v6639_v9 = vrot.slane %v6637_v59, 1 }
 0x293   : > { %5879 = vst.msk [vmem:[#allocation3 + $0x28] sm:$0xff] %vm5873_vm14, %v5692_v39  ;;  %5880 = vst.msk [vmem:[#allocation3 + $0x30] sm:$0xff] %vm5873_vm14, %v5694_v51  ;;  %v6652_v39 = vrot.slane %v6650_v27, 1  ;;  %v6677_v51 = vshll.u32 %v17726_v10, 16  ;;  %v6684_v53 = vrot.slane %v6682_v4, 1 }
 0x294   : > { %5807 = vrot.lane.b32.xlu1 %v15484_v62, %s16006_s14  ;;  %7154 = vrot.lane.b32.xlu0 %v6525_v18, %s16007_s15  ;;  %v6600_v62 = vor.u32 %v6599_v12, %v6595_v52  ;;  %v6657_v18 = vshll.u32 %v17710_v61, 16  ;;  %v6625_v12 = vsel %vm3341_vm9, %v6620_v45, %v6624_v0  ;;  %v6640_v14 = vor.u32 %v6639_v9, %v6635_v58  ;;  %v17769_v0 = vld [vmem:[#allocation2 + $0xf0] sm:$0xff]   ;;  %s18490_s14 = scalar_lea.vmem %s19841_s5, %s13817_s11 }
 0x295   : > { %v6679_v16 = vrot.slane %v6677_v51, 1 }
 0x296   : > { %v5696_v20 = vpop.permute.xlu1 %5695  ;;  %v5698_v7 = vpop.permute.xlu0 %5697  ;;  %v6605_v55 = vsel %vm3341_vm9, %v6600_v62, %v6604_v41  ;;  %v6659_v52 = vrot.slane %v6657_v18, 1  ;;  %v6645_v57 = vsel %vm3341_vm9, %v6640_v14, %v6644_v32  ;;  %v6737_v18 = vshll.u32 %v17769_v0, 16 }
 0x297   : > { %5881 = vst.msk [vmem:[#allocation3 + $0x38] sm:$0xff] %vm5873_vm14, %v5696_v20  ;;  %5882 = vst.msk [vmem:[#allocation3 + $0x40] sm:$0xff] %vm5873_vm14, %v5698_v7  ;;  %v6690_v20 = vshll.u32 %v15511_v33, 16  ;;  %v6613_v7 = vsel %vm3341_vm9, %v6608_v36, %v17703_v38  ;;  %v6633_v38 = vsel %vm3341_vm9, %v6628_v15, %v17712_v6  ;;  %v6717_v6 = vshll.u32 %v17756_v42, 16 }
 0x298   : > { %7156 = vrot.lane.b32.xlu1 %v6533_v21, %s16007_s15  ;;  %7158 = vrot.lane.b32.xlu0 %v6545_v47, %s16007_s15  ;;  %v6675_v21 = vshrl.u32 %v17726_v10, 16  ;;  %v6672_v47 = vrot.slane %v6670_v56, 1  ;;  %v6660_v61 = vor.u32 %v6659_v52, %v6655_v31  ;;  %v17780_v10 = vld [vmem:[#allocation2 + $0xf8] sm:$0xff]   ;;  %v6726_v36 = vshrl.u32 %v17760_v48, 16 }
 0x299   : > { %v6692_v59 = vrot.slane %v6690_v20, 1  ;;  %v6719_v51 = vrot.slane %v6717_v6, 1  ;;  %v6746_v52 = vshrl.u32 %v17780_v10, 16  ;;  %v15523_v15 = vld [vmem:[#allocation2 + $0x114] ss:$0 sps:$4 sm:$0x11]  }
 0x29a   : > { %v5700_v19 = vpop.permute.xlu1 %5699  ;;  %v5702_v63 = vpop.permute.xlu0 %5701  ;;  %v6665_v9 = vsel %vm3341_vm9, %v6660_v61, %v6664_v37  ;;  %v6680_v31 = vor.u32 %v6679_v16, %v6675_v21  ;;  %v6750_v21 = vshll.u32 %v15520_v22, 16  ;;  %v17800_v16 = vld [vmem:[#allocation2 + $0x118] sm:$0xff]  }
 0x29b   : > { %5883 = vst.msk [vmem:[#allocation3 + $0x48] sm:$0xff] %vm5873_vm14, %v5700_v19  ;;  %5884 = vst.msk [vmem:[#allocation3 + $0x50] sm:$0xff] %vm5873_vm14, %v5702_v63  ;;  %v6668_v19 = vor.u32 %v6666_v40, %v6664_v37  ;;  %v6695_v63 = vshrl.u32 %v15512_v26, 16  ;;  %v6739_v40 = vrot.slane %v6737_v18, 1  ;;  %v17818_v61 = vld [vmem:[#allocation2 + $0x134] sm:$0xff]   ;;  %v6775_v22 = vshrl.u32 %v17800_v16, 16 }
 0x29c   : > { %7160 = vrot.lane.b32.xlu1 %v6553_v43, %s16007_s15  ;;  %7162 = vrot.lane.b32.xlu0 %v6565_v49, %s16007_s15  ;;  %v15517_v43 = vld [vmem:[#allocation2 + $0xec] ss:$0 sps:$4 sm:$0x11]   ;;  %v6648_v49 = vor.u32 %v6646_v13, %v6644_v32  ;;  %v6722_v13 = vshll.u32 %v17760_v48, 16  ;;  %v6685_v37 = vsel %vm3341_vm9, %v6680_v31, %v6684_v53 }
 0x29d   : > { %v6730_v27 = vshll.u32 %v15517_v43, 16  ;;  %v6673_v32 = vsel %vm3341_vm9, %v6668_v19, %v6672_v47  ;;  %v17797_v47 = vld [vmem:[#allocation2 + $0x10c] sm:$0xff]   ;;  %v15529_v19 = vld [vmem:[#allocation2 + $0x13c] ss:$0 sps:$4 sm:$0x11]  }
 0x29e   : > { %v5704_v11 = vpop.permute.xlu1 %5703  ;;  %v5706_v28 = vpop.permute.xlu0 %5705  ;;  %v6653_v62 = vsel %vm3341_vm9, %v6648_v49, %v6652_v39  ;;  %v6688_v39 = vor.u32 %v6686_v50, %v6684_v53  ;;  %v6770_v49 = vshll.u32 %v15523_v15, 16  ;;  %v6777_v53 = vshll.u32 %v17800_v16, 16 }
 0x29f   : > { %5885 = vst.msk [vmem:[#allocation3 + $0x58] sm:$0xff] %vm5873_vm14, %v5704_v11  ;;  %5886 = vst.msk [vmem:[#allocation3 + $0x60] sm:$0xff] %vm5873_vm14, %v5706_v28  ;;  %v17785_v11 = vld [vmem:[#allocation2 + $0x104] sm:$0xff]   ;;  %v6732_v45 = vrot.slane %v6730_v27, 1 }
 0x2a0   : > { %7164 = vrot.lane.b32.xlu1 %v6573_v8, %s16007_s15  ;;  %7166 = vrot.lane.b32.xlu0 %v6585_v17, %s16007_s15  ;;  %v6702_v8 = vshll.u32 %v17754_v35, 16  ;;  %v6710_v17 = vshll.u32 %v15514_v29, 16  ;;  %v6757_v4 = vshll.u32 %v17785_v11, 16  ;;  %v6693_v20 = vsel %vm3341_vm9, %v6688_v39, %v6692_v59  ;;  %v17813_v59 = vld [vmem:[#allocation2 + $0x12c] sm:$0xff]  }
 0x2a1   : > { %v6720_v29 = vor.u32 %v6719_v51, %v6715_v25  ;;  %v6755_v42 = vshrl.u32 %v17785_v11, 16  ;;  %v6779_v27 = vrot.slane %v6777_v53, 1  ;;  %v6806_v25 = vshrl.u32 %v17818_v61, 16  ;;  %v17837_v39 = vld [vmem:[#allocation2 + $0x148] sm:$0xff]  }
 0x2a2   : > { %v5708_v34 = vpop.permute.xlu1 %5707  ;;  %v5710_v46 = vpop.permute.xlu0 %5709  ;;  %v6704_v33 = vrot.slane %v6702_v8, 1  ;;  %v6712_v56 = vrot.slane %v6710_v17, 1  ;;  %v6759_v43 = vrot.slane %v6757_v4, 1  ;;  %v6810_v51 = vshll.u32 %v15529_v19, 16 }
 0x2a3   : > { %5887 = vst.msk [vmem:[#allocation3 + $0x68] sm:$0xff] %vm5873_vm14, %v5708_v34  ;;  %5888 = vst.msk [vmem:[#allocation3 + $0x70] sm:$0xff] %vm5873_vm14, %v5710_v46  ;;  %v6735_v34 = vshrl.u32 %v17769_v0, 16  ;;  %v6742_v46 = vshll.u32 %v17780_v10, 16  ;;  %v6780_v4 = vor.u32 %v6779_v27, %v6775_v22 }
 0x2a4   : > { %7168 = vrot.lane.b32.xlu1 %v6593_v54, %s16007_s15  ;;  %7170 = vrot.lane.b32.xlu0 %v6605_v55, %s16007_s15  ;;  %v6700_v54 = vor.u32 %v6699_v23, %v6695_v63  ;;  %v6724_v55 = vrot.slane %v6722_v13, 1  ;;  %v6708_v35 = vor.u32 %v6706_v5, %v6704_v33  ;;  %v6772_v13 = vrot.slane %v6770_v49, 1 }
 0x2a5   : > { %v6740_v0 = vor.u32 %v6739_v40, %v6735_v34  ;;  %v15532_v34 = vld [vmem:[#allocation2 + $0x150] ss:$0 sps:$4 sm:$0x11]   ;;  %v15533_v40 = vld [vmem:[#allocation2 + $0x154] sm:$0xff]  }
 0x2a6   : > { %v5712_v30 = vpop.permute.xlu1 %5711  ;;  %v5714_v41 = vpop.permute.xlu0 %5713  ;;  %v6705_v14 = vsel %vm3341_vm9, %v6700_v54, %v6704_v33  ;;  %v6728_v63 = vor.u32 %v6726_v36, %v6724_v55  ;;  %v6713_v8 = vsel %vm3341_vm9, %v6708_v35, %v6712_v56  ;;  %v6725_v5 = vsel %vm3341_vm9, %v6720_v29, %v6724_v55 }
 0x2a7   : > { %5889 = vst.msk [vmem:[#allocation3 + $0x78] sm:$0xff] %vm5873_vm14, %v5712_v30  ;;  %5890 = vst.msk [vmem:[#allocation3 + $0x80] sm:$0xff] %vm5873_vm14, %v5714_v41  ;;  %v6744_v30 = vrot.slane %v6742_v46, 1  ;;  %v6752_v41 = vrot.slane %v6750_v21, 1  ;;  %v6760_v33 = vor.u32 %v6759_v43, %v6755_v42  ;;  %v6795_v56 = vshrl.u32 %v17813_v59, 16 }
 0x2a8   : > { %7172 = vrot.lane.b32.xlu1 %v6613_v7, %s16007_s15  ;;  %7174 = vrot.lane.b32.xlu0 %v6625_v12, %s16007_s15  ;;  %v17805_v7 = vld [vmem:[#allocation2 + $0x120] sm:$0xff]   ;;  %v15526_v12 = vld [vmem:[#allocation2 + $0x128] ss:$0 sps:$4 sm:$0x11]   ;;  %v6733_v31 = vsel %vm3341_vm9, %v6728_v63, %v6732_v45  ;;  %v6835_v19 = vshrl.u32 %v15533_v40, 16 }
 0x2a9   : > { %v6745_v18 = vsel %vm3341_vm9, %v6740_v0, %v6744_v30  ;;  %v6748_v11 = vor.u32 %v6746_v52, %v6744_v30 }
 0x2aa   : > { %v5716_v58 = vpop.permute.xlu1 %5715  ;;  %v5718_v60 = vpop.permute.xlu0 %5717 }
 0x2ab   : > { %5891 = vst.msk [vmem:[#allocation3 + $0x88] sm:$0xff] %vm5873_vm14, %v5716_v58  ;;  %5892 = vst.msk [vmem:[#allocation3 + $0x90] sm:$0xff] %vm5873_vm14, %v5718_v60  ;;  %v6766_v58 = vshrl.u32 %v17797_v47, 16  ;;  %v6790_v60 = vshll.u32 %v15526_v12, 16  ;;  %v6753_v21 = vsel %vm3341_vm9, %v6748_v11, %v6752_v41  ;;  %v6830_v12 = vshll.u32 %v15532_v34, 16 }
 0x2ac   : > { %7176 = vrot.lane.b32.xlu1 %v6633_v38, %s16007_s15  ;;  %7178 = vrot.lane.b32.xlu0 %v6645_v57, %s16007_s15  ;;  %v6762_v38 = vshll.u32 %v17797_v47, 16  ;;  %v6782_v57 = vshll.u32 %v17805_v7, 16  ;;  %v6826_v41 = vshrl.u32 %v17837_v39, 16 }
 0x2ae   : > { %v5720_v28 = vpop.permute.xlu1 %5719  ;;  %v5722_v24 = vpop.permute.xlu0 %5721  ;;  %v6764_v23 = vrot.slane %v6762_v38, 1  ;;  %v6784_v10 = vrot.slane %v6782_v57, 1 }
 0x2af   : > { %5893 = vst.msk [vmem:[#allocation3 + $0x98] sm:$0xff] %vm5873_vm14, %v5720_v28  ;;  %5894 = vst.msk [vmem:[#allocation3 + $0xa0] sm:$0xff] %vm5873_vm14, %v5722_v24  ;;  %v6792_v28 = vrot.slane %v6790_v60, 1  ;;  %v15530_v24 = vld [vmem:[#allocation2 + $0x140] sm:$0xff]  }
 0x2b0   : > { %7180 = vrot.lane.b32.xlu1 %v6653_v62, %s16007_s15  ;;  %7182 = vrot.lane.b32.xlu0 %v6665_v9, %s16007_s15  ;;  %v6797_v62 = vshll.u32 %v17813_v59, 16  ;;  %v6786_v9 = vshrl.u32 %v17805_v7, 16  ;;  %v6815_v46 = vshrl.u32 %v15530_v24, 16  ;;  %v6768_v52 = vor.u32 %v6766_v58, %v6764_v23  ;;  %v15535_v7 = vld [vmem:[#allocation2 + $0x164] ss:$0 sps:$4 sm:$0x11]  }
 0x2b1   : > { %v6765_v47 = vsel %vm3341_vm9, %v6760_v33, %v6764_v23  ;;  %v6785_v42 = vsel %vm3341_vm9, %v6780_v4, %v6784_v10  ;;  %v6850_v53 = vshll.u32 %v15535_v7, 16  ;;  %v17858_v59 = vld [vmem:[#allocation2 + $0x170] sm:$0xff]   ;;  %v15539_v60 = vld [vmem:[#allocation2 + $0x17c] sm:$0xff]   ;;  %v15538_v23 = vld [vmem:[#allocation2 + $0x178] ss:$0 sps:$4 sm:$0x11]  }
 0x2b2   : > { %v5724_v50 = vpop.permute.xlu1 %5723  ;;  %v5726_v26 = vpop.permute.xlu0 %5725  ;;  %v6799_v36 = vrot.slane %v6797_v62, 1  ;;  %v6773_v35 = vsel %vm3341_vm9, %v6768_v52, %v6772_v13  ;;  %v6788_v29 = vor.u32 %v6786_v9, %v6784_v10  ;;  %v6862_v9 = vshll.u32 %v17858_v59, 16 }
 0x2b3   : > { %5895 = vst.msk [vmem:[#allocation3 + $0xa8] sm:$0xff] %vm5873_vm14, %v5724_v50  ;;  %5896 = vst.msk [vmem:[#allocation3 + $0xb0] sm:$0xff] %vm5873_vm14, %v5726_v26  ;;  %v6812_v50 = vrot.slane %v6810_v51, 1  ;;  %v17845_v26 = vld [vmem:[#allocation2 + $0x15c] sm:$0xff]   ;;  %v6852_v27 = vrot.slane %v6850_v53, 1  ;;  %v6866_v11 = vshrl.u32 %v17858_v59, 16 }
 0x2b4   : > { %7184 = vrot.lane.b32.xlu1 %v6673_v32, %s16007_s15  ;;  %7186 = vrot.lane.b32.xlu0 %v6685_v37, %s16007_s15  ;;  %v6802_v32 = vshll.u32 %v17818_v61, 16  ;;  %v6817_v37 = vshll.u32 %v15530_v24, 16  ;;  %v6800_v43 = vor.u32 %v6799_v36, %v6795_v56  ;;  %v6832_v61 = vrot.slane %v6830_v12, 1  ;;  %v15542_v51 = vld [vmem:[#allocation2 + $0x190] sm:$0xff]  }
 0x2b5   : > { %v6846_v58 = vshrl.u32 %v17845_v26, 16  ;;  %v15541_v36 = vld [vmem:[#allocation2 + $0x18c] ss:$0 sps:$4 sm:$0x11]  }
 0x2b6   : > { %v5728_v44 = vpop.permute.xlu1 %5727  ;;  %v5730_v48 = vpop.permute.xlu0 %5729  ;;  %v6804_v45 = vrot.slane %v6802_v32, 1  ;;  %v6819_v30 = vrot.slane %v6817_v37, 1 }
 0x2b7   : > { %5897 = vst.msk [vmem:[#allocation3 + $0xb8] sm:$0xff] %vm5873_vm14, %v5728_v44  ;;  %5898 = vst.msk [vmem:[#allocation3 + $0xc0] sm:$0xff] %vm5873_vm14, %v5730_v48  ;;  %v6837_v44 = vshll.u32 %v15533_v40, 16  ;;  %v6842_v48 = vshll.u32 %v17845_v26, 16  ;;  %v15543_v40 = vld [vmem:[#allocation2 + $0x198] sm:$0xff]   ;;  %v15545_v26 = vld [vmem:[#allocation2 + $0x1a4] sm:$0xff]  }
 0x2b8   : > { %7188 = vrot.lane.b32.xlu1 %v6693_v20, %s16007_s15  ;;  %7190 = vrot.lane.b32.xlu0 %v6705_v14, %s16007_s15  ;;  %v6822_v20 = vshll.u32 %v17837_v39, 16  ;;  %v17850_v14 = vld [vmem:[#allocation2 + $0x168] sm:$0xff]   ;;  %v6808_v0 = vor.u32 %v6806_v25, %v6804_v45  ;;  %v6870_v25 = vshll.u32 %v15538_v23, 16 }
 0x2b9   : > { %v6857_v63 = vshll.u32 %v17850_v14, 16  ;;  %v6844_v62 = vrot.slane %v6842_v48, 1  ;;  %v6855_v10 = vshrl.u32 %v17850_v14, 16  ;;  %v6890_v14 = vshll.u32 %v15541_v36, 16  ;;  %v15546_v48 = vld [vmem:[#allocation2 + $0x1ac] sm:$0xff]  }
 0x2ba   : > { %v5732_v17 = vpop.permute.xlu1 %5731  ;;  %v5734_v6 = vpop.permute.xlu0 %5733  ;;  %v6824_v57 = vrot.slane %v6822_v20, 1  ;;  %v6872_v7 = vrot.slane %v6870_v25, 1 }
 0x2bb   : > { %5899 = vst.msk [vmem:[#allocation3 + $0xc8] sm:$0xff] %vm5873_vm14, %v5732_v17  ;;  %5900 = vst.msk [vmem:[#allocation3 + $0xd0] sm:$0xff] %vm5873_vm14, %v5734_v6  ;;  %v6820_v17 = vor.u32 %v6819_v30, %v6815_v46  ;;  %v6839_v6 = vrot.slane %v6837_v44, 1  ;;  %v6859_v32 = vrot.slane %v6857_v63, 1  ;;  %v6848_v34 = vor.u32 %v6846_v58, %v6844_v62 }
 0x2bc   : > { %7192 = vrot.lane.b32.xlu1 %v6713_v8, %s16007_s15  ;;  %7194 = vrot.lane.b32.xlu0 %v6725_v5, %s16007_s15  ;;  %v6793_v8 = vsel %vm3341_vm9, %v6788_v29, %v6792_v28  ;;  %v6805_v5 = vsel %vm3341_vm9, %v6800_v43, %v6804_v45  ;;  %v6877_v28 = vshll.u32 %v15539_v60, 16  ;;  %v6828_v33 = vor.u32 %v6826_v41, %v6824_v57 }
 0x2bd   : > { %v6825_v24 = vsel %vm3341_vm9, %v6820_v17, %v6824_v57  ;;  %v6840_v56 = vor.u32 %v6839_v6, %v6835_v19  ;;  %v6875_v45 = vshrl.u32 %v15539_v60, 16  ;;  %v6860_v52 = vor.u32 %v6859_v32, %v6855_v10  ;;  %v15547_v57 = vld [vmem:[#allocation2 + $0x1b4] ss:$0 sps:$4 sm:$0x11]   ;;  %v15548_v32 = vld [vmem:[#allocation2 + $0x14] sm:$0xfe]  }
 0x2be   : > { %v5736_v54 = vpop.permute.xlu1 %5735  ;;  %v5738_v55 = vpop.permute.xlu0 %5737  ;;  %v6879_v37 = vrot.slane %v6877_v28, 1  ;;  %v6853_v20 = vsel %vm3341_vm9, %v6848_v34, %v6852_v27  ;;  %v6902_v41 = vshll.u32 %v15543_v40, 16  ;;  %v6895_v43 = vshrl.u32 %v15542_v51, 16 }
 0x2bf   : > { %5901 = vst.msk [vmem:[#allocation3 + $0xd8] sm:$0xff] %vm5873_vm14, %v5736_v54  ;;  %5902 = vst.msk [vmem:[#allocation3 + $0xe0] sm:$0xff] %vm5873_vm14, %v5738_v55  ;;  %v6864_v55 = vrot.slane %v6862_v9, 1  ;;  %v6845_v4 = vsel %vm3341_vm9, %v6840_v56, %v6844_v62  ;;  %v6906_v19 = vshrl.u32 %v15543_v40, 16  ;;  %v6915_v60 = vshrl.u32 %v15545_v26, 16  ;;  %v15549_v62 = vld [vmem:[#allocation2 + $0x1c] sm:$0xff]  }
 0x2c0   : > { %7196 = vrot.lane.b32.xlu1 %v6733_v31, %s16007_s15  ;;  %7198 = vrot.lane.b32.xlu0 %v6745_v18, %s16007_s15  ;;  %v15540_v31 = vld [vmem:[#allocation2 + $0x184] sm:$0xff]   ;;  %v6813_v18 = vsel %vm3341_vm9, %v6808_v0, %v6812_v50  ;;  %v6897_v50 = vshll.u32 %v15542_v51, 16  ;;  %v6904_v58 = vrot.slane %v6902_v41, 1  ;;  %v6922_v6 = vshll.u32 %v15546_v48, 16 }
 0x2c1   : > { %v6882_v46 = vshll.u32 %v15540_v31, 16  ;;  %v6886_v12 = vshrl.u32 %v15540_v31, 16  ;;  %v6868_v29 = vor.u32 %v6866_v11, %v6864_v55  ;;  %v6926_v27 = vshrl.u32 %v15546_v48, 16  ;;  %v15550_v51 = vld [vmem:[#allocation2 + $0x24] ss:$0 sps:$4 sm:$0x11]  }
 0x2c2   : > { %v5740_v15 = vpop.permute.xlu1 %5739  ;;  %v5742_v16 = vpop.permute.xlu0 %5741  ;;  %v6899_v44 = vrot.slane %v6897_v50, 1  ;;  %v6930_v10 = vshll.u32 %v15547_v57, 16  ;;  %v6908_v9 = vor.u32 %v6906_v19, %v6904_v58  ;;  %v6924_v28 = vrot.slane %v6922_v6, 1  ;;  %v15555_v40 = vld [vmem:[#allocation2 + $0x38] ss:$0 sps:$4 sm:$0x11]  }
 0x2c3   : > { %5903 = vst.msk [vmem:[#allocation3 + $0xe8] sm:$0xff] %vm5873_vm14, %v5740_v15  ;;  %5904 = vst.msk [vmem:[#allocation3 + $0xf0] sm:$0xff] %vm5873_vm14, %v5742_v16  ;;  %v6884_v30 = vrot.slane %v6882_v46, 1  ;;  %v6873_v63 = vsel %vm3341_vm9, %v6868_v29, %v6872_v7  ;;  %v7988_v25 = vrot.slane %v15549_v62, 1  ;;  %v15551_v7 = vld [vmem:[#allocation2 + $0x28] sm:$0xff]   ;;  %v9702_v29 = vshll.u32 %v15555_v40, 16 }
 0x2c4   : > { %7200 = vrot.lane.b32.xlu1 %v6753_v21, %s16007_s15  ;;  %7202 = vrot.lane.b32.xlu0 %v6765_v47, %s16007_s15  ;;  %v15544_v21 = vld [vmem:[#allocation2 + $0x1a0] ss:$0 sps:$4 sm:$0x11]   ;;  %v6833_v47 = vsel %vm3341_vm9, %v6828_v33, %v6832_v61  ;;  %v6892_v61 = vrot.slane %v6890_v14, 1  ;;  %v6928_v34 = vor.u32 %v6926_v27, %v6924_v28  ;;  %v15557_v14 = vld [vmem:[#allocation2 + $0x30] sm:$0xff]   ;;  %v15563_v40 = vld [vmem:[#allocation2 + $0x44] sm:$0xff]  }
 0x2c5   : > { %v6910_v59 = vshll.u32 %v15544_v21, 16  ;;  %v6888_v0 = vor.u32 %v6886_v12, %v6884_v30  ;;  %v7990_v21 = vrot.slane %v15550_v51, 1  ;;  %v15552_v48 = vld [vmem:[#allocation2 + $0x30] sm:$0xff]   ;;  %v9704_v19 = vrot.slane %v9702_v29, 1  ;;  %v15562_v51 = vld [vmem:[#allocation2 + $0x3c] sm:$0xff]  }
 0x2c6   : > { %v5744_v38 = vpop.permute.xlu1 %5743  ;;  %v5746_v49 = vpop.permute.xlu0 %5745  ;;  %v15572_v29 = vld [vmem:[#allocation2 + $0x4c] ss:$0 sps:$4 sm:$0x11]  }
 0x2c7   : > { %5905 = vst.msk [vmem:[#allocation3 + $0xf8] sm:$0xff] %vm5873_vm14, %v5744_v38  ;;  %5906 = vst.msk [vmem:[#allocation3 + $0x100] sm:$0xff] %vm5873_vm14, %v5746_v49  ;;  %v6917_v38 = vshll.u32 %v15545_v26, 16  ;;  %v6893_v31 = vsel %vm3341_vm9, %v6888_v0, %v6892_v61  ;;  %v15564_v0 = vld [vmem:[#allocation2 + $0x3c] sm:$0xff]  }
 0x2c8   : > { %7204 = vrot.lane.b32.xlu1 %v6773_v35, %s16007_s15  ;;  %7206 = vrot.lane.b32.xlu0 %v6785_v42, %s16007_s15  ;;  %v6865_v35 = vsel %vm3341_vm9, %v6860_v52, %v6864_v55  ;;  %v6880_v42 = vor.u32 %v6879_v37, %v6875_v45  ;;  %v15554_v55 = vld [vmem:[#allocation2 + $0x30] sm:$0xff]   ;;  %v7987_v45 = vrot.slane %v15548_v32, 1  ;;  %v9709_v62 = vshll.u32 %v15564_v0, 16 }
 0x2c9   : > { %v6919_v17 = vrot.slane %v6917_v38, 1  ;;  %v9698_v12 = vshrl.u32 %v15554_v55, 16  ;;  %v11160_v38 = vrot.slane %v15557_v14, 1 }
 0x2ca   : > { %v5748_v13 = vpop.permute.xlu1 %5747  ;;  %v5750_v22 = vpop.permute.xlu0 %5749  ;;  %v7989_v50 = vsel %vm4815_vm12, %v7987_v45, %v7988_v25  ;;  %v15567_v45 = vld [vmem:[#allocation2 + $0x3c] sm:$0xfe]  }
 0x2cb   : > { %5907 = vst.msk [vmem:[#allocation3 + $0x108] sm:$0xff] %vm5873_vm14, %v5748_v13  ;;  %5908 = vst.msk [vmem:[#allocation3 + $0x110] sm:$0xff] %vm5873_vm14, %v5750_v22  ;;  %v6912_v22 = vrot.slane %v6910_v59, 1  ;;  %v6920_v11 = vor.u32 %v6919_v17, %v6915_v60  ;;  %v15559_v59 = vld [vmem:[#allocation2 + $0x28] sm:$0xfe]  }
 0x2cc   : > { %7208 = vrot.lane.b32.xlu1 %v6793_v8, %s16007_s15  ;;  %7210 = vrot.lane.b32.xlu0 %v6805_v5, %s16007_s15  ;;  %v6885_v8 = vsel %vm3341_vm9, %v6880_v42, %v6884_v30  ;;  %v6900_v5 = vor.u32 %v6899_v44, %v6895_v43  ;;  %v7991_v30 = vsel %vm4815_vm12, %v7988_v25, %v7990_v21  ;;  %v15556_v42 = vld [vmem:[#allocation2 + $0x28] sm:$0xfe]   ;;  %v7992_v17 = vrot.slane %v15559_v59, 1 }
 0x2cd   : > { %v6925_v36 = vsel %vm3341_vm9, %v6920_v11, %v6924_v28  ;;  %v9711_v28 = vrot.slane %v9709_v62, 1 }
 0x2ce   : > { %v5752_v39 = vpop.permute.xlu1 %5751  ;;  %v5754_v54 = vpop.permute.xlu0 %5753 }
 0x2cf   : > { %5909 = vst.msk [vmem:[#allocation3 + $0x118] sm:$0xff] %vm5873_vm14, %v5752_v39  ;;  %5910 = vst.msk [vmem:[#allocation3 + $0x120] sm:$0xff] %vm5873_vm14, %v5754_v54  ;;  %v6913_v39 = vsel %vm3341_vm9, %v6908_v9, %v6912_v22  ;;  %v6932_v54 = vrot.slane %v6930_v10, 1  ;;  %v15565_v22 = vld [vmem:[#allocation2 + $0x44] sm:$0xff]  }
 0x2d0   : > { %7212 = vrot.lane.b32.xlu1 %v6813_v18, %s16007_s15  ;;  %7214 = vrot.lane.b32.xlu0 %v6825_v24, %s16007_s15  ;;  %v6905_v18 = vsel %vm3341_vm9, %v6900_v5, %v6904_v58  ;;  %v15553_v24 = vld [vmem:[#allocation2 + $0x28] sm:$0xff]  }
 0x2d1   : > { %v9689_v46 = vshll.u32 %v15553_v24, 16  ;;  %v9687_v26 = vshrl.u32 %v15553_v24, 16  ;;  %v15566_v9 = vld [vmem:[#allocation2 + $0x4c] ss:$0 sps:$4 sm:$0x11]   ;;  %v9714_v24 = vshll.u32 %v15565_v22, 16 }
 0x2d2   : > { %v5756_v15 = vpop.permute.xlu1 %5755  ;;  %v5758_v16 = vpop.permute.xlu0 %5757  ;;  %v9722_v25 = vshll.u32 %v15566_v9, 16 }
 0x2d3   : > { %5911 = vst.msk [vmem:[#allocation3 + $0x128] sm:$0xff] %vm5873_vm14, %v5756_v15  ;;  %5912 = vst.msk [vmem:[#allocation3 + $0x130] sm:$0xff] %vm5873_vm14, %v5758_v16  ;;  %v9691_v15 = vrot.slane %v9689_v46, 1  ;;  %v17940_v46 = vld [vmem:[#allocation2 + $0x44] sm:$0xff]  }
 0x2d4   : > { %7216 = vrot.lane.b32.xlu1 %v6833_v47, %s16007_s15  ;;  %7218 = vrot.lane.b32.xlu0 %v6845_v4, %s16007_s15  ;;  %v9694_v47 = vshll.u32 %v15554_v55, 16  ;;  %v6933_v4 = vsel %vm3341_vm9, %v6928_v34, %v6932_v54  ;;  %v15568_v54 = vld [vmem:[#allocation2 + $0x44] sm:$0xff]   ;;  %v9716_v34 = vrot.slane %v9714_v24, 1  ;;  %v9724_v21 = vrot.slane %v9722_v25, 1  ;;  %v15574_v24 = vld [vmem:[#allocation2 + $0x58] sm:$0xff]  }
 0x2d5   : > { %v9692_v41 = vor.u32 %v9691_v15, %v9687_v26  ;;  %v15636_v26 = vld [vmem:[%s19837_s1] sm:$0xff]   ;;  %v15581_v25 = vld [vmem:[#allocation2 + $0x50] sm:$0xfe]  }
 0x2d6   : > { %v5760_v49 = vpop.permute.xlu1 %5759  ;;  %v5762_v53 = vpop.permute.xlu0 %5761  ;;  %14980 = vmatprep.subr.bf16.mxu0 %v15636_v26  ;;  %15112 = vmatprep.subr.bf16.mxu1 %v15636_v26 }
 0x2d7   : > { %5913 = vst.msk [vmem:[#allocation3 + $0x138] sm:$0xff] %vm5873_vm14, %v5760_v49  ;;  %5914 = vst.msk [vmem:[#allocation3 + $0x140] sm:$0xff] %vm5873_vm14, %v5762_v53  ;;  %v15558_v49 = vld [vmem:[#allocation2 + $0x38] ss:$0 sps:$4 sm:$0x11]   ;;  %v15560_v53 = vld [vmem:[#allocation2 + $0x30] sm:$0xff]   ;;  %14981 = vmatpush3.bf16.msra.mxu0 %v15636_v26  ;;  %15114 = vmatpush3.bf16.msra.mxu1 %v15636_v26 }
 0x2d8   : > { %7220 = vrot.lane.b32.xlu1 %v6853_v20, %s16007_s15  ;;  %7222 = vrot.lane.b32.xlu0 %v6865_v35, %s16007_s15  ;;  %v9696_v35 = vrot.slane %v9694_v47, 1  ;;  %v11162_v5 = vrot.slane %v15558_v49, 1  ;;  %v7993_v6 = vrot.slane %v15560_v53, 1  ;;  %v15569_v47 = vld [vmem:[#allocation2 + $0x4c] ss:$0 sps:$4 sm:$0x11]  }
 0x2d9   : > { %v16012_v49 = vmov 65535  }
 0x2da   : > { %v5764_v23 = vpop.permute.xlu1 %5763  ;;  %v5766_v13 = vpop.permute.xlu0 %5765  ;;  %v9697_v57 = vsel %vm3341_vm9, %v9692_v41, %v9696_v35  ;;  %v9700_v61 = vor.u32 %v9698_v12, %v9696_v35  ;;  %v7994_v11 = vsel %vm4815_vm12, %v7992_v17, %v7993_v6  ;;  %v11167_v35 = vrot.slane %v15569_v47, 1 }
 0x2db   : > { %5915 = vst.msk [vmem:[#allocation3 + $0x148] sm:$0xff] %vm5873_vm14, %v5764_v23  ;;  %5916 = vst.msk [vmem:[#allocation3 + $0x150] sm:$0xff] %vm5873_vm14, %v5766_v13  ;;  %v11857_v53 = vsel %vm11855_vm15, 4294967295, %v16012_v49 }
 0x2dc   : > { %7224 = vrot.lane.b32.xlu1 %v6873_v63, %s16007_s15  ;;  %7226 = vrot.lane.b32.xlu0 %v6885_v8, %s16007_s15  ;;  %v11159_v63 = vrot.slane %v15556_v42, 1  ;;  %v15561_v8 = vld [vmem:[#allocation2 + $0x38] ss:$0 sps:$4 sm:$0x11]   ;;  %v9705_v23 = vsel %vm3341_vm9, %v9700_v61, %v9704_v19  ;;  %v11858_v61 = vsel %vm11856_vm0, %v11857_v53, 0 }
 0x2dd   : > { %v7995_v32 = vrot.slane %v15561_v8, 1  ;;  %v15576_v42 = vld [vmem:[#allocation2 + $0x58] sm:$0xff]   ;;  %v15577_v19 = vld [vmem:[#allocation2 + $0x60] ss:$0 sps:$4 sm:$0x11]  }
 0x2de   : > { %v5768_v33 = vpop.permute.xlu1 %5767  ;;  %v5770_v56 = vpop.permute.xlu0 %5769  ;;  %v11161_v13 = vsel %vm4815_vm12, %v11159_v63, %v11160_v38 }
 0x2df   : > { %5917 = vst.msk [vmem:[#allocation3 + $0x158] sm:$0xff] %vm5873_vm14, %v5768_v33  ;;  %5918 = vst.msk [vmem:[#allocation3 + $0x160] sm:$0xff] %vm5873_vm14, %v5770_v56  ;;  %v7996_v55 = vsel %vm4815_vm12, %v7993_v6, %v7995_v32 }
 0x2e0   : > { %7228 = vrot.lane.b32.xlu1 %v6893_v31, %s16007_s15  ;;  %7230 = vrot.lane.b32.xlu0 %v6905_v18, %s16007_s15  ;;  %v9707_v31 = vshrl.u32 %v15564_v0, 16  ;;  %v11163_v18 = vsel %vm4815_vm12, %v11160_v38, %v11162_v5  ;;  %v8000_v0 = vrot.slane %v15572_v29, 1 }
 0x2e2   : > { %v5772_v52 = vpop.permute.xlu1 %5771  ;;  %v5774_v37 = vpop.permute.xlu0 %5773 }
 0x2e3   : > { %5919 = vst.msk [vmem:[#allocation3 + $0x168] sm:$0xff] %vm5873_vm14, %v5772_v52  ;;  %5920 = vst.msk [vmem:[#allocation3 + $0x170] sm:$0xff] %vm5873_vm14, %v5774_v37 }
 0x2e4   : > { %7232 = vrot.lane.b32.xlu1 %v6913_v39, %s16007_s15  ;;  %7234 = vrot.lane.b32.xlu0 %v6925_v36, %s16007_s15  ;;  %v9718_v39 = vshrl.u32 %v15565_v22, 16  ;;  %v9712_v36 = vor.u32 %v9711_v28, %v9707_v31  ;;  %v15579_v22 = vld [vmem:[#allocation2 + $0x58] sm:$0xff]   ;;  %v9742_v31 = vshll.u32 %v15577_v19, 16 }
 0x2e6   : > { %v5776_v16 = vpop.permute.xlu1 %5775  ;;  %v5778_v20 = vpop.permute.xlu0 %5777  ;;  %v9717_v15 = vsel %vm3341_vm9, %v9712_v36, %v9716_v34  ;;  %v15586_v36 = vld [vmem:[#allocation2 + $0x64] sm:$0xff]  }
 0x2e7   : > { %5921 = vst.msk [vmem:[#allocation3 + $0x178] sm:$0xff] %vm5873_vm14, %v5776_v16  ;;  %5922 = vst.msk [vmem:[#allocation3 + $0x180] sm:$0xff] %vm5873_vm14, %v5778_v20  ;;  %v9720_v16 = vor.u32 %v9718_v39, %v9716_v34  ;;  %v11164_v20 = vrot.slane %v15567_v45, 1 }
 0x2e8   : > { %7236 = vrot.lane.b32.xlu1 %v6933_v4, %s16007_s15  ;;  %8147 = vrot.lane.b32.xlu0 %v7989_v50, %s16008_s16  ;;  %v15570_v4 = vld [vmem:[#allocation2 + $0x3c] sm:$0xfe]   ;;  %v11165_v50 = vrot.slane %v15568_v54, 1  ;;  %v9744_v54 = vrot.slane %v9742_v31, 1 }
 0x2e9   : > { %v7997_v41 = vrot.slane %v15570_v4, 1  ;;  %v15587_v4 = vld [vmem:[#allocation2 + $0x6c] sm:$0xff]  }
 0x2ea   : > { %v5780_v43 = vpop.permute.xlu1 %5779  ;;  %v5782_v44 = vpop.permute.xlu0 %5781  ;;  %v9754_v29 = vshll.u32 %v15587_v4, 16 }
 0x2eb   : > { %5923 = vst.msk [vmem:[#allocation3 + $0x188] sm:$0xff] %vm5873_vm14, %v5780_v43  ;;  %5924 = vst.msk [vmem:[#allocation3 + $0x190] sm:$0xff] %vm5873_vm14, %v5782_v44  ;;  %v15640_v43 = vld [vmem:[%s19837_s1 + $0x8] sm:$0x3f]   ;;  %v9725_v44 = vsel %vm3341_vm9, %v9720_v16, %v9724_v21 }
 0x2ec   : > { %8149 = vrot.lane.b32.xlu1 %v7991_v30, %s16008_s16  ;;  %8853 = vrot.lane.b32.xlu0 %v15551_v7, %s16009_s17  ;;  %v15575_v7 = vld [vmem:[#allocation2 + $0x50] sm:$0xff]   ;;  %v7998_v30 = vrot.slane %v17940_v46, 1  ;;  %v11860_v63 = vand.u32 %v15640_v43, %v11858_v61  ;;  %v15583_v46 = vld [vmem:[#allocation2 + $0x60] ss:$0 sps:$4 sm:$0x11]   ;;  %v9758_v43 = vshrl.u32 %v15587_v4, 16 }
 0x2ed   : > { %v9729_v38 = vshll.u32 %v15575_v7, 16  ;;  %v9727_v5 = vshrl.u32 %v15575_v7, 16  ;;  %v15588_v16 = vld [vmem:[#allocation2 + $0x74] ss:$0 sps:$4 sm:$0x11]   ;;  %v8005_v7 = vrot.slane %v15583_v46, 1 }
 0x2ee   : > { %v5784_v58 = vpop.permute.xlu1 %5783  ;;  %v5786_v60 = vpop.permute.xlu0 %5785  ;;  %v7999_v8 = vsel %vm4815_vm12, %v7997_v41, %v7998_v30  ;;  %14982 = vmatprep.subr.bf16.mxu0 %v11860_v63  ;;  %15113 = vmatprep.subr.bf16.mxu1 %v11860_v63  ;;  %v8001_v9 = vsel %vm4815_vm12, %v7998_v30, %v8000_v0  ;;  %v15593_v0 = vld [vmem:[#allocation2 + $0x6c] sm:$0xff]   ;;  %v15600_v4 = vld [vmem:[#allocation2 + $0x78] sm:$0xfe]  }
 0x2ef   : > { %5925 = vst.msk [vmem:[#allocation3 + $0x198] sm:$0xff] %vm5873_vm14, %v5784_v58  ;;  %5926 = vst.msk [vmem:[#allocation3 + $0x1a0] sm:$0xff] %vm5873_vm14, %v5786_v60  ;;  %v9734_v58 = vshll.u32 %v15576_v42, 16  ;;  %v11168_v60 = vsel %vm4815_vm12, %v11165_v50, %v11167_v35  ;;  %v9731_v17 = vrot.slane %v9729_v38, 1  ;;  %14983 = vmatpush3.bf16.msra.mxu0 %v11860_v63  ;;  %15115 = vmatpush3.bf16.msra.mxu1 %v11860_v63  ;;  %v15589_v38 = vld [vmem:[#allocation2 + $0x64] sm:$0xfe]  }
 0x2f0   : > { %8855 = vrot.lane.b32.xlu1 %v15552_v48, %s16009_s17  ;;  %10326 = vrot.lane.b32.xlu0 %v9697_v57, %s16010_s18  ;;  %v11166_v48 = vsel %vm4815_vm12, %v11164_v20, %v11165_v50  ;;  %v9749_v50 = vshll.u32 %v15586_v36, 16  ;;  %v15585_v63 = vld [vmem:[#allocation2 + $0x6c] sm:$0xff]  }
 0x2f1   : > { %v9736_v62 = vrot.slane %v9734_v58, 1  ;;  %v9732_v32 = vor.u32 %v9731_v17, %v9727_v5 }
 0x2f2   : > { %v5788_v27 = vpop.permute.xlu1 %5787  ;;  %v5790_v10 = vpop.permute.xlu0 %5789  ;;  %v9751_v35 = vrot.slane %v9749_v50, 1 }
 0x2f3   : > { %5927 = vst.msk [vmem:[#allocation3 + $0x1a8] sm:$0xff] %vm5873_vm14, %v5788_v27  ;;  %5928 = vst.msk [vmem:[#allocation3 + $0x1b0] sm:$0xff] %vm5873_vm14, %v5790_v10  ;;  %v9738_v27 = vshrl.u32 %v15576_v42, 16  ;;  %v15578_v10 = vld [vmem:[#allocation2 + $0x50] sm:$0xfe]   ;;  %v15584_v42 = vld [vmem:[#allocation2 + $0x64] sm:$0xff]  }
 0x2f4   : > { %10328 = vrot.lane.b32.xlu1 %v9705_v23, %s16010_s18  ;;  %11319 = vrot.lane.b32.xlu0 %v11161_v13, %s16011_s19  ;;  %v15573_v13 = vld [vmem:[#allocation2 + $0x50] sm:$0xff]  }
 0x2f5   : > { %v9740_v39 = vor.u32 %v9738_v27, %v9736_v62  ;;  %v8008_v27 = vrot.slane %v15593_v0, 1  ;;  %v15610_v0 = vld [vmem:[#allocation2 + $0x9c] ss:$0 sps:$4 sm:$0x11]  }
 0x2f6   : > { %v5792_v33 = vpop.permute.xlu1 %5791  ;;  %v5794_v56 = vpop.permute.xlu0 %5793 }
 0x2f7   : > { %5929 = vst.msk [vmem:[#allocation3 + $0x1b8] sm:$0xff] %vm5873_vm14, %v5792_v33  ;;  %5930 = vst.msk [vmem:[#allocation3 + $0x1c0] sm:$0xff] %vm5873_vm14, %v5794_v56  ;;  %v11170_v33 = vrot.slane %v15579_v22, 1  ;;  %v15582_v56 = vld [vmem:[#allocation2 + $0x58] sm:$0xff]   ;;  %v9745_v21 = vsel %vm3341_vm9, %v9740_v39, %v9744_v54 }
 0x2f8   : > { %11321 = vrot.lane.b32.xlu1 %v11163_v18, %s16011_s19  ;;  %8151 = vrot.lane.b32.xlu0 %v7994_v11, %s16008_s16  ;;  %v15580_v18 = vld [vmem:[#allocation2 + $0x60] ss:$0 sps:$4 sm:$0x11]  }
 0x2fa   : > { %v5796_v52 = vpop.permute.xlu1 %5795  ;;  %v5798_v37 = vpop.permute.xlu0 %5797 }
 0x2fb   : > { %5931 = vst.msk [vmem:[#allocation3 + $0x1c8] sm:$0xff] %vm5873_vm14, %v5796_v52  ;;  %5932 = vst.msk [vmem:[#allocation3 + $0x1d0] sm:$0xff] %vm5873_vm14, %v5798_v37  ;;  %v11172_v52 = vrot.slane %v15580_v18, 1  ;;  %v8002_v37 = vrot.slane %v15581_v25, 1 }
 0x2fc   : > { %8153 = vrot.lane.b32.xlu1 %v7996_v55, %s16008_s16  ;;  %8857 = vrot.lane.b32.xlu0 %v15562_v51, %s16009_s17  ;;  %v9737_v51 = vsel %vm3341_vm9, %v9732_v32, %v9736_v62  ;;  %v11169_v55 = vrot.slane %v15578_v10, 1  ;;  %v15594_v10 = vld [vmem:[#allocation2 + $0x74] ss:$0 sps:$4 sm:$0x11]  }
 0x2fd   : > { %v11173_v20 = vsel %vm4815_vm12, %v11170_v33, %v11172_v52  ;;  %v8010_v39 = vrot.slane %v15594_v10, 1  ;;  %v15601_v52 = vld [vmem:[#allocation2 + $0x80] sm:$0xff]  }
 0x2fe   : > { %v5800_v12 = vpop.permute.xlu1 %5799  ;;  %v5802_v14 = vpop.permute.xlu0 %5801  ;;  %v11171_v47 = vsel %vm4815_vm12, %v11169_v55, %v11170_v33  ;;  %v15599_v33 = vld [vmem:[#allocation2 + $0x88] ss:$0 sps:$4 sm:$0x11]  }
 0x2ff   : > { %5933 = vst.msk [vmem:[#allocation3 + $0x1d8] sm:$0xff] %vm5873_vm14, %v5800_v12  ;;  %5934 = vst.msk [vmem:[#allocation3 + $0x1e0] sm:$0xff] %vm5873_vm14, %v5802_v14  ;;  %v9747_v14 = vshrl.u32 %v15586_v36, 16 }
 0x300   : > { %8859 = vrot.lane.b32.xlu1 %v15563_v40, %s16009_s17  ;;  %10330 = vrot.lane.b32.xlu0 %v9717_v15, %s16010_s18  ;;  %v8003_v40 = vrot.slane %v15582_v56, 1 }
 0x301   : > { %v9752_v53 = vor.u32 %v9751_v35, %v9747_v14 }
 0x302   : > { %v5804_v59 = vpop.permute.xlu1 %5803  ;;  %v5806_v57 = vpop.permute.xlu0 %5805  ;;  %v8004_v12 = vsel %vm4815_vm12, %v8002_v37, %v8003_v40  ;;  %v8006_v49 = vsel %vm4815_vm12, %v8003_v40, %v8005_v7  ;;  %v9782_v40 = vshll.u32 %v15599_v33, 16  ;;  %v15613_v33 = vld [vmem:[#allocation2 + $0x9c] ss:$0 sps:$4 sm:$0x11]  }
 0x303   : > { %5935 = vst.msk [vmem:[#allocation3 + $0x1e8] sm:$0xff] %vm5873_vm14, %v5804_v59  ;;  %5936 = vst.msk [vmem:[#allocation3 + $0x1f0] sm:$0xff] %vm5873_vm14, %v5806_v57  ;;  %v9756_v59 = vrot.slane %v9754_v29, 1  ;;  %v15591_v57 = vld [vmem:[#allocation2 + $0x74] ss:$0 sps:$4 sm:$0x11]  }
 0x304   : > { %10332 = vrot.lane.b32.xlu1 %v9725_v44, %s16010_s18  ;;  %11323 = vrot.lane.b32.xlu0 %v11166_v48, %s16011_s19  ;;  %v9762_v44 = vshll.u32 %v15588_v16, 16  ;;  %v15590_v48 = vld [vmem:[#allocation2 + $0x6c] sm:$0xff]   ;;  %v11177_v62 = vrot.slane %v15591_v57, 1  ;;  %v11180_v16 = vrot.slane %v15601_v52, 1  ;;  %v9784_v7 = vrot.slane %v9782_v40, 1  ;;  %v15609_v57 = vld [vmem:[#allocation2 + $0x94] sm:$0xff]  }
 0x305   : > { %v9757_v5 = vsel %vm3341_vm9, %v9752_v53, %v9756_v59  ;;  %v9760_v17 = vor.u32 %v9758_v43, %v9756_v59  ;;  %v11179_v29 = vrot.slane %v15600_v4, 1  ;;  %v15616_v52 = vld [vmem:[#allocation2 + $0x9c] ss:$0 sps:$4 sm:$0x11]   ;;  %v11187_v40 = vrot.slane %v15613_v33, 1 }
 0x306   : > { %v5808_v6 = vpop.permute.xlu1 %5807  ;;  %v7155_v23 = vpop.permute.xlu0 %7154  ;;  %v9764_v58 = vrot.slane %v9762_v44, 1  ;;  %v15605_v44 = vld [vmem:[#allocation2 + $0x88] ss:$0 sps:$4 sm:$0x11]  }
 0x307   : > { %5937 = vst.msk [vmem:[#allocation3 + $0x1f8] sm:$0xff] %vm5873_vm14, %v5808_v6  ;;  %v11174_v6 = vrot.slane %v15589_v38, 1  ;;  %v11181_v53 = vsel %vm4815_vm12, %v11179_v29, %v11180_v16 }
 0x308   : > { %7347 = vst.msk [vmem:[#allocation3] sm:$0xff] %vm7346_vm1, %v7155_v23  ;;  %11325 = vrot.lane.b32.xlu1 %v11168_v60, %s16011_s19  ;;  %8155 = vrot.lane.b32.xlu0 %v7999_v8, %s16008_s16  ;;  %v11175_v60 = vrot.slane %v15590_v48, 1  ;;  %v15592_v8 = vld [vmem:[#allocation2 + $0x64] sm:$0xfe]   ;;  %v15597_v23 = vld [vmem:[#allocation2 + $0x78] sm:$0xff]   ;;  %v9765_v32 = vsel %vm3341_vm9, %v9760_v17, %v9764_v58  ;;  %v8015_v58 = vrot.slane %v15605_v44, 1 }
 0x309   : > { %v8007_v18 = vrot.slane %v15592_v8, 1  ;;  %v9767_v54 = vshrl.u32 %v15597_v23, 16 }
 0x30a   : > { %v7157_v11 = vpop.permute.xlu1 %7156  ;;  %v7159_v28 = vpop.permute.xlu0 %7158  ;;  %v11176_v31 = vsel %vm4815_vm12, %v11174_v6, %v11175_v60  ;;  %v11178_v56 = vsel %vm4815_vm12, %v11175_v60, %v11177_v62  ;;  %v9794_v6 = vshll.u32 %v15609_v57, 16  ;;  %v9802_v62 = vshll.u32 %v15610_v0, 16  ;;  %v15618_v0 = vld [vmem:[#allocation2 + $0xa8] sm:$0xff]  }
 0x30b   : > { %7348 = vst.msk [vmem:[#allocation3 + $0x8] sm:$0xff] %vm7346_vm1, %v7157_v11  ;;  %7349 = vst.msk [vmem:[#allocation3 + $0x10] sm:$0xff] %vm7346_vm1, %v7159_v28  ;;  %v9769_v11 = vshll.u32 %v15597_v23, 16 }
 0x30c   : > { %8157 = vrot.lane.b32.xlu1 %v8001_v9, %s16008_s16  ;;  %8861 = vrot.lane.b32.xlu0 %v15573_v13, %s16009_s17  ;;  %v15598_v9 = vld [vmem:[#allocation2 + $0x80] sm:$0xff]  }
 0x30d   : > { %v9774_v25 = vshll.u32 %v15598_v9, 16  ;;  %v9771_v55 = vrot.slane %v9769_v11, 1  ;;  %v9778_v46 = vshrl.u32 %v15598_v9, 16 }
 0x30e   : > { %v7161_v34 = vpop.permute.xlu1 %7160  ;;  %v7163_v45 = vpop.permute.xlu0 %7162 }
 0x30f   : > { %7350 = vst.msk [vmem:[#allocation3 + $0x18] sm:$0xff] %vm7346_vm1, %v7161_v34  ;;  %7351 = vst.msk [vmem:[#allocation3 + $0x20] sm:$0xff] %vm7346_vm1, %v7163_v45  ;;  %v15595_v45 = vld [vmem:[#allocation2 + $0x78] sm:$0xff]   ;;  %v9776_v37 = vrot.slane %v9774_v25, 1  ;;  %v9804_v25 = vrot.slane %v9802_v62, 1 }
 0x310   : > { %8863 = vrot.lane.b32.xlu1 %v15574_v24, %s16009_s17  ;;  %10334 = vrot.lane.b32.xlu0 %v9737_v51, %s16010_s18  ;;  %v8009_v51 = vsel %vm4815_vm12, %v8007_v18, %v8008_v27  ;;  %v15611_v18 = vld [vmem:[#allocation2 + $0x8c] sm:$0xfe]  }
 0x311   : > { %v9780_v35 = vor.u32 %v9778_v46, %v9776_v37 }
 0x312   : > { %v7165_v26 = vpop.permute.xlu1 %7164  ;;  %v7167_v15 = vpop.permute.xlu0 %7166 }
 0x313   : > { %7352 = vst.msk [vmem:[#allocation3 + $0x28] sm:$0xff] %vm7346_vm1, %v7165_v26  ;;  %7353 = vst.msk [vmem:[#allocation3 + $0x30] sm:$0xff] %vm7346_vm1, %v7167_v15  ;;  %v15596_v15 = vld [vmem:[#allocation2 + $0x80] sm:$0xff]  }
 0x314   : > { %10336 = vrot.lane.b32.xlu1 %v9745_v21, %s16010_s18  ;;  %11327 = vrot.lane.b32.xlu0 %v11171_v47, %s16011_s19  ;;  %v8011_v21 = vsel %vm4815_vm12, %v8008_v27, %v8010_v39  ;;  %v9772_v47 = vor.u32 %v9771_v55, %v9767_v54  ;;  %v15612_v27 = vld [vmem:[#allocation2 + $0x94] sm:$0xff]   ;;  %v11184_v55 = vrot.slane %v15611_v18, 1 }
 0x316   : > { %v7169_v30 = vpop.permute.xlu1 %7168  ;;  %v7171_v41 = vpop.permute.xlu0 %7170  ;;  %v9777_v14 = vsel %vm3341_vm9, %v9772_v47, %v9776_v37  ;;  %v15620_v37 = vld [vmem:[#allocation2 + $0xa8] sm:$0xff]  }
 0x317   : > { %7354 = vst.msk [vmem:[#allocation3 + $0x38] sm:$0xff] %vm7346_vm1, %v7169_v30  ;;  %7355 = vst.msk [vmem:[#allocation3 + $0x40] sm:$0xff] %vm7346_vm1, %v7171_v41  ;;  %v15603_v30 = vld [vmem:[#allocation2 + $0x78] sm:$0xfe]   ;;  %v15608_v41 = vld [vmem:[#allocation2 + $0x8c] sm:$0xff]   ;;  %v9818_v44 = vshrl.u32 %v15620_v37, 16 }
 0x318   : > { %11329 = vrot.lane.b32.xlu1 %v11173_v20, %s16011_s19  ;;  %8159 = vrot.lane.b32.xlu0 %v8004_v12, %s16008_s16  ;;  %v15604_v20 = vld [vmem:[#allocation2 + $0x80] sm:$0xff]   ;;  %v15602_v12 = vld [vmem:[#allocation2 + $0x88] ss:$0 sps:$4 sm:$0x11]   ;;  %v8012_v59 = vrot.slane %v15603_v30, 1  ;;  %v9787_v60 = vshrl.u32 %v15608_v41, 16 }
 0x319   : > { %v11182_v48 = vrot.slane %v15602_v12, 1  ;;  %v8013_v38 = vrot.slane %v15604_v20, 1  ;;  %v9814_v20 = vshll.u32 %v15620_v37, 16  ;;  %v15621_v30 = vld [vmem:[#allocation2 + $0xb0] ss:$0 sps:$4 sm:$0x11]  }
 0x31a   : > { %v7173_v61 = vpop.permute.xlu1 %7172  ;;  %v7175_v19 = vpop.permute.xlu0 %7174  ;;  %v15634_v37 = vld [vmem:[#allocation2 + $0xbc] sm:$0xff]  }
 0x31b   : > { %7356 = vst.msk [vmem:[#allocation3 + $0x48] sm:$0xff] %vm7346_vm1, %v7173_v61  ;;  %7357 = vst.msk [vmem:[#allocation3 + $0x50] sm:$0xff] %vm7346_vm1, %v7175_v19  ;;  %v9789_v61 = vshll.u32 %v15608_v41, 16  ;;  %v11183_v8 = vsel %vm4815_vm12, %v11180_v16, %v11182_v48  ;;  %v8016_v10 = vsel %vm4815_vm12, %v8013_v38, %v8015_v58  ;;  %v9816_v48 = vrot.slane %v9814_v20, 1  ;;  %v15626_v58 = vld [vmem:[#allocation2 + $0xa8] sm:$0xff]  }
 0x31c   : > { %8161 = vrot.lane.b32.xlu1 %v8006_v49, %s16008_s16  ;;  %8865 = vrot.lane.b32.xlu0 %v15584_v42, %s16009_s17  ;;  %v9785_v49 = vsel %vm3341_vm9, %v9780_v35, %v9784_v7  ;;  %v8020_v7 = vrot.slane %v15616_v52, 1  ;;  %v15637_v20 = vld [vmem:[#allocation2 + $0xb4] sm:$0xfe]  }
 0x31d   : > { %v9791_v17 = vrot.slane %v9789_v61, 1  ;;  %v15624_v61 = vld [vmem:[#allocation2 + $0xb0] ss:$0 sps:$4 sm:$0x11]  }
 0x31e   : > { %v7177_v13 = vpop.permute.xlu1 %7176  ;;  %v7179_v22 = vpop.permute.xlu0 %7178 }
 0x31f   : > { %7358 = vst.msk [vmem:[#allocation3 + $0x58] sm:$0xff] %vm7346_vm1, %v7177_v13  ;;  %7359 = vst.msk [vmem:[#allocation3 + $0x60] sm:$0xff] %vm7346_vm1, %v7179_v22  ;;  %v15606_v22 = vld [vmem:[#allocation2 + $0x8c] sm:$0xff]   ;;  %v9792_v9 = vor.u32 %v9791_v17, %v9787_v60  ;;  %v15625_v60 = vld [vmem:[#allocation2 + $0xa0] sm:$0xfe]  }
 0x320   : > { %8867 = vrot.lane.b32.xlu1 %v15585_v63, %s16009_s17  ;;  %10338 = vrot.lane.b32.xlu0 %v9757_v5, %s16010_s18  ;;  %v8014_v5 = vsel %vm4815_vm12, %v8012_v59, %v8013_v38  ;;  %v15623_v38 = vld [vmem:[#allocation2 + $0xa8] sm:$0xff]  }
 0x322   : > { %v7181_v28 = vpop.permute.xlu1 %7180  ;;  %v7183_v24 = vpop.permute.xlu0 %7182 }
 0x323   : > { %7360 = vst.msk [vmem:[#allocation3 + $0x68] sm:$0xff] %vm7346_vm1, %v7181_v28  ;;  %7361 = vst.msk [vmem:[#allocation3 + $0x70] sm:$0xff] %vm7346_vm1, %v7183_v24  ;;  %v15607_v24 = vld [vmem:[#allocation2 + $0x94] sm:$0xff]  }
 0x324   : > { %10340 = vrot.lane.b32.xlu1 %v9765_v32, %s16010_s18  ;;  %11331 = vrot.lane.b32.xlu0 %v11176_v31, %s16011_s19  ;;  %v9796_v32 = vrot.slane %v9794_v6, 1  ;;  %v9798_v31 = vshrl.u32 %v15609_v57, 16  ;;  %v9822_v57 = vshll.u32 %v15621_v30, 16  ;;  %v9820_v6 = vor.u32 %v9818_v44, %v9816_v48 }
 0x326   : > { %v7185_v36 = vpop.permute.xlu1 %7184  ;;  %v7187_v34 = vpop.permute.xlu0 %7186  ;;  %v9797_v39 = vsel %vm3341_vm9, %v9792_v9, %v9796_v32  ;;  %v9800_v54 = vor.u32 %v9798_v31, %v9796_v32  ;;  %v8022_v9 = vrot.slane %v15625_v60, 1  ;;  %v8023_v32 = vrot.slane %v15626_v58, 1  ;;  %v15631_v31 = vld [vmem:[#allocation2 + $0xbc] sm:$0xff]   ;;  %v15645_v58 = vld [vmem:[#allocation2 + $0xd8] ss:$0 sps:$4 sm:$0x11]  }
 0x327   : > { %7362 = vst.msk [vmem:[#allocation3 + $0x78] sm:$0xff] %vm7346_vm1, %v7185_v36  ;;  %7363 = vst.msk [vmem:[#allocation3 + $0x80] sm:$0xff] %vm7346_vm1, %v7187_v34  ;;  %v15614_v36 = vld [vmem:[#allocation2 + $0x8c] sm:$0xfe]   ;;  %v15619_v34 = vld [vmem:[#allocation2 + $0xa0] sm:$0xff]   ;;  %v9838_v52 = vshrl.u32 %v15631_v31, 16 }
 0x328   : > { %11333 = vrot.lane.b32.xlu1 %v11178_v56, %s16011_s19  ;;  %8163 = vrot.lane.b32.xlu0 %v8009_v51, %s16008_s16  ;;  %v15615_v56 = vld [vmem:[#allocation2 + $0x94] sm:$0xff]   ;;  %v11185_v51 = vrot.slane %v15612_v27, 1  ;;  %v9805_v47 = vsel %vm3341_vm9, %v9800_v54, %v9804_v25  ;;  %v9807_v12 = vshrl.u32 %v15619_v34, 16  ;;  %v11192_v27 = vrot.slane %v15624_v61, 1 }
 0x329   : > { %v8024_v54 = vsel %vm4815_vm12, %v8022_v9, %v8023_v32 }
 0x32a   : > { %v7189_v50 = vpop.permute.xlu1 %7188  ;;  %v7191_v26 = vpop.permute.xlu0 %7190  ;;  %v11186_v4 = vsel %vm4815_vm12, %v11184_v55, %v11185_v51 }
 0x32b   : > { %7364 = vst.msk [vmem:[#allocation3 + $0x88] sm:$0xff] %vm7346_vm1, %v7189_v50  ;;  %7365 = vst.msk [vmem:[#allocation3 + $0x90] sm:$0xff] %vm7346_vm1, %v7191_v26  ;;  %v8017_v50 = vrot.slane %v15614_v36, 1  ;;  %v9809_v26 = vshll.u32 %v15619_v34, 16 }
 0x32c   : > { %8165 = vrot.lane.b32.xlu1 %v8011_v21, %s16008_s16  ;;  %8869 = vrot.lane.b32.xlu0 %v15595_v45, %s16009_s17  ;;  %v8018_v21 = vrot.slane %v15615_v56, 1  ;;  %v15632_v56 = vld [vmem:[#allocation2 + $0xc4] ss:$0 sps:$4 sm:$0x11]  }
 0x32d   : > { %v9811_v29 = vrot.slane %v9809_v26, 1  ;;  %v15635_v26 = vld [vmem:[#allocation2 + $0xc4] ss:$0 sps:$4 sm:$0x11]  }
 0x32e   : > { %v7193_v42 = vpop.permute.xlu1 %7192  ;;  %v7195_v43 = vpop.permute.xlu0 %7194  ;;  %v8019_v35 = vsel %vm4815_vm12, %v8017_v50, %v8018_v21  ;;  %v15633_v50 = vld [vmem:[#allocation2 + $0xb4] sm:$0xfe]  }
 0x32f   : > { %7366 = vst.msk [vmem:[#allocation3 + $0x98] sm:$0xff] %vm7346_vm1, %v7193_v42  ;;  %7367 = vst.msk [vmem:[#allocation3 + $0xa0] sm:$0xff] %vm7346_vm1, %v7195_v43  ;;  %v15617_v43 = vld [vmem:[#allocation2 + $0xa0] sm:$0xff]   ;;  %v9812_v59 = vor.u32 %v9811_v29, %v9807_v12  ;;  %v11195_v12 = vrot.slane %v15634_v37, 1  ;;  %v11194_v30 = vrot.slane %v15633_v50, 1 }
 0x330   : > { %8871 = vrot.lane.b32.xlu1 %v15596_v15, %s16009_s17  ;;  %10342 = vrot.lane.b32.xlu0 %v9777_v14, %s16010_s18  ;;  %v11188_v14 = vsel %vm4815_vm12, %v11185_v51, %v11187_v40  ;;  %v9834_v51 = vshll.u32 %v15631_v31, 16  ;;  %v15648_v31 = vld [vmem:[#allocation2 + $0xd8] ss:$0 sps:$4 sm:$0x11]  }
 0x331   : > { %v9817_v17 = vsel %vm3341_vm9, %v9812_v59, %v9816_v48  ;;  %v15639_v48 = vld [vmem:[#allocation2 + $0xc4] ss:$0 sps:$4 sm:$0x11]  }
 0x332   : > { %v7197_v19 = vpop.permute.xlu1 %7196  ;;  %v7199_v63 = vpop.permute.xlu0 %7198  ;;  %v9836_v40 = vrot.slane %v9834_v51, 1  ;;  %v8030_v60 = vrot.slane %v15639_v48, 1 }
 0x333   : > { %7368 = vst.msk [vmem:[#allocation3 + $0xa8] sm:$0xff] %vm7346_vm1, %v7197_v19  ;;  %7369 = vst.msk [vmem:[#allocation3 + $0xb0] sm:$0xff] %vm7346_vm1, %v7199_v63 }
 0x334   : > { %10344 = vrot.lane.b32.xlu1 %v9785_v49, %s16010_s18  ;;  %11335 = vrot.lane.b32.xlu0 %v11181_v53, %s16011_s19  ;;  %v15622_v49 = vld [vmem:[#allocation2 + $0xa0] sm:$0xfe]   ;;  %v8021_v53 = vsel %vm4815_vm12, %v8018_v21, %v8020_v7  ;;  %v9842_v21 = vshll.u32 %v15632_v56, 16  ;;  %v15650_v56 = vld [vmem:[#allocation2 + $0xd0] sm:$0xff]  }
 0x335   : > { %v15629_v7 = vld [vmem:[#allocation2 + $0xbc] sm:$0xff]  }
 0x336   : > { %v7201_v23 = vpop.permute.xlu1 %7200  ;;  %v7203_v13 = vpop.permute.xlu0 %7202  ;;  %v9844_v29 = vrot.slane %v9842_v21, 1  ;;  %v8033_v21 = vrot.slane %v15650_v56, 1 }
 0x337   : > { %7370 = vst.msk [vmem:[#allocation3 + $0xb8] sm:$0xff] %vm7346_vm1, %v7201_v23  ;;  %7371 = vst.msk [vmem:[#allocation3 + $0xc0] sm:$0xff] %vm7346_vm1, %v7203_v13  ;;  %v9824_v23 = vrot.slane %v9822_v57, 1  ;;  %v11189_v13 = vrot.slane %v15622_v49, 1  ;;  %v8027_v49 = vrot.slane %v15637_v20, 1  ;;  %v11196_v57 = vsel %vm4815_vm12, %v11194_v30, %v11195_v12 }
 0x338   : > { %11337 = vrot.lane.b32.xlu1 %v11183_v8, %s16011_s19  ;;  %8167 = vrot.lane.b32.xlu0 %v8014_v5, %s16008_s16  ;;  %v11190_v8 = vrot.slane %v15623_v38, 1  ;;  %v15630_v5 = vld [vmem:[#allocation2 + $0xb4] sm:$0xff]   ;;  %v11197_v38 = vrot.slane %v15635_v26, 1 }
 0x339   : > { %v9829_v18 = vshll.u32 %v15630_v5, 16  ;;  %v9827_v55 = vshrl.u32 %v15630_v5, 16 }
 0x33a   : > { %v7205_v11 = vpop.permute.xlu1 %7204  ;;  %v7207_v28 = vpop.permute.xlu0 %7206  ;;  %v11198_v5 = vsel %vm4815_vm12, %v11195_v12, %v11197_v38  ;;  %v15652_v38 = vld [vmem:[#allocation2 + $0xdc] sm:$0xff]  }
 0x33b   : > { %7372 = vst.msk [vmem:[#allocation3 + $0xc8] sm:$0xff] %vm7346_vm1, %v7205_v11  ;;  %7373 = vst.msk [vmem:[#allocation3 + $0xd0] sm:$0xff] %vm7346_vm1, %v7207_v28  ;;  %v9825_v11 = vsel %vm3341_vm9, %v9820_v6, %v9824_v23  ;;  %v11191_v28 = vsel %vm4815_vm12, %v11189_v13, %v11190_v8  ;;  %v9831_v36 = vrot.slane %v9829_v18, 1 }
 0x33c   : > { %8169 = vrot.lane.b32.xlu1 %v8016_v10, %s16008_s16  ;;  %8873 = vrot.lane.b32.xlu0 %v15606_v22, %s16009_s17  ;;  %v15627_v10 = vld [vmem:[#allocation2 + $0xb0] ss:$0 sps:$4 sm:$0x11]  }
 0x33d   : > { %v8025_v25 = vrot.slane %v15627_v10, 1  ;;  %v15647_v10 = vld [vmem:[#allocation2 + $0xd0] sm:$0xff]  }
 0x33e   : > { %v7209_v45 = vpop.permute.xlu1 %7208  ;;  %v7211_v46 = vpop.permute.xlu0 %7210  ;;  %v11200_v51 = vrot.slane %v15647_v10, 1 }
 0x33f   : > { %7374 = vst.msk [vmem:[#allocation3 + $0xd8] sm:$0xff] %vm7346_vm1, %v7209_v45  ;;  %7375 = vst.msk [vmem:[#allocation3 + $0xe0] sm:$0xff] %vm7346_vm1, %v7211_v46  ;;  %v15628_v46 = vld [vmem:[#allocation2 + $0xb4] sm:$0xff]  }
 0x340   : > { %8875 = vrot.lane.b32.xlu1 %v15607_v24, %s16009_s17  ;;  %10346 = vrot.lane.b32.xlu0 %v9797_v39, %s16010_s18  ;;  %v11193_v39 = vsel %vm4815_vm12, %v11190_v8, %v11192_v27 }
 0x342   : > { %v7213_v15 = vpop.permute.xlu1 %7212  ;;  %v7215_v16 = vpop.permute.xlu0 %7214 }
 0x343   : > { %7376 = vst.msk [vmem:[#allocation3 + $0xe8] sm:$0xff] %vm7346_vm1, %v7213_v15  ;;  %7377 = vst.msk [vmem:[#allocation3 + $0xf0] sm:$0xff] %vm7346_vm1, %v7215_v16 }
 0x344   : > { %10348 = vrot.lane.b32.xlu1 %v9805_v47, %s16010_s18  ;;  %11339 = vrot.lane.b32.xlu0 %v11186_v4, %s16011_s19  ;;  %v8026_v47 = vsel %vm4815_vm12, %v8023_v32, %v8025_v25  ;;  %v9832_v4 = vor.u32 %v9831_v36, %v9827_v55  ;;  %v9862_v32 = vshll.u32 %v15645_v58, 16  ;;  %v15642_v25 = vld [vmem:[#allocation2 + $0xd0] sm:$0xff]  }
 0x346   : > { %v7217_v41 = vpop.permute.xlu1 %7216  ;;  %v7219_v42 = vpop.permute.xlu0 %7218  ;;  %v9864_v55 = vrot.slane %v9862_v32, 1 }
 0x347   : > { %7378 = vst.msk [vmem:[#allocation3 + $0xf8] sm:$0xff] %vm7346_vm1, %v7217_v41  ;;  %7379 = vst.msk [vmem:[#allocation3 + $0x100] sm:$0xff] %vm7346_vm1, %v7219_v42  ;;  %v15638_v41 = vld [vmem:[#allocation2 + $0xbc] sm:$0xff]   ;;  %v15643_v42 = vld [vmem:[#allocation2 + $0xc8] sm:$0xff]  }
 0x348   : > { %11341 = vrot.lane.b32.xlu1 %v11188_v14, %s16011_s19  ;;  %8171 = vrot.lane.b32.xlu0 %v8019_v35, %s16008_s16  ;;  %v9837_v14 = vsel %vm3341_vm9, %v9832_v4, %v9836_v40  ;;  %v9840_v35 = vor.u32 %v9838_v52, %v9836_v40  ;;  %v8028_v61 = vrot.slane %v15638_v41, 1  ;;  %v9847_v6 = vshrl.u32 %v15643_v42, 16  ;;  %v15655_v4 = vld [vmem:[#allocation2 + $0xe4] sm:$0xff]  }
 0x349   : > { %v11202_v40 = vrot.slane %v15648_v31, 1 }
 0x34a   : > { %v7221_v19 = vpop.permute.xlu1 %7220  ;;  %v7223_v63 = vpop.permute.xlu0 %7222  ;;  %v9845_v59 = vsel %vm3341_vm9, %v9840_v35, %v9844_v29  ;;  %v8031_v18 = vsel %vm4815_vm12, %v8028_v61, %v8030_v60  ;;  %v9874_v29 = vshll.u32 %v15655_v4, 16 }
 0x34b   : > { %7380 = vst.msk [vmem:[#allocation3 + $0x108] sm:$0xff] %vm7346_vm1, %v7221_v19  ;;  %7381 = vst.msk [vmem:[#allocation3 + $0x110] sm:$0xff] %vm7346_vm1, %v7223_v63  ;;  %v9849_v19 = vshll.u32 %v15643_v42, 16  ;;  %v11203_v30 = vsel %vm4815_vm12, %v11200_v51, %v11202_v40 }
 0x34c   : > { %8173 = vrot.lane.b32.xlu1 %v8021_v53, %s16008_s16  ;;  %8877 = vrot.lane.b32.xlu0 %v15617_v43, %s16009_s17  ;;  %v15644_v53 = vld [vmem:[#allocation2 + $0xd0] sm:$0xff]  }
 0x34d   : > { %v9854_v8 = vshll.u32 %v15644_v53, 16  ;;  %v9851_v23 = vrot.slane %v9849_v19, 1  ;;  %v9858_v27 = vshrl.u32 %v15644_v53, 16  ;;  %v15658_v53 = vld [vmem:[#allocation2 + $0xe4] sm:$0xff]  }
 0x34e   : > { %v7225_v22 = vpop.permute.xlu1 %7224  ;;  %v7227_v62 = vpop.permute.xlu0 %7226 }
 0x34f   : > { %7382 = vst.msk [vmem:[#allocation3 + $0x118] sm:$0xff] %vm7346_vm1, %v7225_v22  ;;  %7383 = vst.msk [vmem:[#allocation3 + $0x120] sm:$0xff] %vm7346_vm1, %v7227_v62  ;;  %v15641_v62 = vld [vmem:[#allocation2 + $0xc8] sm:$0xff]   ;;  %v9856_v9 = vrot.slane %v9854_v8, 1 }
 0x350   : > { %8879 = vrot.lane.b32.xlu1 %v15618_v0, %s16009_s17  ;;  %10350 = vrot.lane.b32.xlu0 %v9817_v17, %s16010_s18  ;;  %v8029_v17 = vsel %vm4815_vm12, %v8027_v49, %v8028_v61  ;;  %v9878_v49 = vshrl.u32 %v15655_v4, 16  ;;  %v15659_v61 = vld [vmem:[#allocation2 + $0xec] ss:$0 sps:$4 sm:$0x11]   ;;  %v15661_v8 = vld [vmem:[#allocation2 + $0xe4] sm:$0xff]  }
 0x351   : > { %v11207_v31 = vrot.slane %v15659_v61, 1 }
 0x352   : > { %v7229_v24 = vpop.permute.xlu1 %7228  ;;  %v7231_v33 = vpop.permute.xlu0 %7230 }
 0x353   : > { %7384 = vst.msk [vmem:[#allocation3 + $0x128] sm:$0xff] %vm7346_vm1, %v7229_v24  ;;  %7385 = vst.msk [vmem:[#allocation3 + $0x130] sm:$0xff] %vm7346_vm1, %v7231_v33 }
 0x354   : > { %10352 = vrot.lane.b32.xlu1 %v9825_v11, %s16010_s18  ;;  %11343 = vrot.lane.b32.xlu0 %v11191_v28, %s16011_s19  ;;  %v9852_v11 = vor.u32 %v9851_v23, %v9847_v6  ;;  %v15646_v28 = vld [vmem:[#allocation2 + $0xc8] sm:$0xfe]  }
 0x355   : > { %v11199_v36 = vrot.slane %v15646_v28, 1  ;;  %v15666_v28 = vld [vmem:[#allocation2 + $0xf8] sm:$0xff]  }
 0x356   : > { %v7233_v34 = vpop.permute.xlu1 %7232  ;;  %v7235_v45 = vpop.permute.xlu0 %7234  ;;  %v9898_v4 = vshrl.u32 %v15666_v28, 16 }
 0x357   : > { %7386 = vst.msk [vmem:[#allocation3 + $0x138] sm:$0xff] %vm7346_vm1, %v7233_v34  ;;  %7387 = vst.msk [vmem:[#allocation3 + $0x140] sm:$0xff] %vm7346_vm1, %v7235_v45  ;;  %v15649_v34 = vld [vmem:[#allocation2 + $0xc8] sm:$0xfe]   ;;  %v15654_v45 = vld [vmem:[#allocation2 + $0xdc] sm:$0xff]   ;;  %v11201_v26 = vsel %vm4815_vm12, %v11199_v36, %v11200_v51 }
 0x358   : > { %11345 = vrot.lane.b32.xlu1 %v11193_v39, %s16011_s19  ;;  %8175 = vrot.lane.b32.xlu0 %v8024_v54, %s16008_s16  ;;  %v9857_v39 = vsel %vm3341_vm9, %v9852_v11, %v9856_v9  ;;  %v9860_v54 = vor.u32 %v9858_v27, %v9856_v9  ;;  %v9867_v42 = vshrl.u32 %v15654_v45, 16  ;;  %v15665_v27 = vld [vmem:[#allocation2 + $0xf0] sm:$0xff]   ;;  %v15662_v11 = vld [vmem:[#allocation2 + $0xec] ss:$0 sps:$4 sm:$0x11]  }
 0x359   : > { %v8040_v36 = vrot.slane %v15662_v11, 1  ;;  %v15674_v11 = vld [vmem:[#allocation2 + $0x104] sm:$0xff]  }
 0x35a   : > { %v7237_v15 = vpop.permute.xlu1 %7236  ;;  %v8148_v16 = vpop.permute.xlu0 %8147  ;;  %v9865_v50 = vsel %vm3341_vm9, %v9860_v54, %v9864_v55  ;;  %v15667_v55 = vld [vmem:[#allocation2 + $0x100] ss:$0 sps:$4 sm:$0x11]  }
 0x35b   : > { %7388 = vst.msk [vmem:[#allocation3 + $0x148] sm:$0xff] %vm7346_vm1, %v7237_v15  ;;  %v8032_v15 = vrot.slane %v15649_v34, 1  ;;  %v9894_v34 = vshll.u32 %v15666_v28, 16 }
 0x35c   : > { %8340 = vst.msk [vmem:[#allocation3] sm:$0xff] %vm8339_vm2, %v8148_v16  ;;  %8177 = vrot.lane.b32.xlu1 %v8026_v47, %s16008_s16  ;;  %8881 = vrot.lane.b32.xlu0 %v15628_v46, %s16009_s17  ;;  %v15651_v47 = vld [vmem:[#allocation2 + $0xd8] ss:$0 sps:$4 sm:$0x11]   ;;  %v9869_v16 = vshll.u32 %v15654_v45, 16 }
 0x35d   : > { %v8035_v35 = vrot.slane %v15651_v47, 1  ;;  %v8034_v41 = vsel %vm4815_vm12, %v8032_v15, %v8033_v21  ;;  %v15663_v47 = vld [vmem:[#allocation2 + $0xf0] sm:$0xff]   ;;  %v9902_v15 = vshll.u32 %v15667_v55, 16 }
 0x35e   : > { %v8150_v43 = vpop.permute.xlu1 %8149  ;;  %v8854_v44 = vpop.permute.xlu0 %8853 }
 0x35f   : > { %8341 = vst.msk [vmem:[#allocation3 + $0x8] sm:$0xff] %vm8339_vm2, %v8150_v43  ;;  %v9871_v43 = vrot.slane %v9869_v16, 1  ;;  %v8036_v19 = vsel %vm4815_vm12, %v8033_v21, %v8035_v35  ;;  %v15670_v16 = vld [vmem:[#allocation2 + $0x100] ss:$0 sps:$4 sm:$0x11]  }
 0x360   : > { %9046 = vst.msk [vmem:[#allocation3] sm:$0xff] %vm9045_vm4, %v8854_v44  ;;  %8883 = vrot.lane.b32.xlu1 %v15629_v7, %s16009_s17  ;;  %10354 = vrot.lane.b32.xlu0 %v9837_v14, %s16010_s18  ;;  %v15656_v14 = vld [vmem:[#allocation2 + $0xec] ss:$0 sps:$4 sm:$0x11]   ;;  %v11212_v61 = vrot.slane %v15670_v16, 1 }
 0x362   : > { %v8856_v63 = vpop.permute.xlu1 %8855  ;;  %v10327_v0 = vpop.permute.xlu0 %10326 }
 0x363   : > { %9047 = vst.msk [vmem:[#allocation3 + $0x8] sm:$0xff] %vm9045_vm4, %v8856_v63  ;;  %v9872_v63 = vor.u32 %v9871_v43, %v9867_v42 }
 0x364   : > { %10519 = vst.msk [vmem:[#allocation3] sm:$0xff] %vm10518_vm6, %v10327_v0  ;;  %10356 = vrot.lane.b32.xlu1 %v9845_v59, %s16010_s18  ;;  %11347 = vrot.lane.b32.xlu0 %v11196_v57, %s16011_s19  ;;  %v9876_v59 = vrot.slane %v9874_v29, 1  ;;  %v9882_v57 = vshll.u32 %v15656_v14, 16  ;;  %v15657_v0 = vld [vmem:[#allocation2 + $0xdc] sm:$0xfe]  }
 0x365   : > { %v15672_v29 = vld [vmem:[#allocation2 + $0xf8] sm:$0xff]  }
 0x366   : > { %v10329_v13 = vpop.permute.xlu1 %10328  ;;  %v11320_v22 = vpop.permute.xlu0 %11319  ;;  %v9877_v6 = vsel %vm3341_vm9, %v9872_v63, %v9876_v59  ;;  %v9880_v23 = vor.u32 %v9878_v49, %v9876_v59  ;;  %v15676_v49 = vld [vmem:[#allocation2 + $0x104] sm:$0xff]   ;;  %v15673_v63 = vld [vmem:[#allocation2 + $0x100] ss:$0 sps:$4 sm:$0x11]  }
 0x367   : > { %10520 = vst.msk [vmem:[#allocation3 + $0x8] sm:$0xff] %vm10518_vm6, %v10329_v13  ;;  %v9884_v13 = vrot.slane %v9882_v57, 1 }
 0x368   : > { %11512 = vst.msk [vmem:[#allocation3] sm:$0xff] %vm11511_vm7, %v11320_v22  ;;  %11349 = vrot.lane.b32.xlu1 %v11198_v5, %s16011_s19  ;;  %8179 = vrot.lane.b32.xlu0 %v8029_v17, %s16008_s16  ;;  %v15653_v5 = vld [vmem:[#allocation2 + $0xe4] sm:$0xff]   ;;  %v11205_v17 = vrot.slane %v15658_v53, 1  ;;  %v11204_v22 = vrot.slane %v15657_v0, 1  ;;  %v15677_v0 = vld [vmem:[#allocation2 + $0x10c] sm:$0xff]  }
 0x369   : > { %v9918_v28 = vshrl.u32 %v15677_v0, 16 }
 0x36a   : > { %v11322_v24 = vpop.permute.xlu1 %11321  ;;  %v8152_v33 = vpop.permute.xlu0 %8151  ;;  %v11208_v45 = vsel %vm4815_vm12, %v11205_v17, %v11207_v31 }
 0x36b   : > { %11513 = vst.msk [vmem:[#allocation3 + $0x8] sm:$0xff] %vm11511_vm7, %v11322_v24  ;;  %v9885_v24 = vsel %vm3341_vm9, %v9880_v23, %v9884_v13  ;;  %v15678_v13 = vld [vmem:[#allocation2 + $0x114] ss:$0 sps:$4 sm:$0x11]  }
 0x36c   : > { %8342 = vst.msk [vmem:[#allocation3 + $0x10] sm:$0xff] %vm8339_vm2, %v8152_v33  ;;  %8181 = vrot.lane.b32.xlu1 %v8031_v18, %s16008_s16  ;;  %8885 = vrot.lane.b32.xlu0 %v15641_v62, %s16009_s17  ;;  %v15660_v62 = vld [vmem:[#allocation2 + $0xdc] sm:$0xfe]   ;;  %v8038_v18 = vrot.slane %v15661_v8, 1  ;;  %v11206_v33 = vsel %vm4815_vm12, %v11204_v22, %v11205_v17  ;;  %v8045_v22 = vrot.slane %v15673_v63, 1 }
 0x36d   : > { %v8037_v56 = vrot.slane %v15660_v62, 1  ;;  %v9914_v62 = vshll.u32 %v15677_v0, 16  ;;  %v15685_v63 = vld [vmem:[#allocation2 + $0x118] sm:$0xff]  }
 0x36e   : > { %v8154_v46 = vpop.permute.xlu1 %8153  ;;  %v8858_v52 = vpop.permute.xlu0 %8857 }
 0x36f   : > { %v11576_v37 = vld [vmem:[#allocation3] sm:$0xff]  ;;  %8343 = vst.msk [vmem:[#allocation3 + $0x18] sm:$0xff] %vm8339_vm2, %v8154_v46  ;;  %v8039_v46 = vsel %vm4815_vm12, %v8037_v56, %v8038_v18  ;;  %v9922_v56 = vshll.u32 %v15678_v13, 16 }
 0x370   : > { %9048 = vst.msk [vmem:[#allocation3 + $0x10] sm:$0xff] %vm9045_vm4, %v8858_v52  ;;  %14984 = vmatprep.mubr.msk.bf16.mxu0 %vm11662_vm8, %v11576_v37  ;;  %8887 = vrot.lane.b32.xlu1 %v15642_v25, %s16009_s17  ;;  %v9889_v25 = vshll.u32 %v15665_v27, 16  ;;  %v9887_v52 = vshrl.u32 %v15665_v27, 16 }
 0x371   : > { %10358 = vrot.lane.b32.xlu0 %v9857_v39, %s16010_s18 }
 0x372   : > { %v8860_v20 = vpop.permute.xlu1 %8859  ;;  %v11577_v7 = vld [vmem:[#allocation3 + $0x8] sm:$0xff]  ;;  %v10331_v12 = vpop.permute.xlu0 %10330  ;;  %v9891_v37 = vrot.slane %v9889_v25, 1 }
 0x373   : > { %9049 = vst.msk [vmem:[#allocation3 + $0x18] sm:$0xff] %vm9045_vm4, %v8860_v20  ;;  %14985 = vmatmul.mubr.msk.bf16.vlgmr.msra.gmra.mrb[0].mxu0 %vm11662_vm8, %v11577_v7  ;;  %v8041_v20 = vsel %vm4815_vm12, %v8038_v18, %v8040_v36  ;;  %v15681_v25 = vld [vmem:[#allocation2 + $0x114] ss:$0 sps:$4 sm:$0x11]  }
 0x374   : > { %10521 = vst.msk [vmem:[#allocation3 + $0x10] sm:$0xff] %vm10518_vm6, %v10331_v12  ;;  %10360 = vrot.lane.b32.xlu1 %v9865_v50, %s16010_s18  ;;  %v15669_v50 = vld [vmem:[#allocation2 + $0xf8] sm:$0xff]   ;;  %v9892_v7 = vor.u32 %v9891_v37, %v9887_v52  ;;  %v15668_v12 = vld [vmem:[#allocation2 + $0xf0] sm:$0xfe]   ;;  %v11217_v16 = vrot.slane %v15681_v25, 1 }
 0x375   : > { %11351 = vrot.lane.b32.xlu0 %v11201_v26, %s16011_s19  ;;  %v9896_v26 = vrot.slane %v9894_v34, 1  ;;  %v15683_v34 = vld [vmem:[#allocation2 + $0x10c] sm:$0xff]  }
 0x376   : > { %v10333_v44 = vpop.permute.xlu1 %10332  ;;  %v11324_v48 = vpop.permute.xlu0 %11323 }
 0x377   : > { %10522 = vst.msk [vmem:[#allocation3 + $0x18] sm:$0xff] %vm10518_vm6, %v10333_v44  ;;  %v9897_v42 = vsel %vm3341_vm9, %v9892_v7, %v9896_v26  ;;  %v9900_v43 = vor.u32 %v9898_v4, %v9896_v26  ;;  %v9904_v44 = vrot.slane %v9902_v15, 1  ;;  %v15687_v4 = vld [vmem:[#allocation2 + $0x118] sm:$0xff]   ;;  %v15684_v7 = vld [vmem:[#allocation2 + $0x114] ss:$0 sps:$4 sm:$0x11]  }
 0x378   : > { %11514 = vst.msk [vmem:[#allocation3 + $0x10] sm:$0xff] %vm11511_vm7, %v11324_v48  ;;  %11353 = vrot.lane.b32.xlu1 %v11203_v30, %s16011_s19  ;;  %v15664_v30 = vld [vmem:[#allocation2 + $0xf8] sm:$0xff]   ;;  %v11209_v48 = vrot.slane %v15668_v12, 1  ;;  %v15688_v12 = vld [vmem:[#allocation2 + $0x120] sm:$0xff]  }
 0x379   : > { %8183 = vrot.lane.b32.xlu0 %v8034_v41, %s16008_s16  ;;  %v11210_v41 = vrot.slane %v15669_v50, 1  ;;  %v9938_v0 = vshrl.u32 %v15688_v12, 16 }
 0x37a   : > { %v11326_v58 = vpop.permute.xlu1 %11325  ;;  %v8156_v60 = vpop.permute.xlu0 %8155 }
 0x37b   : > { %11515 = vst.msk [vmem:[#allocation3 + $0x18] sm:$0xff] %vm11511_vm7, %v11326_v58  ;;  %v9905_v58 = vsel %vm3341_vm9, %v9900_v43, %v9904_v44  ;;  %v11213_v27 = vsel %vm4815_vm12, %v11210_v41, %v11212_v61  ;;  %v15689_v44 = vld [vmem:[#allocation2 + $0x128] ss:$0 sps:$4 sm:$0x11]  }
 0x37c   : > { %8344 = vst.msk [vmem:[#allocation3 + $0x20] sm:$0xff] %vm8339_vm2, %v8156_v60  ;;  %8185 = vrot.lane.b32.xlu1 %v8036_v19, %s16008_s16  ;;  %v8043_v19 = vrot.slane %v15672_v29, 1  ;;  %v11211_v60 = vsel %vm4815_vm12, %v11209_v48, %v11210_v41  ;;  %v8050_v48 = vrot.slane %v15684_v7, 1  ;;  %v15696_v7 = vld [vmem:[#allocation2 + $0x12c] sm:$0xff]  }
 0x37d   : > { %8889 = vrot.lane.b32.xlu0 %v15652_v38, %s16009_s17  ;;  %v15671_v38 = vld [vmem:[#allocation2 + $0xf0] sm:$0xfe]  }
 0x37e   : > { %v8158_v10 = vpop.permute.xlu1 %8157  ;;  %v8862_v9 = vpop.permute.xlu0 %8861  ;;  %v8042_v8 = vrot.slane %v15671_v38, 1  ;;  %v9934_v38 = vshll.u32 %v15688_v12, 16 }
 0x37f   : > { %v11578_v32 = vld [vmem:[#allocation3 + $0x10] sm:$0xff]  ;;  %8345 = vst.msk [vmem:[#allocation3 + $0x28] sm:$0xff] %vm8339_vm2, %v8158_v10 }
 0x380   : > { %9050 = vst.msk [vmem:[#allocation3 + $0x20] sm:$0xff] %vm9045_vm4, %v8862_v9  ;;  %14988 = vmatprep.mubr.msk.bf16.mxu0 %vm11662_vm8, %v11578_v32  ;;  %8891 = vrot.lane.b32.xlu1 %v15653_v5, %s16009_s17  ;;  %v9909_v5 = vshll.u32 %v15676_v49, 16  ;;  %v8044_v10 = vsel %vm4815_vm12, %v8042_v8, %v8043_v19  ;;  %v9907_v9 = vshrl.u32 %v15676_v49, 16  ;;  %v9942_v8 = vshll.u32 %v15689_v44, 16 }
 0x381   : > { %10362 = vrot.lane.b32.xlu0 %v9877_v6, %s16010_s18 }
 0x382   : > { %v8864_v51 = vpop.permute.xlu1 %8863  ;;  %v11579_v39 = vld [vmem:[#allocation3 + $0x18] sm:$0xff]  ;;  %v10335_v54 = vpop.permute.xlu0 %10334  ;;  %v9911_v32 = vrot.slane %v9909_v5, 1  ;;  %v15692_v5 = vld [vmem:[#allocation2 + $0x128] ss:$0 sps:$4 sm:$0x11]  }
 0x383   : > { %9051 = vst.msk [vmem:[#allocation3 + $0x28] sm:$0xff] %vm9045_vm4, %v8864_v51  ;;  %14989 = vmatmul.mubr.msk.bf16.gmra.mrb[4].mxu0 %vm11662_vm8, %v11579_v39  ;;  %v8046_v51 = vsel %vm4815_vm12, %v8043_v19, %v8045_v22  ;;  %v11222_v25 = vrot.slane %v15692_v5, 1  ;;  %v15706_v5 = vld [vmem:[#allocation2 + $0x13c] ss:$0 sps:$4 sm:$0x11]  }
 0x384   : > { %10523 = vst.msk [vmem:[#allocation3 + $0x20] sm:$0xff] %vm10518_vm6, %v10335_v54  ;;  %10364 = vrot.lane.b32.xlu1 %v9885_v24, %s16010_s18  ;;  %v15680_v24 = vld [vmem:[#allocation2 + $0x10c] sm:$0xff]   ;;  %v9912_v39 = vor.u32 %v9911_v32, %v9907_v9  ;;  %v15679_v54 = vld [vmem:[#allocation2 + $0x104] sm:$0xfe]  }
 0x385   : > { %11355 = vrot.lane.b32.xlu0 %v11206_v33, %s16011_s19  ;;  %v9916_v33 = vrot.slane %v9914_v62, 1  ;;  %v15694_v62 = vld [vmem:[#allocation2 + $0x120] sm:$0xff]  }
 0x386   : > { %v10337_v40 = vpop.permute.xlu1 %10336  ;;  %v11328_v21 = vpop.permute.xlu0 %11327 }
 0x387   : > { %10524 = vst.msk [vmem:[#allocation3 + $0x28] sm:$0xff] %vm10518_vm6, %v10337_v40  ;;  %v9917_v52 = vsel %vm3341_vm9, %v9912_v39, %v9916_v33  ;;  %v9920_v37 = vor.u32 %v9918_v28, %v9916_v33  ;;  %v9924_v40 = vrot.slane %v9922_v56, 1  ;;  %v15698_v28 = vld [vmem:[#allocation2 + $0x12c] sm:$0xff]   ;;  %v15695_v39 = vld [vmem:[#allocation2 + $0x128] ss:$0 sps:$4 sm:$0x11]  }
 0x388   : > { %11516 = vst.msk [vmem:[#allocation3 + $0x20] sm:$0xff] %vm11511_vm7, %v11328_v21  ;;  %11357 = vrot.lane.b32.xlu1 %v11208_v45, %s16011_s19  ;;  %v15675_v45 = vld [vmem:[#allocation2 + $0x10c] sm:$0xff]   ;;  %v11214_v21 = vrot.slane %v15679_v54, 1  ;;  %v15699_v54 = vld [vmem:[#allocation2 + $0x134] sm:$0xff]  }
 0x389   : > { %8187 = vrot.lane.b32.xlu0 %v8039_v46, %s16008_s16  ;;  %v11215_v46 = vrot.slane %v15680_v24, 1 }
 0x38a   : > { %v11330_v14 = vpop.permute.xlu1 %11329  ;;  %v8160_v35 = vpop.permute.xlu0 %8159 }
 0x38b   : > { %11517 = vst.msk [vmem:[#allocation3 + $0x28] sm:$0xff] %vm11511_vm7, %v11330_v14  ;;  %v9925_v14 = vsel %vm3341_vm9, %v9920_v37, %v9924_v40  ;;  %v11218_v49 = vsel %vm4815_vm12, %v11215_v46, %v11217_v16  ;;  %v9954_v40 = vshll.u32 %v15699_v54, 16 }
 0x38c   : > { %8346 = vst.msk [vmem:[#allocation3 + $0x30] sm:$0xff] %vm8339_vm2, %v8160_v35  ;;  %8189 = vrot.lane.b32.xlu1 %v8041_v20, %s16008_s16  ;;  %v8048_v20 = vrot.slane %v15683_v34, 1  ;;  %v11216_v35 = vsel %vm4815_vm12, %v11214_v21, %v11215_v46  ;;  %v15700_v21 = vld [vmem:[#allocation2 + $0x13c] ss:$0 sps:$4 sm:$0x11]  }
 0x38d   : > { %8893 = vrot.lane.b32.xlu0 %v15663_v47, %s16009_s17  ;;  %v15682_v47 = vld [vmem:[#allocation2 + $0x104] sm:$0xfe]   ;;  %v9956_v12 = vrot.slane %v9954_v40, 1 }
 0x38e   : > { %v8162_v53 = vpop.permute.xlu1 %8161  ;;  %v8866_v59 = vpop.permute.xlu0 %8865  ;;  %v8047_v29 = vrot.slane %v15682_v47, 1 }
 0x38f   : > { %v11580_v57 = vld [vmem:[#allocation3 + $0x20] sm:$0xff]  ;;  %8347 = vst.msk [vmem:[#allocation3 + $0x38] sm:$0xff] %vm8339_vm2, %v8162_v53 }
 0x390   : > { %9052 = vst.msk [vmem:[#allocation3 + $0x30] sm:$0xff] %vm9045_vm4, %v8866_v59  ;;  %14992 = vmatprep.mubr.msk.bf16.mxu0 %vm11662_vm8, %v11580_v57  ;;  %8895 = vrot.lane.b32.xlu1 %v15664_v30, %s16009_s17  ;;  %v9929_v30 = vshll.u32 %v15687_v4, 16  ;;  %v8049_v53 = vsel %vm4815_vm12, %v8047_v29, %v8048_v20  ;;  %v9927_v59 = vshrl.u32 %v15687_v4, 16  ;;  %v15702_v29 = vld [vmem:[#allocation2 + $0x134] sm:$0xff]  }
 0x391   : > { %10366 = vrot.lane.b32.xlu0 %v9897_v42, %s16010_s18 }
 0x392   : > { %v8868_v17 = vpop.permute.xlu1 %8867  ;;  %v11581_v6 = vld [vmem:[#allocation3 + $0x28] sm:$0xff]  ;;  %v10339_v23 = vpop.permute.xlu0 %10338  ;;  %v9931_v57 = vrot.slane %v9929_v30, 1 }
 0x393   : > { %9053 = vst.msk [vmem:[#allocation3 + $0x38] sm:$0xff] %vm9045_vm4, %v8868_v17  ;;  %14993 = vmatmul.mubr.msk.bf16.gmra.mrb[8].mxu0 %vm11662_vm8, %v11581_v6  ;;  %v8051_v17 = vsel %vm4815_vm12, %v8048_v20, %v8050_v48  ;;  %v15701_v30 = vld [vmem:[#allocation2 + $0x12c] sm:$0xfe]   ;;  %v15703_v48 = vld [vmem:[#allocation2 + $0x13c] ss:$0 sps:$4 sm:$0x11]  }
 0x394   : > { %10525 = vst.msk [vmem:[#allocation3 + $0x30] sm:$0xff] %vm10518_vm6, %v10339_v23  ;;  %10368 = vrot.lane.b32.xlu1 %v9905_v58, %s16010_s18  ;;  %v15691_v58 = vld [vmem:[#allocation2 + $0x120] sm:$0xff]   ;;  %v9932_v6 = vor.u32 %v9931_v57, %v9927_v59  ;;  %v15690_v23 = vld [vmem:[#allocation2 + $0x118] sm:$0xfe]  }
 0x395   : > { %11359 = vrot.lane.b32.xlu0 %v11211_v60, %s16011_s19  ;;  %v9936_v60 = vrot.slane %v9934_v38, 1  ;;  %v15697_v38 = vld [vmem:[#allocation2 + $0x134] sm:$0xff]  }
 0x396   : > { %v10341_v31 = vpop.permute.xlu1 %10340  ;;  %v11332_v18 = vpop.permute.xlu0 %11331  ;;  %v15705_v59 = vld [vmem:[#allocation2 + $0x134] sm:$0xff]  }
 0x397   : > { %10526 = vst.msk [vmem:[#allocation3 + $0x38] sm:$0xff] %vm10518_vm6, %v10341_v31  ;;  %v9937_v9 = vsel %vm3341_vm9, %v9932_v6, %v9936_v60  ;;  %v9940_v32 = vor.u32 %v9938_v0, %v9936_v60  ;;  %v9944_v31 = vrot.slane %v9942_v8, 1  ;;  %v15709_v0 = vld [vmem:[#allocation2 + $0x140] sm:$0xff]   ;;  %v11227_v6 = vrot.slane %v15703_v48, 1 }
 0x398   : > { %11518 = vst.msk [vmem:[#allocation3 + $0x30] sm:$0xff] %vm11511_vm7, %v11332_v18  ;;  %11361 = vrot.lane.b32.xlu1 %v11213_v27, %s16011_s19  ;;  %v15686_v27 = vld [vmem:[#allocation2 + $0x120] sm:$0xff]   ;;  %v11219_v18 = vrot.slane %v15690_v23, 1  ;;  %v15710_v23 = vld [vmem:[#allocation2 + $0x148] sm:$0xff]  }
 0x399   : > { %8191 = vrot.lane.b32.xlu0 %v8044_v10, %s16008_s16  ;;  %v11220_v10 = vrot.slane %v15691_v58, 1 }
 0x39a   : > { %v11334_v55 = vpop.permute.xlu1 %11333  ;;  %v8164_v36 = vpop.permute.xlu0 %8163 }
 0x39b   : > { %11519 = vst.msk [vmem:[#allocation3 + $0x38] sm:$0xff] %vm11511_vm7, %v11334_v55  ;;  %v9945_v55 = vsel %vm3341_vm9, %v9940_v32, %v9944_v31  ;;  %v11223_v47 = vsel %vm4815_vm12, %v11220_v10, %v11222_v25  ;;  %v15711_v31 = vld [vmem:[#allocation2 + $0x150] ss:$0 sps:$4 sm:$0x11]  }
 0x39c   : > { %8348 = vst.msk [vmem:[#allocation3 + $0x40] sm:$0xff] %vm8339_vm2, %v8164_v36  ;;  %8193 = vrot.lane.b32.xlu1 %v8046_v51, %s16008_s16  ;;  %v8053_v51 = vrot.slane %v15694_v62, 1  ;;  %v11221_v36 = vsel %vm4815_vm12, %v11219_v18, %v11220_v10  ;;  %v8058_v62 = vrot.slane %v15705_v59, 1  ;;  %v8060_v18 = vrot.slane %v15706_v5, 1 }
 0x39d   : > { %8897 = vrot.lane.b32.xlu0 %v15674_v11, %s16009_s17  ;;  %v15693_v11 = vld [vmem:[#allocation2 + $0x118] sm:$0xfe]  }
 0x39e   : > { %v8166_v50 = vpop.permute.xlu1 %8165  ;;  %v8870_v26 = vpop.permute.xlu0 %8869  ;;  %v8052_v34 = vrot.slane %v15693_v11, 1  ;;  %v9974_v11 = vshll.u32 %v15710_v23, 16 }
 0x39f   : > { %v11582_v15 = vld [vmem:[#allocation3 + $0x30] sm:$0xff]  ;;  %8349 = vst.msk [vmem:[#allocation3 + $0x48] sm:$0xff] %vm8339_vm2, %v8166_v50  ;;  %v8055_v50 = vrot.slane %v15695_v39, 1  ;;  %v9982_v39 = vshll.u32 %v15711_v31, 16 }
 0x3a0   : > { %9054 = vst.msk [vmem:[#allocation3 + $0x40] sm:$0xff] %vm9045_vm4, %v8870_v26  ;;  %14996 = vmatprep.mubr.msk.bf16.mxu0 %vm11662_vm8, %v11582_v15  ;;  %8899 = vrot.lane.b32.xlu1 %v15675_v45, %s16009_s17  ;;  %v9949_v45 = vshll.u32 %v15698_v28, 16  ;;  %v8054_v4 = vsel %vm4815_vm12, %v8052_v34, %v8053_v51  ;;  %v9947_v26 = vshrl.u32 %v15698_v28, 16  ;;  %v8061_v34 = vsel %vm4815_vm12, %v8058_v62, %v8060_v18 }
 0x3a1   : > { %10370 = vrot.lane.b32.xlu0 %v9917_v52, %s16010_s18 }
 0x3a2   : > { %v8872_v41 = vpop.permute.xlu1 %8871  ;;  %v11583_v42 = vld [vmem:[#allocation3 + $0x38] sm:$0xff]  ;;  %v10343_v43 = vpop.permute.xlu0 %10342  ;;  %v9951_v15 = vrot.slane %v9949_v45, 1 }
 0x3a3   : > { %9055 = vst.msk [vmem:[#allocation3 + $0x48] sm:$0xff] %vm9045_vm4, %v8872_v41  ;;  %14997 = vmatmul.mubr.msk.bf16.gmra.mrb[12].mxu0 %vm11662_vm8, %v11583_v42  ;;  %v8056_v41 = vsel %vm4815_vm12, %v8053_v51, %v8055_v50 }
 0x3a4   : > { %10527 = vst.msk [vmem:[#allocation3 + $0x40] sm:$0xff] %vm10518_vm6, %v10343_v43  ;;  %10372 = vrot.lane.b32.xlu1 %v9925_v14, %s16010_s18  ;;  %v9958_v14 = vshrl.u32 %v15699_v54, 16  ;;  %v9952_v42 = vor.u32 %v9951_v15, %v9947_v26  ;;  %v15712_v54 = vld [vmem:[#allocation2 + $0x140] sm:$0xfe]   ;;  %v15716_v15 = vld [vmem:[#allocation2 + $0x148] sm:$0xff]  }
 0x3a5   : > { %11363 = vrot.lane.b32.xlu0 %v11216_v35, %s16011_s19  ;;  %v9962_v35 = vshll.u32 %v15700_v21, 16  ;;  %v15708_v21 = vld [vmem:[#allocation2 + $0x148] sm:$0xff]   ;;  %v11229_v50 = vrot.slane %v15712_v54, 1  ;;  %v15715_v26 = vld [vmem:[#allocation2 + $0x140] sm:$0xfe]  }
 0x3a6   : > { %v10345_v61 = vpop.permute.xlu1 %10344  ;;  %v11336_v19 = vpop.permute.xlu0 %11335  ;;  %v9960_v57 = vor.u32 %v9958_v14, %v9956_v12 }
 0x3a7   : > { %10528 = vst.msk [vmem:[#allocation3 + $0x48] sm:$0xff] %vm10518_vm6, %v10345_v61  ;;  %v15704_v61 = vld [vmem:[#allocation2 + $0x12c] sm:$0xfe]  }
 0x3a8   : > { %11520 = vst.msk [vmem:[#allocation3 + $0x40] sm:$0xff] %vm11511_vm7, %v11336_v19  ;;  %11365 = vrot.lane.b32.xlu1 %v11218_v49, %s16011_s19  ;;  %v9964_v49 = vrot.slane %v9962_v35, 1  ;;  %v9957_v19 = vsel %vm3341_vm9, %v9952_v42, %v9956_v12 }
 0x3a9   : > { %8195 = vrot.lane.b32.xlu0 %v8049_v53, %s16008_s16  ;;  %v11225_v53 = vrot.slane %v15702_v29, 1 }
 0x3aa   : > { %v11338_v13 = vpop.permute.xlu1 %11337  ;;  %v8168_v22 = vpop.permute.xlu0 %8167 }
 0x3ab   : > { %11521 = vst.msk [vmem:[#allocation3 + $0x48] sm:$0xff] %vm11511_vm7, %v11338_v13  ;;  %v11228_v28 = vsel %vm4815_vm12, %v11225_v53, %v11227_v6  ;;  %v15718_v6 = vld [vmem:[#allocation2 + $0x154] sm:$0xff]  }
 0x3ac   : > { %8350 = vst.msk [vmem:[#allocation3 + $0x50] sm:$0xff] %vm8339_vm2, %v8168_v22  ;;  %8197 = vrot.lane.b32.xlu1 %v8051_v17, %s16008_s16  ;;  %v9965_v17 = vsel %vm3341_vm9, %v9960_v57, %v9964_v49  ;;  %v8057_v22 = vrot.slane %v15704_v61, 1  ;;  %v8063_v49 = vrot.slane %v15716_v15, 1 }
 0x3ad   : > { %8901 = vrot.lane.b32.xlu0 %v15685_v63, %s16009_s17  ;;  %v11224_v63 = vrot.slane %v15701_v30, 1  ;;  %v15721_v30 = vld [vmem:[#allocation2 + $0x15c] sm:$0xff]  }
 0x3ae   : > { %v8170_v24 = vpop.permute.xlu1 %8169  ;;  %v8874_v33 = vpop.permute.xlu0 %8873 }
 0x3af   : > { %v11584_v56 = vld [vmem:[#allocation3 + $0x40] sm:$0xff]  ;;  %8351 = vst.msk [vmem:[#allocation3 + $0x58] sm:$0xff] %vm8339_vm2, %v8170_v24  ;;  %v11226_v13 = vsel %vm4815_vm12, %v11224_v63, %v11225_v53  ;;  %v8059_v24 = vsel %vm4815_vm12, %v8057_v22, %v8058_v62  ;;  %v15723_v62 = vld [vmem:[#allocation2 + $0x154] sm:$0xfe]  }
 0x3b0   : > { %9056 = vst.msk [vmem:[#allocation3 + $0x50] sm:$0xff] %vm9045_vm4, %v8874_v33  ;;  %15000 = vmatprep.mubr.msk.bf16.mxu0 %vm11662_vm8, %v11584_v56  ;;  %8903 = vrot.lane.b32.xlu1 %v15686_v27, %s16009_s17  ;;  %v9969_v27 = vshll.u32 %v15709_v0, 16  ;;  %v9967_v33 = vshrl.u32 %v15709_v0, 16 }
 0x3b1   : > { %10374 = vrot.lane.b32.xlu0 %v9937_v9, %s16010_s18 }
 0x3b2   : > { %v8876_v46 = vpop.permute.xlu1 %8875  ;;  %v11585_v52 = vld [vmem:[#allocation3 + $0x48] sm:$0xff]  ;;  %v10347_v37 = vpop.permute.xlu0 %10346  ;;  %v9971_v56 = vrot.slane %v9969_v27, 1  ;;  %v15724_v27 = vld [vmem:[#allocation2 + $0x15c] sm:$0xff]  }
 0x3b3   : > { %9057 = vst.msk [vmem:[#allocation3 + $0x58] sm:$0xff] %vm9045_vm4, %v8876_v46  ;;  %15001 = vmatmul.mubr.msk.bf16.gmra.mrb[16].mxu0 %vm11662_vm8, %v11585_v52  ;;  %v9976_v46 = vrot.slane %v9974_v11, 1  ;;  %v9978_v52 = vshrl.u32 %v15710_v23, 16  ;;  %v15726_v11 = vld [vmem:[#allocation2 + $0x154] sm:$0xfe]   ;;  %v11235_v54 = vrot.slane %v15724_v27, 1 }
 0x3b4   : > { %10529 = vst.msk [vmem:[#allocation3 + $0x50] sm:$0xff] %vm10518_vm6, %v10347_v37  ;;  %10376 = vrot.lane.b32.xlu1 %v9945_v55, %s16010_s18  ;;  %v15707_v55 = vld [vmem:[#allocation2 + $0x140] sm:$0xff]   ;;  %v9972_v45 = vor.u32 %v9971_v56, %v9967_v33  ;;  %v15731_v56 = vld [vmem:[#allocation2 + $0x168] sm:$0xff]   ;;  %v15739_v27 = vld [vmem:[#allocation2 + $0x178] ss:$0 sps:$4 sm:$0x11]  }
 0x3b5   : > { %11367 = vrot.lane.b32.xlu0 %v11221_v36, %s16011_s19  ;;  %v15713_v36 = vld [vmem:[#allocation2 + $0x148] sm:$0xff]   ;;  %v9980_v12 = vor.u32 %v9978_v52, %v9976_v46  ;;  %v15732_v52 = vld [vmem:[#allocation2 + $0x170] sm:$0xff]  }
 0x3b6   : > { %v10349_v16 = vpop.permute.xlu1 %10348  ;;  %v11340_v20 = vpop.permute.xlu0 %11339 }
 0x3b7   : > { %10530 = vst.msk [vmem:[#allocation3 + $0x58] sm:$0xff] %vm10518_vm6, %v10349_v16  ;;  %v11230_v16 = vrot.slane %v15713_v36, 1 }
 0x3b8   : > { %11522 = vst.msk [vmem:[#allocation3 + $0x50] sm:$0xff] %vm11511_vm7, %v11340_v20  ;;  %11369 = vrot.lane.b32.xlu1 %v11223_v47, %s16011_s19  ;;  %v9984_v47 = vrot.slane %v9982_v39, 1  ;;  %v15720_v20 = vld [vmem:[#allocation2 + $0x154] sm:$0xff]   ;;  %v11234_v39 = vrot.slane %v15723_v62, 1 }
 0x3b9   : > { %8199 = vrot.lane.b32.xlu0 %v8054_v4, %s16008_s16  ;;  %v15714_v4 = vld [vmem:[#allocation2 + $0x150] ss:$0 sps:$4 sm:$0x11]   ;;  %v9989_v53 = vshll.u32 %v15720_v20, 16 }
 0x3ba   : > { %v11342_v43 = vpop.permute.xlu1 %11341  ;;  %v8172_v44 = vpop.permute.xlu0 %8171  ;;  %v11232_v42 = vrot.slane %v15714_v4, 1  ;;  %v9985_v48 = vsel %vm3341_vm9, %v9980_v12, %v9984_v47  ;;  %v15733_v47 = vld [vmem:[#allocation2 + $0x178] ss:$0 sps:$4 sm:$0x11]  }
 0x3bb   : > { %11523 = vst.msk [vmem:[#allocation3 + $0x58] sm:$0xff] %vm11511_vm7, %v11342_v43  ;;  %v8062_v43 = vrot.slane %v15715_v26, 1 }
 0x3bc   : > { %8352 = vst.msk [vmem:[#allocation3 + $0x60] sm:$0xff] %vm8339_vm2, %v8172_v44  ;;  %8201 = vrot.lane.b32.xlu1 %v8056_v41, %s16008_s16  ;;  %v15717_v41 = vld [vmem:[#allocation2 + $0x150] ss:$0 sps:$4 sm:$0x11]   ;;  %v11233_v0 = vsel %vm4815_vm12, %v11230_v16, %v11232_v42  ;;  %v15729_v42 = vld [vmem:[#allocation2 + $0x168] sm:$0xff]  }
 0x3bd   : > { %8905 = vrot.lane.b32.xlu0 %v15696_v7, %s16009_s17  ;;  %v9977_v7 = vsel %vm3341_vm9, %v9972_v45, %v9976_v46  ;;  %v15722_v44 = vld [vmem:[#allocation2 + $0x164] ss:$0 sps:$4 sm:$0x11]   ;;  %v8065_v63 = vrot.slane %v15717_v41, 1 }
 0x3be   : > { %v8174_v58 = vpop.permute.xlu1 %8173  ;;  %v8878_v60 = vpop.permute.xlu0 %8877  ;;  %v10002_v22 = vshll.u32 %v15722_v44, 16  ;;  %v15728_v46 = vld [vmem:[#allocation2 + $0x164] ss:$0 sps:$4 sm:$0x11]   ;;  %v10022_v44 = vshll.u32 %v15733_v47, 16 }
 0x3bf   : > { %v11586_v8 = vld [vmem:[#allocation3 + $0x50] sm:$0xff]  ;;  %8353 = vst.msk [vmem:[#allocation3 + $0x68] sm:$0xff] %vm8339_vm2, %v8174_v58  ;;  %v8064_v58 = vsel %vm4815_vm12, %v8062_v43, %v8063_v49 }
 0x3c0   : > { %9058 = vst.msk [vmem:[#allocation3 + $0x60] sm:$0xff] %vm9045_vm4, %v8878_v60  ;;  %15004 = vmatprep.mubr.msk.bf16.mxu0 %vm11662_vm8, %v11586_v8  ;;  %8907 = vrot.lane.b32.xlu1 %v15697_v38, %s16009_s17  ;;  %v11231_v38 = vsel %vm4815_vm12, %v11229_v50, %v11230_v16  ;;  %v9987_v60 = vshrl.u32 %v15720_v20, 16  ;;  %v9991_v8 = vrot.slane %v9989_v53, 1  ;;  %v11236_v50 = vsel %vm4815_vm12, %v11234_v39, %v11235_v54 }
 0x3c1   : > { %10378 = vrot.lane.b32.xlu0 %v9957_v19, %s16010_s18  ;;  %v9994_v19 = vshll.u32 %v15721_v30, 16  ;;  %v10014_v20 = vshll.u32 %v15732_v52, 16 }
 0x3c2   : > { %v8880_v10 = vpop.permute.xlu1 %8879  ;;  %v11587_v9 = vld [vmem:[#allocation3 + $0x58] sm:$0xff]  ;;  %v10351_v32 = vpop.permute.xlu0 %10350 }
 0x3c3   : > { %9059 = vst.msk [vmem:[#allocation3 + $0x68] sm:$0xff] %vm9045_vm4, %v8880_v10  ;;  %15005 = vmatmul.mubr.msk.bf16.gmra.mrb[20].mxu0 %vm11662_vm8, %v11587_v9  ;;  %v9996_v23 = vrot.slane %v9994_v19, 1  ;;  %v15725_v10 = vld [vmem:[#allocation2 + $0x164] ss:$0 sps:$4 sm:$0x11]   ;;  %v8066_v9 = vsel %vm4815_vm12, %v8063_v49, %v8065_v63  ;;  %v10016_v43 = vrot.slane %v10014_v20, 1 }
 0x3c4   : > { %10531 = vst.msk [vmem:[#allocation3 + $0x60] sm:$0xff] %vm10518_vm6, %v10351_v32  ;;  %10380 = vrot.lane.b32.xlu1 %v9965_v17, %s16010_s18  ;;  %v9992_v32 = vor.u32 %v9991_v8, %v9987_v60  ;;  %v11237_v45 = vrot.slane %v15725_v10, 1  ;;  %v15735_v49 = vld [vmem:[#allocation2 + $0x170] sm:$0xff]   ;;  %v10024_v63 = vrot.slane %v10022_v44, 1  ;;  %v15741_v20 = vld [vmem:[#allocation2 + $0x184] sm:$0xff]  }
 0x3c5   : > { %11371 = vrot.lane.b32.xlu0 %v11226_v13, %s16011_s19  ;;  %v9998_v13 = vshrl.u32 %v15721_v30, 16  ;;  %v15730_v19 = vld [vmem:[#allocation2 + $0x170] sm:$0xff]  }
 0x3c6   : > { %v10353_v25 = vpop.permute.xlu1 %10352  ;;  %v11344_v51 = vpop.permute.xlu0 %11343  ;;  %v11238_v12 = vsel %vm4815_vm12, %v11235_v54, %v11237_v45 }
 0x3c7   : > { %10532 = vst.msk [vmem:[#allocation3 + $0x68] sm:$0xff] %vm10518_vm6, %v10353_v25  ;;  %v10000_v33 = vor.u32 %v9998_v13, %v9996_v23  ;;  %v9997_v25 = vsel %vm3341_vm9, %v9992_v32, %v9996_v23 }
 0x3c8   : > { %11524 = vst.msk [vmem:[#allocation3 + $0x60] sm:$0xff] %vm11511_vm7, %v11344_v51  ;;  %11373 = vrot.lane.b32.xlu1 %v11228_v28, %s16011_s19  ;;  %v15727_v28 = vld [vmem:[#allocation2 + $0x15c] sm:$0xff]   ;;  %v10004_v51 = vrot.slane %v10002_v22, 1 }
 0x3c9   : > { %8203 = vrot.lane.b32.xlu0 %v8059_v24, %s16008_s16  ;;  %v15719_v24 = vld [vmem:[#allocation2 + $0x15c] sm:$0xff]  }
 0x3ca   : > { %v11346_v37 = vpop.permute.xlu1 %11345  ;;  %v8176_v40 = vpop.permute.xlu0 %8175  ;;  %v10005_v4 = vsel %vm3341_vm9, %v10000_v33, %v10004_v51  ;;  %v8075_v51 = vrot.slane %v15739_v27, 1 }
 0x3cb   : > { %11525 = vst.msk [vmem:[#allocation3 + $0x68] sm:$0xff] %vm11511_vm7, %v11346_v37  ;;  %v8067_v37 = vrot.slane %v15726_v11, 1 }
 0x3cc   : > { %8354 = vst.msk [vmem:[#allocation3 + $0x70] sm:$0xff] %vm8339_vm2, %v8176_v40  ;;  %8205 = vrot.lane.b32.xlu1 %v8061_v34, %s16008_s16  ;;  %v8068_v40 = vrot.slane %v15727_v28, 1 }
 0x3cd   : > { %8909 = vrot.lane.b32.xlu0 %v15707_v55, %s16009_s17 }
 0x3ce   : > { %v8178_v14 = vpop.permute.xlu1 %8177  ;;  %v8882_v35 = vpop.permute.xlu0 %8881 }
 0x3cf   : > { %v11588_v29 = vld [vmem:[#allocation3 + $0x60] sm:$0xff]  ;;  %8355 = vst.msk [vmem:[#allocation3 + $0x78] sm:$0xff] %vm8339_vm2, %v8178_v14  ;;  %v8069_v14 = vsel %vm4815_vm12, %v8067_v37, %v8068_v40 }
 0x3d0   : > { %9060 = vst.msk [vmem:[#allocation3 + $0x70] sm:$0xff] %vm9045_vm4, %v8882_v35  ;;  %15008 = vmatprep.mubr.msk.bf16.mxu0 %vm11662_vm8, %v11588_v29  ;;  %8911 = vrot.lane.b32.xlu1 %v15708_v21, %s16009_s17  ;;  %v10009_v21 = vshll.u32 %v15731_v56, 16  ;;  %v10007_v35 = vshrl.u32 %v15731_v56, 16 }
 0x3d1   : > { %10382 = vrot.lane.b32.xlu0 %v9977_v7, %s16010_s18  ;;  %v8070_v7 = vrot.slane %v15728_v46, 1 }
 0x3d2   : > { %v8884_v59 = vpop.permute.xlu1 %8883  ;;  %v11589_v57 = vld [vmem:[#allocation3 + $0x68] sm:$0xff]  ;;  %v10355_v61 = vpop.permute.xlu0 %10354  ;;  %v10011_v29 = vrot.slane %v10009_v21, 1  ;;  %v15745_v21 = vld [vmem:[#allocation2 + $0x17c] sm:$0xfe]  }
 0x3d3   : > { %9061 = vst.msk [vmem:[#allocation3 + $0x78] sm:$0xff] %vm9045_vm4, %v8884_v59  ;;  %15009 = vmatmul.mubr.msk.bf16.gmra.mrb[24].mxu0 %vm11662_vm8, %v11589_v57  ;;  %v8071_v53 = vsel %vm4815_vm12, %v8068_v40, %v8070_v7  ;;  %v15747_v7 = vld [vmem:[#allocation2 + $0x18c] ss:$0 sps:$4 sm:$0x11]  }
 0x3d4   : > { %10533 = vst.msk [vmem:[#allocation3 + $0x70] sm:$0xff] %vm10518_vm6, %v10355_v61  ;;  %10384 = vrot.lane.b32.xlu1 %v9985_v48, %s16010_s18  ;;  %v15734_v48 = vld [vmem:[#allocation2 + $0x168] sm:$0xfe]   ;;  %v10012_v59 = vor.u32 %v10011_v29, %v10007_v35  ;;  %v15753_v29 = vld [vmem:[#allocation2 + $0x190] sm:$0xff]  }
 0x3d5   : > { %11375 = vrot.lane.b32.xlu0 %v11231_v38, %s16011_s19  ;;  %v10018_v38 = vshrl.u32 %v15732_v52, 16  ;;  %v11239_v8 = vrot.slane %v15734_v48, 1  ;;  %v15740_v52 = vld [vmem:[#allocation2 + $0x17c] sm:$0xff]  }
 0x3d6   : > { %v10357_v5 = vpop.permute.xlu1 %10356  ;;  %v11348_v17 = vpop.permute.xlu0 %11347  ;;  %v10017_v23 = vsel %vm3341_vm9, %v10012_v59, %v10016_v43  ;;  %v11247_v59 = vrot.slane %v15747_v7, 1 }
 0x3d7   : > { %10534 = vst.msk [vmem:[#allocation3 + $0x78] sm:$0xff] %vm10518_vm6, %v10357_v5  ;;  %v10020_v60 = vor.u32 %v10018_v38, %v10016_v43  ;;  %v11240_v5 = vrot.slane %v15735_v49, 1  ;;  %v15750_v49 = vld [vmem:[#allocation2 + $0x18c] ss:$0 sps:$4 sm:$0x11]  }
 0x3d8   : > { %11526 = vst.msk [vmem:[#allocation3 + $0x70] sm:$0xff] %vm11511_vm7, %v11348_v17  ;;  %11377 = vrot.lane.b32.xlu1 %v11233_v0, %s16011_s19  ;;  %v15736_v0 = vld [vmem:[#allocation2 + $0x178] ss:$0 sps:$4 sm:$0x11]   ;;  %v15738_v17 = vld [vmem:[#allocation2 + $0x170] sm:$0xff]  }
 0x3d9   : > { %8207 = vrot.lane.b32.xlu0 %v8064_v58, %s16008_s16  ;;  %v15737_v58 = vld [vmem:[#allocation2 + $0x168] sm:$0xfe]   ;;  %v10025_v10 = vsel %vm3341_vm9, %v10020_v60, %v10024_v63  ;;  %v8073_v28 = vrot.slane %v15738_v17, 1  ;;  %v15755_v17 = vld [vmem:[#allocation2 + $0x1a0] ss:$0 sps:$4 sm:$0x11]  }
 0x3da   : > { %v11350_v31 = vpop.permute.xlu1 %11349  ;;  %v8180_v18 = vpop.permute.xlu0 %8179  ;;  %v8072_v11 = vrot.slane %v15737_v58, 1 }
 0x3db   : > { %11527 = vst.msk [vmem:[#allocation3 + $0x78] sm:$0xff] %vm11511_vm7, %v11350_v31  ;;  %v11241_v31 = vsel %vm4815_vm12, %v11239_v8, %v11240_v5  ;;  %v8076_v47 = vsel %vm4815_vm12, %v8073_v28, %v8075_v51  ;;  %v15752_v51 = vld [vmem:[#allocation2 + $0x198] sm:$0xff]  }
 0x3dc   : > { %8356 = vst.msk [vmem:[#allocation3 + $0x80] sm:$0xff] %vm8339_vm2, %v8180_v18  ;;  %8209 = vrot.lane.b32.xlu1 %v8066_v9, %s16008_s16  ;;  %v15743_v9 = vld [vmem:[#allocation2 + $0x184] sm:$0xff]   ;;  %v11242_v18 = vrot.slane %v15736_v0, 1 }
 0x3dd   : > { %8913 = vrot.lane.b32.xlu0 %v15718_v6, %s16009_s17  ;;  %v15742_v6 = vld [vmem:[#allocation2 + $0x17c] sm:$0xff]  }
 0x3de   : > { %v8182_v55 = vpop.permute.xlu1 %8181  ;;  %v8886_v36 = vpop.permute.xlu0 %8885  ;;  %v10029_v32 = vshll.u32 %v15742_v6, 16  ;;  %v10027_v39 = vshrl.u32 %v15742_v6, 16 }
 0x3df   : > { %v11590_v34 = vld [vmem:[#allocation3 + $0x70] sm:$0xff]  ;;  %8357 = vst.msk [vmem:[#allocation3 + $0x88] sm:$0xff] %vm8339_vm2, %v8182_v55  ;;  %v10034_v55 = vshll.u32 %v15743_v9, 16 }
 0x3e0   : > { %9062 = vst.msk [vmem:[#allocation3 + $0x80] sm:$0xff] %vm9045_vm4, %v8886_v36  ;;  %15012 = vmatprep.mubr.msk.bf16.mxu0 %vm11662_vm8, %v11590_v34  ;;  %8915 = vrot.lane.b32.xlu1 %v15719_v24, %s16009_s17  ;;  %v10031_v54 = vrot.slane %v10029_v32, 1  ;;  %v11243_v36 = vsel %vm4815_vm12, %v11240_v5, %v11242_v18  ;;  %v8074_v34 = vsel %vm4815_vm12, %v8072_v11, %v8073_v28  ;;  %v15756_v11 = vld [vmem:[#allocation2 + $0x190] sm:$0xfe]   ;;  %v15757_v28 = vld [vmem:[#allocation2 + $0x198] sm:$0xff]  }
 0x3e1   : > { %10386 = vrot.lane.b32.xlu0 %v9997_v25, %s16010_s18  ;;  %v15744_v25 = vld [vmem:[#allocation2 + $0x18c] ss:$0 sps:$4 sm:$0x11]   ;;  %v10036_v37 = vrot.slane %v10034_v55, 1  ;;  %v11249_v55 = vrot.slane %v15756_v11, 1 }
 0x3e2   : > { %v8888_v26 = vpop.permute.xlu1 %8887  ;;  %v11591_v15 = vld [vmem:[#allocation3 + $0x78] sm:$0xff]  ;;  %v10042_v40 = vshll.u32 %v15744_v25, 16 }
 0x3e3   : > { %v10359_v16 = vpop.permute.xlu0 %10358  ;;  %9063 = vst.msk [vmem:[#allocation3 + $0x88] sm:$0xff] %vm9045_vm4, %v8888_v26  ;;  %15013 = vmatmul.mubr.msk.bf16.gmra.mrb[28].mxu0 %vm11662_vm8, %v11591_v15  ;;  %v15746_v26 = vld [vmem:[#allocation2 + $0x184] sm:$0xff]  }
 0x3e4   : > { %10535 = vst.msk [vmem:[#allocation3 + $0x80] sm:$0xff] %vm10518_vm6, %v10359_v16  ;;  %10388 = vrot.lane.b32.xlu1 %v10005_v4, %s16010_s18  ;;  %v10032_v4 = vor.u32 %v10031_v54, %v10027_v39  ;;  %v10044_v35 = vrot.slane %v10042_v40, 1  ;;  %v11245_v43 = vrot.slane %v15746_v26, 1  ;;  %v15758_v54 = vld [vmem:[#allocation2 + $0x1a0] ss:$0 sps:$4 sm:$0x11]  }
 0x3e5   : > { %11379 = vrot.lane.b32.xlu0 %v11236_v50, %s16011_s19  ;;  %v10038_v50 = vshrl.u32 %v15743_v9, 16  ;;  %v15751_v9 = vld [vmem:[#allocation2 + $0x190] sm:$0xff]  }
 0x3e6   : > { %v10361_v30 = vpop.permute.xlu1 %10360  ;;  %v11248_v6 = vsel %vm4815_vm12, %v11245_v43, %v11247_v59  ;;  %v15765_v26 = vld [vmem:[#allocation2 + $0x1ac] sm:$0xff]  }
 0x3e7   : > { %v11352_v41 = vpop.permute.xlu0 %11351  ;;  %10536 = vst.msk [vmem:[#allocation3 + $0x88] sm:$0xff] %vm10518_vm6, %v10361_v30  ;;  %v10037_v30 = vsel %vm3341_vm9, %v10032_v4, %v10036_v37  ;;  %v15761_v4 = vld [vmem:[#allocation2 + $0x1a0] ss:$0 sps:$4 sm:$0x11]  }
 0x3e8   : > { %11528 = vst.msk [vmem:[#allocation3 + $0x80] sm:$0xff] %vm11511_vm7, %v11352_v41  ;;  %11381 = vrot.lane.b32.xlu1 %v11238_v12, %s16011_s19  ;;  %v15748_v12 = vld [vmem:[#allocation2 + $0x17c] sm:$0xfe]   ;;  %v10040_v41 = vor.u32 %v10038_v50, %v10036_v37  ;;  %v11252_v50 = vrot.slane %v15758_v54, 1 }
 0x3e9   : > { %8211 = vrot.lane.b32.xlu0 %v8069_v14, %s16008_s16  ;;  %v15749_v14 = vld [vmem:[#allocation2 + $0x184] sm:$0xff]   ;;  %v15760_v37 = vld [vmem:[#allocation2 + $0x198] sm:$0xff]  }
 0x3ea   : > { %v11354_v57 = vpop.permute.xlu1 %11353  ;;  %v10045_v63 = vsel %vm3341_vm9, %v10040_v41, %v10044_v35  ;;  %v8085_v41 = vrot.slane %v15761_v4, 1 }
 0x3eb   : > { %v8184_v61 = vpop.permute.xlu0 %8183  ;;  %11529 = vst.msk [vmem:[#allocation3 + $0x88] sm:$0xff] %vm11511_vm7, %v11354_v57  ;;  %v8077_v57 = vrot.slane %v15748_v12, 1  ;;  %v8083_v12 = vrot.slane %v15760_v37, 1 }
 0x3ec   : > { %8358 = vst.msk [vmem:[#allocation3 + $0x90] sm:$0xff] %vm8339_vm2, %v8184_v61  ;;  %8213 = vrot.lane.b32.xlu1 %v8071_v53, %s16008_s16  ;;  %v15754_v53 = vld [vmem:[#allocation2 + $0x198] sm:$0xff]   ;;  %v8078_v61 = vrot.slane %v15749_v14, 1 }
 0x3ed   : > { %8917 = vrot.lane.b32.xlu0 %v15729_v42, %s16009_s17  ;;  %v11244_v42 = vrot.slane %v15745_v21, 1  ;;  %v10054_v5 = vshll.u32 %v15754_v53, 16  ;;  %v10058_v18 = vshrl.u32 %v15754_v53, 16 }
 0x3ee   : > { %v8186_v13 = vpop.permute.xlu1 %8185 }
 0x3ef   : > { %v8890_v22 = vpop.permute.xlu0 %8889  ;;  %v11592_v62 = vld [vmem:[#allocation3 + $0x80] sm:$0xff]  ;;  %8359 = vst.msk [vmem:[#allocation3 + $0x98] sm:$0xff] %vm8339_vm2, %v8186_v13  ;;  %v11246_v0 = vsel %vm4815_vm12, %v11244_v42, %v11245_v43  ;;  %v8080_v13 = vrot.slane %v15750_v49, 1  ;;  %v10056_v32 = vrot.slane %v10054_v5, 1 }
 0x3f0   : > { %9064 = vst.msk [vmem:[#allocation3 + $0x90] sm:$0xff] %vm9045_vm4, %v8890_v22  ;;  %15016 = vmatprep.mubr.msk.bf16.mxu0 %vm11662_vm8, %v11592_v62  ;;  %8919 = vrot.lane.b32.xlu1 %v15730_v19, %s16009_s17  ;;  %v10049_v19 = vshll.u32 %v15753_v29, 16  ;;  %v10047_v22 = vshrl.u32 %v15753_v29, 16 }
 0x3f1   : > { %10390 = vrot.lane.b32.xlu0 %v10017_v23, %s16010_s18  ;;  %v8079_v23 = vsel %vm4815_vm12, %v8077_v57, %v8078_v61  ;;  %v15762_v57 = vld [vmem:[#allocation2 + $0x1a4] sm:$0xff]  }
 0x3f2   : > { %v8892_v24 = vpop.permute.xlu1 %8891  ;;  %v11593_v33 = vld [vmem:[#allocation3 + $0x88] sm:$0xff]  ;;  %v10051_v62 = vrot.slane %v10049_v19, 1 }
 0x3f3   : > { %v10363_v56 = vpop.permute.xlu0 %10362  ;;  %9065 = vst.msk [vmem:[#allocation3 + $0x98] sm:$0xff] %vm9045_vm4, %v8892_v24  ;;  %15017 = vmatmul.mubr.msk.bf16.gmra.mrb[32].mxu0 %vm11662_vm8, %v11593_v33  ;;  %v8081_v24 = vsel %vm4815_vm12, %v8078_v61, %v8080_v13  ;;  %v15767_v61 = vld [vmem:[#allocation2 + $0x1a4] sm:$0xfe]   ;;  %v15768_v19 = vld [vmem:[#allocation2 + $0x1ac] sm:$0xff]  }
 0x3f4   : > { %10537 = vst.msk [vmem:[#allocation3 + $0x90] sm:$0xff] %vm10518_vm6, %v10363_v56  ;;  %10392 = vrot.lane.b32.xlu1 %v10025_v10, %s16010_s18  ;;  %v10052_v33 = vor.u32 %v10051_v62, %v10047_v22  ;;  %v15770_v13 = vld [vmem:[#allocation2 + $0x1a4] sm:$0xfe]   ;;  %v11254_v22 = vrot.slane %v15767_v61, 1  ;;  %v11255_v62 = vrot.slane %v15768_v19, 1 }
 0x3f5   : > { %11383 = vrot.lane.b32.xlu0 %v11241_v31, %s16011_s19  ;;  %v10062_v31 = vshll.u32 %v15755_v17, 16  ;;  %v15763_v17 = vld [vmem:[#allocation2 + $0x1ac] sm:$0xff]  }
 0x3f6   : > { %v10365_v45 = vpop.permute.xlu1 %10364 }
 0x3f7   : > { %v11356_v46 = vpop.permute.xlu0 %11355  ;;  %10538 = vst.msk [vmem:[#allocation3 + $0x98] sm:$0xff] %vm10518_vm6, %v10365_v45  ;;  %v10064_v39 = vrot.slane %v10062_v31, 1  ;;  %v10057_v45 = vsel %vm3341_vm9, %v10052_v33, %v10056_v32  ;;  %v15772_v33 = vld [vmem:[#allocation2 + $0x1b4] ss:$0 sps:$4 sm:$0x11]  }
 0x3f8   : > { %11530 = vst.msk [vmem:[#allocation3 + $0x90] sm:$0xff] %vm11511_vm7, %v11356_v46  ;;  %11385 = vrot.lane.b32.xlu1 %v11243_v36, %s16011_s19  ;;  %v15759_v36 = vld [vmem:[#allocation2 + $0x190] sm:$0xfe]   ;;  %v10060_v46 = vor.u32 %v10058_v18, %v10056_v32  ;;  %v8090_v4 = vrot.slane %v15772_v33, 1 }
 0x3f9   : > { %8215 = vrot.lane.b32.xlu0 %v8074_v34, %s16008_s16  ;;  %v15764_v34 = vld [vmem:[#allocation2 + $0x1a4] sm:$0xff]   ;;  %v8082_v7 = vrot.slane %v15759_v36, 1 }
 0x3fa   : > { %v11358_v15 = vpop.permute.xlu1 %11357  ;;  %v10067_v42 = vshrl.u32 %v15764_v34, 16 }
 0x3fb   : > { %v8188_v16 = vpop.permute.xlu0 %8187  ;;  %11531 = vst.msk [vmem:[#allocation3 + $0x98] sm:$0xff] %vm11511_vm7, %v11358_v15  ;;  %v10069_v15 = vshll.u32 %v15764_v34, 16 }
 0x3fc   : > { %8360 = vst.msk [vmem:[#allocation3 + $0xa0] sm:$0xff] %vm8339_vm2, %v8188_v16  ;;  %8217 = vrot.lane.b32.xlu1 %v8076_v47, %s16008_s16  ;;  %v10065_v16 = vsel %vm3341_vm9, %v10060_v46, %v10064_v39  ;;  %v8087_v39 = vrot.slane %v15770_v13, 1 }
 0x3fd   : > { %8921 = vrot.lane.b32.xlu0 %v15740_v52, %s16009_s17  ;;  %v11250_v52 = vrot.slane %v15757_v28, 1  ;;  %v10071_v43 = vrot.slane %v10069_v15, 1  ;;  %v15773_v15 = vld [vmem:[#allocation2 + $0x1b8] sm:$0xff]  }
 0x3fe   : > { %v8190_v44 = vpop.permute.xlu1 %8189 }
 0x3ff   : > { %v8894_v48 = vpop.permute.xlu0 %8893  ;;  %v11594_v38 = vld [vmem:[#allocation3 + $0x90] sm:$0xff]  ;;  %8361 = vst.msk [vmem:[#allocation3 + $0xa8] sm:$0xff] %vm8339_vm2, %v8190_v44  ;;  %v10074_v44 = vshll.u32 %v15765_v26, 16 }
 0x400   : > { %9066 = vst.msk [vmem:[#allocation3 + $0xa0] sm:$0xff] %vm9045_vm4, %v8894_v48  ;;  %15020 = vmatprep.mubr.msk.bf16.mxu0 %vm11662_vm8, %v11594_v38  ;;  %8923 = vrot.lane.b32.xlu1 %v15741_v20, %s16009_s17  ;;  %v11251_v20 = vsel %vm4815_vm12, %v11249_v55, %v11250_v52  ;;  %v11253_v48 = vsel %vm4815_vm12, %v11250_v52, %v11252_v50 }
 0x401   : > { %10394 = vrot.lane.b32.xlu0 %v10037_v30, %s16010_s18  ;;  %v15766_v30 = vld [vmem:[#allocation2 + $0x1b4] ss:$0 sps:$4 sm:$0x11]   ;;  %v8084_v38 = vsel %vm4815_vm12, %v8082_v7, %v8083_v12  ;;  %v15778_v7 = vld [vmem:[#allocation2 + $0x1b8] sm:$0xfe]  }
 0x402   : > { %v8896_v58 = vpop.permute.xlu1 %8895  ;;  %v11595_v60 = vld [vmem:[#allocation3 + $0x98] sm:$0xff]  ;;  %v10082_v59 = vshll.u32 %v15766_v30, 16  ;;  %v11259_v61 = vrot.slane %v15778_v7, 1 }
 0x403   : > { %v10367_v8 = vpop.permute.xlu0 %10366  ;;  %9067 = vst.msk [vmem:[#allocation3 + $0xa8] sm:$0xff] %vm9045_vm4, %v8896_v58  ;;  %15021 = vmatmul.mubr.msk.bf16.gmra.mrb[36].mxu0 %vm11662_vm8, %v11595_v60  ;;  %v10076_v58 = vrot.slane %v10074_v44, 1  ;;  %v10078_v60 = vshrl.u32 %v15765_v26, 16  ;;  %v15782_v30 = vld [vmem:[#allocation2 + $0x1c0] sm:$0xff]  }
 0x404   : > { %10539 = vst.msk [vmem:[#allocation3 + $0xa0] sm:$0xff] %vm10518_vm6, %v10367_v8  ;;  %10396 = vrot.lane.b32.xlu1 %v10045_v63, %s16010_s18  ;;  %v8086_v63 = vsel %vm4815_vm12, %v8083_v12, %v8085_v41 }
 0x405   : > { %11387 = vrot.lane.b32.xlu0 %v11246_v0, %s16011_s19  ;;  %v10072_v0 = vor.u32 %v10071_v43, %v10067_v42  ;;  %v10080_v32 = vor.u32 %v10078_v60, %v10076_v58 }
 0x406   : > { %v10369_v27 = vpop.permute.xlu1 %10368 }
 0x407   : > { %v11360_v10 = vpop.permute.xlu0 %11359  ;;  %10540 = vst.msk [vmem:[#allocation3 + $0xa8] sm:$0xff] %vm10518_vm6, %v10369_v27  ;;  %v15771_v27 = vld [vmem:[#allocation2 + $0x1ac] sm:$0xff]  }
 0x408   : > { %11532 = vst.msk [vmem:[#allocation3 + $0xa0] sm:$0xff] %vm11511_vm7, %v11360_v10  ;;  %11389 = vrot.lane.b32.xlu1 %v11248_v6, %s16011_s19  ;;  %v10084_v6 = vrot.slane %v10082_v59, 1  ;;  %v15775_v10 = vld [vmem:[#allocation2 + $0x1b8] sm:$0xff]   ;;  %v8088_v54 = vrot.slane %v15771_v27, 1 }
 0x409   : > { %8219 = vrot.lane.b32.xlu0 %v8079_v23, %s16008_s16  ;;  %v15769_v23 = vld [vmem:[#allocation2 + $0x1b4] ss:$0 sps:$4 sm:$0x11]   ;;  %v10087_v46 = vshrl.u32 %v15775_v10, 16 }
 0x40a   : > { %v11362_v56 = vpop.permute.xlu1 %11361  ;;  %v11257_v28 = vrot.slane %v15769_v23, 1  ;;  %v8091_v42 = vsel %vm4815_vm12, %v8088_v54, %v8090_v4  ;;  %v15785_v23 = vld [vmem:[#allocation2 + $0x1c0] sm:$0xff]   ;;  %v18401_v27 = vld [vmem:[#allocation2 + $0x1d4] sm:$0xff]  }
 0x40b   : > { %v8192_v25 = vpop.permute.xlu0 %8191  ;;  %11533 = vst.msk [vmem:[#allocation3 + $0xa8] sm:$0xff] %vm11511_vm7, %v11362_v56  ;;  %v10089_v56 = vshll.u32 %v15775_v10, 16 }
 0x40c   : > { %8362 = vst.msk [vmem:[#allocation3 + $0xb0] sm:$0xff] %vm8339_vm2, %v8192_v25  ;;  %8221 = vrot.lane.b32.xlu1 %v8081_v24, %s16008_s16  ;;  %v15776_v24 = vld [vmem:[#allocation2 + $0x1c0] sm:$0xff]   ;;  %v10085_v25 = vsel %vm3341_vm9, %v10080_v32, %v10084_v6  ;;  %v15784_v6 = vld [vmem:[#allocation2 + $0x1b8] sm:$0xfe]  }
 0x40d   : > { %8925 = vrot.lane.b32.xlu0 %v15751_v9, %s16009_s17  ;;  %v10077_v9 = vsel %vm3341_vm9, %v10072_v0, %v10076_v58  ;;  %v10094_v52 = vshll.u32 %v15776_v24, 16  ;;  %v10091_v37 = vrot.slane %v10089_v56, 1 }
 0x40e   : > { %v8194_v40 = vpop.permute.xlu1 %8193 }
 0x40f   : > { %v8898_v21 = vpop.permute.xlu0 %8897  ;;  %v11596_v47 = vld [vmem:[#allocation3 + $0xa0] sm:$0xff]  ;;  %8363 = vst.msk [vmem:[#allocation3 + $0xb8] sm:$0xff] %vm8339_vm2, %v8194_v40  ;;  %v15781_v40 = vld [vmem:[#allocation2 + $0x1b8] sm:$0xff]   ;;  %v10092_v12 = vor.u32 %v10091_v37, %v10087_v46  ;;  %v10114_v46 = vshll.u32 %v18401_v27, 16 }
 0x410   : > { %9068 = vst.msk [vmem:[#allocation3 + $0xb0] sm:$0xff] %vm9045_vm4, %v8898_v21  ;;  %15024 = vmatprep.mubr.msk.bf16.mxu0 %vm11662_vm8, %v11596_v47  ;;  %8927 = vrot.lane.b32.xlu1 %v15752_v51, %s16009_s17  ;;  %v11256_v51 = vsel %vm4815_vm12, %v11254_v22, %v11255_v62  ;;  %v11258_v21 = vsel %vm4815_vm12, %v11255_v62, %v11257_v28  ;;  %v6937_v41 = vshll.u32 %v15781_v40, 16  ;;  %v6946_v22 = vshrl.u32 %v15782_v30, 16  ;;  %v15789_v62 = vld [vmem:[#allocation2 + $0x1cc] sm:$0xff]  }
 0x411   : > { %10398 = vrot.lane.b32.xlu0 %v10057_v45, %s16010_s18  ;;  %v15777_v45 = vld [vmem:[#allocation2 + $0x1c8] ss:$0 sps:$4 sm:$0x11]   ;;  %v8089_v47 = vsel %vm4815_vm12, %v8087_v39, %v8088_v54  ;;  %v10109_v56 = vshll.u32 %v15789_v62, 16  ;;  %v8092_v54 = vrot.slane %v15784_v6, 1 }
 0x412   : > { %v8900_v14 = vpop.permute.xlu1 %8899  ;;  %v11597_v35 = vld [vmem:[#allocation3 + $0xa8] sm:$0xff]  ;;  %v6939_v0 = vrot.slane %v6937_v41, 1  ;;  %v15797_v41 = vld [vmem:[#allocation2 + $0x1dc] ss:$0 sps:$4 sm:$0x11]  }
 0x413   : > { %v10371_v29 = vpop.permute.xlu0 %10370  ;;  %9069 = vst.msk [vmem:[#allocation3 + $0xb8] sm:$0xff] %vm9045_vm4, %v8900_v14  ;;  %15025 = vmatmul.mubr.msk.bf16.gmra.mrb[40].mxu0 %vm11662_vm8, %v11597_v35  ;;  %v10102_v14 = vshll.u32 %v15777_v45, 16  ;;  %v15779_v35 = vld [vmem:[#allocation2 + $0x1c0] sm:$0xff]   ;;  %v10107_v45 = vshrl.u32 %v15789_v62, 16  ;;  %v10111_v37 = vrot.slane %v10109_v56, 1 }
 0x414   : > { %10541 = vst.msk [vmem:[#allocation3 + $0xb0] sm:$0xff] %vm10518_vm6, %v10371_v29  ;;  %10400 = vrot.lane.b32.xlu1 %v10065_v16, %s16010_s18  ;;  %v10096_v16 = vrot.slane %v10094_v52, 1  ;;  %v15780_v29 = vld [vmem:[#allocation2 + $0x1c8] ss:$0 sps:$4 sm:$0x11]   ;;  %v11260_v19 = vrot.slane %v15779_v35, 1 }
 0x415   : > { %11391 = vrot.lane.b32.xlu0 %v11251_v20, %s16011_s19  ;;  %v10098_v20 = vshrl.u32 %v15776_v24, 16  ;;  %v10104_v59 = vrot.slane %v10102_v14, 1  ;;  %v15786_v24 = vld [vmem:[#allocation2 + $0x1c8] ss:$0 sps:$4 sm:$0x11]   ;;  %v18416_v52 = vld [vmem:[#allocation2 + $0x1cc] sm:$0xff]  }
 0x416   : > { %v10373_v49 = vpop.permute.xlu1 %10372  ;;  %v8095_v4 = vrot.slane %v15786_v24, 1  ;;  %v18433_v14 = vld [vmem:[#allocation2 + $0x1d4] sm:$0xff]   ;;  %v6957_v35 = vshll.u32 %v18416_v52, 16  ;;  %v18464_v62 = vld [vmem:[#allocation2 + $0x1dc] ss:$0 sps:$4 sm:$0x11]  }
 0x417   : > { %v11364_v53 = vpop.permute.xlu0 %11363  ;;  %10542 = vst.msk [vmem:[#allocation3 + $0xb8] sm:$0xff] %vm10518_vm6, %v10373_v49  ;;  %v10097_v49 = vsel %vm3341_vm9, %v10092_v12, %v10096_v16  ;;  %v15792_v12 = vld [vmem:[#allocation2 + $0x1cc] sm:$0xfe]  }
 0x418   : > { %11534 = vst.msk [vmem:[#allocation3 + $0xb0] sm:$0xff] %vm11511_vm7, %v11364_v53  ;;  %11393 = vrot.lane.b32.xlu1 %v11253_v48, %s16011_s19  ;;  %v15783_v48 = vld [vmem:[#allocation2 + $0x1c8] ss:$0 sps:$4 sm:$0x11]   ;;  %v10100_v53 = vor.u32 %v10098_v20, %v10096_v16  ;;  %v10116_v16 = vrot.slane %v10114_v46, 1  ;;  %v10118_v20 = vshrl.u32 %v18401_v27, 16 }
 0x419   : > { %8223 = vrot.lane.b32.xlu0 %v8084_v38, %s16008_s16  ;;  %v15774_v38 = vld [vmem:[#allocation2 + $0x1c0] sm:$0xff]  }
 0x41a   : > { %v11366_v8 = vpop.permute.xlu1 %11365  ;;  %v10105_v10 = vsel %vm3341_vm9, %v10100_v53, %v10104_v59  ;;  %v15794_v53 = vld [vmem:[#allocation2 + $0x1dc] ss:$0 sps:$4 sm:$0x11]   ;;  %v6955_v59 = vshrl.u32 %v18416_v52, 16  ;;  %v18466_v27 = vld [vmem:[#allocation2 + $0x1e0] sm:$0xff]  }
 0x41b   : > { %v8196_v5 = vpop.permute.xlu0 %8195  ;;  %11535 = vst.msk [vmem:[#allocation3 + $0xb8] sm:$0xff] %vm11511_vm7, %v11366_v8 }
 0x41c   : > { %8364 = vst.msk [vmem:[#allocation3 + $0xc0] sm:$0xff] %vm8339_vm2, %v8196_v5  ;;  %8225 = vrot.lane.b32.xlu1 %v8086_v63, %s16008_s16  ;;  %v6935_v63 = vshrl.u32 %v15781_v40, 16  ;;  %v11262_v5 = vrot.slane %v15780_v29, 1  ;;  %v18420_v40 = vld [vmem:[#allocation2 + $0x1d4] sm:$0xff]   ;;  %v10112_v29 = vor.u32 %v10111_v37, %v10107_v45  ;;  %v18485_v45 = vld [vmem:[#allocation2 + $0x1e0] sm:$0xff]  }
 0x41d   : > { %8929 = vrot.lane.b32.xlu0 %v15762_v57, %s16009_s17  ;;  %v6942_v57 = vshll.u32 %v15782_v30, 16  ;;  %v6962_v30 = vshll.u32 %v18420_v40, 16 }
 0x41e   : > { %v8198_v31 = vpop.permute.xlu1 %8197  ;;  %v6940_v32 = vor.u32 %v6939_v0, %v6935_v63  ;;  %v11263_v33 = vsel %vm4815_vm12, %v11260_v19, %v11262_v5  ;;  %v6970_v63 = vshll.u32 %v15797_v41, 16  ;;  %v18453_v0 = vld [vmem:[#allocation2 + $0x1cc] sm:$0xfe]  }
 0x41f   : > { %v8902_v18 = vpop.permute.xlu0 %8901  ;;  %v11598_v11 = vld [vmem:[#allocation3 + $0xb0] sm:$0xff]  ;;  %8365 = vst.msk [vmem:[#allocation3 + $0xc8] sm:$0xff] %vm8339_vm2, %v8198_v31  ;;  %v6944_v13 = vrot.slane %v6942_v57, 1  ;;  %v6959_v57 = vrot.slane %v6957_v35, 1  ;;  %v6964_v5 = vrot.slane %v6962_v30, 1 }
 0x420   : > { %9070 = vst.msk [vmem:[#allocation3 + $0xc0] sm:$0xff] %vm9045_vm4, %v8902_v18  ;;  %15028 = vmatprep.mubr.msk.bf16.mxu0 %vm11662_vm8, %v11598_v11  ;;  %8931 = vrot.lane.b32.xlu1 %v15763_v17, %s16009_s17  ;;  %v6950_v17 = vshll.u32 %v15783_v48, 16 }
 0x421   : > { %10402 = vrot.lane.b32.xlu0 %v10077_v9, %s16010_s18  ;;  %v11261_v9 = vsel %vm4815_vm12, %v11259_v61, %v11260_v19  ;;  %v6948_v39 = vor.u32 %v6946_v22, %v6944_v13  ;;  %v10117_v61 = vsel %vm3341_vm9, %v10112_v29, %v10116_v16  ;;  %v10120_v19 = vor.u32 %v10118_v20, %v10116_v16  ;;  %v18462_v22 = vld [vmem:[%s19838_s2] ss:$0 sm:$0xff] }
 0x422   : > { %v8904_v55 = vpop.permute.xlu1 %8903  ;;  %v11599_v36 = vld [vmem:[#allocation3 + $0xb8] sm:$0xff]  ;;  %v6952_v28 = vrot.slane %v6950_v17, 1  ;;  %v6966_v17 = vshrl.u32 %v18420_v40, 16 }
 0x423   : > { %v10375_v34 = vpop.permute.xlu0 %10374  ;;  %9071 = vst.msk [vmem:[#allocation3 + $0xc8] sm:$0xff] %vm9045_vm4, %v8904_v55  ;;  %15029 = vmatmul.mubr.msk.bf16.gmra.mrb[44].mxu0 %vm11662_vm8, %v11599_v36  ;;  %v8093_v55 = vrot.slane %v15785_v23, 1 }
 0x424   : > { %10543 = vst.msk [vmem:[#allocation3 + $0xc0] sm:$0xff] %vm10518_vm6, %v10375_v34  ;;  %10404 = vrot.lane.b32.xlu1 %v10085_v25, %s16010_s18  ;;  %v15791_v25 = vld [vmem:[#allocation2 + $0x1dc] ss:$0 sps:$4 sm:$0x11]  }
 0x425   : > { %11395 = vrot.lane.b32.xlu0 %v11256_v51, %s16011_s19  ;;  %v6945_v51 = vsel %vm3341_vm9, %v6940_v32, %v6944_v13  ;;  %v10122_v7 = vshll.u32 %v15791_v25, 16  ;;  %v6960_v32 = vor.u32 %v6959_v57, %v6955_v59 }
 0x426   : > { %v10377_v50 = vpop.permute.xlu1 %10376 }
 0x427   : > { %v11368_v26 = vpop.permute.xlu0 %11367  ;;  %10544 = vst.msk [vmem:[#allocation3 + $0xc8] sm:$0xff] %vm10518_vm6, %v10377_v50  ;;  %v6965_v40 = vsel %vm3341_vm9, %v6960_v32, %v6964_v5  ;;  %v15811_v32 = vld [vmem:[#allocation2 + $0x1f0] ss:$0 sps:$4 sm:$0x11]  }
 0x428   : > { %11536 = vst.msk [vmem:[#allocation3 + $0xc0] sm:$0xff] %vm11511_vm7, %v11368_v26  ;;  %11397 = vrot.lane.b32.xlu1 %v11258_v21, %s16011_s19  ;;  %v6953_v21 = vsel %vm3341_vm9, %v6948_v39, %v6952_v28 }
 0x429   : > { %8227 = vrot.lane.b32.xlu0 %v8089_v47, %s16008_s16  ;;  %v8094_v47 = vsel %vm4815_vm12, %v8092_v54, %v8093_v55 }
 0x42a   : > { %v11370_v43 = vpop.permute.xlu1 %11369 }
 0x42b   : > { %v8200_v44 = vpop.permute.xlu0 %8199  ;;  %11537 = vst.msk [vmem:[#allocation3 + $0xc8] sm:$0xff] %vm11511_vm7, %v11370_v43 }
 0x42c   : > { %8366 = vst.msk [vmem:[#allocation3 + $0xd0] sm:$0xff] %vm8339_vm2, %v8200_v44  ;;  %8229 = vrot.lane.b32.xlu1 %v8091_v42, %s16008_s16  ;;  %v8096_v42 = vsel %vm4815_vm12, %v8093_v55, %v8095_v4 }
 0x42d   : > { %8933 = vrot.lane.b32.xlu0 %v15773_v15, %s16009_s17  ;;  %v15787_v15 = vld [vmem:[#allocation2 + $0x1cc] sm:$0xff]  }
 0x42e   : > { %v8202_v58 = vpop.permute.xlu1 %8201 }
 0x42f   : > { %v8906_v60 = vpop.permute.xlu0 %8905  ;;  %v11600_v8 = vld [vmem:[#allocation3 + $0xc0] sm:$0xff]  ;;  %8367 = vst.msk [vmem:[#allocation3 + $0xd8] sm:$0xff] %vm8339_vm2, %v8202_v58  ;;  %v18455_v58 = vld [vmem:[#allocation2 + $0x1d4] sm:$0xff]  }
 0x430   : > { %9072 = vst.msk [vmem:[#allocation3 + $0xd0] sm:$0xff] %vm9045_vm4, %v8906_v60  ;;  %15032 = vmatprep.mubr.msk.bf16.mxu0 %vm11662_vm8, %v11600_v8  ;;  %8935 = vrot.lane.b32.xlu1 %v15774_v38, %s16009_s17  ;;  %v15788_v38 = vld [vmem:[#allocation2 + $0x1d4] sm:$0xff]   ;;  %v11264_v60 = vrot.slane %v15792_v12, 1  ;;  %v11265_v8 = vrot.slane %v18433_v14, 1 }
 0x431   : > { %10406 = vrot.lane.b32.xlu0 %v10097_v49, %s16010_s18  ;;  %v10124_v49 = vrot.slane %v10122_v7, 1 }
 0x432   : > { %v8908_v31 = vpop.permute.xlu1 %8907  ;;  %v11601_v18 = vld [vmem:[#allocation3 + $0xc8] sm:$0xff]  ;;  %v11266_v24 = vsel %vm4815_vm12, %v11264_v60, %v11265_v8 }
 0x433   : > { %v10379_v11 = vpop.permute.xlu0 %10378  ;;  %9073 = vst.msk [vmem:[#allocation3 + $0xd8] sm:$0xff] %vm9045_vm4, %v8908_v31  ;;  %15033 = vmatmul.mubr.msk.bf16.gmra.mrb[48].mxu0 %vm11662_vm8, %v11601_v18  ;;  %v6972_v31 = vrot.slane %v6970_v63, 1  ;;  %v8097_v18 = vrot.slane %v18453_v0, 1  ;;  %v10125_v28 = vsel %vm3341_vm9, %v10120_v19, %v10124_v49  ;;  %v15806_v19 = vld [vmem:[#allocation2 + $0x1e0] sm:$0xfe]  }
 0x434   : > { %10545 = vst.msk [vmem:[#allocation3 + $0xd0] sm:$0xff] %vm10518_vm6, %v10379_v11  ;;  %10408 = vrot.lane.b32.xlu1 %v10105_v10, %s16010_s18  ;;  %v11267_v10 = vrot.slane %v15794_v53, 1  ;;  %v8098_v11 = vrot.slane %v18455_v58, 1 }
 0x435   : > { %11399 = vrot.lane.b32.xlu0 %v11261_v9, %s16011_s19  ;;  %v18471_v9 = vld [vmem:[#allocation2 + $0x1e8] sm:$0xff]  }
 0x436   : > { %v10381_v36 = vpop.permute.xlu1 %10380  ;;  %v11268_v37 = vsel %vm4815_vm12, %v11265_v8, %v11267_v10  ;;  %v8099_v59 = vsel %vm4815_vm12, %v8097_v18, %v8098_v11  ;;  %v10138_v57 = vshrl.u32 %v18471_v9, 16  ;;  %v15807_v10 = vld [vmem:[#allocation2 + $0x1e8] sm:$0xff]  }
 0x437   : > { %v11372_v34 = vpop.permute.xlu0 %11371  ;;  %10546 = vst.msk [vmem:[#allocation3 + $0xd8] sm:$0xff] %vm10518_vm6, %v10381_v36  ;;  %v8100_v36 = vrot.slane %v18464_v62, 1  ;;  %v11270_v58 = vrot.slane %v15807_v10, 1  ;;  %v15819_v10 = vld [vmem:[#allocation2 + $0x204] ss:$0 sps:$4 sm:$0x11]  }
 0x438   : > { %11538 = vst.msk [vmem:[#allocation3 + $0xd0] sm:$0xff] %vm11511_vm7, %v11372_v34  ;;  %11401 = vrot.lane.b32.xlu1 %v11263_v33, %s16011_s19  ;;  %v6968_v33 = vor.u32 %v6966_v17, %v6964_v5  ;;  %v10134_v34 = vshll.u32 %v18471_v9, 16  ;;  %v15808_v17 = vld [vmem:[#allocation2 + $0x1f0] ss:$0 sps:$4 sm:$0x11]  }
 0x439   : > { %7238 = vrot.lane.b32.xlu0 %v6945_v51, %s16007_s15  ;;  %v10129_v51 = vshll.u32 %v18466_v27, 16 }
 0x43a   : > { %v11374_v50 = vpop.permute.xlu1 %11373  ;;  %v18507_v41 = vrot.slane %v10134_v34, 1 }
 0x43b   : > { %v8204_v26 = vpop.permute.xlu0 %8203  ;;  %11539 = vst.msk [vmem:[#allocation3 + $0xd8] sm:$0xff] %vm11511_vm7, %v11374_v50  ;;  %v10131_v14 = vrot.slane %v10129_v51, 1  ;;  %v15801_v51 = vld [vmem:[#allocation2 + $0x1e0] sm:$0xff]  }
 0x43c   : > { %8368 = vst.msk [vmem:[#allocation3 + $0xe0] sm:$0xff] %vm8339_vm2, %v8204_v26  ;;  %7240 = vrot.lane.b32.xlu1 %v6953_v21, %s16007_s15  ;;  %v18498_v21 = vld [vmem:[#allocation2 + $0x1f0] ss:$0 sps:$4 sm:$0x11]   ;;  %v6973_v26 = vsel %vm3341_vm9, %v6968_v33, %v6972_v31 }
 0x43d   : > { %8231 = vrot.lane.b32.xlu0 %v8094_v47, %s16008_s16 }
 0x43e   : > { %v8206_v43 = vpop.permute.xlu1 %8205 }
 0x43f   : > { %v8910_v44 = vpop.permute.xlu0 %8909  ;;  %v11602_v48 = vld [vmem:[#allocation3 + $0xd0] sm:$0xff]  ;;  %8369 = vst.msk [vmem:[#allocation3 + $0xe8] sm:$0xff] %vm8339_vm2, %v8206_v43  ;;  %v6977_v43 = vshll.u32 %v18485_v45, 16 }
 0x440   : > { %9074 = vst.msk [vmem:[#allocation3 + $0xe0] sm:$0xff] %vm9045_vm4, %v8910_v44  ;;  %15036 = vmatprep.mubr.msk.bf16.mxu0 %vm11662_vm8, %v11602_v48  ;;  %8233 = vrot.lane.b32.xlu1 %v8096_v42, %s16008_s16  ;;  %v18509_v42 = vld [vmem:[#allocation2 + $0x1e8] sm:$0xff]  }
 0x441   : > { %8937 = vrot.lane.b32.xlu0 %v15787_v15, %s16009_s17  ;;  %v10127_v15 = vshrl.u32 %v18466_v27, 16  ;;  %v6982_v9 = vshll.u32 %v18509_v42, 16 }
 0x442   : > { %v8912_v6 = vpop.permute.xlu1 %8911  ;;  %v11603_v23 = vld [vmem:[#allocation3 + $0xd8] sm:$0xff] }
 0x443   : > { %v10383_v13 = vpop.permute.xlu0 %10382  ;;  %9075 = vst.msk [vmem:[#allocation3 + $0xe8] sm:$0xff] %vm9045_vm4, %v8912_v6  ;;  %15037 = vmatmul.mubr.msk.bf16.gmra.mrb[52].mxu0 %vm11662_vm8, %v11603_v23  ;;  %v10132_v34 = vor.u32 %v10131_v14, %v10127_v15 }
 0x444   : > { %10547 = vst.msk [vmem:[#allocation3 + $0xe0] sm:$0xff] %vm10518_vm6, %v10383_v13  ;;  %8939 = vrot.lane.b32.xlu1 %v15788_v38, %s16009_s17 }
 0x445   : > { %10410 = vrot.lane.b32.xlu0 %v10117_v61, %s16010_s18  ;;  %v10142_v61 = vshll.u32 %v18498_v21, 16  ;;  %v6984_v21 = vrot.slane %v6982_v9, 1 }
 0x446   : > { %v14986_v56 = vpop.f32.mrb[0].mxu0  ;;  %v10385_v25 = vpop.permute.xlu1 %10384 }
 0x447   : > { %v11905_v39 = vadd.f32 %v14986_v56, %v18462_v22  ;;  %10548 = vst.msk [vmem:[#allocation3 + $0xe8] sm:$0xff] %vm10518_vm6, %v10385_v25  ;;  %v11896_v54 = vpop.f32.mrb[1].mxu0  ;;  %v11376_v55 = vpop.permute.xlu0 %11375  ;;  %v8101_v25 = vsel %vm4815_vm12, %v8098_v11, %v8100_v36  ;;  %v15802_v11 = vld [vmem:[#allocation2 + $0x1e8] sm:$0xff]  }
 0x448   : > { %v11897_v46 = vadd.f32 %v18462_v22, %v11896_v54  ;;  %v14987_v52 = vpop.f32.mrb[2].mxu0  ;;  %10412 = vrot.lane.b32.xlu1 %v10125_v28, %s16010_s18  ;;  %11540 = vst.msk [vmem:[#allocation3 + $0xe0] sm:$0xff] %vm11511_vm7, %v11376_v55  ;;  %v6975_v28 = vshrl.u32 %v18485_v45, 16  ;;  %v10144_v45 = vrot.slane %v10142_v61, 1 }
 0x449   : > { %11403 = vrot.lane.b32.xlu0 %v11266_v24, %s16011_s19  ;;  %v14788_v47 = vpack.c.bf16 %v11905_v39, %v11905_v39  ;;  %v11908_v4 = vadd.f32 %v14987_v52, %v18462_v22  ;;  %v11899_v50 = vpop.f32.mrb[3].mxu0  ;;  %v13314_v35 = vmul.f32 %v11905_v39, %v11905_v39  ;;  %v13052_v63 = vsel %vm13048_vm10, %v11905_v39, 0.0 }
 0x44a   : > { %v14786_v16 = vpack.c.bf16 %v11897_v46, %v11897_v46  ;;  %v13312_v20 = vmul.f32 %v11897_v46, %v11897_v46  ;;  %v11900_v7 = vadd.f32 %v18462_v22, %v11899_v50  ;;  %v11378_v12 = vpop.permute.xlu1 %11377  ;;  %v13049_v44 = vsel %vm13048_vm10, %v11897_v46, 0.0  ;;  %v18555_v50 = vld [vmem:[#allocation2 + $0x1f4] sm:$0xff]  }
 0x44b   : > { %12922 = vst.msk [vmem:[%s18490_s14 + $0x8] sm:$0xf] %vm12919_vm11, %v14788_v47  ;;  %v14789_v29 = vpack.c.bf16 %v11908_v4, %v11908_v4  ;;  %v8208_v30 = vpop.permute.xlu0 %8207  ;;  %v13315_v60 = vmul.f32 %v11908_v4, %v11908_v4  ;;  %v13443_v31 = vsel %vm13048_vm10, %v13314_v35, 0.0  ;;  %v13054_v18 = vsel %vm13048_vm10, %v11908_v4, 0.0 }
 0x44c   : > { %11541 = vst.msk [vmem:[#allocation3 + $0xe8] sm:$0xff] %vm11511_vm7, %v11378_v12  ;;  %v14787_v48 = vpack.c.bf16 %v11900_v7, %v11900_v7  ;;  %v13050_v38 = vsel %vm13048_vm10, %v11900_v7, 0.0  ;;  %v13313_v49 = vmul.f32 %v11900_v7, %v11900_v7  ;;  %11405 = vrot.lane.b32.xlu1 %v11268_v37, %s16011_s19  ;;  %v13440_v0 = vsel %vm13048_vm10, %v13312_v20, 0.0 }
 0x44d   : > { %12920 = vst.msk [vmem:[%s18490_s14] sm:$0xf] %vm12919_vm11, %v14786_v16  ;;  %7242 = vrot.lane.b32.xlu0 %v6965_v40, %s16007_s15  ;;  %12923 = vst.msk [vmem:[%s18490_s14 + $0xc] sm:$0xf] %vm12919_vm11, %v14789_v29  ;;  %v13051_v53 = vadd.f32 %v13050_v38, %v13049_v44  ;;  %v6979_v24 = vrot.slane %v6977_v43, 1  ;;  %v13445_v39 = vsel %vm13048_vm10, %v13315_v60, 0.0  ;;  %v10140_v46 = vor.u32 %v10138_v57, %v18507_v41 }
 0x44e   : > { %8370 = vst.msk [vmem:[#allocation3 + $0xf0] sm:$0xff] %vm8339_vm2, %v8208_v30  ;;  %v13441_v8 = vsel %vm13048_vm10, %v13313_v49, 0.0  ;;  %v8210_v5 = vpop.permute.xlu1 %8209  ;;  %v11269_v37 = vrot.slane %v15806_v19, 1  ;;  %v11272_v40 = vrot.slane %v15808_v17, 1  ;;  %v6986_v47 = vshrl.u32 %v18509_v42, 16  ;;  %v18568_v43 = vld [vmem:[#allocation2 + $0x1e8] sm:$0xff]  }
 0x44f   : > { %12921 = vst.msk [vmem:[%s18490_s14 + $0x4] sm:$0xf] %vm12919_vm11, %v14787_v48  ;;  %v13053_v6 = vadd.f32 %v13052_v63, %v13051_v53  ;;  %v13442_v23 = vadd.f32 %v13441_v8, %v13440_v0  ;;  %v8914_v13 = vpop.permute.xlu0 %8913  ;;  %v11604_v27 = vld [vmem:[#allocation3 + $0xe0] sm:$0xff]  ;;  %v6980_v36 = vor.u32 %v6979_v24, %v6975_v28  ;;  %v6990_v4 = vshll.u32 %v15811_v32, 16  ;;  %v18566_v42 = vld [vmem:[#allocation2 + $0x1e0] sm:$0xfe]  }
 0x450   : > { %8371 = vst.msk [vmem:[#allocation3 + $0xf8] sm:$0xff] %vm8339_vm2, %v8210_v5  ;;  %7244 = vrot.lane.b32.xlu1 %v6973_v26, %s16007_s15  ;;  %15040 = vmatprep.mubr.msk.bf16.mxu0 %vm11662_vm8, %v11604_v27  ;;  %v18557_v26 = vld [vmem:[#allocation2 + $0x1fc] sm:$0xff]   ;;  %v10137_v20 = vsel %vm3341_vm9, %v10132_v34, %v18507_v41  ;;  %v10145_v35 = vsel %vm3341_vm9, %v10140_v46, %v10144_v45  ;;  %v10149_v61 = vshll.u32 %v18555_v50, 16  ;;  %v8103_v27 = vrot.slane %v18568_v43, 1 }
 0x451   : > { %9076 = vst.msk [vmem:[#allocation3 + $0xf0] sm:$0xff] %vm9045_vm4, %v8914_v13  ;;  %v13055_v33 = vadd.f32 %v13054_v18, %v13053_v6  ;;  %v13444_v56 = vadd.f32 %v13443_v31, %v13442_v23  ;;  %8235 = vrot.lane.b32.xlu0 %v8099_v59, %s16008_s16  ;;  %v11271_v29 = vsel %vm4815_vm12, %v11269_v37, %v11270_v58  ;;  %v6992_v49 = vrot.slane %v6990_v4, 1 }
 0x452   : > { %v8916_v54 = vpop.permute.xlu1 %8915  ;;  %v11273_v30 = vsel %vm4815_vm12, %v11270_v58, %v11272_v40  ;;  %v6985_v48 = vsel %vm3341_vm9, %v6980_v36, %v6984_v21  ;;  %v6988_v38 = vor.u32 %v6986_v47, %v6984_v21  ;;  %v10154_v19 = vshll.u32 %v18557_v26, 16  ;;  %v18606_v36 = vld [vmem:[#allocation2 + $0x1f4] sm:$0xff]  }
 0x453   : > { %v11605_v55 = vld [vmem:[#allocation3 + $0xe8] sm:$0xff]  ;;  %v18547_v52 = vadd.f32 %v13445_v39, %v13444_v56  ;;  %9077 = vst.msk [vmem:[#allocation3 + $0xf8] sm:$0xff] %vm9045_vm4, %v8916_v54  ;;  %v10387_v62 = vpop.permute.xlu0 %10386  ;;  %v8102_v13 = vrot.slane %v18566_v42, 1  ;;  %v10147_v18 = vshrl.u32 %v18555_v50, 16  ;;  %v10151_v54 = vrot.slane %v10149_v61, 1 }
 0x454   : > { %15041 = vmatmul.mubr.msk.bf16.gmra.mrb[56].mxu0 %vm11662_vm8, %v11605_v55  ;;  %8237 = vrot.lane.b32.xlu1 %v8101_v25, %s16008_s16  ;;  %10549 = vst.msk [vmem:[#allocation3 + $0xf0] sm:$0xff] %vm10518_vm6, %v10387_v62  ;;  %v15814_v25 = vld [vmem:[#allocation2 + $0x1f0] ss:$0 sps:$4 sm:$0x11]   ;;  %v10156_v55 = vrot.slane %v10154_v19, 1  ;;  %v10158_v34 = vshrl.u32 %v18557_v26, 16  ;;  %v6993_v4 = vsel %vm3341_vm9, %v6988_v38, %v6992_v49 }
 0x455   : > { %8941 = vrot.lane.b32.xlu0 %v15801_v51, %s16009_s17  ;;  %v10162_v58 = vshll.u32 %v15819_v10, 16  ;;  %v8105_v50 = vrot.slane %v15814_v25, 1  ;;  %v18611_v26 = vld [vmem:[#allocation2 + $0x1fc] sm:$0xff]   ;;  %v18617_v42 = vld [vmem:[#allocation2 + $0x1f4] sm:$0xfe]  }
 0x456   : > { %v10389_v15 = vpop.permute.xlu1 %10388  ;;  %v14990_v16 = vpop.f32.mrb[4].mxu0  ;;  %v15815_v49 = vld [vmem:[#allocation2 + $0x1f4] sm:$0xff]  }
 0x457   : > { %10550 = vst.msk [vmem:[#allocation3 + $0xf8] sm:$0xff] %vm10518_vm6, %v10389_v15  ;;  %v11921_v7 = vadd.f32 %v14990_v16, %v18462_v22  ;;  %v11912_v12 = vpop.f32.mrb[5].mxu0  ;;  %v11380_v14 = vpop.permute.xlu0 %11379  ;;  %v8106_v38 = vsel %vm4815_vm12, %v8103_v27, %v8105_v50 }
 0x458   : > { %v11913_v44 = vadd.f32 %v18462_v22, %v11912_v12  ;;  %8943 = vrot.lane.b32.xlu1 %v15802_v11, %s16009_s17  ;;  %v14991_v41 = vpop.f32.mrb[6].mxu0  ;;  %11542 = vst.msk [vmem:[#allocation3 + $0xf0] sm:$0xff] %vm11511_vm7, %v11380_v14 }
 0x459   : > { %v14792_v53 = vpack.c.bf16 %v11921_v7, %v11921_v7  ;;  %v11924_v59 = vadd.f32 %v14991_v41, %v18462_v22  ;;  %v11915_v57 = vpop.f32.mrb[7].mxu0  ;;  %10414 = vrot.lane.b32.xlu0 %v10137_v20, %s16010_s18  ;;  %v13318_v28 = vmul.f32 %v11921_v7, %v11921_v7  ;;  %v13060_v51 = vsel %vm13048_vm10, %v11921_v7, 0.0 }
 0x45a   : > { %v14790_v63 = vpack.c.bf16 %v11913_v44, %v11913_v44  ;;  %v13056_v0 = vsel %vm13048_vm10, %v11913_v44, 0.0  ;;  %v13316_v60 = vmul.f32 %v11913_v44, %v11913_v44  ;;  %v11916_v8 = vadd.f32 %v18462_v22, %v11915_v57  ;;  %v11382_v5 = vpop.permute.xlu1 %11381  ;;  %v18621_v44 = vld [vmem:[#allocation2 + $0x1fc] sm:$0xff]  }
 0x45b   : > { %12926 = vst.msk [vmem:[%s18490_s14 + $0x18] sm:$0xf] %vm12919_vm11, %v14792_v53  ;;  %v13057_v17 = vadd.f32 %v13056_v0, %v13055_v33  ;;  %v14793_v6 = vpack.c.bf16 %v11924_v59, %v11924_v59  ;;  %v8212_v23 = vpop.permute.xlu0 %8211  ;;  %v13319_v46 = vmul.f32 %v11924_v59, %v11924_v59  ;;  %v13062_v40 = vsel %vm13048_vm10, %v11924_v59, 0.0  ;;  %v15822_v53 = vld [vmem:[#allocation2 + $0x204] ss:$0 sps:$4 sm:$0x11]  }
 0x45c   : > { %11543 = vst.msk [vmem:[#allocation3 + $0xf8] sm:$0xff] %vm11511_vm7, %v11382_v5  ;;  %v13447_v9 = vsel %vm13048_vm10, %v13316_v60, 0.0  ;;  %v14791_v32 = vpack.c.bf16 %v11916_v8, %v11916_v8  ;;  %v13058_v31 = vsel %vm13048_vm10, %v11916_v8, 0.0  ;;  %10416 = vrot.lane.b32.xlu1 %v10145_v35, %s16010_s18  ;;  %v13317_v56 = vmul.f32 %v11916_v8, %v11916_v8 }
 0x45d   : > { %12924 = vst.msk [vmem:[%s18490_s14 + $0x10] sm:$0xf] %vm12919_vm11, %v14790_v63  ;;  %v13448_v24 = vadd.f32 %v13447_v9, %v18547_v52  ;;  %12927 = vst.msk [vmem:[%s18490_s14 + $0x1c] sm:$0xf] %vm12919_vm11, %v14793_v6  ;;  %v13059_v33 = vadd.f32 %v13058_v31, %v13057_v17  ;;  %11407 = vrot.lane.b32.xlu0 %v11271_v29, %s16011_s19  ;;  %v13451_v21 = vsel %vm13048_vm10, %v13318_v28, 0.0  ;;  %v13453_v12 = vsel %vm13048_vm10, %v13319_v46, 0.0 }
 0x45e   : > { %8372 = vst.msk [vmem:[#allocation3 + $0x100] sm:$0xff] %vm8339_vm2, %v8212_v23  ;;  %v8214_v39 = vpop.permute.xlu1 %8213  ;;  %v13449_v52 = vsel %vm13048_vm10, %v13317_v56, 0.0  ;;  %v8104_v7 = vsel %vm4815_vm12, %v8102_v13, %v8103_v27  ;;  %v10152_v35 = vor.u32 %v10151_v54, %v10147_v18  ;;  %v10160_v29 = vor.u32 %v10158_v34, %v10156_v55  ;;  %v18634_v6 = vld [vmem:[#allocation2 + $0x204] ss:$0 sps:$4 sm:$0x11]   ;;  %v15816_v27 = vld [vmem:[#allocation2 + $0x1fc] sm:$0xff]  }
 0x45f   : > { %12925 = vst.msk [vmem:[%s18490_s14 + $0x14] sm:$0xf] %vm12919_vm11, %v14791_v32  ;;  %v13061_v45 = vadd.f32 %v13060_v51, %v13059_v33  ;;  %v8918_v62 = vpop.permute.xlu0 %8917  ;;  %v11606_v37 = vld [vmem:[#allocation3 + $0xf0] sm:$0xff]  ;;  %v13450_v11 = vadd.f32 %v13449_v52, %v13448_v24  ;;  %v6997_v41 = vshll.u32 %v18606_v36, 16  ;;  %v7002_v59 = vshll.u32 %v18611_v26, 16 }
 0x460   : > { %8373 = vst.msk [vmem:[#allocation3 + $0x108] sm:$0xff] %vm8339_vm2, %v8214_v39  ;;  %11409 = vrot.lane.b32.xlu1 %v11273_v30, %s16011_s19  ;;  %15044 = vmatprep.mubr.msk.bf16.mxu0 %vm11662_vm8, %v11606_v37  ;;  %v10164_v30 = vrot.slane %v10162_v58, 1  ;;  %v10157_v8 = vsel %vm3341_vm9, %v10152_v35, %v10156_v55  ;;  %v11274_v17 = vrot.slane %v18617_v42, 1  ;;  %v11275_v10 = vrot.slane %v18621_v44, 1 }
 0x461   : > { %9078 = vst.msk [vmem:[#allocation3 + $0x100] sm:$0xff] %vm9045_vm4, %v8918_v62  ;;  %v13063_v47 = vadd.f32 %v13062_v40, %v13061_v45  ;;  %7246 = vrot.lane.b32.xlu0 %v6985_v48, %s16007_s15  ;;  %v13452_v15 = vadd.f32 %v13451_v21, %v13450_v11  ;;  %v609_v48 = vld [vmem:[#allocation2 + $0x290] sm:$0x1]  ;;  %v6995_v9 = vshrl.u32 %v18606_v36, 16  ;;  %v6999_v32 = vrot.slane %v6997_v41, 1  ;;  %v18650_v62 = vld [vmem:[#allocation2 + $0x208] sm:$0xff]  }
 0x462   : > { %v8920_v16 = vpop.permute.xlu1 %8919  ;;  %v610_v57 = vsel %vm16116_vm5, 0, %v609_v48  ;;  %v10165_v5 = vsel %vm3341_vm9, %v10160_v29, %v10164_v30  ;;  %v11277_v24 = vrot.slane %v15822_v53, 1  ;;  %v7004_v33 = vrot.slane %v7002_v59, 1  ;;  %v18658_v36 = vld [vmem:[#allocation2 + $0x210] sm:$0xff]  }
 0x463   : > { %v11607_v20 = vld [vmem:[#allocation3 + $0xf8] sm:$0xff]  ;;  %9079 = vst.msk [vmem:[#allocation3 + $0x108] sm:$0xff] %vm9045_vm4, %v8920_v16  ;;  %v10391_v14 = vpop.permute.xlu0 %10390  ;;  %v13454_v43 = vadd.f32 %v13453_v12, %v13452_v15  ;;  %611 = vst [vmem:[#allocation2 + $0x290] sm:$0x1] %v610_v57  ;;  %v7006_v45 = vshrl.u32 %v18611_v26, 16  ;;  %v7010_v52 = vshll.u32 %v18634_v6, 16  ;;  %v7000_v11 = vor.u32 %v6999_v32, %v6995_v9 }
 0x464   : > { %15045 = vmatmul.mubr.msk.bf16.gmra.mrb[60].mxu0 %vm11662_vm8, %v11607_v20  ;;  %7248 = vrot.lane.b32.xlu1 %v6993_v4, %s16007_s15  ;;  %10551 = vst.msk [vmem:[#allocation3 + $0x100] sm:$0xff] %vm10518_vm6, %v10391_v14  ;;  %v15826_v26 = vld [vmem:[#allocation2 + $0x1f4] sm:$0xfe]   ;;  %v11276_v20 = vsel %vm4815_vm12, %v11274_v17, %v11275_v10  ;;  %v15827_v12 = vld [vmem:[#allocation2 + $0x1fc] sm:$0xff]   ;;  %v10169_v44 = vshll.u32 %v18650_v62, 16  ;;  %v18685_v9 = vld [vmem:[#allocation2 + $0x208] sm:$0xff]  }
 0x465   : > { %8239 = vrot.lane.b32.xlu0 %v8104_v7, %s16008_s16  ;;  %v11278_v7 = vsel %vm4815_vm12, %v11275_v10, %v11277_v24  ;;  %v15828_v14 = vld [vmem:[#allocation2 + $0x204] ss:$0 sps:$4 sm:$0x11]   ;;  %v15833_v53 = vld [vmem:[#allocation2 + $0x218] ss:$0 sps:$4 sm:$0x11]  }
 0x466   : > { %v10393_v61 = vpop.permute.xlu1 %10392  ;;  %v14994_v19 = vpop.f32.mrb[8].mxu0  ;;  %v8110_v17 = vrot.slane %v15828_v14, 1  ;;  %v10171_v10 = vrot.slane %v10169_v44, 1  ;;  %v18687_v32 = vld [vmem:[#allocation2 + $0x210] sm:$0xff]   ;;  %v10178_v24 = vshrl.u32 %v18658_v36, 16 }
 0x467   : > { %10552 = vst.msk [vmem:[#allocation3 + $0x108] sm:$0xff] %vm10518_vm6, %v10393_v61  ;;  %v11937_v63 = vadd.f32 %v14994_v19, %v18462_v22  ;;  %v11928_v0 = vpop.f32.mrb[9].mxu0  ;;  %v11384_v60 = vpop.permute.xlu0 %11383  ;;  %v7005_v61 = vsel %vm3341_vm9, %v7000_v11, %v7004_v33  ;;  %v7012_v19 = vrot.slane %v7010_v52, 1 }
 0x468   : > { %v11929_v23 = vadd.f32 %v18462_v22, %v11928_v0  ;;  %8241 = vrot.lane.b32.xlu1 %v8106_v38, %s16008_s16  ;;  %v14995_v13 = vpop.f32.mrb[10].mxu0  ;;  %11544 = vst.msk [vmem:[#allocation3 + $0x100] sm:$0xff] %vm11511_vm7, %v11384_v60  ;;  %v7008_v38 = vor.u32 %v7006_v45, %v7004_v33  ;;  %v10182_v33 = vshll.u32 %v15833_v53, 16 }
 0x469   : > { %v14796_v31 = vpack.c.bf16 %v11937_v63, %v11937_v63  ;;  %v11940_v18 = vadd.f32 %v14995_v13, %v18462_v22  ;;  %v11931_v28 = vpop.f32.mrb[11].mxu0  ;;  %8945 = vrot.lane.b32.xlu0 %v15815_v49, %s16009_s17  ;;  %v13322_v21 = vmul.f32 %v11937_v63, %v11937_v63  ;;  %v13068_v15 = vsel %vm13048_vm10, %v11937_v63, 0.0 }
 0x46a   : > { %v14794_v56 = vpack.c.bf16 %v11929_v23, %v11929_v23  ;;  %v13064_v25 = vsel %vm13048_vm10, %v11929_v23, 0.0  ;;  %v13320_v51 = vmul.f32 %v11929_v23, %v11929_v23  ;;  %v11932_v39 = vadd.f32 %v18462_v22, %v11931_v28  ;;  %v11386_v54 = vpop.permute.xlu1 %11385  ;;  %v2185_v6 = vld [vmem:[#allocation2 + $0x290] sm:$0x1] }
 0x46b   : > { %12930 = vst.msk [vmem:[%s18490_s14 + $0x28] sm:$0xf] %vm12919_vm11, %v14796_v31  ;;  %v13065_v55 = vadd.f32 %v13064_v25, %v13063_v47  ;;  %v14797_v34 = vpack.c.bf16 %v11940_v18, %v11940_v18  ;;  %v8216_v46 = vpop.permute.xlu0 %8215  ;;  %v13323_v35 = vmul.f32 %v11940_v18, %v11940_v18  ;;  %v13070_v41 = vsel %vm13048_vm10, %v11940_v18, 0.0 }
 0x46c   : > { %11545 = vst.msk [vmem:[#allocation3 + $0x108] sm:$0xff] %vm11511_vm7, %v11386_v54  ;;  %v13455_v37 = vsel %vm13048_vm10, %v13320_v51, 0.0  ;;  %v14795_v58 = vpack.c.bf16 %v11932_v39, %v11932_v39  ;;  %v13066_v40 = vsel %vm13048_vm10, %v11932_v39, 0.0  ;;  %8947 = vrot.lane.b32.xlu1 %v15816_v27, %s16009_s17  ;;  %v13321_v50 = vmul.f32 %v11932_v39, %v11932_v39  ;;  %v18699_v51 = vld [vmem:[#allocation2 + $0x210] sm:$0xff]  }
 0x46d   : > { %12928 = vst.msk [vmem:[%s18490_s14 + $0x20] sm:$0xf] %vm12919_vm11, %v14794_v56  ;;  %v13456_v47 = vadd.f32 %v13455_v37, %v13454_v43  ;;  %12931 = vst.msk [vmem:[%s18490_s14 + $0x2c] sm:$0xf] %vm12919_vm11, %v14797_v34  ;;  %v13067_v4 = vadd.f32 %v13066_v40, %v13065_v55  ;;  %10418 = vrot.lane.b32.xlu0 %v10157_v8, %s16010_s18  ;;  %v10174_v49 = vshll.u32 %v18658_v36, 16  ;;  %v13459_v59 = vsel %vm13048_vm10, %v13322_v21, 0.0 }
 0x46e   : > { %8374 = vst.msk [vmem:[#allocation3 + $0x110] sm:$0xff] %vm8339_vm2, %v8216_v46  ;;  %v8218_v16 = vpop.permute.xlu1 %8217  ;;  %v13457_v30 = vsel %vm13048_vm10, %v13321_v50, 0.0  ;;  %v8107_v8 = vrot.slane %v15826_v26, 1  ;;  %v13461_v23 = vsel %vm13048_vm10, %v13323_v35, 0.0  ;;  %v10167_v27 = vshrl.u32 %v18650_v62, 16 }
 0x46f   : > { %12929 = vst.msk [vmem:[%s18490_s14 + $0x24] sm:$0xf] %vm12919_vm11, %v14795_v58  ;;  %v13069_v29 = vadd.f32 %v13068_v15, %v13067_v4  ;;  %v8922_v42 = vpop.permute.xlu0 %8921  ;;  %v11608_v43 = vld [vmem:[#allocation3 + $0x100] sm:$0xff]  ;;  %v13458_v48 = vadd.f32 %v13457_v30, %v13456_v47  ;;  %v1736_v31 = vrot.slane %v17544_v3, 4  ;;  %v18692_v28 = vrot.slane %v10174_v49, 1 }
 0x470   : > { %8375 = vst.msk [vmem:[#allocation3 + $0x118] sm:$0xff] %vm8339_vm2, %v8218_v16  ;;  %10420 = vrot.lane.b32.xlu1 %v10165_v5, %s16010_s18  ;;  %15048 = vmatprep.mubr.msk.bf16.mxu1 %vm11662_vm8, %v11608_v43  ;;  %v8108_v5 = vrot.slane %v15827_v12, 1  ;;  %v18695_v56 = vld [vmem:[#allocation2 + $0x208] sm:$0xfe]   ;;  %v7013_v25 = vsel %vm3341_vm9, %v7008_v38, %v7012_v19  ;;  %v10172_v62 = vor.u32 %v10171_v10, %v10167_v27  ;;  %v7017_v37 = vshll.u32 %v18685_v9, 16 }
 0x471   : > { %9080 = vst.msk [vmem:[#allocation3 + $0x110] sm:$0xff] %vm9045_vm4, %v8922_v42  ;;  %v18677_v57 = vadd.f32 %v13070_v41, %v13069_v29  ;;  %11411 = vrot.lane.b32.xlu0 %v11276_v20, %s16011_s19  ;;  %v13460_v63 = vadd.f32 %v13459_v59, %v13458_v48  ;;  %v2186_v3 = vsel %vm16102_vm3, %v1736_v31, %v2185_v6  ;;  %v7022_v58 = vshll.u32 %v18687_v32, 16  ;;  %v15829_v15 = vld [vmem:[#allocation2 + $0x208] sm:$0xff]   ;;  %v15839_v30 = vld [vmem:[#allocation2 + $0x218] ss:$0 sps:$4 sm:$0x11]  }
 0x472   : > { %v8924_v0 = vpop.permute.xlu1 %8923  ;;  %v8109_v55 = vsel %vm4815_vm12, %v8107_v8, %v8108_v5  ;;  %v8111_v34 = vsel %vm4815_vm12, %v8108_v5, %v8110_v17  ;;  %2187 = vst [vmem:[#allocation2 + $0x290] sm:$0x1] %v2186_v3  ;;  %v10180_v36 = vor.u32 %v10178_v24, %v18692_v28  ;;  %v10184_v21 = vrot.slane %v10182_v33, 1  ;;  %v15830_v59 = vld [vmem:[#allocation2 + $0x210] sm:$0xff]  }
 0x473   : > { %v11609_v60 = vld [vmem:[#allocation3 + $0x108] sm:$0xff]  ;;  %9081 = vst.msk [vmem:[#allocation3 + $0x118] sm:$0xff] %vm9045_vm4, %v8924_v0  ;;  %v10395_v13 = vpop.permute.xlu0 %10394  ;;  %v13462_v18 = vadd.f32 %v13461_v23, %v13460_v63  ;;  %v11279_v47 = vrot.slane %v18695_v56, 1  ;;  %v11280_v16 = vrot.slane %v18699_v51, 1  ;;  %v7015_v20 = vshrl.u32 %v18685_v9, 16 }
 0x474   : > { %15049 = vmatmul.mubr.msk.bf16.vlgmr.msra.gmra.mrb[0].mxu1 %vm11662_vm8, %v11609_v60  ;;  %11413 = vrot.lane.b32.xlu1 %v11278_v7, %s16011_s19  ;;  %10553 = vst.msk [vmem:[#allocation3 + $0x110] sm:$0xff] %vm10518_vm6, %v10395_v13  ;;  %v7019_v41 = vrot.slane %v7017_v37, 1  ;;  %v18724_v48 = vrot.slane %v7022_v58, 1  ;;  %v15836_v60 = vld [vmem:[#allocation2 + $0x218] ss:$0 sps:$4 sm:$0x11]   ;;  %v10177_v17 = vsel %vm3341_vm9, %v10172_v62, %v18692_v28 }
 0x475   : > { %7250 = vrot.lane.b32.xlu0 %v7005_v61, %s16007_s15  ;;  %v7030_v6 = vshll.u32 %v15839_v30, 16  ;;  %v15840_v23 = vld [vmem:[#allocation2 + $0x208] sm:$0xfe]   ;;  %v15841_v31 = vld [vmem:[#allocation2 + $0x210] sm:$0xff]   ;;  %v18747_v28 = vld [vmem:[#allocation2 + $0x21c] sm:$0xff]  }
 0x476   : > { %v10397_v39 = vpop.permute.xlu1 %10396  ;;  %v14998_v54 = vpop.f32.mrb[12].mxu0  ;;  %v7020_v62 = vor.u32 %v7019_v41, %v7015_v20  ;;  %v508_v58 = vld [vmem:[#allocation2 + $0x294] sm:$0x1] }
 0x477   : > { %10554 = vst.msk [vmem:[#allocation3 + $0x118] sm:$0xff] %vm10518_vm6, %v10397_v39  ;;  %v11953_v46 = vadd.f32 %v14998_v54, %v18462_v22  ;;  %v11944_v45 = vpop.f32.mrb[13].mxu0  ;;  %v11388_v52 = vpop.permute.xlu0 %11387  ;;  %v10185_v39 = vsel %vm3341_vm9, %v10180_v36, %v10184_v21  ;;  %v11282_v54 = vrot.slane %v15836_v60, 1  ;;  %v7032_v36 = vrot.slane %v7030_v6, 1 }
 0x478   : > { %v11945_v40 = vadd.f32 %v18462_v22, %v11944_v45  ;;  %7252 = vrot.lane.b32.xlu1 %v7013_v25, %s16007_s15  ;;  %v14999_v11 = vpop.f32.mrb[14].mxu0  ;;  %11546 = vst.msk [vmem:[#allocation3 + $0x110] sm:$0xff] %vm11511_vm7, %v11388_v52  ;;  %v11281_v52 = vsel %vm4815_vm12, %v11279_v47, %v11280_v16  ;;  %v8112_v21 = vrot.slane %v15840_v23, 1  ;;  %v10189_v47 = vshll.u32 %v18747_v28, 16 }
 0x479   : > { %v14800_v4 = vpack.c.bf16 %v11953_v46, %v11953_v46  ;;  %v11956_v50 = vadd.f32 %v14999_v11, %v18462_v22  ;;  %v11947_v26 = vpop.f32.mrb[15].mxu0  ;;  %8243 = vrot.lane.b32.xlu0 %v8109_v55, %s16008_s16  ;;  %v13326_v61 = vmul.f32 %v11953_v46, %v11953_v46  ;;  %v13076_v8 = vsel %vm13048_vm10, %v11953_v46, 0.0  ;;  %v18754_v55 = vld [vmem:[#allocation2 + $0x224] sm:$0xff]  }
 0x47a   : > { %v14798_v7 = vpack.c.bf16 %v11945_v40, %v11945_v40  ;;  %v13072_v12 = vsel %vm13048_vm10, %v11945_v40, 0.0  ;;  %v13324_v14 = vmul.f32 %v11945_v40, %v11945_v40  ;;  %v11948_v35 = vadd.f32 %v18462_v22, %v11947_v26  ;;  %v11390_v29 = vpop.permute.xlu1 %11389 }
 0x47b   : > { %12934 = vst.msk [vmem:[%s18490_s14 + $0x38] sm:$0xf] %vm12919_vm11, %v14800_v4  ;;  %v13073_v42 = vadd.f32 %v13072_v12, %v18677_v57  ;;  %v14801_v43 = vpack.c.bf16 %v11956_v50, %v11956_v50  ;;  %v8220_v44 = vpop.permute.xlu0 %8219  ;;  %v7026_v57 = vshrl.u32 %v18687_v32, 16  ;;  %v13327_v13 = vmul.f32 %v11956_v50, %v11956_v50  ;;  %v18775_v12 = vld [vmem:[#allocation2 + $0x21c] sm:$0xff]  }
 0x47c   : > { %11547 = vst.msk [vmem:[#allocation3 + $0x118] sm:$0xff] %vm11511_vm7, %v11390_v29  ;;  %v13463_v38 = vsel %vm13048_vm10, %v13324_v14, 0.0  ;;  %v14799_v49 = vpack.c.bf16 %v11948_v35, %v11948_v35  ;;  %v13074_v53 = vsel %vm13048_vm10, %v11948_v35, 0.0  ;;  %8245 = vrot.lane.b32.xlu1 %v8111_v34, %s16008_s16  ;;  %v13325_v0 = vmul.f32 %v11948_v35, %v11948_v35 }
 0x47d   : > { %12932 = vst.msk [vmem:[%s18490_s14 + $0x30] sm:$0xf] %vm12919_vm11, %v14798_v7  ;;  %v13464_v19 = vadd.f32 %v13463_v38, %v13462_v18  ;;  %12935 = vst.msk [vmem:[%s18490_s14 + $0x3c] sm:$0xf] %vm12919_vm11, %v14801_v43  ;;  %v13075_v63 = vadd.f32 %v13074_v53, %v13073_v42  ;;  %8949 = vrot.lane.b32.xlu0 %v15829_v15, %s16009_s17  ;;  %v13078_v24 = vsel %vm13048_vm10, %v11956_v50, 0.0  ;;  %v13467_v25 = vsel %vm13048_vm10, %v13326_v61, 0.0 }
 0x47e   : > { %8376 = vst.msk [vmem:[#allocation3 + $0x120] sm:$0xff] %vm8339_vm2, %v8220_v44  ;;  %v8222_v5 = vpop.permute.xlu1 %8221  ;;  %v13465_v10 = vsel %vm13048_vm10, %v13325_v0, 0.0  ;;  %v15842_v18 = vld [vmem:[#allocation2 + $0x218] ss:$0 sps:$4 sm:$0x11]   ;;  %v7028_v37 = vor.u32 %v7026_v57, %v18724_v48  ;;  %v13469_v40 = vsel %vm13048_vm10, %v13327_v13, 0.0  ;;  %v11283_v20 = vsel %vm4815_vm12, %v11280_v16, %v11282_v54 }
 0x47f   : > { %12933 = vst.msk [vmem:[%s18490_s14 + $0x34] sm:$0xf] %vm12919_vm11, %v14799_v49  ;;  %v13077_v27 = vadd.f32 %v13076_v8, %v13075_v63  ;;  %v8926_v9 = vpop.permute.xlu0 %8925  ;;  %v11610_v32 = vld [vmem:[#allocation3 + $0x110] sm:$0xff]  ;;  %v13466_v33 = vadd.f32 %v13465_v10, %v13464_v19  ;;  %v8113_v4 = vrot.slane %v15841_v31, 1  ;;  %v8115_v56 = vrot.slane %v15842_v18, 1  ;;  %v18785_v44 = vld [vmem:[#allocation2 + $0x224] sm:$0xff]  }
 0x480   : > { %8377 = vst.msk [vmem:[#allocation3 + $0x128] sm:$0xff] %vm8339_vm2, %v8222_v5  ;;  %8951 = vrot.lane.b32.xlu1 %v15830_v59, %s16009_s17  ;;  %15052 = vmatprep.mubr.msk.bf16.mxu1 %vm11662_vm8, %v11610_v32  ;;  %v509_v26 = vsel %vm16102_vm3, 0, %v508_v58  ;;  %v612_v15 = vld [vmem:[#allocation2 + $0x2a4] sm:$0x1]  ;;  %v10194_v7 = vshll.u32 %v18754_v55, 16  ;;  %v7025_v29 = vsel %vm3341_vm9, %v7020_v62, %v18724_v48  ;;  %v7033_v16 = vsel %vm3341_vm9, %v7028_v37, %v7032_v36 }
 0x481   : > { %9082 = vst.msk [vmem:[#allocation3 + $0x120] sm:$0xff] %vm9045_vm4, %v8926_v9  ;;  %v18750_v3 = vadd.f32 %v13078_v24, %v13077_v27  ;;  %10422 = vrot.lane.b32.xlu0 %v10177_v17, %s16010_s18  ;;  %v13468_v34 = vadd.f32 %v13467_v25, %v13466_v33  ;;  %510 = vst [vmem:[#allocation2 + $0x294] sm:$0x1] %v509_v26  ;;  %v613_v1 = vsel %vm16116_vm5, 0, %v612_v15  ;;  %v10187_v38 = vshrl.u32 %v18747_v28, 16 }
 0x482   : > { %v8928_v46 = vpop.permute.xlu1 %8927  ;;  %v8114_v43 = vsel %vm4815_vm12, %v8112_v21, %v8113_v4  ;;  %614 = vst [vmem:[#allocation2 + $0x2a4] sm:$0x1] %v613_v1  ;;  %v8116_v2 = vsel %vm4815_vm12, %v8113_v4, %v8115_v56  ;;  %v10191_v49 = vrot.slane %v10189_v47, 1  ;;  %v15847_v53 = vld [vmem:[#allocation2 + $0x22c] ss:$0 sps:$4 sm:$0x11]  }
 0x483   : > { %v11611_v45 = vld [vmem:[#allocation3 + $0x118] sm:$0xff]  ;;  %9083 = vst.msk [vmem:[#allocation3 + $0x128] sm:$0xff] %vm9045_vm4, %v8928_v46  ;;  %v10399_v11 = vpop.permute.xlu0 %10398  ;;  %v13470_v50 = vadd.f32 %v13469_v40, %v13468_v34  ;;  %v10196_v19 = vrot.slane %v10194_v7, 1  ;;  %v7037_v63 = vshll.u32 %v18775_v12, 16  ;;  %v10198_v27 = vshrl.u32 %v18754_v55, 16 }
 0x484   : > { %15053 = vmatmul.mubr.msk.bf16.gmra.mrb[4].mxu1 %vm11662_vm8, %v11611_v45  ;;  %10424 = vrot.lane.b32.xlu1 %v10185_v39, %s16010_s18  ;;  %10555 = vst.msk [vmem:[#allocation3 + $0x120] sm:$0xff] %vm10518_vm6, %v10399_v11  ;;  %v7042_v10 = vshll.u32 %v18785_v44, 16  ;;  %v15853_v9 = vld [vmem:[#allocation2 + $0x22c] ss:$0 sps:$4 sm:$0x11]   ;;  %v10202_v18 = vshll.u32 %v15847_v53, 16  ;;  %v10192_v34 = vor.u32 %v10191_v49, %v10187_v38 }
 0x485   : > { %11415 = vrot.lane.b32.xlu0 %v11281_v52, %s16011_s19  ;;  %v15848_v39 = vld [vmem:[#allocation2 + $0x21c] sm:$0xfe]   ;;  %v15849_v46 = vld [vmem:[#allocation2 + $0x224] sm:$0xff]   ;;  %v7035_v45 = vshrl.u32 %v18775_v12, 16  ;;  %v7039_v52 = vrot.slane %v7037_v63, 1  ;;  %v7046_v47 = vshrl.u32 %v18785_v44, 16  ;;  %v10200_v7 = vor.u32 %v10198_v27, %v10196_v19 }
 0x486   : > { %v10401_v14 = vpop.permute.xlu1 %10400  ;;  %v15002_v35 = vpop.f32.mrb[16].mxu0  ;;  %v15850_v36 = vld [vmem:[#allocation2 + $0x22c] ss:$0 sps:$4 sm:$0x11]   ;;  %v7044_v21 = vrot.slane %v7042_v10, 1  ;;  %v15844_v56 = vld [vmem:[#allocation2 + $0x224] sm:$0xff]   ;;  %v10197_v1 = vsel %vm3341_vm9, %v10192_v34, %v10196_v19 }
 0x487   : > { %10556 = vst.msk [vmem:[#allocation3 + $0x128] sm:$0xff] %vm10518_vm6, %v10401_v14  ;;  %v11969_v30 = vadd.f32 %v15002_v35, %v18462_v22  ;;  %v11960_v51 = vpop.f32.mrb[17].mxu0  ;;  %v11392_v42 = vpop.permute.xlu0 %11391  ;;  %v7050_v26 = vshll.u32 %v15853_v9, 16  ;;  %v10204_v12 = vrot.slane %v10202_v18, 1  ;;  %v15854_v44 = vld [vmem:[#allocation2 + $0x21c] sm:$0xfe]  }
 0x488   : > { %v11961_v41 = vadd.f32 %v18462_v22, %v11960_v51  ;;  %11417 = vrot.lane.b32.xlu1 %v11283_v20, %s16011_s19  ;;  %v15003_v48 = vpop.f32.mrb[18].mxu0  ;;  %11548 = vst.msk [vmem:[#allocation3 + $0x120] sm:$0xff] %vm11511_vm7, %v11392_v42  ;;  %v11285_v51 = vrot.slane %v15849_v46, 1  ;;  %v7048_v38 = vor.u32 %v7046_v47, %v7044_v21  ;;  %v18833_v53 = vld [vmem:[#allocation2 + $0x230] sm:$0xff]   ;;  %vm13310_vm3 = vcmask 516096  }
 0x489   : > { %v14804_v59 = vpack.c.bf16 %v11969_v30, %v11969_v30  ;;  %v11972_v57 = vadd.f32 %v15003_v48, %v18462_v22  ;;  %v11963_v61 = vpop.f32.mrb[19].mxu0  ;;  %7254 = vrot.lane.b32.xlu0 %v7025_v29, %s16007_s15  ;;  %v13330_v24 = vmul.f32 %v11969_v30, %v11969_v30  ;;  %v13084_v54 = vsel %vm13048_vm10, %v11969_v30, 0.0  ;;  %v15861_v34 = vld [vmem:[#allocation2 + $0x240] ss:$0 sps:$4 sm:$0x11]  }
 0x48a   : > { %v14802_v0 = vpack.c.bf16 %v11961_v41, %v11961_v41  ;;  %v13080_v60 = vsel %vm13048_vm10, %v11961_v41, 0.0  ;;  %v13328_v8 = vmul.f32 %v11961_v41, %v11961_v41  ;;  %v11964_v5 = vadd.f32 %v18462_v22, %v11963_v61  ;;  %v11394_v17 = vpop.permute.xlu1 %11393  ;;  %v18829_v41 = vld [vmem:[#allocation2 + $0x224] sm:$0xff]   ;;  %v18839_v61 = vld [vmem:[#allocation2 + $0x238] sm:$0xff]  }
 0x48b   : > { %12938 = vst.msk [vmem:[%s18490_s14 + $0x48] sm:$0xf] %vm12919_vm11, %v14804_v59  ;;  %v13081_v6 = vadd.f32 %v13080_v60, %v18750_v3  ;;  %v14805_v23 = vpack.c.bf16 %v11972_v57, %v11972_v57  ;;  %v8224_v13 = vpop.permute.xlu0 %8223  ;;  %v15843_v3 = vld [vmem:[#allocation2 + $0x21c] sm:$0xff]   ;;  %v13331_v62 = vmul.f32 %v11972_v57, %v11972_v57  ;;  %v13086_v4 = vsel %vm13048_vm10, %v11972_v57, 0.0 }
 0x48c   : > { %11549 = vst.msk [vmem:[#allocation3 + $0x128] sm:$0xff] %vm11511_vm7, %v11394_v17  ;;  %v13471_v22 = vsel %vm13048_vm10, %v13328_v8, 0.0  ;;  %v14803_v32 = vpack.c.bf16 %v11964_v5, %v11964_v5  ;;  %v13082_v31 = vsel %vm13048_vm10, %v11964_v5, 0.0  ;;  %7256 = vrot.lane.b32.xlu1 %v7033_v16, %s16007_s15  ;;  %v13329_v25 = vmul.f32 %v11964_v5, %v11964_v5  ;;  %v18837_v57 = vld [vmem:[#allocation2 + $0x22c] ss:$0 sps:$4 sm:$0x11]  }
 0x48d   : > { %12936 = vst.msk [vmem:[%s18490_s14 + $0x40] sm:$0xf] %vm12919_vm11, %v14802_v0  ;;  %v13472_v33 = vadd.f32 %v13471_v22, %v13470_v50  ;;  %12939 = vst.msk [vmem:[%s18490_s14 + $0x4c] sm:$0xf] %vm12919_vm11, %v14805_v23  ;;  %v13083_v28 = vadd.f32 %v13082_v31, %v13081_v6  ;;  %8247 = vrot.lane.b32.xlu0 %v8114_v43, %s16008_s16  ;;  %v13475_v15 = vsel %vm13048_vm10, %v13330_v24, 0.0  ;;  %v11284_v30 = vrot.slane %v15848_v39, 1 }
 0x48e   : > { %8378 = vst.msk [vmem:[#allocation3 + $0x130] sm:$0xff] %vm8339_vm2, %v8224_v13  ;;  %v8226_v55 = vpop.permute.xlu1 %8225  ;;  %v13473_v58 = vsel %vm13048_vm10, %v13329_v25, 0.0  ;;  %v13477_v42 = vsel %vm13048_vm10, %v13331_v62, 0.0  ;;  %v11287_v43 = vrot.slane %v15850_v36, 1  ;;  %v7052_v49 = vrot.slane %v7050_v26, 1 }
 0x48f   : > { %12937 = vst.msk [vmem:[%s18490_s14 + $0x44] sm:$0xf] %vm12919_vm11, %v14803_v32  ;;  %v13085_v37 = vadd.f32 %v13084_v54, %v13083_v28  ;;  %v8930_v40 = vpop.permute.xlu0 %8929  ;;  %v11612_v11 = vld [vmem:[#allocation3 + $0x120] sm:$0xff]  ;;  %v13474_v50 = vadd.f32 %v13473_v58, %v13472_v33  ;;  %v10205_v59 = vsel %vm3341_vm9, %v10200_v7, %v10204_v12  ;;  %v11286_v0 = vsel %vm4815_vm12, %v11284_v30, %v11285_v51  ;;  %v18846_v60 = vld [vmem:[%s19838_s2] ss:$0 sm:$0xff]  ;;  %v18870_v58 = vld [vmem:[#allocation2 + $0x230] sm:$0xff]  }
 0x490   : > { %8379 = vst.msk [vmem:[#allocation3 + $0x138] sm:$0xff] %vm8339_vm2, %v8226_v55  ;;  %8249 = vrot.lane.b32.xlu1 %v8116_v2, %s16008_s16  ;;  %15056 = vmatprep.mubr.msk.bf16.mxu1 %vm11662_vm8, %v11612_v11  ;;  %v7040_v2 = vor.u32 %v7039_v52, %v7035_v45  ;;  %v11288_v6 = vsel %vm4815_vm12, %v11285_v51, %v11287_v43  ;;  %v8117_v23 = vrot.slane %v15854_v44, 1  ;;  %v8118_v13 = vrot.slane %v18829_v41, 1 }
 0x491   : > { %9084 = vst.msk [vmem:[#allocation3 + $0x130] sm:$0xff] %vm9045_vm4, %v8930_v40  ;;  %v13087_v20 = vadd.f32 %v13086_v4, %v13085_v37  ;;  %8953 = vrot.lane.b32.xlu0 %v15843_v3, %s16009_s17  ;;  %v13476_v14 = vadd.f32 %v13475_v15, %v13474_v50  ;;  %v7053_v22 = vsel %vm3341_vm9, %v7048_v38, %v7052_v49  ;;  %v10209_v32 = vshll.u32 %v18833_v53, 16  ;;  %v18878_v4 = vld [vmem:[#allocation2 + $0x238] sm:$0xff]  }
 0x492   : > { %v8932_v35 = vpop.permute.xlu1 %8931  ;;  %v7045_v9 = vsel %vm3341_vm9, %v7040_v2, %v7044_v21  ;;  %v8120_v33 = vrot.slane %v18837_v57, 1  ;;  %v10214_v28 = vshll.u32 %v18839_v61, 16  ;;  %v8119_v62 = vsel %vm4815_vm12, %v8117_v23, %v8118_v13  ;;  %v15864_v2 = vld [vmem:[#allocation2 + $0x240] ss:$0 sps:$4 sm:$0x11]   ;;  %v15857_v57 = vld [vmem:[#allocation2 + $0x230] sm:$0xff]  }
 0x493   : > { %v11613_v29 = vld [vmem:[#allocation3 + $0x128] sm:$0xff]  ;;  %9085 = vst.msk [vmem:[#allocation3 + $0x138] sm:$0xff] %vm9045_vm4, %v8932_v35  ;;  %v10403_v16 = vpop.permute.xlu0 %10402  ;;  %v13478_v48 = vadd.f32 %v13477_v42, %v13476_v14  ;;  %v10207_v37 = vshrl.u32 %v18833_v53, 16  ;;  %v10211_v21 = vrot.slane %v10209_v32, 1  ;;  %v10218_v12 = vshrl.u32 %v18839_v61, 16 }
 0x494   : > { %15057 = vmatmul.mubr.msk.bf16.gmra.mrb[8].mxu1 %vm11662_vm8, %v11613_v29  ;;  %8955 = vrot.lane.b32.xlu1 %v15844_v56, %s16009_s17  ;;  %10557 = vst.msk [vmem:[#allocation3 + $0x130] sm:$0xff] %vm10518_vm6, %v10403_v16  ;;  %v10216_v7 = vrot.slane %v10214_v28, 1  ;;  %v10222_v14 = vshll.u32 %v15861_v34, 16  ;;  %v15862_v35 = vld [vmem:[#allocation2 + $0x230] sm:$0xfe]   ;;  %v15863_v16 = vld [vmem:[#allocation2 + $0x238] sm:$0xff]  }
 0x495   : > { %10426 = vrot.lane.b32.xlu0 %v10197_v1, %s16010_s18  ;;  %v7057_v43 = vshll.u32 %v18870_v58, 16  ;;  %v7062_v38 = vshll.u32 %v18878_v4, 16  ;;  %v10212_v61 = vor.u32 %v10211_v21, %v10207_v37  ;;  %v7055_v41 = vshrl.u32 %v18870_v58, 16 }
 0x496   : > { %v10405_v19 = vpop.permute.xlu1 %10404  ;;  %v15006_v63 = vpop.f32.mrb[20].mxu0  ;;  %v11292_v32 = vrot.slane %v15864_v2, 1 }
 0x497   : > { %10558 = vst.msk [vmem:[#allocation3 + $0x138] sm:$0xff] %vm10518_vm6, %v10405_v19  ;;  %v11985_v8 = vadd.f32 %v18846_v60, %v15006_v63  ;;  %v11976_v5 = vpop.f32.mrb[21].mxu0  ;;  %v11396_v17 = vpop.permute.xlu0 %11395  ;;  %v15867_v19 = vld [vmem:[#allocation2 + $0x240] ss:$0 sps:$4 sm:$0x11]  }
 0x498   : > { %v11977_v27 = vadd.f32 %v18846_v60, %v11976_v5  ;;  %10428 = vrot.lane.b32.xlu1 %v10205_v59, %s16010_s18  ;;  %v15007_v10 = vpop.f32.mrb[22].mxu0  ;;  %11550 = vst.msk [vmem:[#allocation3 + $0x130] sm:$0xff] %vm11511_vm7, %v11396_v17  ;;  %v8121_v59 = vsel %vm4815_vm12, %v8118_v13, %v8120_v33  ;;  %v10220_v5 = vor.u32 %v10218_v12, %v10216_v7  ;;  %v10224_v17 = vrot.slane %v10222_v14, 1  ;;  %v18908_v33 = vld [vmem:[#allocation2 + $0x244] sm:$0xff]   ;;  %v18928_v12 = vld [vmem:[#allocation2 + $0x238] sm:$0xff]  }
 0x499   : > { %v14808_v31 = vpack.c.bf16 %v11985_v8, %v11985_v8  ;;  %v11988_v18 = vadd.f32 %v18846_v60, %v15007_v10  ;;  %v11979_v24 = vpop.f32.mrb[23].mxu0  ;;  %11419 = vrot.lane.b32.xlu0 %v11286_v0, %s16011_s19  ;;  %v13334_v50 = vmul.f32 %v11985_v8, %v11985_v8  ;;  %v13092_v15 = vsel %vm13048_vm10, %v11985_v8, 0.0 }
 0x49a   : > { %v14806_v25 = vpack.c.bf16 %v11977_v27, %v11977_v27  ;;  %v13088_v3 = vsel %vm13048_vm10, %v11977_v27, 0.0  ;;  %v13332_v39 = vmul.f32 %v11977_v27, %v11977_v27  ;;  %v11980_v54 = vadd.f32 %v18846_v60, %v11979_v24  ;;  %v11398_v55 = vpop.permute.xlu1 %11397 }
 0x49b   : > { %12942 = vst.msk [vmem:[%s18490_s14 + $0x58] sm:$0xf] %vm12919_vm11, %v14808_v31  ;;  %v13089_v46 = vadd.f32 %v13088_v3, %v13087_v20  ;;  %v14809_v45 = vpack.c.bf16 %v11988_v18, %v11988_v18  ;;  %v8228_v52 = vpop.permute.xlu0 %8227  ;;  %v13335_v29 = vmul.f32 %v11988_v18, %v11988_v18  ;;  %v13094_v44 = vsel %vm13048_vm10, %v11988_v18, 0.0 }
 0x49c   : > { %11551 = vst.msk [vmem:[#allocation3 + $0x138] sm:$0xff] %vm11511_vm7, %v11398_v55  ;;  %v13479_v40 = vsel %vm13048_vm10, %v13332_v39, 0.0  ;;  %v14807_v11 = vpack.c.bf16 %v11980_v54, %v11980_v54  ;;  %v13090_v36 = vsel %vm13048_vm10, %v11980_v54, 0.0  ;;  %11421 = vrot.lane.b32.xlu1 %v11288_v6, %s16011_s19  ;;  %v13333_v26 = vmul.f32 %v11980_v54, %v11980_v54 }
 0x49d   : > { %12940 = vst.msk [vmem:[%s18490_s14 + $0x50] sm:$0xf] %vm12919_vm11, %v14806_v25  ;;  %v13480_v56 = vadd.f32 %v13479_v40, %v13478_v48  ;;  %12943 = vst.msk [vmem:[%s18490_s14 + $0x5c] sm:$0xf] %vm12919_vm11, %v14809_v45  ;;  %v13091_v47 = vadd.f32 %v13090_v36, %v13089_v46  ;;  %7258 = vrot.lane.b32.xlu0 %v7045_v9, %s16007_s15  ;;  %v13483_v49 = vsel %vm13048_vm10, %v13334_v50, 0.0  ;;  %v11289_v6 = vrot.slane %v15862_v35, 1 }
 0x49e   : > { %8380 = vst.msk [vmem:[#allocation3 + $0x140] sm:$0xff] %vm8339_vm2, %v8228_v52  ;;  %v8230_v20 = vpop.permute.xlu1 %8229  ;;  %v13481_v30 = vsel %vm13048_vm10, %v13333_v26, 0.0  ;;  %v13485_v23 = vsel %vm13048_vm10, %v13335_v29, 0.0  ;;  %v11290_v10 = vrot.slane %v15863_v16, 1  ;;  %v7059_v13 = vrot.slane %v7057_v43, 1  ;;  %v18914_v45 = vld [vmem:[#allocation2 + $0x24c] sm:$0xff]  }
 0x49f   : > { %12941 = vst.msk [vmem:[%s18490_s14 + $0x54] sm:$0xf] %vm12919_vm11, %v14807_v11  ;;  %v13093_v1 = vadd.f32 %v13092_v15, %v13091_v47  ;;  %v8934_v51 = vpop.permute.xlu0 %8933  ;;  %v11614_v42 = vld [vmem:[#allocation3 + $0x130] sm:$0xff]  ;;  %v13482_v48 = vadd.f32 %v13481_v30, %v13480_v56  ;;  %v7064_v31 = vrot.slane %v7062_v38, 1  ;;  %v7066_v18 = vshrl.u32 %v18878_v4, 16 }
 0x4a0   : > { %8381 = vst.msk [vmem:[#allocation3 + $0x148] sm:$0xff] %vm8339_vm2, %v8230_v20  ;;  %7260 = vrot.lane.b32.xlu1 %v7053_v22, %s16007_s15  ;;  %15060 = vmatprep.mubr.msk.bf16.mxu1 %vm11662_vm8, %v11614_v42  ;;  %v15858_v22 = vld [vmem:[#allocation2 + $0x238] sm:$0xff]   ;;  %v7070_v24 = vshll.u32 %v15867_v19, 16  ;;  %v10217_v3 = vsel %vm3341_vm9, %v10212_v61, %v10216_v7  ;;  %v10225_v34 = vsel %vm3341_vm9, %v10220_v5, %v10224_v17  ;;  %v18921_v11 = vld [vmem:[#allocation2 + $0x230] sm:$0xfe]   ;;  %v10229_v56 = vshll.u32 %v18908_v33, 16 }
 0x4a1   : > { %9086 = vst.msk [vmem:[#allocation3 + $0x140] sm:$0xff] %vm9045_vm4, %v8934_v51  ;;  %v13095_v53 = vadd.f32 %v13094_v44, %v13093_v1  ;;  %8251 = vrot.lane.b32.xlu0 %v8119_v62, %s16008_s16  ;;  %v13484_v63 = vadd.f32 %v13483_v49, %v13482_v48  ;;  %v7060_v46 = vor.u32 %v7059_v13, %v7055_v41  ;;  %v10234_v30 = vshll.u32 %v18914_v45, 16  ;;  %v15875_v44 = vld [vmem:[#allocation2 + $0x254] ss:$0 sps:$4 sm:$0x11]  }
 0x4a2   : > { %v8936_v0 = vpop.permute.xlu1 %8935  ;;  %v11291_v37 = vsel %vm4815_vm12, %v11289_v6, %v11290_v10  ;;  %v11293_v58 = vsel %vm4815_vm12, %v11290_v10, %v11292_v32  ;;  %v7068_v40 = vor.u32 %v7066_v18, %v7064_v31  ;;  %v7072_v50 = vrot.slane %v7070_v24, 1  ;;  %v18960_v18 = vld [vmem:[#allocation2 + $0x244] sm:$0xff]  }
 0x4a3   : > { %v11615_v8 = vld [vmem:[#allocation3 + $0x138] sm:$0xff]  ;;  %9087 = vst.msk [vmem:[#allocation3 + $0x148] sm:$0xff] %vm9045_vm4, %v8936_v0  ;;  %v10407_v27 = vpop.permute.xlu0 %10406  ;;  %v13486_v9 = vadd.f32 %v13485_v23, %v13484_v63  ;;  %v7065_v1 = vsel %vm3341_vm9, %v7060_v46, %v7064_v31  ;;  %v8122_v43 = vrot.slane %v18921_v11, 1  ;;  %v8123_v61 = vrot.slane %v18928_v12, 1 }
 0x4a4   : > { %15061 = vmatmul.mubr.msk.bf16.gmra.mrb[12].mxu1 %vm11662_vm8, %v11615_v8  ;;  %8253 = vrot.lane.b32.xlu1 %v8121_v59, %s16008_s16  ;;  %10559 = vst.msk [vmem:[#allocation3 + $0x140] sm:$0xff] %vm10518_vm6, %v10407_v27  ;;  %v10227_v19 = vshrl.u32 %v18908_v33, 16  ;;  %v10231_v63 = vrot.slane %v10229_v56, 1  ;;  %v10236_v23 = vrot.slane %v10234_v30, 1  ;;  %v10238_v41 = vshrl.u32 %v18914_v45, 16 }
 0x4a5   : > { %8957 = vrot.lane.b32.xlu0 %v15857_v57, %s16009_s17  ;;  %v10242_v13 = vshll.u32 %v15875_v44, 16  ;;  %v7073_v32 = vsel %vm3341_vm9, %v7068_v40, %v7072_v50  ;;  %v15871_v40 = vld [vmem:[#allocation2 + $0x244] sm:$0xff]   ;;  %v7077_v11 = vshll.u32 %v18960_v18, 16 }
 0x4a6   : > { %v10409_v28 = vpop.permute.xlu1 %10408  ;;  %v15010_v25 = vpop.f32.mrb[24].mxu0  ;;  %v10240_v45 = vor.u32 %v10238_v41, %v10236_v23 }
 0x4a7   : > { %10560 = vst.msk [vmem:[#allocation3 + $0x148] sm:$0xff] %vm10518_vm6, %v10409_v28  ;;  %v12001_v39 = vadd.f32 %v18846_v60, %v15010_v25  ;;  %v11992_v54 = vpop.f32.mrb[25].mxu0  ;;  %v11400_v55 = vpop.permute.xlu0 %11399  ;;  %v8124_v25 = vsel %vm4815_vm12, %v8122_v43, %v8123_v61  ;;  %v7079_v43 = vrot.slane %v7077_v11, 1 }
 0x4a8   : > { %v11993_v52 = vadd.f32 %v18846_v60, %v11992_v54  ;;  %8959 = vrot.lane.b32.xlu1 %v15858_v22, %s16009_s17  ;;  %v15011_v62 = vpop.f32.mrb[26].mxu0  ;;  %11552 = vst.msk [vmem:[#allocation3 + $0x140] sm:$0xff] %vm11511_vm7, %v11400_v55  ;;  %v10232_v54 = vor.u32 %v10231_v63, %v10227_v19  ;;  %v18966_v55 = vld [vmem:[#allocation2 + $0x244] sm:$0xfe]   ;;  %v18999_v63 = vld [vmem:[#allocation2 + $0x258] sm:$0xff]  }
 0x4a9   : > { %v14812_v36 = vpack.c.bf16 %v12001_v39, %v12001_v39  ;;  %v12004_v21 = vadd.f32 %v18846_v60, %v15011_v62  ;;  %v11995_v4 = vpop.f32.mrb[27].mxu0  ;;  %10430 = vrot.lane.b32.xlu0 %v10217_v3, %s16010_s18  ;;  %v13338_v48 = vmul.f32 %v12001_v39, %v12001_v39  ;;  %v13100_v59 = vsel %vm13048_vm10, %v12001_v39, 0.0  ;;  %v18972_v62 = vld [vmem:[#allocation2 + $0x24c] sm:$0xff]  }
 0x4aa   : > { %v14810_v47 = vpack.c.bf16 %v11993_v52, %v11993_v52  ;;  %v13096_v26 = vsel %vm13048_vm10, %v11993_v52, 0.0  ;;  %v13336_v15 = vmul.f32 %v11993_v52, %v11993_v52  ;;  %v11996_v20 = vadd.f32 %v18846_v60, %v11995_v4  ;;  %v11402_v7 = vpop.permute.xlu1 %11401 }
 0x4ab   : > { %12946 = vst.msk [vmem:[%s18490_s14 + $0x68] sm:$0xf] %vm12919_vm11, %v14812_v36  ;;  %v13097_v14 = vadd.f32 %v13096_v26, %v13095_v53  ;;  %v14813_v35 = vpack.c.bf16 %v12004_v21, %v12004_v21  ;;  %v7239_v29 = vpop.permute.xlu0 %7238  ;;  %v15870_v53 = vld [vmem:[#allocation2 + $0x240] ss:$0 sps:$4 sm:$0x11]   ;;  %v13339_v0 = vmul.f32 %v12004_v21, %v12004_v21  ;;  %v13102_v27 = vsel %vm13048_vm10, %v12004_v21, 0.0 }
 0x4ac   : > { %11553 = vst.msk [vmem:[#allocation3 + $0x148] sm:$0xff] %vm11511_vm7, %v11402_v7  ;;  %v13487_v51 = vsel %vm13048_vm10, %v13336_v15, 0.0  ;;  %v14811_v42 = vpack.c.bf16 %v11996_v20, %v11996_v20  ;;  %v13098_v16 = vsel %vm13048_vm10, %v11996_v20, 0.0  ;;  %10432 = vrot.lane.b32.xlu1 %v10225_v34, %s16010_s18  ;;  %v13337_v49 = vmul.f32 %v11996_v20, %v11996_v20  ;;  %v18968_v34 = vld [vmem:[#allocation2 + $0x24c] sm:$0xff]  }
 0x4ad   : > { %12944 = vst.msk [vmem:[%s18490_s14 + $0x60] sm:$0xf] %vm12919_vm11, %v14810_v47  ;;  %v13488_v2 = vadd.f32 %v13487_v51, %v13486_v9  ;;  %12947 = vst.msk [vmem:[%s18490_s14 + $0x6c] sm:$0xf] %vm12919_vm11, %v14813_v35  ;;  %v13099_v38 = vadd.f32 %v13098_v16, %v13097_v14  ;;  %11423 = vrot.lane.b32.xlu0 %v11291_v37, %s16011_s19  ;;  %v13491_v9 = vsel %vm13048_vm10, %v13338_v48, 0.0  ;;  %v8125_v31 = vrot.slane %v15870_v53, 1 }
 0x4ae   : > { %7389 = vst.msk [vmem:[#allocation3 + $0x150] sm:$0xff] %vm7346_vm1, %v7239_v29  ;;  %v7241_v57 = vpop.permute.xlu1 %7240  ;;  %v13489_v5 = vsel %vm13048_vm10, %v13337_v49, 0.0  ;;  %v13493_v3 = vsel %vm13048_vm10, %v13339_v0, 0.0  ;;  %v10244_v52 = vrot.slane %v10242_v13, 1  ;;  %v15872_v47 = vld [vmem:[#allocation2 + $0x24c] sm:$0xff]   ;;  %v10237_v26 = vsel %vm3341_vm9, %v10232_v54, %v10236_v23 }
 0x4af   : > { %12945 = vst.msk [vmem:[%s18490_s14 + $0x64] sm:$0xf] %vm12919_vm11, %v14811_v42  ;;  %v13101_v8 = vadd.f32 %v13100_v59, %v13099_v38  ;;  %v8232_v17 = vpop.permute.xlu0 %8231  ;;  %v11616_v6 = vld [vmem:[#allocation3 + $0x140] sm:$0xff]  ;;  %v13490_v10 = vadd.f32 %v13489_v5, %v13488_v2  ;;  %v18974_v37 = vld [vmem:[#allocation2 + $0x254] ss:$0 sps:$4 sm:$0x11]  }
 0x4b0   : > { %7390 = vst.msk [vmem:[#allocation3 + $0x158] sm:$0xff] %vm7346_vm1, %v7241_v57  ;;  %11425 = vrot.lane.b32.xlu1 %v11293_v58, %s16011_s19  ;;  %15064 = vmatprep.mubr.msk.bf16.mxu1 %vm11662_vm8, %v11616_v6  ;;  %v8126_v58 = vsel %vm4815_vm12, %v8123_v61, %v8125_v31  ;;  %v11294_v15 = vrot.slane %v18966_v55, 1  ;;  %v7082_v20 = vshll.u32 %v18968_v34, 16  ;;  %v10245_v14 = vsel %vm3341_vm9, %v10240_v45, %v10244_v52  ;;  %v19007_v6 = vld [vmem:[#allocation2 + $0x260] sm:$0xff]  }
 0x4b1   : > { %8382 = vst.msk [vmem:[#allocation3 + $0x150] sm:$0xff] %vm8339_vm2, %v8232_v17  ;;  %v13103_v22 = vadd.f32 %v13102_v27, %v13101_v8  ;;  %7262 = vrot.lane.b32.xlu0 %v7065_v1, %s16007_s15  ;;  %v13492_v24 = vadd.f32 %v13491_v9, %v13490_v10  ;;  %v11295_v35 = vrot.slane %v18972_v62, 1  ;;  %v11297_v29 = vrot.slane %v18974_v37, 1  ;;  %v15881_v1 = vld [vmem:[#allocation2 + $0x254] ss:$0 sps:$4 sm:$0x11]  }
 0x4b2   : > { %v8234_v33 = vpop.permute.xlu1 %8233  ;;  %v7075_v16 = vshrl.u32 %v18960_v18, 16  ;;  %v7084_v61 = vrot.slane %v7082_v20, 1  ;;  %v7086_v19 = vshrl.u32 %v18968_v34, 16  ;;  %v7090_v17 = vshll.u32 %v15881_v1, 16  ;;  %v15882_v31 = vld [vmem:[#allocation2 + $0x244] sm:$0xfe]  }
 0x4b3   : > { %v11617_v28 = vld [vmem:[#allocation3 + $0x148] sm:$0xff]  ;;  %8383 = vst.msk [vmem:[#allocation3 + $0x158] sm:$0xff] %vm8339_vm2, %v8234_v33  ;;  %v8938_v39 = vpop.permute.xlu0 %8937  ;;  %v13494_v46 = vadd.f32 %v13493_v3, %v13492_v24  ;;  %v10249_v3 = vshll.u32 %v18999_v63, 16  ;;  %v11298_v55 = vsel %vm4815_vm12, %v11295_v35, %v11297_v29  ;;  %v19036_v1 = vld [vmem:[#allocation2 + $0x258] sm:$0xff]  }
 0x4b4   : > { %15065 = vmatmul.mubr.msk.bf16.gmra.mrb[16].mxu1 %vm11662_vm8, %v11617_v28  ;;  %7264 = vrot.lane.b32.xlu1 %v7073_v32, %s16007_s15  ;;  %9088 = vst.msk [vmem:[#allocation3 + $0x150] sm:$0xff] %vm9045_vm4, %v8938_v39  ;;  %v7080_v32 = vor.u32 %v7079_v43, %v7075_v16  ;;  %v15883_v18 = vld [vmem:[#allocation2 + $0x24c] sm:$0xff]   ;;  %v15884_v34 = vld [vmem:[#allocation2 + $0x254] ss:$0 sps:$4 sm:$0x11]   ;;  %v7088_v62 = vor.u32 %v7086_v19, %v7084_v61  ;;  %v7092_v37 = vrot.slane %v7090_v17, 1 }
 0x4b5   : > { %8255 = vrot.lane.b32.xlu0 %v8124_v25, %s16008_s16  ;;  %v7097_v17 = vshll.u32 %v19036_v1, 16 }
 0x4b6   : > { %v8940_v36 = vpop.permute.xlu1 %8939  ;;  %v15014_v21 = vpop.f32.mrb[28].mxu0 }
 0x4b7   : > { %9089 = vst.msk [vmem:[#allocation3 + $0x158] sm:$0xff] %vm9045_vm4, %v8940_v36  ;;  %v12017_v4 = vadd.f32 %v18846_v60, %v15014_v21  ;;  %v12008_v50 = vpop.f32.mrb[29].mxu0  ;;  %v10411_v56 = vpop.permute.xlu0 %10410  ;;  %v7085_v36 = vsel %vm3341_vm9, %v7080_v32, %v7084_v61  ;;  %v8127_v21 = vrot.slane %v15882_v31, 1  ;;  %v19050_v61 = vld [vmem:[#allocation2 + $0x258] sm:$0xfe]   ;;  %v15886_v31 = vld [vmem:[#allocation2 + $0x260] sm:$0xff]  }
 0x4b8   : > { %v12009_v7 = vadd.f32 %v18846_v60, %v12008_v50  ;;  %8257 = vrot.lane.b32.xlu1 %v8126_v58, %s16008_s16  ;;  %v15015_v12 = vpop.f32.mrb[30].mxu0  ;;  %10561 = vst.msk [vmem:[#allocation3 + $0x150] sm:$0xff] %vm10518_vm6, %v10411_v56  ;;  %v15889_v58 = vld [vmem:[#allocation2 + $0x268] ss:$0 sps:$4 sm:$0x11]  }
 0x4b9   : > { %v14816_v30 = vpack.c.bf16 %v12017_v4, %v12017_v4  ;;  %v12020_v51 = vadd.f32 %v18846_v60, %v15015_v12  ;;  %v12011_v42 = vpop.f32.mrb[31].mxu0  ;;  %8961 = vrot.lane.b32.xlu0 %v15871_v40, %s16009_s17  ;;  %v13342_v23 = vmul.f32 %v12017_v4, %v12017_v4  ;;  %v13108_v13 = vsel %vm13048_vm10, %v12017_v4, 0.0 }
 0x4ba   : > { %v14814_v44 = vpack.c.bf16 %v12009_v7, %v12009_v7  ;;  %v13104_v48 = vsel %vm13048_vm10, %v12009_v7, 0.0  ;;  %v13340_v2 = vmul.f32 %v12009_v7, %v12009_v7  ;;  %v12012_v38 = vadd.f32 %v18846_v60, %v12011_v42  ;;  %v10413_v49 = vpop.permute.xlu1 %10412 }
 0x4bb   : > { %12950 = vst.msk [vmem:[%s18490_s14 + $0x78] sm:$0xf] %vm12919_vm11, %v14816_v30  ;;  %v13105_v53 = vadd.f32 %v13104_v48, %v13103_v22  ;;  %v14817_v59 = vpack.c.bf16 %v12020_v51, %v12020_v51  ;;  %v11404_v57 = vpop.permute.xlu0 %11403  ;;  %v11296_v22 = vsel %vm4815_vm12, %v11294_v15, %v11295_v35  ;;  %v13343_v24 = vmul.f32 %v12020_v51, %v12020_v51 }
 0x4bc   : > { %10562 = vst.msk [vmem:[#allocation3 + $0x158] sm:$0xff] %vm10518_vm6, %v10413_v49  ;;  %v13495_v0 = vsel %vm13048_vm10, %v13340_v2, 0.0  ;;  %v14815_v8 = vpack.c.bf16 %v12012_v38, %v12012_v38  ;;  %v13106_v5 = vsel %vm13048_vm10, %v12012_v38, 0.0  ;;  %8963 = vrot.lane.b32.xlu1 %v15872_v47, %s16009_s17  ;;  %v13341_v41 = vmul.f32 %v12012_v38, %v12012_v38  ;;  %v19042_v38 = vld [vmem:[#allocation2 + $0x260] sm:$0xff]  }
 0x4bd   : > { %12948 = vst.msk [vmem:[%s18490_s14 + $0x70] sm:$0xf] %vm12919_vm11, %v14814_v44  ;;  %v13496_v27 = vadd.f32 %v13495_v0, %v13494_v46  ;;  %12951 = vst.msk [vmem:[%s18490_s14 + $0x7c] sm:$0xf] %vm12919_vm11, %v14817_v59  ;;  %v13107_v10 = vadd.f32 %v13106_v5, %v13105_v53  ;;  %10434 = vrot.lane.b32.xlu0 %v10237_v26, %s16010_s18  ;;  %v13110_v39 = vsel %vm13048_vm10, %v12020_v51, 0.0  ;;  %v10254_v46 = vshll.u32 %v19007_v6, 16 }
 0x4be   : > { %11554 = vst.msk [vmem:[#allocation3 + $0x150] sm:$0xff] %vm11511_vm7, %v11404_v57  ;;  %v11406_v9 = vpop.permute.xlu1 %11405  ;;  %v13497_v28 = vsel %vm13048_vm10, %v13341_v41, 0.0  ;;  %v13499_v45 = vsel %vm13048_vm10, %v13342_v23, 0.0  ;;  %v8128_v4 = vrot.slane %v15883_v18, 1  ;;  %v13501_v50 = vsel %vm13048_vm10, %v13343_v24, 0.0 }
 0x4bf   : > { %12949 = vst.msk [vmem:[%s18490_s14 + $0x74] sm:$0xf] %vm12919_vm11, %v14815_v8  ;;  %v13109_v33 = vadd.f32 %v13108_v13, %v13107_v10  ;;  %v7243_v25 = vpop.permute.xlu0 %7242  ;;  %v13498_v54 = vadd.f32 %v13497_v28, %v13496_v27  ;;  %v10247_v26 = vshrl.u32 %v18999_v63, 16  ;;  %v10251_v15 = vrot.slane %v10249_v3, 1  ;;  %v15885_v8 = vld [vmem:[#allocation2 + $0x258] sm:$0xff]   ;;  %v19057_v13 = vld [vmem:[#allocation2 + $0x260] sm:$0xff]  }
 0x4c0   : > { %11555 = vst.msk [vmem:[#allocation3 + $0x158] sm:$0xff] %vm11511_vm7, %v11406_v9  ;;  %10436 = vrot.lane.b32.xlu1 %v10245_v14, %s16010_s18  ;;  %v8130_v7 = vrot.slane %v15884_v34, 1  ;;  %v10256_v12 = vrot.slane %v10254_v46, 1  ;;  %v10258_v14 = vshrl.u32 %v19007_v6, 16  ;;  %v7093_v35 = vsel %vm3341_vm9, %v7088_v62, %v7092_v37 }
 0x4c1   : > { %7391 = vst.msk [vmem:[#allocation3 + $0x160] sm:$0xff] %vm7346_vm1, %v7243_v25  ;;  %v13111_v52 = vadd.f32 %v13110_v39, %v13109_v33  ;;  %11427 = vrot.lane.b32.xlu0 %v11296_v22, %s16011_s19  ;;  %v13500_v40 = vadd.f32 %v13499_v45, %v13498_v54  ;;  %v10262_v29 = vshll.u32 %v15889_v58, 16  ;;  %v8129_v16 = vsel %vm4815_vm12, %v8127_v21, %v8128_v4  ;;  %v15895_v39 = vld [vmem:[#allocation2 + $0x268] ss:$0 sps:$4 sm:$0x11]  }
 0x4c2   : > { %v7245_v11 = vpop.permute.xlu1 %7244  ;;  %v10252_v2 = vor.u32 %v10251_v15, %v10247_v26  ;;  %v8131_v59 = vsel %vm4815_vm12, %v8128_v4, %v8130_v7  ;;  %v19048_v57 = vor.u32 %v10258_v14, %v10256_v12  ;;  %v7102_v24 = vshll.u32 %v19042_v38, 16  ;;  %v15892_v45 = vld [vmem:[#allocation2 + $0x268] ss:$0 sps:$4 sm:$0x11]  }
 0x4c3   : > { %7392 = vst.msk [vmem:[#allocation3 + $0x168] sm:$0xff] %vm7346_vm1, %v7245_v11  ;;  %v8236_v56 = vpop.permute.xlu0 %8235  ;;  %v13502_v20 = vadd.f32 %v13501_v50, %v13500_v40  ;;  %v10264_v5 = vrot.slane %v10262_v29, 1  ;;  %v11299_v3 = vrot.slane %v19050_v61, 1  ;;  %v11300_v37 = vrot.slane %v19057_v13, 1 }
 0x4c4   : > { %11429 = vrot.lane.b32.xlu1 %v11298_v55, %s16011_s19  ;;  %8384 = vst.msk [vmem:[#allocation3 + $0x160] sm:$0xff] %vm8339_vm2, %v8236_v56  ;;  %v10257_v18 = vsel %vm3341_vm9, %v10252_v2, %v10256_v12  ;;  %v7095_v58 = vshrl.u32 %v19036_v1, 16  ;;  %v7099_v40 = vrot.slane %v7097_v17, 1  ;;  %v7104_v50 = vrot.slane %v7102_v24, 1  ;;  %v15896_v56 = vld [vmem:[#allocation2 + $0x258] sm:$0xfe]  }
 0x4c5   : > { %v11618_v47 = vld [vmem:[#allocation3 + $0x150] sm:$0xff]  ;;  %7266 = vrot.lane.b32.xlu0 %v7085_v36, %s16007_s15  ;;  %v7110_v7 = vshll.u32 %v15895_v39, 16  ;;  %v15898_v12 = vld [vmem:[#allocation2 + $0x268] ss:$0 sps:$4 sm:$0x11]   ;;  %v10265_v29 = vsel %vm3341_vm9, %v19048_v57, %v10264_v5  ;;  %v11302_v1 = vrot.slane %v15892_v45, 1 }
 0x4c6   : > { %15068 = vmatprep.mubr.msk.bf16.mxu1 %vm11662_vm8, %v11618_v47  ;;  %v8238_v30 = vpop.permute.xlu1 %8237  ;;  %v15018_v51 = vpop.f32.mrb[32].mxu0  ;;  %v15897_v47 = vld [vmem:[#allocation2 + $0x260] sm:$0xff]   ;;  %v8135_v61 = vrot.slane %v15898_v12, 1  ;;  %v19106_v13 = vld [vmem:[#allocation2 + $0x27c] ss:$0 sps:$4 sm:$0x11]  }
 0x4c7   : > { %v11619_v42 = vld [vmem:[#allocation3 + $0x158] sm:$0xff]  ;;  %8385 = vst.msk [vmem:[#allocation3 + $0x168] sm:$0xff] %vm8339_vm2, %v8238_v30  ;;  %v12033_v43 = vadd.f32 %v18846_v60, %v15018_v51  ;;  %v12024_v44 = vpop.f32.mrb[33].mxu0  ;;  %v8942_v48 = vpop.permute.xlu0 %8941  ;;  %v19089_v30 = vld [vmem:[#allocation2 + $0x26c] sm:$0xff]   ;;  %v19091_v51 = vld [vmem:[#allocation2 + $0x274] sm:$0xff]   ;;  %v7112_v57 = vrot.slane %v7110_v7, 1 }
 0x4c8   : > { %15069 = vmatmul.mubr.msk.bf16.gmra.mrb[20].mxu1 %vm11662_vm8, %v11619_v42  ;;  %v12025_v49 = vadd.f32 %v18846_v60, %v12024_v44  ;;  %7268 = vrot.lane.b32.xlu1 %v7093_v35, %s16007_s15  ;;  %v15019_v53 = vpop.f32.mrb[34].mxu0  ;;  %9090 = vst.msk [vmem:[#allocation3 + $0x160] sm:$0xff] %vm9045_vm4, %v8942_v48  ;;  %v7100_v44 = vor.u32 %v7099_v40, %v7095_v58  ;;  %v19115_v24 = vld [vmem:[#allocation2 + $0x26c] sm:$0xff]   ;;  %v10278_v40 = vshrl.u32 %v19091_v51, 16 }
 0x4c9   : > { %v14820_v19 = vpack.c.bf16 %v12033_v43, %v12033_v43  ;;  %v12036_v63 = vadd.f32 %v18846_v60, %v15019_v53  ;;  %v12027_v0 = vpop.f32.mrb[35].mxu0  ;;  %8259 = vrot.lane.b32.xlu0 %v8129_v16, %s16008_s16  ;;  %v13346_v54 = vmul.f32 %v12033_v43, %v12033_v43  ;;  %v15899_v7 = vld [vmem:[#allocation2 + $0x26c] sm:$0xff]  }
 0x4ca   : > { %v14818_v6 = vpack.c.bf16 %v12025_v49, %v12025_v49  ;;  %v13112_v23 = vsel %vm13048_vm10, %v12025_v49, 0.0  ;;  %v13344_v27 = vmul.f32 %v12025_v49, %v12025_v49  ;;  %v12028_v10 = vadd.f32 %v18846_v60, %v12027_v0  ;;  %v8944_v41 = vpop.permute.xlu1 %8943 }
 0x4cb   : > { %12954 = vst.msk [vmem:[%s18490_s14 + $0x88] sm:$0xf] %vm12919_vm11, %v14820_v19  ;;  %v13113_v9 = vadd.f32 %v13112_v23, %v13111_v52  ;;  %v14821_v22 = vpack.c.bf16 %v12036_v63, %v12036_v63  ;;  %v10415_v32 = vpop.permute.xlu0 %10414  ;;  %v13116_v52 = vsel %vm13048_vm10, %v12033_v43, 0.0  ;;  %v13347_v11 = vmul.f32 %v12036_v63, %v12036_v63 }
 0x4cc   : > { %9091 = vst.msk [vmem:[#allocation3 + $0x168] sm:$0xff] %vm9045_vm4, %v8944_v41  ;;  %v13503_v33 = vsel %vm13048_vm10, %v13344_v27, 0.0  ;;  %v14819_v28 = vpack.c.bf16 %v12028_v10, %v12028_v10  ;;  %v13114_v25 = vsel %vm13048_vm10, %v12028_v10, 0.0  ;;  %8261 = vrot.lane.b32.xlu1 %v8131_v59, %s16008_s16  ;;  %v13345_v46 = vmul.f32 %v12028_v10, %v12028_v10 }
 0x4cd   : > { %12952 = vst.msk [vmem:[%s18490_s14 + $0x80] sm:$0xf] %vm12919_vm11, %v14818_v6  ;;  %v13504_v55 = vadd.f32 %v13503_v33, %v13502_v20  ;;  %12955 = vst.msk [vmem:[%s18490_s14 + $0x8c] sm:$0xf] %vm12919_vm11, %v14821_v22  ;;  %v13115_v34 = vadd.f32 %v13114_v25, %v13113_v9  ;;  %8965 = vrot.lane.b32.xlu0 %v15885_v8, %s16009_s17  ;;  %v13118_v26 = vsel %vm13048_vm10, %v12036_v63, 0.0  ;;  %v7106_v20 = vshrl.u32 %v19042_v38, 16 }
 0x4ce   : > { %10563 = vst.msk [vmem:[#allocation3 + $0x160] sm:$0xff] %vm10518_vm6, %v10415_v32  ;;  %v10417_v62 = vpop.permute.xlu1 %10416  ;;  %v13505_v21 = vsel %vm13048_vm10, %v13345_v46, 0.0  ;;  %v13507_v14 = vsel %vm13048_vm10, %v13346_v54, 0.0  ;;  %v11301_v43 = vsel %vm4815_vm12, %v11299_v3, %v11300_v37  ;;  %v13509_v48 = vsel %vm13048_vm10, %v13347_v11, 0.0 }
 0x4cf   : > { %12953 = vst.msk [vmem:[%s18490_s14 + $0x84] sm:$0xf] %vm12919_vm11, %v14819_v28  ;;  %v13117_v36 = vadd.f32 %v13116_v52, %v13115_v34  ;;  %v11408_v4 = vpop.permute.xlu0 %11407  ;;  %v13506_v15 = vadd.f32 %v13505_v21, %v13504_v55  ;;  %v8132_v38 = vrot.slane %v15896_v56, 1  ;;  %v8133_v49 = vrot.slane %v15897_v47, 1 }
 0x4d0   : > { %10564 = vst.msk [vmem:[#allocation3 + $0x168] sm:$0xff] %vm10518_vm6, %v10417_v62  ;;  %8967 = vrot.lane.b32.xlu1 %v15886_v31, %s16009_s17  ;;  %v7108_v59 = vor.u32 %v7106_v20, %v7104_v50  ;;  %v11303_v19 = vsel %vm4815_vm12, %v11300_v37, %v11302_v1  ;;  %v10269_v63 = vshll.u32 %v19089_v30, 16  ;;  %v10274_v0 = vshll.u32 %v19091_v51, 16  ;;  %v15905_v1 = vld [vmem:[#allocation2 + $0x274] sm:$0xff]  }
 0x4d1   : > { %11556 = vst.msk [vmem:[#allocation3 + $0x160] sm:$0xff] %vm11511_vm7, %v11408_v4  ;;  %v13119_v35 = vadd.f32 %v13118_v26, %v13117_v36  ;;  %10438 = vrot.lane.b32.xlu0 %v10257_v18, %s16010_s18  ;;  %v13508_v42 = vadd.f32 %v13507_v14, %v13506_v15  ;;  %v7105_v17 = vsel %vm3341_vm9, %v7100_v44, %v7104_v50  ;;  %v10267_v18 = vshrl.u32 %v19089_v30, 16  ;;  %v19133_v50 = vld [vmem:[#allocation2 + $0x274] sm:$0xff]   ;;  %v15906_v44 = vld [vmem:[#allocation2 + $0x27c] ss:$0 sps:$4 sm:$0x11]  }
 0x4d2   : > { %v11410_v16 = vpop.permute.xlu1 %11409  ;;  %v8134_v41 = vsel %vm4815_vm12, %v8132_v38, %v8133_v49  ;;  %v7113_v32 = vsel %vm3341_vm9, %v7108_v59, %v7112_v57  ;;  %v8136_v31 = vsel %vm4815_vm12, %v8133_v49, %v8135_v61  ;;  %v10271_v3 = vrot.slane %v10269_v63, 1  ;;  %v15909_v59 = vld [vmem:[#allocation2 + $0x27c] ss:$0 sps:$4 sm:$0x11]  }
 0x4d3   : > { %11557 = vst.msk [vmem:[#allocation3 + $0x168] sm:$0xff] %vm11511_vm7, %v11410_v16  ;;  %v7247_v2 = vpop.permute.xlu0 %7246  ;;  %v13510_v53 = vadd.f32 %v13509_v48, %v13508_v42  ;;  %v10276_v39 = vrot.slane %v10274_v0, 1  ;;  %v10282_v11 = vshll.u32 %v19106_v13, 16  ;;  %v7117_v56 = vshll.u32 %v19115_v24, 16  ;;  %v15910_v13 = vld [vmem:[#allocation2 + $0x26c] sm:$0xfe]  }
 0x4d4   : > { %10440 = vrot.lane.b32.xlu1 %v10265_v29, %s16010_s18  ;;  %7393 = vst.msk [vmem:[#allocation3 + $0x170] sm:$0xff] %vm7346_vm1, %v7247_v2  ;;  %v15904_v29 = vld [vmem:[#allocation2 + $0x26c] sm:$0xfe]   ;;  %v7115_v48 = vshrl.u32 %v19115_v24, 16 }
 0x4d5   : > { %11431 = vrot.lane.b32.xlu0 %v11301_v43, %s16011_s19  ;;  %v15900_v43 = vld [vmem:[#allocation2 + $0x274] sm:$0xff]   ;;  %v7119_v49 = vrot.slane %v7117_v56, 1  ;;  %v10284_v63 = vrot.slane %v10282_v11, 1 }
 0x4d6   : > { %v7249_v8 = vpop.permute.xlu1 %7248  ;;  %v15022_v5 = vpop.f32.mrb[36].mxu0 }
 0x4d7   : > { %7394 = vst.msk [vmem:[#allocation3 + $0x178] sm:$0xff] %vm7346_vm1, %v7249_v8  ;;  %v12049_v6 = vadd.f32 %v18846_v60, %v15022_v5  ;;  %v12040_v23 = vpop.f32.mrb[37].mxu0  ;;  %v8240_v27 = vpop.permute.xlu0 %8239 }
 0x4d8   : > { %v11620_v10 = vld [vmem:[#allocation3 + $0x160] sm:$0xff]  ;;  %v12041_v9 = vadd.f32 %v18846_v60, %v12040_v23  ;;  %11433 = vrot.lane.b32.xlu1 %v11303_v19, %s16011_s19  ;;  %v15023_v22 = vpop.f32.mrb[38].mxu0  ;;  %8386 = vst.msk [vmem:[#allocation3 + $0x170] sm:$0xff] %vm8339_vm2, %v8240_v27  ;;  %v10280_v19 = vor.u32 %v10278_v40, %v10276_v39 }
 0x4d9   : > { %15072 = vmatprep.mubr.msk.bf16.mxu1 %vm11662_vm8, %v11620_v10  ;;  %v14824_v33 = vpack.c.bf16 %v12049_v6, %v12049_v6  ;;  %v12052_v28 = vadd.f32 %v18846_v60, %v15023_v22  ;;  %v12043_v25 = vpop.f32.mrb[39].mxu0  ;;  %7270 = vrot.lane.b32.xlu0 %v7105_v17, %s16007_s15  ;;  %v13350_v47 = vmul.f32 %v12049_v6, %v12049_v6  ;;  %v13124_v12 = vsel %vm13048_vm10, %v12049_v6, 0.0 }
 0x4da   : > { %v14822_v54 = vpack.c.bf16 %v12041_v9, %v12041_v9  ;;  %v13120_v55 = vsel %vm13048_vm10, %v12041_v9, 0.0  ;;  %v13348_v34 = vmul.f32 %v12041_v9, %v12041_v9  ;;  %v12044_v46 = vadd.f32 %v18846_v60, %v12043_v25  ;;  %v8242_v45 = vpop.permute.xlu1 %8241  ;;  %v11621_v52 = vld [vmem:[#allocation3 + $0x168] sm:$0xff] }
 0x4db   : > { %12958 = vst.msk [vmem:[%s18490_s14 + $0x98] sm:$0xf] %vm12919_vm11, %v14824_v33  ;;  %v13121_v62 = vadd.f32 %v13120_v55, %v13119_v35  ;;  %v14825_v37 = vpack.c.bf16 %v12052_v28, %v12052_v28  ;;  %15073 = vmatmul.mubr.msk.bf16.gmra.mrb[24].mxu1 %vm11662_vm8, %v11621_v52  ;;  %v8946_v58 = vpop.permute.xlu0 %8945  ;;  %v10272_v35 = vor.u32 %v10271_v3, %v10267_v18  ;;  %v13126_v2 = vsel %vm13048_vm10, %v12052_v28, 0.0  ;;  %v19155_v9 = vld [vmem:[#allocation2 + $0x274] sm:$0xff]   ;;  %v19161_v33 = vld [vmem:[#allocation2 + $0x280] sm:$0xff]  }
 0x4dc   : > { %8387 = vst.msk [vmem:[#allocation3 + $0x178] sm:$0xff] %vm8339_vm2, %v8242_v45  ;;  %v13511_v36 = vsel %vm13048_vm10, %v13348_v34, 0.0  ;;  %v14823_v21 = vpack.c.bf16 %v12044_v46, %v12044_v46  ;;  %v13122_v4 = vsel %vm13048_vm10, %v12044_v46, 0.0  ;;  %7272 = vrot.lane.b32.xlu1 %v7113_v32, %s16007_s15  ;;  %v13349_v20 = vmul.f32 %v12044_v46, %v12044_v46 }
 0x4dd   : > { %12956 = vst.msk [vmem:[%s18490_s14 + $0x90] sm:$0xf] %vm12919_vm11, %v14822_v54  ;;  %v13512_v26 = vadd.f32 %v13511_v36, %v13510_v53  ;;  %12959 = vst.msk [vmem:[%s18490_s14 + $0x9c] sm:$0xf] %vm12919_vm11, %v14825_v37  ;;  %v13123_v15 = vadd.f32 %v13122_v4, %v13121_v62  ;;  %8263 = vrot.lane.b32.xlu0 %v8134_v41, %s16008_s16  ;;  %v13351_v30 = vmul.f32 %v12052_v28, %v12052_v28  ;;  %v19163_v28 = vld [vmem:[#allocation2 + $0x288] sm:$0xff]  }
 0x4de   : > { %9092 = vst.msk [vmem:[#allocation3 + $0x170] sm:$0xff] %vm9045_vm4, %v8946_v58  ;;  %v8948_v14 = vpop.permute.xlu1 %8947  ;;  %v13513_v42 = vsel %vm13048_vm10, %v13349_v20, 0.0  ;;  %v7122_v53 = vshll.u32 %v19133_v50, 16  ;;  %v13515_v57 = vsel %vm13048_vm10, %v13350_v47, 0.0  ;;  %v10277_v5 = vsel %vm3341_vm9, %v10272_v35, %v10276_v39  ;;  %v19175_v37 = vld [vmem:[%s19838_s2] ss:$0 sm:$0xff] }
 0x4df   : > { %12957 = vst.msk [vmem:[%s18490_s14 + $0x94] sm:$0xf] %vm12919_vm11, %v14823_v21  ;;  %v13125_v51 = vadd.f32 %v13124_v12, %v13123_v15  ;;  %v10419_v16 = vpop.permute.xlu0 %10418  ;;  %v13514_v38 = vadd.f32 %v13513_v42, %v13512_v26  ;;  %v11304_v17 = vrot.slane %v15904_v29, 1  ;;  %v11305_v6 = vrot.slane %v15905_v1, 1 }
 0x4e0   : > { %9093 = vst.msk [vmem:[#allocation3 + $0x178] sm:$0xff] %vm9045_vm4, %v8948_v14  ;;  %8265 = vrot.lane.b32.xlu1 %v8136_v31, %s16008_s16  ;;  %v13517_v23 = vsel %vm13048_vm10, %v13351_v30, 0.0  ;;  %v11307_v10 = vrot.slane %v15906_v44, 1  ;;  %v7126_v41 = vshrl.u32 %v19133_v50, 16  ;;  %v7120_v32 = vor.u32 %v7119_v49, %v7115_v48 }
 0x4e1   : > { %10565 = vst.msk [vmem:[#allocation3 + $0x170] sm:$0xff] %vm10518_vm6, %v10419_v16  ;;  %v13127_v61 = vadd.f32 %v13126_v2, %v13125_v51  ;;  %8969 = vrot.lane.b32.xlu0 %v15899_v7, %s16009_s17  ;;  %v13516_v0 = vadd.f32 %v13515_v57, %v13514_v38  ;;  %v7124_v31 = vrot.slane %v7122_v53, 1  ;;  %v7130_v18 = vshll.u32 %v15909_v59, 16  ;;  %v19170_v62 = vld [vmem:[#allocation2 + $0x27c] ss:$0 sps:$4 sm:$0x11]  }
 0x4e2   : > { %v10421_v8 = vpop.permute.xlu1 %10420  ;;  %v10285_v24 = vsel %vm3341_vm9, %v10280_v19, %v10284_v63  ;;  %v11306_v39 = vsel %vm4815_vm12, %v11304_v17, %v11305_v6  ;;  %v11308_v46 = vsel %vm4815_vm12, %v11305_v6, %v11307_v10  ;;  %v8137_v45 = vrot.slane %v15910_v13, 1  ;;  %v15917_v48 = vld [vmem:[#allocation2 + $0x290] ss:$0 sps:$4 sm:$0x11]   ;;  %v19205_v59 = vld [vmem:[#allocation2 + $0x280] sm:$0xff]   ;;  %v19215_v10 = vld [vmem:[#allocation2 + $0x288] sm:$0xff]  }
 0x4e3   : > { %10566 = vst.msk [vmem:[#allocation3 + $0x178] sm:$0xff] %vm10518_vm6, %v10421_v8  ;;  %v11412_v27 = vpop.permute.xlu0 %11411  ;;  %v13518_v22 = vadd.f32 %v13517_v23, %v13516_v0  ;;  %v8138_v52 = vrot.slane %v19155_v9, 1  ;;  %v7128_v11 = vor.u32 %v7126_v41, %v7124_v31  ;;  %v7132_v36 = vrot.slane %v7130_v18, 1  ;;  %v15914_v9 = vld [vmem:[#allocation2 + $0x288] sm:$0xff]  }
 0x4e4   : > { %8971 = vrot.lane.b32.xlu1 %v15900_v43, %s16009_s17  ;;  %11558 = vst.msk [vmem:[#allocation3 + $0x170] sm:$0xff] %vm11511_vm7, %v11412_v27  ;;  %v10289_v56 = vshll.u32 %v19161_v33, 16  ;;  %v10294_v47 = vshll.u32 %v19163_v28, 16  ;;  %v8140_v51 = vrot.slane %v19170_v62, 1  ;;  %v10287_v63 = vshrl.u32 %v19161_v33, 16 }
 0x4e5   : > { %10442 = vrot.lane.b32.xlu0 %v10277_v5, %s16010_s18  ;;  %v8139_v30 = vsel %vm4815_vm12, %v8137_v45, %v8138_v52  ;;  %v7133_v44 = vsel %vm3341_vm9, %v7128_v11, %v7132_v36  ;;  %v10298_v27 = vshrl.u32 %v19163_v28, 16  ;;  %v15913_v28 = vld [vmem:[#allocation2 + $0x280] sm:$0xff]   ;;  %v7142_v62 = vshll.u32 %v19215_v10, 16 }
 0x4e6   : > { %v11414_v25 = vpop.permute.xlu1 %11413  ;;  %v15026_v3 = vpop.f32.mrb[40].mxu0  ;;  %v10291_v0 = vrot.slane %v10289_v56, 1  ;;  %v10296_v8 = vrot.slane %v10294_v47, 1  ;;  %v8141_v33 = vsel %vm4815_vm12, %v8138_v52, %v8140_v51  ;;  %v19242_v51 = vld [vmem:[#allocation2 + $0x294] sm:$0xff]  }
 0x4e7   : > { %11559 = vst.msk [vmem:[#allocation3 + $0x178] sm:$0xff] %vm11511_vm7, %v11414_v25  ;;  %v12065_v54 = vadd.f32 %v18846_v60, %v15026_v3  ;;  %v12056_v55 = vpop.f32.mrb[41].mxu0  ;;  %v7251_v34 = vpop.permute.xlu0 %7250  ;;  %v7125_v60 = vsel %vm3341_vm9, %v7120_v32, %v7124_v31  ;;  %v15918_v32 = vld [vmem:[#allocation2 + $0x280] sm:$0xfe]   ;;  %v15919_v31 = vld [vmem:[#allocation2 + $0x288] sm:$0xff]   ;;  %v7137_v3 = vshll.u32 %v19205_v59, 16 }
 0x4e8   : > { %v12057_v58 = vadd.f32 %v19175_v37, %v12056_v55  ;;  %10444 = vrot.lane.b32.xlu1 %v10285_v24, %s16010_s18  ;;  %v15027_v40 = vpop.f32.mrb[42].mxu0  ;;  %7395 = vst.msk [vmem:[#allocation3 + $0x180] sm:$0xff] %vm7346_vm1, %v7251_v34  ;;  %v15920_v25 = vld [vmem:[#allocation2 + $0x290] ss:$0 sps:$4 sm:$0x11]   ;;  %v10292_v55 = vor.u32 %v10291_v0, %v10287_v63  ;;  %v10300_v45 = vor.u32 %v10298_v27, %v10296_v8  ;;  %v11310_v11 = vrot.slane %v15919_v31, 1 }
 0x4e9   : > { %v14828_v21 = vpack.c.bf16 %v12065_v54, %v12065_v54  ;;  %v12068_v4 = vadd.f32 %v19175_v37, %v15027_v40  ;;  %v12059_v50 = vpop.f32.mrb[43].mxu0  ;;  %11435 = vrot.lane.b32.xlu0 %v11306_v39, %s16011_s19  ;;  %v13354_v2 = vmul.f32 %v12065_v54, %v12065_v54  ;;  %v13132_v57 = vsel %vm13048_vm10, %v12065_v54, 0.0 }
 0x4ea   : > { %v14826_v26 = vpack.c.bf16 %v12057_v58, %v12057_v58  ;;  %v13128_v15 = vsel %vm13048_vm10, %v12057_v58, 0.0  ;;  %v13352_v20 = vmul.f32 %v12057_v58, %v12057_v58  ;;  %v12060_v7 = vadd.f32 %v19175_v37, %v12059_v50  ;;  %v7253_v12 = vpop.permute.xlu1 %7252  ;;  %v15923_v58 = vld [vmem:[#allocation2 + $0x290] ss:$0 sps:$4 sm:$0x11]  }
 0x4eb   : > { %12962 = vst.msk [vmem:[%s18490_s14 + $0xa8] sm:$0xf] %vm12919_vm11, %v14828_v21  ;;  %v13129_v14 = vadd.f32 %v13128_v15, %v13127_v61  ;;  %v14829_v35 = vpack.c.bf16 %v12068_v4, %v12068_v4  ;;  %v8244_v29 = vpop.permute.xlu0 %8243  ;;  %v11622_v1 = vld [vmem:[#allocation3 + $0x170] sm:$0xff]  ;;  %v13355_v5 = vmul.f32 %v12068_v4, %v12068_v4  ;;  %v13134_v41 = vsel %vm13048_vm10, %v12068_v4, 0.0 }
 0x4ec   : > { %7396 = vst.msk [vmem:[#allocation3 + $0x188] sm:$0xff] %vm7346_vm1, %v7253_v12  ;;  %v13519_v42 = vsel %vm13048_vm10, %v13352_v20, 0.0  ;;  %v14827_v16 = vpack.c.bf16 %v12060_v7, %v12060_v7  ;;  %v13130_v43 = vsel %vm13048_vm10, %v12060_v7, 0.0  ;;  %11437 = vrot.lane.b32.xlu1 %v11308_v46, %s16011_s19  ;;  %15076 = vmatprep.mubr.msk.bf16.mxu1 %vm11662_vm8, %v11622_v1  ;;  %v13353_v53 = vmul.f32 %v12060_v7, %v12060_v7 }
 0x4ed   : > { %12960 = vst.msk [vmem:[%s18490_s14 + $0xa0] sm:$0xf] %vm12919_vm11, %v14826_v26  ;;  %v13520_v38 = vadd.f32 %v13519_v42, %v13518_v22  ;;  %12963 = vst.msk [vmem:[%s18490_s14 + $0xac] sm:$0xf] %vm12919_vm11, %v14829_v35  ;;  %v13131_v49 = vadd.f32 %v13130_v43, %v13129_v14  ;;  %7274 = vrot.lane.b32.xlu0 %v7125_v60, %s16007_s15  ;;  %v10302_v22 = vshll.u32 %v15917_v48, 16  ;;  %v13523_v18 = vsel %vm13048_vm10, %v13354_v2, 0.0 }
 0x4ee   : > { %8388 = vst.msk [vmem:[#allocation3 + $0x180] sm:$0xff] %vm8339_vm2, %v8244_v29  ;;  %v8246_v61 = vpop.permute.xlu1 %8245  ;;  %v11623_v19 = vld [vmem:[#allocation3 + $0x178] sm:$0xff]  ;;  %v13521_v6 = vsel %vm13048_vm10, %v13353_v53, 0.0  ;;  %v13525_v34 = vsel %vm13048_vm10, %v13355_v5, 0.0  ;;  %v11309_v60 = vrot.slane %v15918_v32, 1  ;;  %v11312_v36 = vrot.slane %v15920_v25, 1 }
 0x4ef   : > { %12961 = vst.msk [vmem:[%s18490_s14 + $0xa4] sm:$0xf] %vm12919_vm11, %v14827_v16  ;;  %v13133_v17 = vadd.f32 %v13132_v57, %v13131_v49  ;;  %15077 = vmatmul.mubr.msk.bf16.gmra.mrb[28].mxu1 %vm11662_vm8, %v11623_v19  ;;  %v8950_v23 = vpop.permute.xlu0 %8949  ;;  %v13522_v13 = vadd.f32 %v13521_v6, %v13520_v38  ;;  %v10304_v52 = vrot.slane %v10302_v22, 1  ;;  %v7135_v21 = vshrl.u32 %v19205_v59, 16  ;;  %v15924_v57 = vld [vmem:[#allocation2 + $0x280] sm:$0xfe]  }
 0x4f0   : > { %8389 = vst.msk [vmem:[#allocation3 + $0x188] sm:$0xff] %vm8339_vm2, %v8246_v61  ;;  %7276 = vrot.lane.b32.xlu1 %v7133_v44, %s16007_s15  ;;  %v7139_v4 = vrot.slane %v7137_v3, 1  ;;  %v10297_v47 = vsel %vm3341_vm9, %v10292_v55, %v10296_v8  ;;  %v7144_v7 = vrot.slane %v7142_v62, 1  ;;  %v7146_v12 = vshrl.u32 %v19215_v10, 16  ;;  %v19249_v61 = vld [vmem:[#allocation2 + $0x288] sm:$0xff]   ;;  %v19260_v10 = vld [vmem:[#allocation2 + $0x29c] sm:$0xff]  }
 0x4f1   : > { %9094 = vst.msk [vmem:[#allocation3 + $0x180] sm:$0xff] %vm9045_vm4, %v8950_v23  ;;  %v13135_v24 = vadd.f32 %v13134_v41, %v13133_v17  ;;  %8267 = vrot.lane.b32.xlu0 %v8139_v30, %s16008_s16  ;;  %v13524_v39 = vadd.f32 %v13523_v18, %v13522_v13  ;;  %v7150_v14 = vshll.u32 %v15923_v58, 16  ;;  %v10305_v1 = vsel %vm3341_vm9, %v10300_v45, %v10304_v52  ;;  %v15926_v17 = vld [vmem:[#allocation2 + $0x290] ss:$0 sps:$4 sm:$0x11]  }
 0x4f2   : > { %v8952_v54 = vpop.permute.xlu1 %8951  ;;  %v11311_v30 = vsel %vm4815_vm12, %v11309_v60, %v11310_v11  ;;  %v11313_v44 = vsel %vm4815_vm12, %v11310_v11, %v11312_v36  ;;  %v7140_v48 = vor.u32 %v7139_v4, %v7135_v21  ;;  %v7148_v8 = vor.u32 %v7146_v12, %v7144_v7 }
 0x4f3   : > { %9095 = vst.msk [vmem:[#allocation3 + $0x188] sm:$0xff] %vm9045_vm4, %v8952_v54  ;;  %v10423_v46 = vpop.permute.xlu0 %10422  ;;  %v13526_v40 = vadd.f32 %v13525_v34, %v13524_v39  ;;  %v7152_v5 = vrot.slane %v7150_v14, 1  ;;  %v10309_v41 = vshll.u32 %v19242_v51, 16  ;;  %v8143_v25 = vrot.slane %v19249_v61, 1  ;;  %v15932_v14 = vld [vmem:[#allocation2 + $0x294] sm:$0xfe]  }
 0x4f4   : > { %8269 = vrot.lane.b32.xlu1 %v8141_v33, %s16008_s16  ;;  %10567 = vst.msk [vmem:[#allocation3 + $0x180] sm:$0xff] %vm10518_vm6, %v10423_v46  ;;  %v7145_v33 = vsel %vm3341_vm9, %v7140_v48, %v7144_v7  ;;  %v8145_v46 = vrot.slane %v15926_v17, 1  ;;  %v10307_v11 = vshrl.u32 %v19242_v51, 16  ;;  %v10318_v7 = vshrl.u32 %v19260_v10, 16 }
 0x4f5   : > { %8973 = vrot.lane.b32.xlu0 %v15913_v28, %s16009_s17  ;;  %v8142_v28 = vrot.slane %v15924_v57, 1  ;;  %v7153_v58 = vsel %vm3341_vm9, %v7148_v8, %v7152_v5  ;;  %v10311_v36 = vrot.slane %v10309_v41, 1  ;;  %v15934_v48 = vld [vmem:[#allocation2 + $0x2a4] ss:$0 sps:$4 sm:$0x11]   ;;  %v11314_v57 = vrot.slane %v15932_v14, 1 }
 0x4f6   : > { %v10425_v50 = vpop.permute.xlu1 %10424  ;;  %v15030_v56 = vpop.f32.mrb[44].mxu0 }
 0x4f7   : > { %10568 = vst.msk [vmem:[#allocation3 + $0x188] sm:$0xff] %vm10518_vm6, %v10425_v50  ;;  %v12081_v26 = vadd.f32 %v19175_v37, %v15030_v56  ;;  %v12072_v15 = vpop.f32.mrb[45].mxu0  ;;  %v11416_v20 = vpop.permute.xlu0 %11415  ;;  %v8144_v56 = vsel %vm4815_vm12, %v8142_v28, %v8143_v25 }
 0x4f8   : > { %v12073_v35 = vadd.f32 %v19175_v37, %v12072_v15  ;;  %8975 = vrot.lane.b32.xlu1 %v15914_v9, %s16009_s17  ;;  %v15031_v29 = vpop.f32.mrb[46].mxu0  ;;  %11560 = vst.msk [vmem:[#allocation3 + $0x180] sm:$0xff] %vm11511_vm7, %v11416_v20  ;;  %v15931_v9 = vld [vmem:[#allocation2 + $0x2a4] ss:$0 sps:$4 sm:$0x11]  }
 0x4f9   : > { %v14832_v42 = vpack.c.bf16 %v12081_v26, %v12081_v26  ;;  %v12084_v16 = vadd.f32 %v19175_v37, %v15031_v29  ;;  %v12075_v43 = vpop.f32.mrb[47].mxu0  ;;  %10446 = vrot.lane.b32.xlu0 %v10297_v47, %s16010_s18  ;;  %v13358_v13 = vmul.f32 %v12081_v26, %v12081_v26  ;;  %v13140_v18 = vsel %vm13048_vm10, %v12081_v26, 0.0  ;;  %v15927_v29 = vld [vmem:[#allocation2 + $0x294] sm:$0xff]  }
 0x4fa   : > { %v14830_v2 = vpack.c.bf16 %v12073_v35, %v12073_v35  ;;  %v13136_v38 = vsel %vm13048_vm10, %v12073_v35, 0.0  ;;  %v13356_v49 = vmul.f32 %v12073_v35, %v12073_v35  ;;  %v12076_v53 = vadd.f32 %v19175_v37, %v12075_v43  ;;  %v11418_v59 = vpop.permute.xlu1 %11417 }
 0x4fb   : > { %12966 = vst.msk [vmem:[%s18490_s14 + $0xb8] sm:$0xf] %vm12919_vm11, %v14832_v42  ;;  %v13137_v19 = vadd.f32 %v13136_v38, %v13135_v24  ;;  %v14833_v63 = vpack.c.bf16 %v12084_v16, %v12084_v16  ;;  %v7255_v0 = vpop.permute.xlu0 %7254  ;;  %v13359_v3 = vmul.f32 %v12084_v16, %v12084_v16  ;;  %v13142_v45 = vsel %vm13048_vm10, %v12084_v16, 0.0 }
 0x4fc   : > { %11561 = vst.msk [vmem:[#allocation3 + $0x188] sm:$0xff] %vm11511_vm7, %v11418_v59  ;;  %v13527_v6 = vsel %vm13048_vm10, %v13356_v49, 0.0  ;;  %v14831_v23 = vpack.c.bf16 %v12076_v53, %v12076_v53  ;;  %v13138_v27 = vsel %vm13048_vm10, %v12076_v53, 0.0  ;;  %10448 = vrot.lane.b32.xlu1 %v10305_v1, %s16010_s18  ;;  %v13357_v31 = vmul.f32 %v12076_v53, %v12076_v53  ;;  %v15928_v49 = vld [vmem:[#allocation2 + $0x29c] sm:$0xff]  }
 0x4fd   : > { %12964 = vst.msk [vmem:[%s18490_s14 + $0xb0] sm:$0xf] %vm12919_vm11, %v14830_v2  ;;  %v13528_v22 = vadd.f32 %v13527_v6, %v13526_v40  ;;  %12967 = vst.msk [vmem:[%s18490_s14 + $0xbc] sm:$0xf] %vm12919_vm11, %v14833_v63  ;;  %v13139_v32 = vadd.f32 %v13138_v27, %v13137_v19  ;;  %11439 = vrot.lane.b32.xlu0 %v11311_v30, %s16011_s19  ;;  %v10314_v40 = vshll.u32 %v19260_v10, 16  ;;  %v13531_v52 = vsel %vm13048_vm10, %v13358_v13, 0.0 }
 0x4fe   : > { %7397 = vst.msk [vmem:[#allocation3 + $0x190] sm:$0xff] %vm7346_vm1, %v7255_v0  ;;  %v7257_v24 = vpop.permute.xlu1 %7256  ;;  %v13529_v54 = vsel %vm13048_vm10, %v13357_v31, 0.0  ;;  %v13533_v47 = vsel %vm13048_vm10, %v13359_v3, 0.0  ;;  %v10322_v12 = vshll.u32 %v15931_v9, 16  ;;  %v8146_v35 = vsel %vm4815_vm12, %v8143_v25, %v8145_v46  ;;  %v19291_v30 = vld [vmem:[#allocation2 + $0x29c] sm:$0xff]  }
 0x4ff   : > { %12965 = vst.msk [vmem:[%s18490_s14 + $0xb4] sm:$0xf] %vm12919_vm11, %v14831_v23  ;;  %v13141_v39 = vadd.f32 %v13140_v18, %v13139_v32  ;;  %v8248_v55 = vpop.permute.xlu0 %8247  ;;  %v11624_v34 = vld [vmem:[#allocation3 + $0x180] sm:$0xff]  ;;  %v13530_v62 = vadd.f32 %v13529_v54, %v13528_v22  ;;  %v10316_v20 = vrot.slane %v10314_v40, 1  ;;  %v10312_v1 = vor.u32 %v10311_v36, %v10307_v11 }
 0x500   : > { %7398 = vst.msk [vmem:[#allocation3 + $0x198] sm:$0xff] %vm7346_vm1, %v7257_v24  ;;  %11441 = vrot.lane.b32.xlu1 %v11313_v44, %s16011_s19  ;;  %15080 = vmatprep.mubr.msk.bf16.mxu1 %vm11662_vm8, %v11624_v34  ;;  %v10324_v59 = vrot.slane %v10322_v12, 1  ;;  %v11315_v8 = vrot.slane %v19291_v30, 1  ;;  %v11317_v22 = vrot.slane %v15934_v48, 1 }
 0x501   : > { %8390 = vst.msk [vmem:[#allocation3 + $0x190] sm:$0xff] %vm8339_vm2, %v8248_v55  ;;  %v13143_v60 = vadd.f32 %v13142_v45, %v13141_v39  ;;  %7278 = vrot.lane.b32.xlu0 %v7145_v33, %s16007_s15  ;;  %v13532_v21 = vadd.f32 %v13531_v52, %v13530_v62  ;;  %v10320_v53 = vor.u32 %v10318_v7, %v10316_v20 }
 0x502   : > { %v8250_v4 = vpop.permute.xlu1 %8249  ;;  %v10317_v0 = vsel %vm3341_vm9, %v10312_v1, %v10316_v20  ;;  %v11316_v55 = vsel %vm4815_vm12, %v11314_v57, %v11315_v8 }
 0x503   : > { %v11625_v50 = vld [vmem:[#allocation3 + $0x188] sm:$0xff]  ;;  %8391 = vst.msk [vmem:[#allocation3 + $0x198] sm:$0xff] %vm8339_vm2, %v8250_v4  ;;  %v8954_v26 = vpop.permute.xlu0 %8953  ;;  %v13534_v15 = vadd.f32 %v13533_v47, %v13532_v21  ;;  %v10325_v24 = vsel %vm3341_vm9, %v10320_v53, %v10324_v59 }
 0x504   : > { %15081 = vmatmul.mubr.msk.bf16.gmra.mrb[32].mxu1 %vm11662_vm8, %v11625_v50  ;;  %7280 = vrot.lane.b32.xlu1 %v7153_v58, %s16007_s15  ;;  %9096 = vst.msk [vmem:[#allocation3 + $0x190] sm:$0xff] %vm9045_vm4, %v8954_v26 }
 0x505   : > { %8271 = vrot.lane.b32.xlu0 %v8144_v56, %s16008_s16 }
 0x506   : > { %v8956_v51 = vpop.permute.xlu1 %8955  ;;  %v15034_v42 = vpop.f32.mrb[48].mxu0 }
 0x507   : > { %9097 = vst.msk [vmem:[#allocation3 + $0x198] sm:$0xff] %vm9045_vm4, %v8956_v51  ;;  %v12097_v16 = vadd.f32 %v19175_v37, %v15034_v42  ;;  %v12088_v43 = vpop.f32.mrb[49].mxu0  ;;  %v10427_v44 = vpop.permute.xlu0 %10426 }
 0x508   : > { %v12089_v2 = vadd.f32 %v19175_v37, %v12088_v43  ;;  %8273 = vrot.lane.b32.xlu1 %v8146_v35, %s16008_s16  ;;  %v15035_v38 = vpop.f32.mrb[50].mxu0  ;;  %10569 = vst.msk [vmem:[#allocation3 + $0x190] sm:$0xff] %vm10518_vm6, %v10427_v44 }
 0x509   : > { %v14836_v61 = vpack.c.bf16 %v12097_v16, %v12097_v16  ;;  %v12100_v19 = vadd.f32 %v19175_v37, %v15035_v38  ;;  %v12091_v63 = vpop.f32.mrb[51].mxu0  ;;  %8977 = vrot.lane.b32.xlu0 %v15927_v29, %s16009_s17  ;;  %v13362_v33 = vmul.f32 %v12097_v16, %v12097_v16  ;;  %v13148_v39 = vsel %vm13048_vm10, %v12097_v16, 0.0 }
 0x50a   : > { %v14834_v5 = vpack.c.bf16 %v12089_v2, %v12089_v2  ;;  %v13144_v17 = vsel %vm13048_vm10, %v12089_v2, 0.0  ;;  %v13360_v6 = vmul.f32 %v12089_v2, %v12089_v2  ;;  %v12092_v23 = vadd.f32 %v19175_v37, %v12091_v63  ;;  %v10429_v27 = vpop.permute.xlu1 %10428 }
 0x50b   : > { %12970 = vst.msk [vmem:[%s18490_s14 + $0xc8] sm:$0xf] %vm12919_vm11, %v14836_v61  ;;  %v13145_v10 = vadd.f32 %v13144_v17, %v13143_v60  ;;  %v14837_v41 = vpack.c.bf16 %v12100_v19, %v12100_v19  ;;  %v11420_v13 = vpop.permute.xlu0 %11419  ;;  %v13363_v34 = vmul.f32 %v12100_v19, %v12100_v19  ;;  %v13150_v58 = vsel %vm13048_vm10, %v12100_v19, 0.0 }
 0x50c   : > { %10570 = vst.msk [vmem:[#allocation3 + $0x198] sm:$0xff] %vm10518_vm6, %v10429_v27  ;;  %v13535_v32 = vsel %vm13048_vm10, %v13360_v6, 0.0  ;;  %v14835_v31 = vpack.c.bf16 %v12092_v23, %v12092_v23  ;;  %v13146_v18 = vsel %vm13048_vm10, %v12092_v23, 0.0  ;;  %8979 = vrot.lane.b32.xlu1 %v15928_v49, %s16009_s17  ;;  %v13361_v3 = vmul.f32 %v12092_v23, %v12092_v23 }
 0x50d   : > { %12968 = vst.msk [vmem:[%s18490_s14 + $0xc0] sm:$0xf] %vm12919_vm11, %v14834_v5  ;;  %v13536_v28 = vadd.f32 %v13535_v32, %v13534_v15  ;;  %12971 = vst.msk [vmem:[%s18490_s14 + $0xcc] sm:$0xf] %vm12919_vm11, %v14837_v41  ;;  %v13147_v25 = vadd.f32 %v13146_v18, %v13145_v10  ;;  %10450 = vrot.lane.b32.xlu0 %v10317_v0, %s16010_s18  ;;  %v13539_v9 = vsel %vm13048_vm10, %v13362_v33, 0.0  ;;  %v13541_v21 = vsel %vm13048_vm10, %v13363_v34, 0.0 }
 0x50e   : > { %11562 = vst.msk [vmem:[#allocation3 + $0x190] sm:$0xff] %vm11511_vm7, %v11420_v13  ;;  %v11422_v54 = vpop.permute.xlu1 %11421  ;;  %v13537_v45 = vsel %vm13048_vm10, %v13361_v3, 0.0  ;;  %v11318_v60 = vsel %vm4815_vm12, %v11315_v8, %v11317_v22 }
 0x50f   : > { %12969 = vst.msk [vmem:[%s18490_s14 + $0xc4] sm:$0xf] %vm12919_vm11, %v14835_v31  ;;  %v13149_v46 = vadd.f32 %v13148_v39, %v13147_v25  ;;  %v7259_v62 = vpop.permute.xlu0 %7258  ;;  %v13538_v40 = vadd.f32 %v13537_v45, %v13536_v28 }
 0x510   : > { %11563 = vst.msk [vmem:[#allocation3 + $0x198] sm:$0xff] %vm11511_vm7, %v11422_v54  ;;  %10452 = vrot.lane.b32.xlu1 %v10325_v24, %s16010_s18 }
 0x511   : > { %7399 = vst.msk [vmem:[#allocation3 + $0x1a0] sm:$0xff] %vm7346_vm1, %v7259_v62  ;;  %v13151_v52 = vadd.f32 %v13150_v58, %v13149_v46  ;;  %11443 = vrot.lane.b32.xlu0 %v11316_v55, %s16011_s19  ;;  %v13540_v11 = vadd.f32 %v13539_v9, %v13538_v40 }
 0x512   : > { %v7261_v36 = vpop.permute.xlu1 %7260 }
 0x513   : > { %7400 = vst.msk [vmem:[#allocation3 + $0x1a8] sm:$0xff] %vm7346_vm1, %v7261_v36  ;;  %v8252_v4 = vpop.permute.xlu0 %8251  ;;  %v13542_v56 = vadd.f32 %v13541_v21, %v13540_v11 }
 0x514   : > { %11445 = vrot.lane.b32.xlu1 %v11318_v60, %s16011_s19  ;;  %8392 = vst.msk [vmem:[#allocation3 + $0x1a0] sm:$0xff] %vm8339_vm2, %v8252_v4  ;;  %s250_s19 = sand.u32 1, %s15993_s22  }
 0x515   : > { %v11626_v50 = vld [vmem:[#allocation3 + $0x190] sm:$0xff]  ;;  %s13813_s7 = sshll.u32 %s250_s19, 1 }
 0x516   : > { %15084 = vmatprep.mubr.msk.bf16.mxu1 %vm11662_vm8, %v11626_v50  ;;  %v8254_v47 = vpop.permute.xlu1 %8253  ;;  %v15038_v26 = vpop.f32.mrb[52].mxu0  ;;  %s252_s9 = scalar_lea.vmem [#allocation4], %s13813_s7 }
 0x517   : > { %v11627_v15 = vld [vmem:[#allocation3 + $0x198] sm:$0xff]  ;;  %8393 = vst.msk [vmem:[#allocation3 + $0x1a8] sm:$0xff] %vm8339_vm2, %v8254_v47  ;;  %v12113_v20 = vadd.f32 %v19175_v37, %v15038_v26  ;;  %v12104_v7 = vpop.f32.mrb[53].mxu0  ;;  %v8958_v12 = vpop.permute.xlu0 %8957  ;;  %s13725_s10 = sshll.u32 %s252_s9, 4  ;;  %s19796_s10 = int_to_ptr.vmem [resolvable:$true] %s13725_s10 }
 0x518   : > { %15085 = vmatmul.mubr.msk.bf16.gmra.mrb[36].mxu1 %vm11662_vm8, %v11627_v15  ;;  %v12105_v14 = vadd.f32 %v19175_v37, %v12104_v7  ;;  %v15039_v35 = vpop.f32.mrb[54].mxu0  ;;  %9098 = vst.msk [vmem:[#allocation3 + $0x1a0] sm:$0xff] %vm9045_vm4, %v8958_v12  ;;  %s15939_s20 = scalar_lea.vmem %s19796_s10, 32  ;;  %p15946_p1 = scmp.lt.s32.totalorder %s19796_s10, %s15944_s4 }
 0x519   : > { %v14840_v29 = vpack.c.bf16 %v12113_v20, %v12113_v20  ;;  %v12116_v1 = vadd.f32 %v19175_v37, %v15039_v35  ;;  %v12107_v30 = vpop.f32.mrb[55].mxu0  ;;  %v13366_v57 = vmul.f32 %v12113_v20, %v12113_v20  ;;  %v13156_v0 = vsel %vm13048_vm10, %v12113_v20, 0.0  ;;  %p15940_p12 = scmp.ne.s32.totalorder %s19796_s10, %s15939_s20  ;;  %p15947_p2 = scmp.lt.s32.totalorder %s15945_s26, %s15939_s20 }
 0x51a   : > { %v14838_v51 = vpack.c.bf16 %v12105_v14, %v12105_v14  ;;  %v13152_v42 = vsel %vm13048_vm10, %v12105_v14, 0.0  ;;  %v13364_v16 = vmul.f32 %v12105_v14, %v12105_v14  ;;  %v12108_v43 = vadd.f32 %v19175_v37, %v12107_v30  ;;  %v8960_v44 = vpop.permute.xlu1 %8959 }
 0x51b   : > { %12974 = vst.msk [vmem:[%s18490_s14 + $0xd8] sm:$0xf] %vm12919_vm11, %v14840_v29  ;;  %v13153_v48 = vadd.f32 %v13152_v42, %v13151_v52  ;;  %v14841_v2 = vpack.c.bf16 %v12116_v1, %v12116_v1  ;;  %v10431_v38 = vpop.permute.xlu0 %10430  ;;  %v13367_v5 = vmul.f32 %v12116_v1, %v12116_v1  ;;  %v13158_v27 = vsel %vm13048_vm10, %v12116_v1, 0.0  ;;  %p15941_p13 = pnand %p15940_p12, %p16087_p5  ;;  %p15948_p3 = por %p15947_p2, %p15946_p1 }
 0x51c   : > { %9099 = vst.msk [vmem:[#allocation3 + $0x1a8] sm:$0xff] %vm9045_vm4, %v8960_v44  ;;  %v13543_v49 = vsel %vm13048_vm10, %v13364_v16, 0.0  ;;  %v14839_v53 = vpack.c.bf16 %v12108_v43, %v12108_v43  ;;  %v13154_v59 = vsel %vm13048_vm10, %v12108_v43, 0.0  ;;  %v13365_v63 = vmul.f32 %v12108_v43, %v12108_v43 }
 0x51d   : > { %12972 = vst.msk [vmem:[%s18490_s14 + $0xd0] sm:$0xf] %vm12919_vm11, %v14838_v51  ;;  %v13544_v61 = vadd.f32 %v13543_v49, %v13542_v56  ;;  %12975 = vst.msk [vmem:[%s18490_s14 + $0xdc] sm:$0xf] %vm12919_vm11, %v14841_v2  ;;  %v13155_v19 = vadd.f32 %v13154_v59, %v13153_v48  ;;  %v13547_v41 = vsel %vm13048_vm10, %v13366_v57, 0.0  ;;  %v13549_v31 = vsel %vm13048_vm10, %v13367_v5, 0.0  ;;  %p15942_p0 = pneg %p15941_p13 }
 0x51e   : > { %10571 = vst.msk [vmem:[#allocation3 + $0x1a0] sm:$0xff] %vm10518_vm6, %v10431_v38  ;;  %v10433_v8 = vpop.permute.xlu1 %10432  ;;  %v13545_v6 = vsel %vm13048_vm10, %v13365_v63, 0.0 }
 0x51f   : > { %12973 = vst.msk [vmem:[%s18490_s14 + $0xd4] sm:$0xf] %vm12919_vm11, %v14839_v53  ;;  %v13157_v17 = vadd.f32 %v13156_v0, %v13155_v19  ;;  %v11424_v23 = vpop.permute.xlu0 %11423  ;;  %v13546_v10 = vadd.f32 %v13545_v6, %v13544_v61  ;;  %p15949_p4 = pnand %p15948_p3, %p15942_p0 }
 0x520   : > { %10572 = vst.msk [vmem:[#allocation3 + $0x1a8] sm:$0xff] %vm10518_vm6, %v10433_v8 }
 0x521   : > { %11564 = vst.msk [vmem:[#allocation3 + $0x1a0] sm:$0xff] %vm11511_vm7, %v11424_v23  ;;  %v13159_v13 = vadd.f32 %v13158_v27, %v13157_v17  ;;  %v13548_v22 = vadd.f32 %v13547_v41, %v13546_v10 }
 0x522   : > { %v11426_v32 = vpop.permute.xlu1 %11425 }
 0x523   : > { %11565 = vst.msk [vmem:[#allocation3 + $0x1a8] sm:$0xff] %vm11511_vm7, %v11426_v32  ;;  %v7263_v18 = vpop.permute.xlu0 %7262  ;;  %v13550_v24 = vadd.f32 %v13549_v31, %v13548_v22 }
 0x524   : > { %7401 = vst.msk [vmem:[#allocation3 + $0x1b0] sm:$0xff] %vm7346_vm1, %v7263_v18 }
 0x526   : > { %v7265_v33 = vpop.permute.xlu1 %7264 }
 0x527   : > { %v15042_v28 = vpop.f32.mrb[56].mxu0  ;;  %7402 = vst.msk [vmem:[#allocation3 + $0x1b8] sm:$0xff] %vm7346_vm1, %v7265_v33  ;;  %v8256_v39 = vpop.permute.xlu0 %8255 }
 0x528   : > { %v12129_v25 = vadd.f32 %v19175_v37, %v15042_v28  ;;  %v12120_v3 = vpop.f32.mrb[57].mxu0  ;;  %v11628_v54 = vld [vmem:[#allocation3 + $0x1a0] sm:$0xff]  ;;  %8394 = vst.msk [vmem:[#allocation3 + $0x1b0] sm:$0xff] %vm8339_vm2, %v8256_v39 }
 0x529   : > { %v12121_v55 = vadd.f32 %v19175_v37, %v12120_v3  ;;  %v15043_v34 = vpop.f32.mrb[58].mxu0  ;;  %15088 = vmatprep.mubr.msk.bf16.mxu1 %vm11662_vm8, %v11628_v54 }
 0x52a   : > { %v14844_v46 = vpack.c.bf16 %v12129_v25, %v12129_v25  ;;  %v12132_v45 = vadd.f32 %v19175_v37, %v15043_v34  ;;  %v12123_v62 = vpop.f32.mrb[59].mxu0  ;;  %v8258_v60 = vpop.permute.xlu1 %8257  ;;  %v11629_v11 = vld [vmem:[#allocation3 + $0x1a8] sm:$0xff]  ;;  %v13370_v26 = vmul.f32 %v12129_v25, %v12129_v25  ;;  %v13164_v12 = vsel %vm13048_vm10, %v12129_v25, 0.0 }
 0x52b   : > { %v14842_v58 = vpack.c.bf16 %v12121_v55, %v12121_v55  ;;  %v13160_v40 = vsel %vm13048_vm10, %v12121_v55, 0.0  ;;  %v13368_v9 = vmul.f32 %v12121_v55, %v12121_v55  ;;  %v12124_v52 = vadd.f32 %v19175_v37, %v12123_v62  ;;  %8395 = vst.msk [vmem:[#allocation3 + $0x1b8] sm:$0xff] %vm8339_vm2, %v8258_v60  ;;  %15089 = vmatmul.mubr.msk.bf16.gmra.mrb[40].mxu1 %vm11662_vm8, %v11629_v11  ;;  %v8962_v4 = vpop.permute.xlu0 %8961 }
 0x52c   : > { %12978 = vst.msk [vmem:[%s18490_s14 + $0xe8] sm:$0xf] %vm12919_vm11, %v14844_v46  ;;  %v13161_v36 = vadd.f32 %v13160_v40, %v13159_v13  ;;  %v14845_v21 = vpack.c.bf16 %v12132_v45, %v12132_v45  ;;  %v13371_v35 = vmul.f32 %v12132_v45, %v12132_v45  ;;  %v13166_v51 = vsel %vm13048_vm10, %v12132_v45, 0.0 }
 0x52d   : > { %12976 = vst.msk [vmem:[%s18490_s14 + $0xe0] sm:$0xf] %vm12919_vm11, %v14842_v58  ;;  %v13551_v50 = vsel %vm13048_vm10, %v13368_v9, 0.0  ;;  %v14843_v56 = vpack.c.bf16 %v12124_v52, %v12124_v52  ;;  %v13162_v47 = vsel %vm13048_vm10, %v12124_v52, 0.0  ;;  %v13369_v7 = vmul.f32 %v12124_v52, %v12124_v52 }
 0x52e   : > { %9100 = vst.msk [vmem:[#allocation3 + $0x1b0] sm:$0xff] %vm9045_vm4, %v8962_v4  ;;  %v13552_v15 = vadd.f32 %v13551_v50, %v13550_v24  ;;  %v13163_v20 = vadd.f32 %v13162_v47, %v13161_v36  ;;  %v8964_v14 = vpop.permute.xlu1 %8963  ;;  %v13555_v16 = vsel %vm13048_vm10, %v13370_v26, 0.0  ;;  %v13557_v2 = vsel %vm13048_vm10, %v13371_v35, 0.0 }
 0x52f   : > { %12979 = vst.msk [vmem:[%s18490_s14 + $0xec] sm:$0xf] %vm12919_vm11, %v14845_v21  ;;  %12977 = vst.msk [vmem:[%s18490_s14 + $0xe4] sm:$0xf] %vm12919_vm11, %v14843_v56  ;;  %v13553_v1 = vsel %vm13048_vm10, %v13369_v7, 0.0  ;;  %v10435_v30 = vpop.permute.xlu0 %10434 }
 0x530   : > { %v13165_v29 = vadd.f32 %v13164_v12, %v13163_v20  ;;  %9101 = vst.msk [vmem:[#allocation3 + $0x1b8] sm:$0xff] %vm9045_vm4, %v8964_v14  ;;  %v13554_v42 = vadd.f32 %v13553_v1, %v13552_v15 }
 0x531   : > { %10573 = vst.msk [vmem:[#allocation3 + $0x1b0] sm:$0xff] %vm10518_vm6, %v10435_v30 }
 0x532   : > { %v13167_v43 = vadd.f32 %v13166_v51, %v13165_v29  ;;  %v13556_v44 = vadd.f32 %v13555_v16, %v13554_v42  ;;  %v10437_v48 = vpop.permute.xlu1 %10436 }
 0x533   : > { %10574 = vst.msk [vmem:[#allocation3 + $0x1b8] sm:$0xff] %vm10518_vm6, %v10437_v48  ;;  %v11428_v38 = vpop.permute.xlu0 %11427 }
 0x534   : > { %v13558_v49 = vadd.f32 %v13557_v2, %v13556_v44  ;;  %11566 = vst.msk [vmem:[#allocation3 + $0x1b0] sm:$0xff] %vm11511_vm7, %v11428_v38 }
 0x536   : > { %v11430_v53 = vpop.permute.xlu1 %11429 }
 0x537   : > { %v15046_v59 = vpop.f32.mrb[60].mxu0  ;;  %11567 = vst.msk [vmem:[#allocation3 + $0x1b8] sm:$0xff] %vm11511_vm7, %v11430_v53  ;;  %v7267_v19 = vpop.permute.xlu0 %7266 }
 0x538   : > { %v12145_v57 = vadd.f32 %v19175_v37, %v15046_v59  ;;  %v12136_v61 = vpop.f32.mrb[61].mxu0  ;;  %7403 = vst.msk [vmem:[#allocation3 + $0x1c0] sm:$0xff] %vm7346_vm1, %v7267_v19 }
 0x539   : > { %v12137_v63 = vadd.f32 %v19175_v37, %v12136_v61  ;;  %v15047_v0 = vpop.f32.mrb[62].mxu0 }
 0x53a   : > { %v14848_v8 = vpack.c.bf16 %v12145_v57, %v12145_v57  ;;  %v12148_v5 = vadd.f32 %v19175_v37, %v15047_v0  ;;  %v12139_v17 = vpop.f32.mrb[63].mxu0  ;;  %v7269_v41 = vpop.permute.xlu1 %7268  ;;  %v13374_v28 = vmul.f32 %v12145_v57, %v12145_v57  ;;  %v13172_v54 = vsel %vm13048_vm10, %v12145_v57, 0.0 }
 0x53b   : > { %v14846_v6 = vpack.c.bf16 %v12137_v63, %v12137_v63  ;;  %v13168_v23 = vsel %vm13048_vm10, %v12137_v63, 0.0  ;;  %v13372_v27 = vmul.f32 %v12137_v63, %v12137_v63  ;;  %v12140_v10 = vadd.f32 %v19175_v37, %v12139_v17  ;;  %7404 = vst.msk [vmem:[#allocation3 + $0x1c8] sm:$0xff] %vm7346_vm1, %v7269_v41  ;;  %v8260_v32 = vpop.permute.xlu0 %8259  ;;  %v11630_v31 = vld [vmem:[#allocation3 + $0x1b0] sm:$0xff] }
 0x53c   : > { %12982 = vst.msk [vmem:[%s18490_s14 + $0xf8] sm:$0xf] %vm12919_vm11, %v14848_v8  ;;  %v13169_v13 = vadd.f32 %v13168_v23, %v13167_v43  ;;  %v14849_v22 = vpack.c.bf16 %v12148_v5, %v12148_v5  ;;  %15092 = vmatprep.mubr.msk.bf16.mxu1 %vm11662_vm8, %v11630_v31  ;;  %v13375_v46 = vmul.f32 %v12148_v5, %v12148_v5  ;;  %v13174_v40 = vsel %vm13048_vm10, %v12148_v5, 0.0 }
 0x53d   : > { %12980 = vst.msk [vmem:[%s18490_s14 + $0xf0] sm:$0xf] %vm12919_vm11, %v14846_v6  ;;  %v13559_v18 = vsel %vm13048_vm10, %v13372_v27, 0.0  ;;  %v14847_v24 = vpack.c.bf16 %v12140_v10, %v12140_v10  ;;  %v13170_v33 = vsel %vm13048_vm10, %v12140_v10, 0.0  ;;  %v13373_v39 = vmul.f32 %v12140_v10, %v12140_v10 }
 0x53e   : > { %8396 = vst.msk [vmem:[#allocation3 + $0x1c0] sm:$0xff] %vm8339_vm2, %v8260_v32  ;;  %v13560_v25 = vadd.f32 %v13559_v18, %v13558_v49  ;;  %v13171_v3 = vadd.f32 %v13170_v33, %v13169_v13  ;;  %v8262_v55 = vpop.permute.xlu1 %8261  ;;  %v11631_v34 = vld [vmem:[#allocation3 + $0x1b8] sm:$0xff]  ;;  %v13563_v52 = vsel %vm13048_vm10, %v13374_v28, 0.0  ;;  %v13565_v21 = vsel %vm13048_vm10, %v13375_v46, 0.0 }
 0x53f   : > { %12983 = vst.msk [vmem:[%s18490_s14 + $0xfc] sm:$0xf] %vm12919_vm11, %v14849_v22  ;;  %12981 = vst.msk [vmem:[%s18490_s14 + $0xf4] sm:$0xf] %vm12919_vm11, %v14847_v24  ;;  %v13561_v62 = vsel %vm13048_vm10, %v13373_v39, 0.0  ;;  %15093 = vmatmul.mubr.msk.bf16.gmra.mrb[44].mxu1 %vm11662_vm8, %v11631_v34  ;;  %v8966_v58 = vpop.permute.xlu0 %8965 }
 0x540   : > { %v13173_v45 = vadd.f32 %v13172_v54, %v13171_v3  ;;  %8397 = vst.msk [vmem:[#allocation3 + $0x1c8] sm:$0xff] %vm8339_vm2, %v8262_v55  ;;  %v13562_v9 = vadd.f32 %v13561_v62, %v13560_v25 }
 0x541   : > { %9102 = vst.msk [vmem:[#allocation3 + $0x1c0] sm:$0xff] %vm9045_vm4, %v8966_v58 }
 0x542   : > { %v13175_v60 = vadd.f32 %v13174_v40, %v13173_v45  ;;  %v13564_v11 = vadd.f32 %v13563_v52, %v13562_v9  ;;  %v8968_v36 = vpop.permute.xlu1 %8967 }
 0x543   : > { %9103 = vst.msk [vmem:[#allocation3 + $0x1c8] sm:$0xff] %vm9045_vm4, %v8968_v36  ;;  %v10439_v4 = vpop.permute.xlu0 %10438 }
 0x544   : > { %v13566_v50 = vadd.f32 %v13565_v21, %v13564_v11  ;;  %10575 = vst.msk [vmem:[#allocation3 + $0x1c0] sm:$0xff] %vm10518_vm6, %v10439_v4 }
 0x546   : > { %v10441_v47 = vpop.permute.xlu1 %10440 }
 0x547   : > { %v15050_v56 = vpop.f32.mrb[0].mxu1  ;;  %10576 = vst.msk [vmem:[#allocation3 + $0x1c8] sm:$0xff] %vm10518_vm6, %v10441_v47  ;;  %v11432_v20 = vpop.permute.xlu0 %11431 }
 0x548   : > { %v12161_v26 = vadd.f32 %v19175_v37, %v15050_v56  ;;  %v12152_v15 = vpop.f32.mrb[1].mxu1  ;;  %11568 = vst.msk [vmem:[#allocation3 + $0x1c0] sm:$0xff] %vm11511_vm7, %v11432_v20 }
 0x549   : > { %v12153_v7 = vadd.f32 %v19175_v37, %v12152_v15  ;;  %v15051_v12 = vpop.f32.mrb[2].mxu1 }
 0x54a   : > { %v14852_v14 = vpack.c.bf16 %v12161_v26, %v12161_v26  ;;  %v12164_v35 = vadd.f32 %v19175_v37, %v15051_v12  ;;  %v12155_v29 = vpop.f32.mrb[3].mxu1  ;;  %v11434_v16 = vpop.permute.xlu1 %11433  ;;  %v13378_v53 = vmul.f32 %v12161_v26, %v12161_v26  ;;  %v13180_v19 = vsel %vm13048_vm10, %v12161_v26, 0.0 }
 0x54b   : > { %v14850_v1 = vpack.c.bf16 %v12153_v7, %v12153_v7  ;;  %v13176_v30 = vsel %vm13048_vm10, %v12153_v7, 0.0  ;;  %v13376_v51 = vmul.f32 %v12153_v7, %v12153_v7  ;;  %v12156_v42 = vadd.f32 %v19175_v37, %v12155_v29  ;;  %11569 = vst.msk [vmem:[#allocation3 + $0x1c8] sm:$0xff] %vm11511_vm7, %v11434_v16  ;;  %v7271_v48 = vpop.permute.xlu0 %7270 }
 0x54c   : > { %12986 = vst.msk [vmem:[%s18490_s14 + $0x108] sm:$0xf] %vm12919_vm11, %v14852_v14  ;;  %v13177_v43 = vadd.f32 %v13176_v30, %v13175_v60  ;;  %v14853_v44 = vpack.c.bf16 %v12164_v35, %v12164_v35  ;;  %v13379_v0 = vmul.f32 %v12164_v35, %v12164_v35  ;;  %v13182_v23 = vsel %vm13048_vm10, %v12164_v35, 0.0 }
 0x54d   : > { %12984 = vst.msk [vmem:[%s18490_s14 + $0x100] sm:$0xf] %vm12919_vm11, %v14850_v1  ;;  %v13567_v2 = vsel %vm13048_vm10, %v13376_v51, 0.0  ;;  %v14851_v38 = vpack.c.bf16 %v12156_v42, %v12156_v42  ;;  %v13178_v49 = vsel %vm13048_vm10, %v12156_v42, 0.0  ;;  %v13377_v61 = vmul.f32 %v12156_v42, %v12156_v42 }
 0x54e   : > { %7405 = vst.msk [vmem:[#allocation3 + $0x1d0] sm:$0xff] %vm7346_vm1, %v7271_v48  ;;  %v13568_v59 = vadd.f32 %v13567_v2, %v13566_v50  ;;  %v13179_v57 = vadd.f32 %v13178_v49, %v13177_v43  ;;  %v7273_v63 = vpop.permute.xlu1 %7272  ;;  %v13571_v10 = vsel %vm13048_vm10, %v13378_v53, 0.0  ;;  %v13573_v31 = vsel %vm13048_vm10, %v13379_v0, 0.0 }
 0x54f   : > { %12987 = vst.msk [vmem:[%s18490_s14 + $0x10c] sm:$0xf] %vm12919_vm11, %v14853_v44  ;;  %12985 = vst.msk [vmem:[%s18490_s14 + $0x104] sm:$0xf] %vm12919_vm11, %v14851_v38  ;;  %v13569_v5 = vsel %vm13048_vm10, %v13377_v61, 0.0  ;;  %v8264_v17 = vpop.permute.xlu0 %8263  ;;  %v11632_v6 = vld [vmem:[#allocation3 + $0x1c0] sm:$0xff] }
 0x550   : > { %v13181_v8 = vadd.f32 %v13180_v19, %v13179_v57  ;;  %7406 = vst.msk [vmem:[#allocation3 + $0x1d8] sm:$0xff] %vm7346_vm1, %v7273_v63  ;;  %v13570_v27 = vadd.f32 %v13569_v5, %v13568_v59  ;;  %15096 = vmatprep.mubr.msk.bf16.mxu1 %vm11662_vm8, %v11632_v6  ;;  %v19485_v59 = vld [vmem:[%s19838_s2] ss:$0 sm:$0xff] }
 0x551   : > { %8398 = vst.msk [vmem:[#allocation3 + $0x1d0] sm:$0xff] %vm8339_vm2, %v8264_v17 }
 0x552   : > { %v13183_v41 = vadd.f32 %v13182_v23, %v13181_v8  ;;  %v13572_v13 = vadd.f32 %v13571_v10, %v13570_v27  ;;  %v8266_v22 = vpop.permute.xlu1 %8265  ;;  %v11633_v32 = vld [vmem:[#allocation3 + $0x1c8] sm:$0xff] }
 0x553   : > { %8399 = vst.msk [vmem:[#allocation3 + $0x1d8] sm:$0xff] %vm8339_vm2, %v8266_v22  ;;  %15097 = vmatmul.mubr.msk.bf16.gmra.mrb[48].mxu1 %vm11662_vm8, %v11633_v32  ;;  %v8970_v18 = vpop.permute.xlu0 %8969 }
 0x554   : > { %9104 = vst.msk [vmem:[#allocation3 + $0x1d0] sm:$0xff] %vm9045_vm4, %v8970_v18  ;;  %v13574_v24 = vadd.f32 %v13573_v31, %v13572_v13 }
 0x556   : > { %v8972_v28 = vpop.permute.xlu1 %8971 }
 0x557   : > { %v15054_v33 = vpop.f32.mrb[4].mxu1  ;;  %9105 = vst.msk [vmem:[#allocation3 + $0x1d8] sm:$0xff] %vm9045_vm4, %v8972_v28  ;;  %v10443_v39 = vpop.permute.xlu0 %10442 }
 0x558   : > { %v12177_v25 = vadd.f32 %v19175_v37, %v15054_v33  ;;  %v12168_v3 = vpop.f32.mrb[5].mxu1  ;;  %10577 = vst.msk [vmem:[#allocation3 + $0x1d0] sm:$0xff] %vm10518_vm6, %v10443_v39 }
 0x559   : > { %v12169_v54 = vadd.f32 %v19175_v37, %v12168_v3  ;;  %v15055_v55 = vpop.f32.mrb[6].mxu1 }
 0x55a   : > { %v14856_v34 = vpack.c.bf16 %v12177_v25, %v12177_v25  ;;  %v12180_v46 = vadd.f32 %v19175_v37, %v15055_v55  ;;  %v12171_v45 = vpop.f32.mrb[7].mxu1  ;;  %v10445_v52 = vpop.permute.xlu1 %10444  ;;  %v13382_v56 = vmul.f32 %v12177_v25, %v12177_v25  ;;  %v13188_v15 = vsel %vm13048_vm10, %v12177_v25, 0.0 }
 0x55b   : > { %v14854_v62 = vpack.c.bf16 %v12169_v54, %v12169_v54  ;;  %v13184_v58 = vsel %vm13048_vm10, %v12169_v54, 0.0  ;;  %v13380_v40 = vmul.f32 %v12169_v54, %v12169_v54  ;;  %v12172_v9 = vadd.f32 %v19175_v37, %v12171_v45  ;;  %10578 = vst.msk [vmem:[#allocation3 + $0x1d8] sm:$0xff] %vm10518_vm6, %v10445_v52  ;;  %v11436_v36 = vpop.permute.xlu0 %11435 }
 0x55c   : > { %12990 = vst.msk [vmem:[%s18490_s14 + $0x118] sm:$0xf] %vm12919_vm11, %v14856_v34  ;;  %v13185_v60 = vadd.f32 %v13184_v58, %v13183_v41  ;;  %v14857_v11 = vpack.c.bf16 %v12180_v46, %v12180_v46  ;;  %v13383_v7 = vmul.f32 %v12180_v46, %v12180_v46  ;;  %v13190_v29 = vsel %vm13048_vm10, %v12180_v46, 0.0 }
 0x55d   : > { %12988 = vst.msk [vmem:[%s18490_s14 + $0x110] sm:$0xf] %vm12919_vm11, %v14854_v62  ;;  %v13575_v21 = vsel %vm13048_vm10, %v13380_v40, 0.0  ;;  %v14855_v4 = vpack.c.bf16 %v12172_v9, %v12172_v9  ;;  %v13186_v50 = vsel %vm13048_vm10, %v12172_v9, 0.0  ;;  %v13381_v26 = vmul.f32 %v12172_v9, %v12172_v9 }
 0x55e   : > { %11570 = vst.msk [vmem:[#allocation3 + $0x1d0] sm:$0xff] %vm11511_vm7, %v11436_v36  ;;  %v13576_v37 = vadd.f32 %v13575_v21, %v13574_v24  ;;  %v13187_v47 = vadd.f32 %v13186_v50, %v13185_v60  ;;  %v11438_v20 = vpop.permute.xlu1 %11437  ;;  %v13579_v30 = vsel %vm13048_vm10, %v13382_v56, 0.0  ;;  %v13581_v43 = vsel %vm13048_vm10, %v13383_v7, 0.0 }
 0x55f   : > { %12991 = vst.msk [vmem:[%s18490_s14 + $0x11c] sm:$0xf] %vm12919_vm11, %v14857_v11  ;;  %12989 = vst.msk [vmem:[%s18490_s14 + $0x114] sm:$0xf] %vm12919_vm11, %v14855_v4  ;;  %v13577_v14 = vsel %vm13048_vm10, %v13381_v26, 0.0  ;;  %v7275_v35 = vpop.permute.xlu0 %7274 }
 0x560   : > { %v13189_v12 = vadd.f32 %v13188_v15, %v13187_v47  ;;  %11571 = vst.msk [vmem:[#allocation3 + $0x1d8] sm:$0xff] %vm11511_vm7, %v11438_v20  ;;  %v13578_v1 = vadd.f32 %v13577_v14, %v13576_v37 }
 0x561   : > { %7407 = vst.msk [vmem:[#allocation3 + $0x1e0] sm:$0xff] %vm7346_vm1, %v7275_v35 }
 0x562   : > { %v13191_v51 = vadd.f32 %v13190_v29, %v13189_v12  ;;  %v13580_v42 = vadd.f32 %v13579_v30, %v13578_v1  ;;  %v7277_v16 = vpop.permute.xlu1 %7276 }
 0x563   : > { %7408 = vst.msk [vmem:[#allocation3 + $0x1e8] sm:$0xff] %vm7346_vm1, %v7277_v16  ;;  %v8268_v44 = vpop.permute.xlu0 %8267 }
 0x564   : > { %8400 = vst.msk [vmem:[#allocation3 + $0x1e0] sm:$0xff] %vm8339_vm2, %v8268_v44  ;;  %v13582_v2 = vadd.f32 %v13581_v43, %v13580_v42 }
 0x565   : > { %v11634_v48 = vld [vmem:[#allocation3 + $0x1d0] sm:$0xff] }
 0x566   : > { %15100 = vmatprep.mubr.msk.bf16.mxu1 %vm11662_vm8, %v11634_v48  ;;  %v8270_v49 = vpop.permute.xlu1 %8269 }
 0x567   : > { %v15058_v38 = vpop.f32.mrb[8].mxu1  ;;  %v11635_v53 = vld [vmem:[#allocation3 + $0x1d8] sm:$0xff]  ;;  %8401 = vst.msk [vmem:[#allocation3 + $0x1e8] sm:$0xff] %vm8339_vm2, %v8270_v49  ;;  %v8974_v19 = vpop.permute.xlu0 %8973 }
 0x568   : > { %v12193_v57 = vadd.f32 %v19485_v59, %v15058_v38  ;;  %v12184_v61 = vpop.f32.mrb[9].mxu1  ;;  %15101 = vmatmul.mubr.msk.bf16.gmra.mrb[52].mxu1 %vm11662_vm8, %v11635_v53  ;;  %9106 = vst.msk [vmem:[#allocation3 + $0x1e0] sm:$0xff] %vm9045_vm4, %v8974_v19 }
 0x569   : > { %v12185_v63 = vadd.f32 %v19485_v59, %v12184_v61  ;;  %v15059_v0 = vpop.f32.mrb[10].mxu1 }
 0x56a   : > { %v14860_v8 = vpack.c.bf16 %v12193_v57, %v12193_v57  ;;  %v12196_v5 = vadd.f32 %v19485_v59, %v15059_v0  ;;  %v12187_v17 = vpop.f32.mrb[11].mxu1  ;;  %v8976_v41 = vpop.permute.xlu1 %8975  ;;  %v13386_v33 = vmul.f32 %v12193_v57, %v12193_v57  ;;  %v13196_v39 = vsel %vm13048_vm10, %v12193_v57, 0.0 }
 0x56b   : > { %v14858_v6 = vpack.c.bf16 %v12185_v63, %v12185_v63  ;;  %v13192_v23 = vsel %vm13048_vm10, %v12185_v63, 0.0  ;;  %v13384_v27 = vmul.f32 %v12185_v63, %v12185_v63  ;;  %v12188_v10 = vadd.f32 %v19485_v59, %v12187_v17  ;;  %9107 = vst.msk [vmem:[#allocation3 + $0x1e8] sm:$0xff] %vm9045_vm4, %v8976_v41  ;;  %v10447_v32 = vpop.permute.xlu0 %10446 }
 0x56c   : > { %12994 = vst.msk [vmem:[%s18490_s14 + $0x128] sm:$0xf] %vm12919_vm11, %v14860_v8  ;;  %v13193_v13 = vadd.f32 %v13192_v23, %v13191_v51  ;;  %v14861_v22 = vpack.c.bf16 %v12196_v5, %v12196_v5  ;;  %v13387_v55 = vmul.f32 %v12196_v5, %v12196_v5  ;;  %v13198_v62 = vsel %vm13048_vm10, %v12196_v5, 0.0 }
 0x56d   : > { %12992 = vst.msk [vmem:[%s18490_s14 + $0x120] sm:$0xf] %vm12919_vm11, %v14858_v6  ;;  %v13583_v31 = vsel %vm13048_vm10, %v13384_v27, 0.0  ;;  %v14859_v18 = vpack.c.bf16 %v12188_v10, %v12188_v10  ;;  %v13194_v24 = vsel %vm13048_vm10, %v12188_v10, 0.0  ;;  %v13385_v3 = vmul.f32 %v12188_v10, %v12188_v10 }
 0x56e   : > { %10579 = vst.msk [vmem:[#allocation3 + $0x1e0] sm:$0xff] %vm10518_vm6, %v10447_v32  ;;  %v13584_v28 = vadd.f32 %v13583_v31, %v13582_v2  ;;  %v13195_v25 = vadd.f32 %v13194_v24, %v13193_v13  ;;  %v10449_v54 = vpop.permute.xlu1 %10448  ;;  %v13587_v40 = vsel %vm13048_vm10, %v13386_v33, 0.0  ;;  %v13589_v11 = vsel %vm13048_vm10, %v13387_v55, 0.0 }
 0x56f   : > { %12995 = vst.msk [vmem:[%s18490_s14 + $0x12c] sm:$0xf] %vm12919_vm11, %v14861_v22  ;;  %12993 = vst.msk [vmem:[%s18490_s14 + $0x124] sm:$0xf] %vm12919_vm11, %v14859_v18  ;;  %v13585_v46 = vsel %vm13048_vm10, %v13385_v3, 0.0  ;;  %v11440_v45 = vpop.permute.xlu0 %11439 }
 0x570   : > { %v13197_v34 = vadd.f32 %v13196_v39, %v13195_v25  ;;  %10580 = vst.msk [vmem:[#allocation3 + $0x1e8] sm:$0xff] %vm10518_vm6, %v10449_v54  ;;  %v13586_v58 = vadd.f32 %v13585_v46, %v13584_v28 }
 0x571   : > { %11572 = vst.msk [vmem:[#allocation3 + $0x1e0] sm:$0xff] %vm11511_vm7, %v11440_v45 }
 0x572   : > { %v13199_v9 = vadd.f32 %v13198_v62, %v13197_v34  ;;  %v13588_v52 = vadd.f32 %v13587_v40, %v13586_v58  ;;  %v11442_v60 = vpop.permute.xlu1 %11441 }
 0x573   : > { %11573 = vst.msk [vmem:[#allocation3 + $0x1e8] sm:$0xff] %vm11511_vm7, %v11442_v60  ;;  %v7279_v36 = vpop.permute.xlu0 %7278 }
 0x574   : > { %7409 = vst.msk [vmem:[#allocation3 + $0x1f0] sm:$0xff] %vm7346_vm1, %v7279_v36  ;;  %v13590_v21 = vadd.f32 %v13589_v11, %v13588_v52 }
 0x576   : > { %v7281_v50 = vpop.permute.xlu1 %7280 }
 0x577   : > { %v15062_v4 = vpop.f32.mrb[12].mxu1  ;;  %7410 = vst.msk [vmem:[#allocation3 + $0x1f8] sm:$0xff] %vm7346_vm1, %v7281_v50  ;;  %v8272_v47 = vpop.permute.xlu0 %8271 }
 0x578   : > { %v12209_v56 = vadd.f32 %v19485_v59, %v15062_v4  ;;  %v12200_v37 = vpop.f32.mrb[13].mxu1  ;;  %v11636_v26 = vld [vmem:[#allocation3 + $0x1e0] sm:$0xff]  ;;  %8402 = vst.msk [vmem:[#allocation3 + $0x1f0] sm:$0xff] %vm8339_vm2, %v8272_v47 }
 0x579   : > { %v12201_v15 = vadd.f32 %v19485_v59, %v12200_v37  ;;  %v15063_v20 = vpop.f32.mrb[14].mxu1  ;;  %15104 = vmatprep.mubr.msk.bf16.mxu1 %vm11662_vm8, %v11636_v26 }
 0x57a   : > { %v14864_v7 = vpack.c.bf16 %v12209_v56, %v12209_v56  ;;  %v12212_v12 = vadd.f32 %v19485_v59, %v15063_v20  ;;  %v12203_v14 = vpop.f32.mrb[15].mxu1  ;;  %v8274_v51 = vpop.permute.xlu1 %8273  ;;  %v11637_v42 = vld [vmem:[#allocation3 + $0x1e8] sm:$0xff]  ;;  %v13390_v49 = vmul.f32 %v12209_v56, %v12209_v56  ;;  %v13204_v19 = vsel %vm13048_vm10, %v12209_v56, 0.0 }
 0x57b   : > { %v14862_v35 = vpack.c.bf16 %v12201_v15, %v12201_v15  ;;  %v13200_v29 = vsel %vm13048_vm10, %v12201_v15, 0.0  ;;  %v13388_v1 = vmul.f32 %v12201_v15, %v12201_v15  ;;  %v12204_v30 = vadd.f32 %v19485_v59, %v12203_v14  ;;  %8403 = vst.msk [vmem:[#allocation3 + $0x1f8] sm:$0xff] %vm8339_vm2, %v8274_v51  ;;  %15105 = vmatmul.mubr.msk.bf16.gmra.mrb[56].mxu1 %vm11662_vm8, %v11637_v42  ;;  %v8978_v44 = vpop.permute.xlu0 %8977 }
 0x57c   : > { %12998 = vst.msk [vmem:[%s18490_s14 + $0x138] sm:$0xf] %vm12919_vm11, %v14864_v7  ;;  %v13201_v16 = vadd.f32 %v13200_v29, %v13199_v9  ;;  %v14865_v43 = vpack.c.bf16 %v12212_v12, %v12212_v12  ;;  %v13391_v0 = vmul.f32 %v12212_v12, %v12212_v12  ;;  %v13206_v6 = vsel %vm13048_vm10, %v12212_v12, 0.0 }
 0x57d   : > { %12996 = vst.msk [vmem:[%s18490_s14 + $0x130] sm:$0xf] %vm12919_vm11, %v14862_v35  ;;  %v13591_v48 = vsel %vm13048_vm10, %v13388_v1, 0.0  ;;  %v14863_v2 = vpack.c.bf16 %v12204_v30, %v12204_v30  ;;  %v13202_v38 = vsel %vm13048_vm10, %v12204_v30, 0.0  ;;  %v13389_v61 = vmul.f32 %v12204_v30, %v12204_v30 }
 0x57e   : > { %9108 = vst.msk [vmem:[#allocation3 + $0x1f0] sm:$0xff] %vm9045_vm4, %v8978_v44  ;;  %v13592_v53 = vadd.f32 %v13591_v48, %v13590_v21  ;;  %v13203_v57 = vadd.f32 %v13202_v38, %v13201_v16  ;;  %v8980_v63 = vpop.permute.xlu1 %8979  ;;  %v13595_v27 = vsel %vm13048_vm10, %v13390_v49, 0.0  ;;  %v13597_v22 = vsel %vm13048_vm10, %v13391_v0, 0.0 }
 0x57f   : > { %12999 = vst.msk [vmem:[%s18490_s14 + $0x13c] sm:$0xf] %vm12919_vm11, %v14865_v43  ;;  %12997 = vst.msk [vmem:[%s18490_s14 + $0x134] sm:$0xf] %vm12919_vm11, %v14863_v2  ;;  %v13593_v5 = vsel %vm13048_vm10, %v13389_v61, 0.0  ;;  %v10451_v17 = vpop.permute.xlu0 %10450 }
 0x580   : > { %v13205_v8 = vadd.f32 %v13204_v19, %v13203_v57  ;;  %9109 = vst.msk [vmem:[#allocation3 + $0x1f8] sm:$0xff] %vm9045_vm4, %v8980_v63  ;;  %v13594_v23 = vadd.f32 %v13593_v5, %v13592_v53 }
 0x581   : > { %10581 = vst.msk [vmem:[#allocation3 + $0x1f0] sm:$0xff] %vm10518_vm6, %v10451_v17 }
 0x582   : > { %v13207_v10 = vadd.f32 %v13206_v6, %v13205_v8  ;;  %v13596_v41 = vadd.f32 %v13595_v27, %v13594_v23  ;;  %v10453_v13 = vpop.permute.xlu1 %10452 }
 0x583   : > { %10582 = vst.msk [vmem:[#allocation3 + $0x1f8] sm:$0xff] %vm10518_vm6, %v10453_v13  ;;  %v11444_v32 = vpop.permute.xlu0 %11443 }
 0x584   : > { %11574 = vst.msk [vmem:[#allocation3 + $0x1f0] sm:$0xff] %vm11511_vm7, %v11444_v32  ;;  %v13598_v31 = vadd.f32 %v13597_v22, %v13596_v41 }
 0x586   : > { %v11446_v24 = vpop.permute.xlu1 %11445 }
 0x587   : > { %v15066_v18 = vpop.f32.mrb[16].mxu1  ;;  %11575 = vst.msk [vmem:[#allocation3 + $0x1f8] sm:$0xff] %vm11511_vm7, %v11446_v24 }
 0x588   : > { %v12225_v33 = vadd.f32 %v19485_v59, %v15066_v18  ;;  %v12216_v28 = vpop.f32.mrb[17].mxu1 }
 0x589   : > { %v12217_v25 = vadd.f32 %v19485_v59, %v12216_v28  ;;  %v15067_v3 = vpop.f32.mrb[18].mxu1 }
 0x58a   : > { %v14868_v39 = vpack.c.bf16 %v12225_v33, %v12225_v33  ;;  %v12228_v54 = vadd.f32 %v19485_v59, %v15067_v3  ;;  %v12219_v55 = vpop.f32.mrb[19].mxu1  ;;  %v13394_v36 = vmul.f32 %v12225_v33, %v12225_v33  ;;  %v13212_v56 = vsel %vm13048_vm10, %v12225_v33, 0.0 }
 0x58b   : > { %v14866_v34 = vpack.c.bf16 %v12217_v25, %v12217_v25  ;;  %v13208_v46 = vsel %vm13048_vm10, %v12217_v25, 0.0  ;;  %v13392_v45 = vmul.f32 %v12217_v25, %v12217_v25  ;;  %v12220_v62 = vadd.f32 %v19485_v59, %v12219_v55  ;;  %v11638_v9 = vld [vmem:[#allocation3 + $0x1f0] sm:$0xff] }
 0x58c   : > { %13002 = vst.msk [vmem:[%s18490_s14 + $0x148] sm:$0xf] %vm12919_vm11, %v14868_v39  ;;  %v13209_v58 = vadd.f32 %v13208_v46, %v13207_v10  ;;  %v14869_v40 = vpack.c.bf16 %v12228_v54, %v12228_v54  ;;  %15108 = vmatprep.mubr.msk.bf16.mxu1 %vm11662_vm8, %v11638_v9  ;;  %v13395_v47 = vmul.f32 %v12228_v54, %v12228_v54  ;;  %v13214_v20 = vsel %vm13048_vm10, %v12228_v54, 0.0 }
 0x58d   : > { %13000 = vst.msk [vmem:[%s18490_s14 + $0x140] sm:$0xf] %vm12919_vm11, %v14866_v34  ;;  %v13599_v52 = vsel %vm13048_vm10, %v13392_v45, 0.0  ;;  %v14867_v60 = vpack.c.bf16 %v12220_v62, %v12220_v62  ;;  %v13210_v11 = vsel %vm13048_vm10, %v12220_v62, 0.0  ;;  %v13393_v50 = vmul.f32 %v12220_v62, %v12220_v62 }
 0x58e   : > { %v13600_v21 = vadd.f32 %v13599_v52, %v13598_v31  ;;  %13003 = vst.msk [vmem:[%s18490_s14 + $0x14c] sm:$0xf] %vm12919_vm11, %v14869_v40  ;;  %v13211_v4 = vadd.f32 %v13210_v11, %v13209_v58  ;;  %v11639_v37 = vld [vmem:[#allocation3 + $0x1f8] sm:$0xff]  ;;  %v13603_v12 = vsel %vm13048_vm10, %v13394_v36, 0.0  ;;  %v13605_v29 = vsel %vm13048_vm10, %v13395_v47, 0.0 }
 0x58f   : > { %13001 = vst.msk [vmem:[%s18490_s14 + $0x144] sm:$0xf] %vm12919_vm11, %v14867_v60  ;;  %v13601_v15 = vsel %vm13048_vm10, %v13393_v50, 0.0  ;;  %15109 = vmatmul.mubr.msk.bf16.gmra.mrb[60].mxu1 %vm11662_vm8, %v11639_v37 }
 0x590   : > { %v13213_v26 = vadd.f32 %v13212_v56, %v13211_v4  ;;  %v13602_v7 = vadd.f32 %v13601_v15, %v13600_v21 }
 0x592   : > { %v13215_v14 = vadd.f32 %v13214_v20, %v13213_v26  ;;  %v13604_v35 = vadd.f32 %v13603_v12, %v13602_v7 }
 0x594   : > { %v13606_v1 = vadd.f32 %v13605_v29, %v13604_v35 }
 0x59b   : > { %v15070_v30 = vpop.f32.mrb[20].mxu1 }
 0x59c   : > { %v12241_v51 = vadd.f32 %v19485_v59, %v15070_v30  ;;  %v12232_v42 = vpop.f32.mrb[21].mxu1 }
 0x59d   : > { %v12233_v16 = vadd.f32 %v19485_v59, %v12232_v42  ;;  %v15071_v43 = vpop.f32.mrb[22].mxu1 }
 0x59e   : > { %v14872_v44 = vpack.c.bf16 %v12241_v51, %v12241_v51  ;;  %v12244_v48 = vadd.f32 %v19485_v59, %v15071_v43  ;;  %v12235_v2 = vpop.f32.mrb[23].mxu1  ;;  %v13398_v5 = vmul.f32 %v12241_v51, %v12241_v51  ;;  %v13220_v27 = vsel %vm13048_vm10, %v12241_v51, 0.0 }
 0x59f   : > { %v14870_v38 = vpack.c.bf16 %v12233_v16, %v12233_v16  ;;  %v13216_v49 = vsel %vm13048_vm10, %v12233_v16, 0.0  ;;  %v13396_v53 = vmul.f32 %v12233_v16, %v12233_v16  ;;  %v12236_v57 = vadd.f32 %v19485_v59, %v12235_v2 }
 0x5a0   : > { %13006 = vst.msk [vmem:[%s18490_s14 + $0x158] sm:$0xf] %vm12919_vm11, %v14872_v44  ;;  %v13217_v61 = vadd.f32 %v13216_v49, %v13215_v14  ;;  %v14873_v19 = vpack.c.bf16 %v12244_v48, %v12244_v48  ;;  %v13399_v10 = vmul.f32 %v12244_v48, %v12244_v48  ;;  %v13222_v22 = vsel %vm13048_vm10, %v12244_v48, 0.0 }
 0x5a1   : > { %13004 = vst.msk [vmem:[%s18490_s14 + $0x150] sm:$0xf] %vm12919_vm11, %v14870_v38  ;;  %v13607_v63 = vsel %vm13048_vm10, %v13396_v53, 0.0  ;;  %v14871_v0 = vpack.c.bf16 %v12236_v57, %v12236_v57  ;;  %v13218_v8 = vsel %vm13048_vm10, %v12236_v57, 0.0  ;;  %v13397_v23 = vmul.f32 %v12236_v57, %v12236_v57 }
 0x5a2   : > { %v13608_v17 = vadd.f32 %v13607_v63, %v13606_v1  ;;  %13007 = vst.msk [vmem:[%s18490_s14 + $0x15c] sm:$0xf] %vm12919_vm11, %v14873_v19  ;;  %v13219_v6 = vadd.f32 %v13218_v8, %v13217_v61  ;;  %v13611_v31 = vsel %vm13048_vm10, %v13398_v5, 0.0  ;;  %v13613_v33 = vsel %vm13048_vm10, %v13399_v10, 0.0 }
 0x5a3   : > { %13005 = vst.msk [vmem:[%s18490_s14 + $0x154] sm:$0xf] %vm12919_vm11, %v14871_v0  ;;  %v13609_v13 = vsel %vm13048_vm10, %v13397_v23, 0.0 }
 0x5a4   : > { %v13221_v41 = vadd.f32 %v13220_v27, %v13219_v6  ;;  %v13610_v32 = vadd.f32 %v13609_v13, %v13608_v17 }
 0x5a6   : > { %v13223_v18 = vadd.f32 %v13222_v22, %v13221_v41  ;;  %v13612_v24 = vadd.f32 %v13611_v31, %v13610_v32 }
 0x5a8   : > { %v13614_v28 = vadd.f32 %v13613_v33, %v13612_v24 }
 0x5ae   : > { %v15074_v25 = vpop.f32.mrb[24].mxu1 }
 0x5af   : > { %v12257_v3 = vadd.f32 %v19485_v59, %v15074_v25  ;;  %v12248_v39 = vpop.f32.mrb[25].mxu1 }
 0x5b0   : > { %v12249_v54 = vadd.f32 %v19485_v59, %v12248_v39  ;;  %v15075_v55 = vpop.f32.mrb[26].mxu1 }
 0x5b1   : > { %v14876_v34 = vpack.c.bf16 %v12257_v3, %v12257_v3  ;;  %v12260_v46 = vadd.f32 %v19485_v59, %v15075_v55  ;;  %v12251_v45 = vpop.f32.mrb[27].mxu1  ;;  %v13402_v4 = vmul.f32 %v12257_v3, %v12257_v3  ;;  %v13228_v47 = vsel %vm13048_vm10, %v12257_v3, 0.0 }
 0x5b2   : > { %v14874_v62 = vpack.c.bf16 %v12249_v54, %v12249_v54  ;;  %v13224_v58 = vsel %vm13048_vm10, %v12249_v54, 0.0  ;;  %v13400_v40 = vmul.f32 %v12249_v54, %v12249_v54  ;;  %v12252_v9 = vadd.f32 %v19485_v59, %v12251_v45 }
 0x5b3   : > { %13010 = vst.msk [vmem:[%s18490_s14 + $0x168] sm:$0xf] %vm12919_vm11, %v14876_v34  ;;  %v13225_v52 = vadd.f32 %v13224_v58, %v13223_v18  ;;  %v14877_v60 = vpack.c.bf16 %v12260_v46, %v12260_v46  ;;  %v13403_v26 = vmul.f32 %v12260_v46, %v12260_v46  ;;  %v13230_v7 = vsel %vm13048_vm10, %v12260_v46, 0.0 }
 0x5b4   : > { %13008 = vst.msk [vmem:[%s18490_s14 + $0x160] sm:$0xf] %vm12919_vm11, %v14874_v62  ;;  %v13615_v11 = vsel %vm13048_vm10, %v13400_v40, 0.0  ;;  %v14875_v36 = vpack.c.bf16 %v12252_v9, %v12252_v9  ;;  %v13226_v21 = vsel %vm13048_vm10, %v12252_v9, 0.0  ;;  %v13401_v37 = vmul.f32 %v12252_v9, %v12252_v9 }
 0x5b5   : > { %v13616_v50 = vadd.f32 %v13615_v11, %v13614_v28  ;;  %13011 = vst.msk [vmem:[%s18490_s14 + $0x16c] sm:$0xf] %vm12919_vm11, %v14877_v60  ;;  %v13227_v56 = vadd.f32 %v13226_v21, %v13225_v52  ;;  %v13619_v14 = vsel %vm13048_vm10, %v13402_v4, 0.0  ;;  %v13621_v1 = vsel %vm13048_vm10, %v13403_v26, 0.0 }
 0x5b6   : > { %13009 = vst.msk [vmem:[%s18490_s14 + $0x164] sm:$0xf] %vm12919_vm11, %v14875_v36  ;;  %v13617_v20 = vsel %vm13048_vm10, %v13401_v37, 0.0 }
 0x5b7   : > { %v13229_v15 = vadd.f32 %v13228_v47, %v13227_v56  ;;  %v13618_v12 = vadd.f32 %v13617_v20, %v13616_v50 }
 0x5b9   : > { %v13231_v35 = vadd.f32 %v13230_v7, %v13229_v15  ;;  %v13620_v29 = vadd.f32 %v13619_v14, %v13618_v12 }
 0x5bb   : > { %v13622_v30 = vadd.f32 %v13621_v1, %v13620_v29 }
 0x5c2   : > { %v15078_v51 = vpop.f32.mrb[28].mxu1 }
 0x5c3   : > { %v12273_v42 = vadd.f32 %v19485_v59, %v15078_v51  ;;  %v12264_v16 = vpop.f32.mrb[29].mxu1 }
 0x5c4   : > { %v12265_v43 = vadd.f32 %v19485_v59, %v12264_v16  ;;  %v15079_v44 = vpop.f32.mrb[30].mxu1 }
 0x5c5   : > { %v14880_v48 = vpack.c.bf16 %v12273_v42, %v12273_v42  ;;  %v12276_v2 = vadd.f32 %v19485_v59, %v15079_v44  ;;  %v12267_v38 = vpop.f32.mrb[31].mxu1  ;;  %v13406_v17 = vmul.f32 %v12273_v42, %v12273_v42  ;;  %v13236_v10 = vsel %vm13048_vm10, %v12273_v42, 0.0 }
 0x5c6   : > { %v14878_v49 = vpack.c.bf16 %v12265_v43, %v12265_v43  ;;  %v13232_v53 = vsel %vm13048_vm10, %v12265_v43, 0.0  ;;  %v13404_v57 = vmul.f32 %v12265_v43, %v12265_v43  ;;  %v12268_v61 = vadd.f32 %v19485_v59, %v12267_v38 }
 0x5c7   : > { %13014 = vst.msk [vmem:[%s18490_s14 + $0x178] sm:$0xf] %vm12919_vm11, %v14880_v48  ;;  %v13233_v19 = vadd.f32 %v13232_v53, %v13231_v35  ;;  %v14881_v63 = vpack.c.bf16 %v12276_v2, %v12276_v2  ;;  %v13407_v41 = vmul.f32 %v12276_v2, %v12276_v2  ;;  %v13238_v32 = vsel %vm13048_vm10, %v12276_v2, 0.0 }
 0x5c8   : > { %13012 = vst.msk [vmem:[%s18490_s14 + $0x170] sm:$0xf] %vm12919_vm11, %v14878_v49  ;;  %v13623_v0 = vsel %vm13048_vm10, %v13404_v57, 0.0  ;;  %v14879_v8 = vpack.c.bf16 %v12268_v61, %v12268_v61  ;;  %v13234_v5 = vsel %vm13048_vm10, %v12268_v61, 0.0  ;;  %v13405_v27 = vmul.f32 %v12268_v61, %v12268_v61 }
 0x5c9   : > { %v13624_v6 = vadd.f32 %v13623_v0, %v13622_v30  ;;  %13015 = vst.msk [vmem:[%s18490_s14 + $0x17c] sm:$0xf] %vm12919_vm11, %v14881_v63  ;;  %v13235_v23 = vadd.f32 %v13234_v5, %v13233_v19  ;;  %v13627_v18 = vsel %vm13048_vm10, %v13406_v17, 0.0  ;;  %v13629_v28 = vsel %vm13048_vm10, %v13407_v41, 0.0 }
 0x5ca   : > { %13013 = vst.msk [vmem:[%s18490_s14 + $0x174] sm:$0xf] %vm12919_vm11, %v14879_v8  ;;  %v13625_v22 = vsel %vm13048_vm10, %v13405_v27, 0.0 }
 0x5cb   : > { %v13237_v13 = vadd.f32 %v13236_v10, %v13235_v23  ;;  %v13626_v31 = vadd.f32 %v13625_v22, %v13624_v6 }
 0x5cd   : > { %v13239_v24 = vadd.f32 %v13238_v32, %v13237_v13  ;;  %v13628_v33 = vadd.f32 %v13627_v18, %v13626_v31 }
 0x5cf   : > { %v13630_v25 = vadd.f32 %v13629_v28, %v13628_v33 }
 0x5d7   : > { %v15082_v3 = vpop.f32.mrb[32].mxu1 }
 0x5d8   : > { %v12289_v39 = vadd.f32 %v19485_v59, %v15082_v3  ;;  %v12280_v54 = vpop.f32.mrb[33].mxu1 }
 0x5d9   : > { %v12281_v55 = vadd.f32 %v19485_v59, %v12280_v54  ;;  %v15083_v34 = vpop.f32.mrb[34].mxu1 }
 0x5da   : > { %v14884_v46 = vpack.c.bf16 %v12289_v39, %v12289_v39  ;;  %v12292_v45 = vadd.f32 %v19485_v59, %v15083_v34  ;;  %v12283_v62 = vpop.f32.mrb[35].mxu1  ;;  %v13410_v50 = vmul.f32 %v12289_v39, %v12289_v39  ;;  %v13244_v26 = vsel %vm13048_vm10, %v12289_v39, 0.0 }
 0x5db   : > { %v14882_v58 = vpack.c.bf16 %v12281_v55, %v12281_v55  ;;  %v13240_v40 = vsel %vm13048_vm10, %v12281_v55, 0.0  ;;  %v13408_v9 = vmul.f32 %v12281_v55, %v12281_v55  ;;  %v12284_v52 = vadd.f32 %v19485_v59, %v12283_v62 }
 0x5dc   : > { %13018 = vst.msk [vmem:[%s18490_s14 + $0x188] sm:$0xf] %vm12919_vm11, %v14884_v46  ;;  %v13241_v60 = vadd.f32 %v13240_v40, %v13239_v24  ;;  %v14885_v11 = vpack.c.bf16 %v12292_v45, %v12292_v45  ;;  %v13411_v15 = vmul.f32 %v12292_v45, %v12292_v45  ;;  %v13246_v12 = vsel %vm13048_vm10, %v12292_v45, 0.0 }
 0x5dd   : > { %13016 = vst.msk [vmem:[%s18490_s14 + $0x180] sm:$0xf] %vm12919_vm11, %v14882_v58  ;;  %v13631_v36 = vsel %vm13048_vm10, %v13408_v9, 0.0  ;;  %v14883_v21 = vpack.c.bf16 %v12284_v52, %v12284_v52  ;;  %v13242_v4 = vsel %vm13048_vm10, %v12284_v52, 0.0  ;;  %v13409_v47 = vmul.f32 %v12284_v52, %v12284_v52 }
 0x5de   : > { %v13632_v56 = vadd.f32 %v13631_v36, %v13630_v25  ;;  %13019 = vst.msk [vmem:[%s18490_s14 + $0x18c] sm:$0xf] %vm12919_vm11, %v14885_v11  ;;  %v13243_v37 = vadd.f32 %v13242_v4, %v13241_v60  ;;  %v13635_v35 = vsel %vm13048_vm10, %v13410_v50, 0.0  ;;  %v13637_v30 = vsel %vm13048_vm10, %v13411_v15, 0.0 }
 0x5df   : > { %13017 = vst.msk [vmem:[%s18490_s14 + $0x184] sm:$0xf] %vm12919_vm11, %v14883_v21  ;;  %v13633_v7 = vsel %vm13048_vm10, %v13409_v47, 0.0 }
 0x5e0   : > { %v13245_v20 = vadd.f32 %v13244_v26, %v13243_v37  ;;  %v13634_v14 = vadd.f32 %v13633_v7, %v13632_v56 }
 0x5e2   : > { %v13247_v29 = vadd.f32 %v13246_v12, %v13245_v20  ;;  %v13636_v1 = vadd.f32 %v13635_v35, %v13634_v14 }
 0x5e4   : > { %v13638_v51 = vadd.f32 %v13637_v30, %v13636_v1 }
 0x5eb   : > { %v15086_v42 = vpop.f32.mrb[36].mxu1 }
 0x5ec   : > { %v12305_v16 = vadd.f32 %v19485_v59, %v15086_v42  ;;  %v12296_v43 = vpop.f32.mrb[37].mxu1 }
 0x5ed   : > { %v12297_v44 = vadd.f32 %v19485_v59, %v12296_v43  ;;  %v15087_v48 = vpop.f32.mrb[38].mxu1 }
 0x5ee   : > { %v14888_v2 = vpack.c.bf16 %v12305_v16, %v12305_v16  ;;  %v12308_v38 = vadd.f32 %v19485_v59, %v15087_v48  ;;  %v12299_v49 = vpop.f32.mrb[39].mxu1  ;;  %v13414_v6 = vmul.f32 %v12305_v16, %v12305_v16  ;;  %v13252_v41 = vsel %vm13048_vm10, %v12305_v16, 0.0 }
 0x5ef   : > { %v14886_v53 = vpack.c.bf16 %v12297_v44, %v12297_v44  ;;  %v13248_v57 = vsel %vm13048_vm10, %v12297_v44, 0.0  ;;  %v13412_v61 = vmul.f32 %v12297_v44, %v12297_v44  ;;  %v12300_v19 = vadd.f32 %v19485_v59, %v12299_v49 }
 0x5f0   : > { %13022 = vst.msk [vmem:[%s18490_s14 + $0x198] sm:$0xf] %vm12919_vm11, %v14888_v2  ;;  %v13249_v63 = vadd.f32 %v13248_v57, %v13247_v29  ;;  %v14889_v0 = vpack.c.bf16 %v12308_v38, %v12308_v38  ;;  %v13415_v13 = vmul.f32 %v12308_v38, %v12308_v38  ;;  %v13254_v31 = vsel %vm13048_vm10, %v12308_v38, 0.0 }
 0x5f1   : > { %13020 = vst.msk [vmem:[%s18490_s14 + $0x190] sm:$0xf] %vm12919_vm11, %v14886_v53  ;;  %v13639_v8 = vsel %vm13048_vm10, %v13412_v61, 0.0  ;;  %v14887_v5 = vpack.c.bf16 %v12300_v19, %v12300_v19  ;;  %v13250_v17 = vsel %vm13048_vm10, %v12300_v19, 0.0  ;;  %v13413_v10 = vmul.f32 %v12300_v19, %v12300_v19 }
 0x5f2   : > { %v13640_v23 = vadd.f32 %v13639_v8, %v13638_v51  ;;  %13023 = vst.msk [vmem:[%s18490_s14 + $0x19c] sm:$0xf] %vm12919_vm11, %v14889_v0  ;;  %v13251_v27 = vadd.f32 %v13250_v17, %v13249_v63  ;;  %v13643_v24 = vsel %vm13048_vm10, %v13414_v6, 0.0  ;;  %v13645_v25 = vsel %vm13048_vm10, %v13415_v13, 0.0 }
 0x5f3   : > { %13021 = vst.msk [vmem:[%s18490_s14 + $0x194] sm:$0xf] %vm12919_vm11, %v14887_v5  ;;  %v13641_v32 = vsel %vm13048_vm10, %v13413_v10, 0.0 }
 0x5f4   : > { %v13253_v22 = vadd.f32 %v13252_v41, %v13251_v27  ;;  %v13642_v18 = vadd.f32 %v13641_v32, %v13640_v23 }
 0x5f6   : > { %v13255_v33 = vadd.f32 %v13254_v31, %v13253_v22  ;;  %v13644_v28 = vadd.f32 %v13643_v24, %v13642_v18 }
 0x5f8   : > { %v13646_v3 = vadd.f32 %v13645_v25, %v13644_v28 }
 0x5fe   : > { %v15090_v39 = vpop.f32.mrb[40].mxu1 }
 0x5ff   : > { %v12321_v54 = vadd.f32 %v19485_v59, %v15090_v39  ;;  %v12312_v55 = vpop.f32.mrb[41].mxu1 }
 0x600   : > { %v12313_v34 = vadd.f32 %v19485_v59, %v12312_v55  ;;  %v15091_v46 = vpop.f32.mrb[42].mxu1 }
 0x601   : > { %v14892_v45 = vpack.c.bf16 %v12321_v54, %v12321_v54  ;;  %v12324_v62 = vadd.f32 %v19485_v59, %v15091_v46  ;;  %v12315_v58 = vpop.f32.mrb[43].mxu1  ;;  %v13418_v56 = vmul.f32 %v12321_v54, %v12321_v54  ;;  %v13260_v15 = vsel %vm13048_vm10, %v12321_v54, 0.0 }
 0x602   : > { %v14890_v40 = vpack.c.bf16 %v12313_v34, %v12313_v34  ;;  %v13256_v9 = vsel %vm13048_vm10, %v12313_v34, 0.0  ;;  %v13416_v52 = vmul.f32 %v12313_v34, %v12313_v34  ;;  %v12316_v60 = vadd.f32 %v19485_v59, %v12315_v58 }
 0x603   : > { %13026 = vst.msk [vmem:[%s18490_s14 + $0x1a8] sm:$0xf] %vm12919_vm11, %v14892_v45  ;;  %v13257_v11 = vadd.f32 %v13256_v9, %v13255_v33  ;;  %v14893_v36 = vpack.c.bf16 %v12324_v62, %v12324_v62  ;;  %v13419_v20 = vmul.f32 %v12324_v62, %v12324_v62  ;;  %v13262_v14 = vsel %vm13048_vm10, %v12324_v62, 0.0 }
 0x604   : > { %13024 = vst.msk [vmem:[%s18490_s14 + $0x1a0] sm:$0xf] %vm12919_vm11, %v14890_v40  ;;  %v13647_v21 = vsel %vm13048_vm10, %v13416_v52, 0.0  ;;  %v14891_v4 = vpack.c.bf16 %v12316_v60, %v12316_v60  ;;  %v13258_v50 = vsel %vm13048_vm10, %v12316_v60, 0.0  ;;  %v13417_v26 = vmul.f32 %v12316_v60, %v12316_v60 }
 0x605   : > { %v13648_v37 = vadd.f32 %v13647_v21, %v13646_v3  ;;  %13027 = vst.msk [vmem:[%s18490_s14 + $0x1ac] sm:$0xf] %vm12919_vm11, %v14893_v36  ;;  %v13259_v47 = vadd.f32 %v13258_v50, %v13257_v11  ;;  %v13651_v29 = vsel %vm13048_vm10, %v13418_v56, 0.0  ;;  %v13653_v51 = vsel %vm13048_vm10, %v13419_v20, 0.0 }
 0x606   : > { %13025 = vst.msk [vmem:[%s18490_s14 + $0x1a4] sm:$0xf] %vm12919_vm11, %v14891_v4  ;;  %v13649_v12 = vsel %vm13048_vm10, %v13417_v26, 0.0 }
 0x607   : > { %v13261_v7 = vadd.f32 %v13260_v15, %v13259_v47  ;;  %v13650_v35 = vadd.f32 %v13649_v12, %v13648_v37 }
 0x609   : > { %v13263_v1 = vadd.f32 %v13262_v14, %v13261_v7  ;;  %v13652_v30 = vadd.f32 %v13651_v29, %v13650_v35 }
 0x60b   : > { %v13654_v42 = vadd.f32 %v13653_v51, %v13652_v30 }
 0x612   : > { %v15094_v16 = vpop.f32.mrb[44].mxu1 }
 0x613   : > { %v12337_v43 = vadd.f32 %v19485_v59, %v15094_v16  ;;  %v12328_v44 = vpop.f32.mrb[45].mxu1 }
 0x614   : > { %v12329_v48 = vadd.f32 %v19485_v59, %v12328_v44  ;;  %v15095_v2 = vpop.f32.mrb[46].mxu1 }
 0x615   : > { %v14896_v38 = vpack.c.bf16 %v12337_v43, %v12337_v43  ;;  %v12340_v49 = vadd.f32 %v19485_v59, %v15095_v2  ;;  %v12331_v53 = vpop.f32.mrb[47].mxu1  ;;  %v13422_v23 = vmul.f32 %v12337_v43, %v12337_v43  ;;  %v13268_v13 = vsel %vm13048_vm10, %v12337_v43, 0.0 }
 0x616   : > { %v14894_v57 = vpack.c.bf16 %v12329_v48, %v12329_v48  ;;  %v13264_v61 = vsel %vm13048_vm10, %v12329_v48, 0.0  ;;  %v13420_v19 = vmul.f32 %v12329_v48, %v12329_v48  ;;  %v12332_v63 = vadd.f32 %v19485_v59, %v12331_v53 }
 0x617   : > { %13030 = vst.msk [vmem:[%s18490_s14 + $0x1b8] sm:$0xf] %vm12919_vm11, %v14896_v38  ;;  %v13265_v0 = vadd.f32 %v13264_v61, %v13263_v1  ;;  %v14897_v8 = vpack.c.bf16 %v12340_v49, %v12340_v49  ;;  %v13423_v22 = vmul.f32 %v12340_v49, %v12340_v49  ;;  %v13270_v18 = vsel %vm13048_vm10, %v12340_v49, 0.0 }
 0x618   : > { %13028 = vst.msk [vmem:[%s18490_s14 + $0x1b0] sm:$0xf] %vm12919_vm11, %v14894_v57  ;;  %v13655_v5 = vsel %vm13048_vm10, %v13420_v19, 0.0  ;;  %v14895_v17 = vpack.c.bf16 %v12332_v63, %v12332_v63  ;;  %v13266_v6 = vsel %vm13048_vm10, %v12332_v63, 0.0  ;;  %v13421_v41 = vmul.f32 %v12332_v63, %v12332_v63 }
 0x619   : > { %v13656_v27 = vadd.f32 %v13655_v5, %v13654_v42  ;;  %13031 = vst.msk [vmem:[%s18490_s14 + $0x1bc] sm:$0xf] %vm12919_vm11, %v14897_v8  ;;  %v13267_v10 = vadd.f32 %v13266_v6, %v13265_v0  ;;  %v13659_v33 = vsel %vm13048_vm10, %v13422_v23, 0.0  ;;  %v13661_v3 = vsel %vm13048_vm10, %v13423_v22, 0.0 }
 0x61a   : > { %13029 = vst.msk [vmem:[%s18490_s14 + $0x1b4] sm:$0xf] %vm12919_vm11, %v14895_v17  ;;  %v13657_v31 = vsel %vm13048_vm10, %v13421_v41, 0.0 }
 0x61b   : > { %v13269_v32 = vadd.f32 %v13268_v13, %v13267_v10  ;;  %v13658_v24 = vadd.f32 %v13657_v31, %v13656_v27 }
 0x61d   : > { %v13271_v28 = vadd.f32 %v13270_v18, %v13269_v32  ;;  %v13660_v25 = vadd.f32 %v13659_v33, %v13658_v24 }
 0x61f   : > { %v13662_v39 = vadd.f32 %v13661_v3, %v13660_v25 }
 0x626   : > { %v15098_v54 = vpop.f32.mrb[48].mxu1 }
 0x627   : > { %v12353_v55 = vadd.f32 %v19485_v59, %v15098_v54  ;;  %v12344_v34 = vpop.f32.mrb[49].mxu1 }
 0x628   : > { %v12345_v46 = vadd.f32 %v19485_v59, %v12344_v34  ;;  %v15099_v45 = vpop.f32.mrb[50].mxu1 }
 0x629   : > { %v14900_v62 = vpack.c.bf16 %v12353_v55, %v12353_v55  ;;  %v12356_v58 = vadd.f32 %v19485_v59, %v15099_v45  ;;  %v12347_v40 = vpop.f32.mrb[51].mxu1  ;;  %v13426_v37 = vmul.f32 %v12353_v55, %v12353_v55  ;;  %v13276_v20 = vsel %vm13048_vm10, %v12353_v55, 0.0 }
 0x62a   : > { %v14898_v9 = vpack.c.bf16 %v12345_v46, %v12345_v46  ;;  %v13272_v52 = vsel %vm13048_vm10, %v12345_v46, 0.0  ;;  %v13424_v60 = vmul.f32 %v12345_v46, %v12345_v46  ;;  %v12348_v11 = vadd.f32 %v19485_v59, %v12347_v40 }
 0x62b   : > { %13034 = vst.msk [vmem:[%s18490_s14 + $0x1c8] sm:$0xf] %vm12919_vm11, %v14900_v62  ;;  %v13273_v36 = vadd.f32 %v13272_v52, %v13271_v28  ;;  %v14901_v21 = vpack.c.bf16 %v12356_v58, %v12356_v58  ;;  %v13427_v7 = vmul.f32 %v12356_v58, %v12356_v58  ;;  %v13278_v35 = vsel %vm13048_vm10, %v12356_v58, 0.0 }
 0x62c   : > { %13032 = vst.msk [vmem:[%s18490_s14 + $0x1c0] sm:$0xf] %vm12919_vm11, %v14898_v9  ;;  %v13663_v4 = vsel %vm13048_vm10, %v13424_v60, 0.0  ;;  %v14899_v50 = vpack.c.bf16 %v12348_v11, %v12348_v11  ;;  %v13274_v56 = vsel %vm13048_vm10, %v12348_v11, 0.0  ;;  %v13425_v15 = vmul.f32 %v12348_v11, %v12348_v11 }
 0x62d   : > { %v13664_v47 = vadd.f32 %v13663_v4, %v13662_v39  ;;  %13035 = vst.msk [vmem:[%s18490_s14 + $0x1cc] sm:$0xf] %vm12919_vm11, %v14901_v21  ;;  %v13275_v26 = vadd.f32 %v13274_v56, %v13273_v36  ;;  %v13667_v1 = vsel %vm13048_vm10, %v13426_v37, 0.0  ;;  %v13669_v42 = vsel %vm13048_vm10, %v13427_v7, 0.0 }
 0x62e   : > { %13033 = vst.msk [vmem:[%s18490_s14 + $0x1c4] sm:$0xf] %vm12919_vm11, %v14899_v50  ;;  %v13665_v14 = vsel %vm13048_vm10, %v13425_v15, 0.0 }
 0x62f   : > { %v13277_v12 = vadd.f32 %v13276_v20, %v13275_v26  ;;  %v13666_v29 = vadd.f32 %v13665_v14, %v13664_v47 }
 0x631   : > { %v13279_v30 = vadd.f32 %v13278_v35, %v13277_v12  ;;  %v13668_v51 = vadd.f32 %v13667_v1, %v13666_v29 }
 0x633   : > { %v13670_v16 = vadd.f32 %v13669_v42, %v13668_v51 }
 0x63b   : > { %v15102_v43 = vpop.f32.mrb[52].mxu1 }
 0x63c   : > { %v12369_v44 = vadd.f32 %v19485_v59, %v15102_v43  ;;  %v12360_v48 = vpop.f32.mrb[53].mxu1 }
 0x63d   : > { %v12361_v2 = vadd.f32 %v19485_v59, %v12360_v48  ;;  %v15103_v38 = vpop.f32.mrb[54].mxu1 }
 0x63e   : > { %v14904_v49 = vpack.c.bf16 %v12369_v44, %v12369_v44  ;;  %v12372_v53 = vadd.f32 %v19485_v59, %v15103_v38  ;;  %v12363_v57 = vpop.f32.mrb[55].mxu1  ;;  %v13430_v27 = vmul.f32 %v12369_v44, %v12369_v44  ;;  %v13284_v22 = vsel %vm13048_vm10, %v12369_v44, 0.0  ;;  %v15938_v38 = vld [vmem:[%s19838_s2] ss:$0 sm:$0xff] }
 0x63f   : > { %v14902_v61 = vpack.c.bf16 %v12361_v2, %v12361_v2  ;;  %v13280_v19 = vsel %vm13048_vm10, %v12361_v2, 0.0  ;;  %v13428_v63 = vmul.f32 %v12361_v2, %v12361_v2  ;;  %v12364_v0 = vadd.f32 %v19485_v59, %v12363_v57 }
 0x640   : > { %13038 = vst.msk [vmem:[%s18490_s14 + $0x1d8] sm:$0xf] %vm12919_vm11, %v14904_v49  ;;  %v13281_v8 = vadd.f32 %v13280_v19, %v13279_v30  ;;  %v14905_v5 = vpack.c.bf16 %v12372_v53, %v12372_v53  ;;  %v13431_v32 = vmul.f32 %v12372_v53, %v12372_v53  ;;  %v13286_v24 = vsel %vm13048_vm10, %v12372_v53, 0.0 }
 0x641   : > { %13036 = vst.msk [vmem:[%s18490_s14 + $0x1d0] sm:$0xf] %vm12919_vm11, %v14902_v61  ;;  %v13671_v17 = vsel %vm13048_vm10, %v13428_v63, 0.0  ;;  %v14903_v6 = vpack.c.bf16 %v12364_v0, %v12364_v0  ;;  %v13282_v23 = vsel %vm13048_vm10, %v12364_v0, 0.0  ;;  %v13429_v13 = vmul.f32 %v12364_v0, %v12364_v0 }
 0x642   : > { %v13672_v10 = vadd.f32 %v13671_v17, %v13670_v16  ;;  %13039 = vst.msk [vmem:[%s18490_s14 + $0x1dc] sm:$0xf] %vm12919_vm11, %v14905_v5  ;;  %v13283_v41 = vadd.f32 %v13282_v23, %v13281_v8  ;;  %v13675_v28 = vsel %vm13048_vm10, %v13430_v27, 0.0  ;;  %v13677_v39 = vsel %vm13048_vm10, %v13431_v32, 0.0 }
 0x643   : > { %13037 = vst.msk [vmem:[%s18490_s14 + $0x1d4] sm:$0xf] %vm12919_vm11, %v14903_v6  ;;  %v13673_v18 = vsel %vm13048_vm10, %v13429_v13, 0.0 }
 0x644   : > { %v13285_v31 = vadd.f32 %v13284_v22, %v13283_v41  ;;  %v13674_v33 = vadd.f32 %v13673_v18, %v13672_v10 }
 0x646   : > { %v13287_v25 = vadd.f32 %v13286_v24, %v13285_v31  ;;  %v13676_v3 = vadd.f32 %v13675_v28, %v13674_v33 }
 0x648   : > { %v13678_v54 = vadd.f32 %v13677_v39, %v13676_v3 }
 0x64e   : > { %v15106_v55 = vpop.f32.mrb[56].mxu1 }
 0x64f   : > { %v12385_v34 = vadd.f32 %v19485_v59, %v15106_v55  ;;  %v12376_v46 = vpop.f32.mrb[57].mxu1 }
 0x650   : > { %v12377_v45 = vadd.f32 %v19485_v59, %v12376_v46  ;;  %v15107_v62 = vpop.f32.mrb[58].mxu1 }
 0x651   : > { %v14908_v58 = vpack.c.bf16 %v12385_v34, %v12385_v34  ;;  %v12388_v40 = vadd.f32 %v19485_v59, %v15107_v62  ;;  %v12379_v9 = vpop.f32.mrb[59].mxu1  ;;  %v13434_v47 = vmul.f32 %v12385_v34, %v12385_v34  ;;  %v13292_v7 = vsel %vm13048_vm10, %v12385_v34, 0.0 }
 0x652   : > { %v14906_v52 = vpack.c.bf16 %v12377_v45, %v12377_v45  ;;  %v13288_v60 = vsel %vm13048_vm10, %v12377_v45, 0.0  ;;  %v13432_v11 = vmul.f32 %v12377_v45, %v12377_v45  ;;  %v12380_v36 = vadd.f32 %v19485_v59, %v12379_v9 }
 0x653   : > { %13042 = vst.msk [vmem:[%s18490_s14 + $0x1e8] sm:$0xf] %vm12919_vm11, %v14908_v58  ;;  %v13289_v21 = vadd.f32 %v13288_v60, %v13287_v25  ;;  %v14909_v4 = vpack.c.bf16 %v12388_v40, %v12388_v40  ;;  %v13435_v12 = vmul.f32 %v12388_v40, %v12388_v40  ;;  %v13294_v29 = vsel %vm13048_vm10, %v12388_v40, 0.0 }
 0x654   : > { %13040 = vst.msk [vmem:[%s18490_s14 + $0x1e0] sm:$0xf] %vm12919_vm11, %v14906_v52  ;;  %v13679_v50 = vsel %vm13048_vm10, %v13432_v11, 0.0  ;;  %v14907_v56 = vpack.c.bf16 %v12380_v36, %v12380_v36  ;;  %v13290_v37 = vsel %vm13048_vm10, %v12380_v36, 0.0  ;;  %v13433_v20 = vmul.f32 %v12380_v36, %v12380_v36 }
 0x655   : > { %v13680_v26 = vadd.f32 %v13679_v50, %v13678_v54  ;;  %13043 = vst.msk [vmem:[%s18490_s14 + $0x1ec] sm:$0xf] %vm12919_vm11, %v14909_v4  ;;  %v13291_v15 = vadd.f32 %v13290_v37, %v13289_v21  ;;  %v13683_v30 = vsel %vm13048_vm10, %v13434_v47, 0.0  ;;  %v13685_v16 = vsel %vm13048_vm10, %v13435_v12, 0.0 }
 0x656   : > { %13041 = vst.msk [vmem:[%s18490_s14 + $0x1e4] sm:$0xf] %vm12919_vm11, %v14907_v56  ;;  %v13681_v35 = vsel %vm13048_vm10, %v13433_v20, 0.0 }
 0x657   : > { %v13293_v14 = vadd.f32 %v13292_v7, %v13291_v15  ;;  %v13682_v1 = vadd.f32 %v13681_v35, %v13680_v26 }
 0x659   : > { %v13295_v51 = vadd.f32 %v13294_v29, %v13293_v14  ;;  %v13684_v42 = vadd.f32 %v13683_v30, %v13682_v1 }
 0x65b   : > { %v13686_v43 = vadd.f32 %v13685_v16, %v13684_v42 }
 0x662   : > { %v15110_v44 = vpop.f32.mrb[60].mxu1 }
 0x663   : > { %v12401_v48 = vadd.f32 %v19485_v59, %v15110_v44  ;;  %v12392_v2 = vpop.f32.mrb[61].mxu1 }
 0x664   : > { %v12393_v49 = vadd.f32 %v15938_v38, %v12392_v2  ;;  %v15111_v53 = vpop.f32.mrb[62].mxu1 }
 0x665   : > { %v14912_v57 = vpack.c.bf16 %v12401_v48, %v12401_v48  ;;  %v12404_v61 = vadd.f32 %v15938_v38, %v15111_v53  ;;  %v12395_v19 = vpop.f32.mrb[63].mxu1  ;;  %v13438_v10 = vmul.f32 %v12401_v48, %v12401_v48  ;;  %v13300_v32 = vsel %vm13048_vm10, %v12401_v48, 0.0 }
 0x666   : > { %v14910_v63 = vpack.c.bf16 %v12393_v49, %v12393_v49  ;;  %v13296_v0 = vsel %vm13048_vm10, %v12393_v49, 0.0  ;;  %v13436_v8 = vmul.f32 %v12393_v49, %v12393_v49  ;;  %v12396_v5 = vadd.f32 %v15938_v38, %v12395_v19 }
 0x667   : > { %13046 = vst.msk [vmem:[%s18490_s14 + $0x1f8] sm:$0xf] %vm12919_vm11, %v14912_v57  ;;  %v13297_v59 = vadd.f32 %v13296_v0, %v13295_v51  ;;  %v14913_v17 = vpack.c.bf16 %v12404_v61, %v12404_v61  ;;  %v13439_v31 = vmul.f32 %v12404_v61, %v12404_v61  ;;  %v13302_v33 = vsel %vm13048_vm10, %v12404_v61, 0.0 }
 0x668   : > { %13044 = vst.msk [vmem:[%s18490_s14 + $0x1f0] sm:$0xf] %vm12919_vm11, %v14910_v63  ;;  %v13687_v6 = vsel %vm13048_vm10, %v13436_v8, 0.0  ;;  %v14911_v23 = vpack.c.bf16 %v12396_v5, %v12396_v5  ;;  %v13298_v27 = vsel %vm13048_vm10, %v12396_v5, 0.0  ;;  %v13437_v22 = vmul.f32 %v12396_v5, %v12396_v5 }
 0x669   : > { %v13688_v41 = vadd.f32 %v13687_v6, %v13686_v43  ;;  %13047 = vst.msk [vmem:[%s18490_s14 + $0x1fc] sm:$0xf] %vm12919_vm11, %v14913_v17  ;;  %v13299_v13 = vadd.f32 %v13298_v27, %v13297_v59  ;;  %v13691_v25 = vsel %vm13048_vm10, %v13438_v10, 0.0  ;;  %v13693_v54 = vsel %vm13048_vm10, %v13439_v31, 0.0 }
 0x66a   : > { %13045 = vst.msk [vmem:[%s18490_s14 + $0x1f4] sm:$0xf] %vm12919_vm11, %v14911_v23  ;;  %v13689_v24 = vsel %vm13048_vm10, %v13437_v22, 0.0  ;;  %s13708_s14 = scalar_lea.sflag [#allocation5], %s250_s19 }
 0x66b   : > { %v13301_v18 = vadd.f32 %v13300_v32, %v13299_v13  ;;  %v13690_v28 = vadd.f32 %v13689_v24, %v13688_v41 }
 0x66d   : > { %v13303_v3 = vadd.f32 %v13302_v33, %v13301_v18  ;;  %v13692_v39 = vadd.f32 %v13691_v25, %v13690_v28 }
 0x66f   : > { %v13304_v55 = vrot.slane %v13303_v3, 4  ;;  %v13694_v34 = vadd.f32 %v13693_v54, %v13692_v39 }
 0x671   : > { %v13305_v46 = vadd.f32 %v13304_v55, %v13303_v3  ;;  %v13695_v45 = vrot.slane %v13694_v34, 4 }
 0x673   : > { %v13306_v62 = vrot.slane %v13305_v46, 2  ;;  %v13696_v58 = vadd.f32 %v13695_v45, %v13694_v34 }
 0x675   : > { %v13307_v40 = vadd.f32 %v13306_v62, %v13305_v46  ;;  %v13697_v9 = vrot.slane %v13696_v58, 2 }
 0x677   : > { %v13308_v52 = vrot.slane %v13307_v40, 1  ;;  %v13698_v60 = vadd.f32 %v13697_v9, %v13696_v58 }
 0x679   : > { %v13309_v11 = vadd.f32 %v13308_v52, %v13307_v40  ;;  %v13699_v36 = vrot.slane %v13698_v60, 1 }
 0x67b   : > { %13311 = vst.msk [vmem:[%s252_s9] sm:$0x1] %vm13310_vm3, %v13309_v11  ;;  %v13700_v21 = vadd.f32 %v13699_v36, %v13698_v60 }
 0x67d   : > { %13701 = vst.msk [vmem:[%s252_s9 + $0x1] sm:$0x1] %vm13310_vm3, %v13700_v21 }
 0x67e   : > { %15952 = shalt.err (!%p15949_p4)
}
 0x67f   : > { %s15953_s27 = scalar_lea.hbm %s19794_s13, 32  ;;  %s15957_s17 = scalar_lea.hbm %s19842_s6, 64 }
 0x680   : > { %p15954_p7 = scmp.ne.s32.totalorder %s19794_s13, %s15953_s27  ;;  %p15958_p10 = scmp.lt.u32.totalorder %s19794_s13, %s19842_s6 }
 0x681   : > { %p15959_p11 = scmp.lt.u32.totalorder %s15957_s17, %s15953_s27  ;;  %p15961_p13 = scmp.lt.u32.totalorder %s15953_s27, %s19794_s13 }
 0x682   : > { %p15955_p8 = pnand %p15954_p7, %p16087_p5 }
 0x683   : > { %p15960_p12 = por %p15959_p11, %p15958_p10 }
 0x684   : > { %p15956_p9 = pneg %p15955_p8 }
 0x685   : > { %p15962_p0 = por %p15961_p13, %p15960_p12 }
 0x687   : > { %p15963_p1 = pnand %p15962_p0, %p15956_p9 }
 0x689   : > { %15966 = shalt.err (!%p15963_p1)
}
 0x68a   : > { %15116 = dma.vmem_to_hbm [thread:$0]  (%p16087_p5), %s19796_s10, 32, %s19794_s13, %s13708_s14  }
 0x68b PF: > { %p15122_p2 = scmp.ge.s32.totalorder %s16001_s24, 2  ;;  %s13745_s7 = sand.u32 1, %s15989_s21  }
 0x68c   : > { %s13746_s8 = scalar_lea.sflag [#allocation5], %s13745_s7 }
 0x68d   : > { %p15119_p3 = pnand %p15122_p2, %p16091_p6 }
 0x68f   : > { %15984 = dma.done.wait (!%p15119_p3), %s13746_s8, 32  }
 0x690   : > { %15986 = vsyncadd (!%p15119_p3), %s13746_s8, 4294967264  ;;  %p17_p4 = scmp.ge.s32.totalorder %s16074_s25, 4   ;;  %s19896_s21 = smov %s15993_s22 }
 0x691   : > { %s19897_s22 = smov %s15997_s23  ;;  %s19898_s23 = smov %s16085_s28 }
 0x692   : > { %s19899_s24 = smov %s16074_s25  ;;  %19 = sbr.rel (!%p17_p4) target bundleno = 3 (0x3), region = 90 }
 0x699   :  { %13751 = vsyncpa [#allocation5], 1 }
 0x69a   :  { %13753 = vsyncpa [#allocation5 + $0x1], 1 }

</bundles_post_ra>
